<compile_context>
chip_gen: v7x
topology: tpu7x:2x2x1
jax: 0.10.0
libtpu: 0.0.40
codegen_flags: <defaults>
</compile_context>

<pallas_src>
import jax
import jax.numpy as jnp
from jax import lax
from jax.experimental import pallas as pl
from jax.experimental.pallas import tpu as pltpu

CH1 = 16          # ValueChoice([16, 32]) -> 16
KSIZE = 3         # ValueChoice([3, 5])   -> 3
C2 = 64
NUM_CLASSES = 10
BN_EPS = 1e-5


# ---------------------------------------------------------------- kernel ----

def _make_fused_kernel(H, W):
    """Fused conv1+BN+ReLU -> conv2+bias -> maxpool2 -> mean -> fc -> log_softmax."""
    Hp, Wp = H + 2, W + 2          # conv1 output extended by the conv2 zero-pad ring
    Hh, Wh = H // 2, W // 2

    def kernel(x_ref, w1_ref, t_ref, w2_ref, b2_ref, wfc_ref, bfc_ref,
               o_ref, y1s_ref, mh_ref):
        # ---- conv1 (Cin=1) on the VPU: 9 broadcast FMAs over CH1 channels ----
        # Computed over the (H+2, W+2) extended domain so the zero ring that
        # conv2's padding needs is produced with a border mask (no unaligned
        # scratch stores).  BN scale is pre-folded into w1; t = folded shift.
        y1 = jnp.zeros((Hp, Wp, CH1), jnp.float32)
        for dy in range(3):
            for dx in range(3):
                tap = dy * 3 + dx
                xs = x_ref[0, dy:dy + Hp, dx:dx + Wp, :]        # (Hp, Wp, 1)
                y1 = y1 + xs * w1_ref[tap:tap + 1, :]           # bcast over CH1
        y1 = jnp.maximum(y1 + t_ref[...], 0.0)                  # BN shift + ReLU
        ii = lax.broadcasted_iota(jnp.int32, (Hp, Wp, 1), 0)
        jj = lax.broadcasted_iota(jnp.int32, (Hp, Wp, 1), 1)
        interior = (ii >= 1) & (ii <= H) & (jj >= 1) & (jj <= W)
        y1 = jnp.where(interior, y1, 0.0)                       # conv2 zero ring
        y1s_ref[...] = y1.astype(jnp.bfloat16)                  # stays in VMEM

        # ---- conv2: 9 accumulated (H*W, CH1) x (CH1, 64) MXU matmuls --------
        acc = jnp.zeros((H * W, C2), jnp.float32)
        for dy in range(3):
            for dx in range(3):
                tap = dy * 3 + dx
                lhs = y1s_ref[dy:dy + H, dx:dx + W, :].reshape(H * W, CH1)
                acc = acc + jnp.dot(lhs, w2_ref[tap],
                                    preferred_element_type=jnp.float32)
        acc = acc + b2_ref[...]                                  # conv2 bias

        # ---- 2x2 max pool + spatial mean (all in VMEM) ----------------------
        # rows of acc are (h, w) row-major; split h into (h_hi, h_lo) cleanly.
        y2 = acc.reshape(Hh, 2 * W, C2)                          # (Hh, 2W, 64)
        mh_ref[...] = jnp.maximum(y2[:, :W, :], y2[:, W:, :])    # pool over h
        csum = jnp.zeros((Hh, C2), jnp.float32)
        for k in range(Wh):                                      # pool over w
            csum = csum + jnp.maximum(mh_ref[:, 2 * k, :],
                                      mh_ref[:, 2 * k + 1, :])
        feat = jnp.sum(csum, axis=0, keepdims=True) * (1.0 / (Hh * Wh))  # (1,64)

        # ---- fc + log_softmax ------------------------------------------------
        logits = jnp.dot(feat, wfc_ref[...],
                         preferred_element_type=jnp.float32) + bfc_ref[...]
        mx = jnp.max(logits, axis=-1, keepdims=True)
        lse = jnp.log(jnp.sum(jnp.exp(logits - mx), axis=-1, keepdims=True)) + mx
        o_ref[0] = logits - lse                                  # (1, 10)

    return kernel


# ------------------------------------------------------------------ params --

def init_params(key):
    ks = jax.random.split(key, 8)
    return {
        "w1": 0.1 * jax.random.normal(ks[0], (CH1, 1, KSIZE, KSIZE), jnp.float32),
        "b1": 0.1 * jax.random.normal(ks[1], (CH1,), jnp.float32),
        "bn_gamma": 1.0 + 0.05 * jax.random.normal(ks[2], (CH1,), jnp.float32),
        "bn_beta": 0.05 * jax.random.normal(ks[3], (CH1,), jnp.float32),
        "bn_mean": jnp.zeros((CH1,), jnp.float32),   # eval-mode running stats
        "bn_var": jnp.ones((CH1,), jnp.float32),
        "w2": 0.05 * jax.random.normal(ks[4], (C2, CH1, 3, 3), jnp.float32),
        "b2": 0.05 * jax.random.normal(ks[5], (C2,), jnp.float32),
        "wfc": 0.1 * jax.random.normal(ks[6], (C2, NUM_CLASSES), jnp.float32),
        "bfc": 0.1 * jax.random.normal(ks[7], (NUM_CLASSES,), jnp.float32),
    }


# ----------------------------------------------------------------- forward --

def forward(x_nchw, params):
    B, Cin, H, W = x_nchw.shape
    assert Cin == 1 and H % 2 == 0 and W % 2 == 0
    # TODO(synk): odd H/W (max_pool2d floor) and training-mode BatchNorm
    # (batch statistics) are not implemented; eval running stats are folded.

    # Tiny wrapper-side prep (all O(KB)): pad input by 2 and fold BN into conv1.
    xp = jnp.pad(x_nchw.reshape(B, H, W).astype(jnp.float32),
                 ((0, 0), (2, 2), (2, 2)))[..., None]            # (B, H+4, W+4, 1)
    s = params["bn_gamma"] * lax.rsqrt(params["bn_var"] + BN_EPS)
    t = (s * (params["b1"] - params["bn_mean"]) + params["bn_beta"]).reshape(1, CH1)
    w1m = (params["w1"].transpose(2, 3, 1, 0).reshape(9, CH1)
           * s.reshape(1, CH1)).astype(jnp.float32)              # BN scale folded in
    w2m = params["w2"].transpose(2, 3, 1, 0).reshape(9, CH1, C2).astype(jnp.bfloat16)
    b2 = params["b2"].reshape(1, C2).astype(jnp.float32)
    wfc = params["wfc"].astype(jnp.float32)
    bfc = params["bfc"].reshape(1, NUM_CLASSES).astype(jnp.float32)

    kernel = _make_fused_kernel(H, W)

    flops = B * (2 * (H + 2) * (W + 2) * 9 * CH1          # conv1 (VPU)
                 + 2 * H * W * 9 * CH1 * C2               # conv2 (MXU)
                 + 2 * C2 * NUM_CLASSES)                  # fc
    bytes_accessed = (xp.size * 4 + w1m.size * 4 + t.size * 4 + w2m.size * 2
                      + b2.size * 4 + wfc.size * 4 + bfc.size * 4
                      + B * NUM_CLASSES * 4)

    grid_spec = pltpu.PrefetchScalarGridSpec(
        num_scalar_prefetch=0,
        grid=(B,),
        in_specs=[
            pl.BlockSpec((1, H + 4, W + 4, 1), lambda b: (b, 0, 0, 0)),  # xpad2
            pl.BlockSpec((9, CH1), lambda b: (0, 0)),                    # w1 (BN-folded)
            pl.BlockSpec((1, CH1), lambda b: (0, 0)),                    # t (BN shift)
            pl.BlockSpec((9, CH1, C2), lambda b: (0, 0, 0)),             # w2 (bf16)
            pl.BlockSpec((1, C2), lambda b: (0, 0)),                     # b2
            pl.BlockSpec((C2, NUM_CLASSES), lambda b: (0, 0)),           # wfc
            pl.BlockSpec((1, NUM_CLASSES), lambda b: (0, 0)),            # bfc
        ],
        out_specs=pl.BlockSpec((1, 1, NUM_CLASSES), lambda b: (b, 0, 0)),
        scratch_shapes=[
            pltpu.VMEM((H + 2, W + 2, CH1), jnp.bfloat16),   # zero-ringed conv1 out
            pltpu.VMEM((H // 2, W, C2), jnp.float32),        # row-pooled conv2 out
        ],
    )

    out = pl.pallas_call(
        kernel,
        out_shape=jax.ShapeDtypeStruct((B, 1, NUM_CLASSES), jnp.float32),
        grid_spec=grid_spec,
        compiler_params=pltpu.CompilerParams(
            dimension_semantics=("parallel",)),
        cost_estimate=pl.CostEstimate(
            flops=flops,
            transcendentals=B * (NUM_CLASSES + 1),
            bytes_accessed=bytes_accessed),
    )(xp, w1m, t, w2m, b2, wfc, bfc)
    return out.reshape(B, NUM_CLASSES)


if __name__ == "__main__":
    key = jax.random.PRNGKey(0)
    k_param, k_x = jax.random.split(key)
    params = init_params(k_param)
    # conv1 takes a single input channel (MNIST-like) at a small spatial size.
    x = jax.random.normal(k_x, (2, 1, 16, 16), jnp.float32)      # NCHW
    out = jax.block_until_ready(jax.jit(forward)(x, params))
    assert out.shape == (2, NUM_CLASSES)
    assert bool(jnp.all(jnp.isfinite(out)))
    # log_softmax rows should exp-sum to ~1
    assert bool(jnp.allclose(jnp.sum(jnp.exp(out), axis=1), 1.0, atol=1e-4))
    print("KERNEL_OK")
</pallas_src>

<mosaic_0001>
module attributes {stable_mosaic.version = 11 : i64} {
  func.func @kernel(%arg0: i32, %arg1: memref<1x20x20x1xf32, #tpu.memory_space<vmem>>, %arg2: memref<9x16xf32, #tpu.memory_space<vmem>>, %arg3: memref<1x16xf32, #tpu.memory_space<vmem>>, %arg4: memref<9x16x64xbf16, #tpu.memory_space<vmem>>, %arg5: memref<1x64xf32, #tpu.memory_space<vmem>>, %arg6: memref<64x10xf32, #tpu.memory_space<vmem>>, %arg7: memref<1x10xf32, #tpu.memory_space<vmem>>, %arg8: memref<1x1x10xf32, #tpu.memory_space<vmem>>, %arg9: memref<18x18x16xbf16, #tpu.memory_space<vmem>>, %arg10: memref<8x16x64xf32, #tpu.memory_space<vmem>>) attributes {dimension_semantics = [#tpu.dimension_semantics<parallel>], iteration_bounds = array<i64: 2>, scalar_prefetch = 0 : i64, scratch_operands = 2 : i64, tpu.core_type = #tpu.core_type<tc>, window_params = [{transform_indices = @transform_0, window_bounds = array<i64: 1, 20, 20, 1>}, {pipeline_mode = #tpu.pipeline_mode<synchronous>, transform_indices = @transform_1, window_bounds = array<i64: 9, 16>}, {pipeline_mode = #tpu.pipeline_mode<synchronous>, transform_indices = @transform_2, window_bounds = array<i64: 1, 16>}, {pipeline_mode = #tpu.pipeline_mode<synchronous>, transform_indices = @transform_3, window_bounds = array<i64: 9, 16, 64>}, {pipeline_mode = #tpu.pipeline_mode<synchronous>, transform_indices = @transform_4, window_bounds = array<i64: 1, 64>}, {pipeline_mode = #tpu.pipeline_mode<synchronous>, transform_indices = @transform_5, window_bounds = array<i64: 64, 10>}, {pipeline_mode = #tpu.pipeline_mode<synchronous>, transform_indices = @transform_6, window_bounds = array<i64: 1, 10>}, {transform_indices = @transform_7, window_bounds = array<i64: 1, 1, 10>}]} {
    %cst = arith.constant 0.000000e+00 : f32
    %0 = vector.broadcast %cst : f32 to vector<18x18x16xf32>
    %c0 = arith.constant 0 : index
    %c0_0 = arith.constant 0 : index
    %c0_1 = arith.constant 0 : index
    %c0_2 = arith.constant 0 : index
    %1 = vector.load %arg1[%c0, %c0_0, %c0_1, %c0_2] : memref<1x20x20x1xf32, #tpu.memory_space<vmem>>, vector<1x18x18x1xf32>
    %2 = vector.shape_cast %1 : vector<1x18x18x1xf32> to vector<18x18x1xf32>
    %c0_3 = arith.constant 0 : index
    %c0_4 = arith.constant 0 : index
    %3 = vector.load %arg2[%c0_3, %c0_4] : memref<9x16xf32, #tpu.memory_space<vmem>>, vector<1x16xf32>
    %4 = vector.shape_cast %3 : vector<1x16xf32> to vector<1x1x16xf32>
    %5 = vector.broadcast %2 : vector<18x18x1xf32> to vector<18x18x16xf32>
    %6 = vector.broadcast %4 : vector<1x1x16xf32> to vector<18x18x16xf32>
    %7 = arith.mulf %5, %6 : vector<18x18x16xf32>
    %8 = arith.addf %0, %7 : vector<18x18x16xf32>
    %c0_5 = arith.constant 0 : index
    %c0_6 = arith.constant 0 : index
    %c1 = arith.constant 1 : index
    %c0_7 = arith.constant 0 : index
    %9 = vector.load %arg1[%c0_5, %c0_6, %c1, %c0_7] : memref<1x20x20x1xf32, #tpu.memory_space<vmem>>, vector<1x18x18x1xf32>
    %10 = vector.shape_cast %9 : vector<1x18x18x1xf32> to vector<18x18x1xf32>
    %c1_8 = arith.constant 1 : index
    %c0_9 = arith.constant 0 : index
    %11 = vector.load %arg2[%c1_8, %c0_9] : memref<9x16xf32, #tpu.memory_space<vmem>>, vector<1x16xf32>
    %12 = vector.shape_cast %11 : vector<1x16xf32> to vector<1x1x16xf32>
    %13 = vector.broadcast %10 : vector<18x18x1xf32> to vector<18x18x16xf32>
    %14 = vector.broadcast %12 : vector<1x1x16xf32> to vector<18x18x16xf32>
    %15 = arith.mulf %13, %14 : vector<18x18x16xf32>
    %16 = arith.addf %8, %15 : vector<18x18x16xf32>
    %c0_10 = arith.constant 0 : index
    %c0_11 = arith.constant 0 : index
    %c2 = arith.constant 2 : index
    %c0_12 = arith.constant 0 : index
    %17 = vector.load %arg1[%c0_10, %c0_11, %c2, %c0_12] : memref<1x20x20x1xf32, #tpu.memory_space<vmem>>, vector<1x18x18x1xf32>
    %18 = vector.shape_cast %17 : vector<1x18x18x1xf32> to vector<18x18x1xf32>
    %c2_13 = arith.constant 2 : index
    %c0_14 = arith.constant 0 : index
    %19 = vector.load %arg2[%c2_13, %c0_14] : memref<9x16xf32, #tpu.memory_space<vmem>>, vector<1x16xf32>
    %20 = vector.shape_cast %19 : vector<1x16xf32> to vector<1x1x16xf32>
    %21 = vector.broadcast %18 : vector<18x18x1xf32> to vector<18x18x16xf32>
    %22 = vector.broadcast %20 : vector<1x1x16xf32> to vector<18x18x16xf32>
    %23 = arith.mulf %21, %22 : vector<18x18x16xf32>
    %24 = arith.addf %16, %23 : vector<18x18x16xf32>
    %c0_15 = arith.constant 0 : index
    %c1_16 = arith.constant 1 : index
    %c0_17 = arith.constant 0 : index
    %c0_18 = arith.constant 0 : index
    %25 = vector.load %arg1[%c0_15, %c1_16, %c0_17, %c0_18] : memref<1x20x20x1xf32, #tpu.memory_space<vmem>>, vector<1x18x18x1xf32>
    %26 = vector.shape_cast %25 : vector<1x18x18x1xf32> to vector<18x18x1xf32>
    %c3 = arith.constant 3 : index
    %c0_19 = arith.constant 0 : index
    %27 = vector.load %arg2[%c3, %c0_19] : memref<9x16xf32, #tpu.memory_space<vmem>>, vector<1x16xf32>
    %28 = vector.shape_cast %27 : vector<1x16xf32> to vector<1x1x16xf32>
    %29 = vector.broadcast %26 : vector<18x18x1xf32> to vector<18x18x16xf32>
    %30 = vector.broadcast %28 : vector<1x1x16xf32> to vector<18x18x16xf32>
    %31 = arith.mulf %29, %30 : vector<18x18x16xf32>
    %32 = arith.addf %24, %31 : vector<18x18x16xf32>
    %c0_20 = arith.constant 0 : index
    %c1_21 = arith.constant 1 : index
    %c1_22 = arith.constant 1 : index
    %c0_23 = arith.constant 0 : index
    %33 = vector.load %arg1[%c0_20, %c1_21, %c1_22, %c0_23] : memref<1x20x20x1xf32, #tpu.memory_space<vmem>>, vector<1x18x18x1xf32>
    %34 = vector.shape_cast %33 : vector<1x18x18x1xf32> to vector<18x18x1xf32>
    %c4 = arith.constant 4 : index
    %c0_24 = arith.constant 0 : index
    %35 = vector.load %arg2[%c4, %c0_24] : memref<9x16xf32, #tpu.memory_space<vmem>>, vector<1x16xf32>
    %36 = vector.shape_cast %35 : vector<1x16xf32> to vector<1x1x16xf32>
    %37 = vector.broadcast %34 : vector<18x18x1xf32> to vector<18x18x16xf32>
    %38 = vector.broadcast %36 : vector<1x1x16xf32> to vector<18x18x16xf32>
    %39 = arith.mulf %37, %38 : vector<18x18x16xf32>
    %40 = arith.addf %32, %39 : vector<18x18x16xf32>
    %c0_25 = arith.constant 0 : index
    %c1_26 = arith.constant 1 : index
    %c2_27 = arith.constant 2 : index
    %c0_28 = arith.constant 0 : index
    %41 = vector.load %arg1[%c0_25, %c1_26, %c2_27, %c0_28] : memref<1x20x20x1xf32, #tpu.memory_space<vmem>>, vector<1x18x18x1xf32>
    %42 = vector.shape_cast %41 : vector<1x18x18x1xf32> to vector<18x18x1xf32>
    %c5 = arith.constant 5 : index
    %c0_29 = arith.constant 0 : index
    %43 = vector.load %arg2[%c5, %c0_29] : memref<9x16xf32, #tpu.memory_space<vmem>>, vector<1x16xf32>
    %44 = vector.shape_cast %43 : vector<1x16xf32> to vector<1x1x16xf32>
    %45 = vector.broadcast %42 : vector<18x18x1xf32> to vector<18x18x16xf32>
    %46 = vector.broadcast %44 : vector<1x1x16xf32> to vector<18x18x16xf32>
    %47 = arith.mulf %45, %46 : vector<18x18x16xf32>
    %48 = arith.addf %40, %47 : vector<18x18x16xf32>
    %c0_30 = arith.constant 0 : index
    %c2_31 = arith.constant 2 : index
    %c0_32 = arith.constant 0 : index
    %c0_33 = arith.constant 0 : index
    %49 = vector.load %arg1[%c0_30, %c2_31, %c0_32, %c0_33] : memref<1x20x20x1xf32, #tpu.memory_space<vmem>>, vector<1x18x18x1xf32>
    %50 = vector.shape_cast %49 : vector<1x18x18x1xf32> to vector<18x18x1xf32>
    %c6 = arith.constant 6 : index
    %c0_34 = arith.constant 0 : index
    %51 = vector.load %arg2[%c6, %c0_34] : memref<9x16xf32, #tpu.memory_space<vmem>>, vector<1x16xf32>
    %52 = vector.shape_cast %51 : vector<1x16xf32> to vector<1x1x16xf32>
    %53 = vector.broadcast %50 : vector<18x18x1xf32> to vector<18x18x16xf32>
    %54 = vector.broadcast %52 : vector<1x1x16xf32> to vector<18x18x16xf32>
    %55 = arith.mulf %53, %54 : vector<18x18x16xf32>
    %56 = arith.addf %48, %55 : vector<18x18x16xf32>
    %c0_35 = arith.constant 0 : index
    %c2_36 = arith.constant 2 : index
    %c1_37 = arith.constant 1 : index
    %c0_38 = arith.constant 0 : index
    %57 = vector.load %arg1[%c0_35, %c2_36, %c1_37, %c0_38] : memref<1x20x20x1xf32, #tpu.memory_space<vmem>>, vector<1x18x18x1xf32>
    %58 = vector.shape_cast %57 : vector<1x18x18x1xf32> to vector<18x18x1xf32>
    %c7 = arith.constant 7 : index
    %c0_39 = arith.constant 0 : index
    %59 = vector.load %arg2[%c7, %c0_39] : memref<9x16xf32, #tpu.memory_space<vmem>>, vector<1x16xf32>
    %60 = vector.shape_cast %59 : vector<1x16xf32> to vector<1x1x16xf32>
    %61 = vector.broadcast %58 : vector<18x18x1xf32> to vector<18x18x16xf32>
    %62 = vector.broadcast %60 : vector<1x1x16xf32> to vector<18x18x16xf32>
    %63 = arith.mulf %61, %62 : vector<18x18x16xf32>
    %64 = arith.addf %56, %63 : vector<18x18x16xf32>
    %c0_40 = arith.constant 0 : index
    %c2_41 = arith.constant 2 : index
    %c2_42 = arith.constant 2 : index
    %c0_43 = arith.constant 0 : index
    %65 = vector.load %arg1[%c0_40, %c2_41, %c2_42, %c0_43] : memref<1x20x20x1xf32, #tpu.memory_space<vmem>>, vector<1x18x18x1xf32>
    %66 = vector.shape_cast %65 : vector<1x18x18x1xf32> to vector<18x18x1xf32>
    %c8 = arith.constant 8 : index
    %c0_44 = arith.constant 0 : index
    %67 = vector.load %arg2[%c8, %c0_44] : memref<9x16xf32, #tpu.memory_space<vmem>>, vector<1x16xf32>
    %68 = vector.shape_cast %67 : vector<1x16xf32> to vector<1x1x16xf32>
    %69 = vector.broadcast %66 : vector<18x18x1xf32> to vector<18x18x16xf32>
    %70 = vector.broadcast %68 : vector<1x1x16xf32> to vector<18x18x16xf32>
    %71 = arith.mulf %69, %70 : vector<18x18x16xf32>
    %72 = arith.addf %64, %71 : vector<18x18x16xf32>
    %c0_45 = arith.constant 0 : index
    %c0_46 = arith.constant 0 : index
    %73 = vector.load %arg3[%c0_45, %c0_46] : memref<1x16xf32, #tpu.memory_space<vmem>>, vector<1x16xf32>
    %74 = vector.shape_cast %73 : vector<1x16xf32> to vector<1x1x16xf32>
    %75 = vector.broadcast %74 : vector<1x1x16xf32> to vector<18x18x16xf32>
    %76 = arith.addf %72, %75 : vector<18x18x16xf32>
    %cst_47 = arith.constant 0.000000e+00 : f32
    %77 = vector.broadcast %cst_47 : f32 to vector<18x18x16xf32>
    %78 = arith.maximumf %76, %77 : vector<18x18x16xf32>
    %79 = tpu.iota {dimensions = array<i32: 0>} : vector<18x18x1xi32>
    %80 = tpu.iota {dimensions = array<i32: 1>} : vector<18x18x1xi32>
    %c1_i32 = arith.constant 1 : i32
    %81 = vector.broadcast %c1_i32 : i32 to vector<18x18x1xi32>
    %82 = arith.cmpi sge, %79, %81 : vector<18x18x1xi32>
    %c16_i32 = arith.constant 16 : i32
    %83 = vector.broadcast %c16_i32 : i32 to vector<18x18x1xi32>
    %84 = arith.cmpi sle, %79, %83 : vector<18x18x1xi32>
    %85 = arith.andi %82, %84 : vector<18x18x1xi1>
    %c1_i32_48 = arith.constant 1 : i32
    %86 = vector.broadcast %c1_i32_48 : i32 to vector<18x18x1xi32>
    %87 = arith.cmpi sge, %80, %86 : vector<18x18x1xi32>
    %88 = arith.andi %85, %87 : vector<18x18x1xi1>
    %c16_i32_49 = arith.constant 16 : i32
    %89 = vector.broadcast %c16_i32_49 : i32 to vector<18x18x1xi32>
    %90 = arith.cmpi sle, %80, %89 : vector<18x18x1xi32>
    %91 = arith.andi %88, %90 : vector<18x18x1xi1>
    %cst_50 = arith.constant 0.000000e+00 : f32
    %92 = vector.shape_cast %91 : vector<18x18x1xi1> to vector<18x18x1xi1>
    %93 = vector.broadcast %92 : vector<18x18x1xi1> to vector<18x18x16xi1>
    %94 = vector.broadcast %cst_50 : f32 to vector<18x18x16xf32>
    %95 = arith.select %93, %78, %94 : vector<18x18x16xi1>, vector<18x18x16xf32>
    %96 = arith.truncf %95 : vector<18x18x16xf32> to vector<18x18x16xbf16>
    %c0_51 = arith.constant 0 : index
    %c0_52 = arith.constant 0 : index
    %c0_53 = arith.constant 0 : index
    %97 = vector.load %arg9[%c0_51, %c0_52, %c0_53] : memref<18x18x16xbf16, #tpu.memory_space<vmem>>, vector<18x18x16xbf16>
    tpu.vector_store %arg9[%c0_51, %c0_52, %c0_53], %96 {strides = array<i32>} : memref<18x18x16xbf16, #tpu.memory_space<vmem>>, vector<18x18x16xbf16>,
    %cst_54 = arith.constant 0.000000e+00 : f32
    %98 = vector.broadcast %cst_54 : f32 to vector<256x64xf32>
    %c0_55 = arith.constant 0 : index
    %c0_56 = arith.constant 0 : index
    %c0_57 = arith.constant 0 : index
    %99 = vector.load %arg9[%c0_55, %c0_56, %c0_57] : memref<18x18x16xbf16, #tpu.memory_space<vmem>>, vector<16x16x16xbf16>
    %100 = vector.shape_cast %99 : vector<16x16x16xbf16> to vector<256x16xbf16>
    %c0_58 = arith.constant 0 : index
    %c0_59 = arith.constant 0 : index
    %c0_60 = arith.constant 0 : index
    %101 = vector.load %arg4[%c0_58, %c0_59, %c0_60] : memref<9x16x64xbf16, #tpu.memory_space<vmem>>, vector<1x16x64xbf16>
    %102 = vector.shape_cast %101 : vector<1x16x64xbf16> to vector<16x64xbf16>
    %cst_61 = arith.constant dense<0.000000e+00> : vector<256x64xf32>
    %103 = tpu.matmul %100, %102, %cst_61 {dimension_numbers = #tpu.dot_dimension_numbers<[1], [0], [0], [1], [0, 0, 1, 1], [], []>} : vector<256x16xbf16>, vector<16x64xbf16>, vector<256x64xf32> -> vector<256x64xf32>
    %104 = arith.addf %98, %103 : vector<256x64xf32>
    %c0_62 = arith.constant 0 : index
    %c1_63 = arith.constant 1 : index
    %c0_64 = arith.constant 0 : index
    %105 = vector.load %arg9[%c0_62, %c1_63, %c0_64] : memref<18x18x16xbf16, #tpu.memory_space<vmem>>, vector<16x16x16xbf16>
    %106 = vector.shape_cast %105 : vector<16x16x16xbf16> to vector<256x16xbf16>
    %c1_65 = arith.constant 1 : index
    %c0_66 = arith.constant 0 : index
    %c0_67 = arith.constant 0 : index
    %107 = vector.load %arg4[%c1_65, %c0_66, %c0_67] : memref<9x16x64xbf16, #tpu.memory_space<vmem>>, vector<1x16x64xbf16>
    %108 = vector.shape_cast %107 : vector<1x16x64xbf16> to vector<16x64xbf16>
    %cst_68 = arith.constant dense<0.000000e+00> : vector<256x64xf32>
    %109 = tpu.matmul %106, %108, %cst_68 {dimension_numbers = #tpu.dot_dimension_numbers<[1], [0], [0], [1], [0, 0, 1, 1], [], []>} : vector<256x16xbf16>, vector<16x64xbf16>, vector<256x64xf32> -> vector<256x64xf32>
    %110 = arith.addf %104, %109 : vector<256x64xf32>
    %c0_69 = arith.constant 0 : index
    %c2_70 = arith.constant 2 : index
    %c0_71 = arith.constant 0 : index
    %111 = vector.load %arg9[%c0_69, %c2_70, %c0_71] : memref<18x18x16xbf16, #tpu.memory_space<vmem>>, vector<16x16x16xbf16>
    %112 = vector.shape_cast %111 : vector<16x16x16xbf16> to vector<256x16xbf16>
    %c2_72 = arith.constant 2 : index
    %c0_73 = arith.constant 0 : index
    %c0_74 = arith.constant 0 : index
    %113 = vector.load %arg4[%c2_72, %c0_73, %c0_74] : memref<9x16x64xbf16, #tpu.memory_space<vmem>>, vector<1x16x64xbf16>
    %114 = vector.shape_cast %113 : vector<1x16x64xbf16> to vector<16x64xbf16>
    %cst_75 = arith.constant dense<0.000000e+00> : vector<256x64xf32>
    %115 = tpu.matmul %112, %114, %cst_75 {dimension_numbers = #tpu.dot_dimension_numbers<[1], [0], [0], [1], [0, 0, 1, 1], [], []>} : vector<256x16xbf16>, vector<16x64xbf16>, vector<256x64xf32> -> vector<256x64xf32>
    %116 = arith.addf %110, %115 : vector<256x64xf32>
    %c1_76 = arith.constant 1 : index
    %c0_77 = arith.constant 0 : index
    %c0_78 = arith.constant 0 : index
    %117 = vector.load %arg9[%c1_76, %c0_77, %c0_78] : memref<18x18x16xbf16, #tpu.memory_space<vmem>>, vector<16x16x16xbf16>
    %118 = vector.shape_cast %117 : vector<16x16x16xbf16> to vector<256x16xbf16>
    %c3_79 = arith.constant 3 : index
    %c0_80 = arith.constant 0 : index
    %c0_81 = arith.constant 0 : index
    %119 = vector.load %arg4[%c3_79, %c0_80, %c0_81] : memref<9x16x64xbf16, #tpu.memory_space<vmem>>, vector<1x16x64xbf16>
    %120 = vector.shape_cast %119 : vector<1x16x64xbf16> to vector<16x64xbf16>
    %cst_82 = arith.constant dense<0.000000e+00> : vector<256x64xf32>
    %121 = tpu.matmul %118, %120, %cst_82 {dimension_numbers = #tpu.dot_dimension_numbers<[1], [0], [0], [1], [0, 0, 1, 1], [], []>} : vector<256x16xbf16>, vector<16x64xbf16>, vector<256x64xf32> -> vector<256x64xf32>
    %122 = arith.addf %116, %121 : vector<256x64xf32>
    %c1_83 = arith.constant 1 : index
    %c1_84 = arith.constant 1 : index
    %c0_85 = arith.constant 0 : index
    %123 = vector.load %arg9[%c1_83, %c1_84, %c0_85] : memref<18x18x16xbf16, #tpu.memory_space<vmem>>, vector<16x16x16xbf16>
    %124 = vector.shape_cast %123 : vector<16x16x16xbf16> to vector<256x16xbf16>
    %c4_86 = arith.constant 4 : index
    %c0_87 = arith.constant 0 : index
    %c0_88 = arith.constant 0 : index
    %125 = vector.load %arg4[%c4_86, %c0_87, %c0_88] : memref<9x16x64xbf16, #tpu.memory_space<vmem>>, vector<1x16x64xbf16>
    %126 = vector.shape_cast %125 : vector<1x16x64xbf16> to vector<16x64xbf16>
    %cst_89 = arith.constant dense<0.000000e+00> : vector<256x64xf32>
    %127 = tpu.matmul %124, %126, %cst_89 {dimension_numbers = #tpu.dot_dimension_numbers<[1], [0], [0], [1], [0, 0, 1, 1], [], []>} : vector<256x16xbf16>, vector<16x64xbf16>, vector<256x64xf32> -> vector<256x64xf32>
    %128 = arith.addf %122, %127 : vector<256x64xf32>
    %c1_90 = arith.constant 1 : index
    %c2_91 = arith.constant 2 : index
    %c0_92 = arith.constant 0 : index
    %129 = vector.load %arg9[%c1_90, %c2_91, %c0_92] : memref<18x18x16xbf16, #tpu.memory_space<vmem>>, vector<16x16x16xbf16>
    %130 = vector.shape_cast %129 : vector<16x16x16xbf16> to vector<256x16xbf16>
    %c5_93 = arith.constant 5 : index
    %c0_94 = arith.constant 0 : index
    %c0_95 = arith.constant 0 : index
    %131 = vector.load %arg4[%c5_93, %c0_94, %c0_95] : memref<9x16x64xbf16, #tpu.memory_space<vmem>>, vector<1x16x64xbf16>
    %132 = vector.shape_cast %131 : vector<1x16x64xbf16> to vector<16x64xbf16>
    %cst_96 = arith.constant dense<0.000000e+00> : vector<256x64xf32>
    %133 = tpu.matmul %130, %132, %cst_96 {dimension_numbers = #tpu.dot_dimension_numbers<[1], [0], [0], [1], [0, 0, 1, 1], [], []>} : vector<256x16xbf16>, vector<16x64xbf16>, vector<256x64xf32> -> vector<256x64xf32>
    %134 = arith.addf %128, %133 : vector<256x64xf32>
    %c2_97 = arith.constant 2 : index
    %c0_98 = arith.constant 0 : index
    %c0_99 = arith.constant 0 : index
    %135 = vector.load %arg9[%c2_97, %c0_98, %c0_99] : memref<18x18x16xbf16, #tpu.memory_space<vmem>>, vector<16x16x16xbf16>
    %136 = vector.shape_cast %135 : vector<16x16x16xbf16> to vector<256x16xbf16>
    %c6_100 = arith.constant 6 : index
    %c0_101 = arith.constant 0 : index
    %c0_102 = arith.constant 0 : index
    %137 = vector.load %arg4[%c6_100, %c0_101, %c0_102] : memref<9x16x64xbf16, #tpu.memory_space<vmem>>, vector<1x16x64xbf16>
    %138 = vector.shape_cast %137 : vector<1x16x64xbf16> to vector<16x64xbf16>
    %cst_103 = arith.constant dense<0.000000e+00> : vector<256x64xf32>
    %139 = tpu.matmul %136, %138, %cst_103 {dimension_numbers = #tpu.dot_dimension_numbers<[1], [0], [0], [1], [0, 0, 1, 1], [], []>} : vector<256x16xbf16>, vector<16x64xbf16>, vector<256x64xf32> -> vector<256x64xf32>
    %140 = arith.addf %134, %139 : vector<256x64xf32>
    %c2_104 = arith.constant 2 : index
    %c1_105 = arith.constant 1 : index
    %c0_106 = arith.constant 0 : index
    %141 = vector.load %arg9[%c2_104, %c1_105, %c0_106] : memref<18x18x16xbf16, #tpu.memory_space<vmem>>, vector<16x16x16xbf16>
    %142 = vector.shape_cast %141 : vector<16x16x16xbf16> to vector<256x16xbf16>
    %c7_107 = arith.constant 7 : index
    %c0_108 = arith.constant 0 : index
    %c0_109 = arith.constant 0 : index
    %143 = vector.load %arg4[%c7_107, %c0_108, %c0_109] : memref<9x16x64xbf16, #tpu.memory_space<vmem>>, vector<1x16x64xbf16>
    %144 = vector.shape_cast %143 : vector<1x16x64xbf16> to vector<16x64xbf16>
    %cst_110 = arith.constant dense<0.000000e+00> : vector<256x64xf32>
    %145 = tpu.matmul %142, %144, %cst_110 {dimension_numbers = #tpu.dot_dimension_numbers<[1], [0], [0], [1], [0, 0, 1, 1], [], []>} : vector<256x16xbf16>, vector<16x64xbf16>, vector<256x64xf32> -> vector<256x64xf32>
    %146 = arith.addf %140, %145 : vector<256x64xf32>
    %c2_111 = arith.constant 2 : index
    %c2_112 = arith.constant 2 : index
    %c0_113 = arith.constant 0 : index
    %147 = vector.load %arg9[%c2_111, %c2_112, %c0_113] : memref<18x18x16xbf16, #tpu.memory_space<vmem>>, vector<16x16x16xbf16>
    %148 = vector.shape_cast %147 : vector<16x16x16xbf16> to vector<256x16xbf16>
    %c8_114 = arith.constant 8 : index
    %c0_115 = arith.constant 0 : index
    %c0_116 = arith.constant 0 : index
    %149 = vector.load %arg4[%c8_114, %c0_115, %c0_116] : memref<9x16x64xbf16, #tpu.memory_space<vmem>>, vector<1x16x64xbf16>
    %150 = vector.shape_cast %149 : vector<1x16x64xbf16> to vector<16x64xbf16>
    %cst_117 = arith.constant dense<0.000000e+00> : vector<256x64xf32>
    %151 = tpu.matmul %148, %150, %cst_117 {dimension_numbers = #tpu.dot_dimension_numbers<[1], [0], [0], [1], [0, 0, 1, 1], [], []>} : vector<256x16xbf16>, vector<16x64xbf16>, vector<256x64xf32> -> vector<256x64xf32>
    %152 = arith.addf %146, %151 : vector<256x64xf32>
    %c0_118 = arith.constant 0 : index
    %c0_119 = arith.constant 0 : index
    %153 = vector.load %arg5[%c0_118, %c0_119] : memref<1x64xf32, #tpu.memory_space<vmem>>, vector<1x64xf32>
    %154 = vector.broadcast %153 : vector<1x64xf32> to vector<256x64xf32>
    %155 = arith.addf %152, %154 : vector<256x64xf32>
    %156 = vector.shape_cast %155 : vector<256x64xf32> to vector<8x32x64xf32>
    %157 = vector.extract_strided_slice %156 {offsets = [0, 0, 0], sizes = [8, 16, 64], strides = [1, 1, 1]} : vector<8x32x64xf32> to vector<8x16x64xf32>
    %158 = vector.extract_strided_slice %156 {offsets = [0, 16, 0], sizes = [8, 16, 64], strides = [1, 1, 1]} : vector<8x32x64xf32> to vector<8x16x64xf32>
    %159 = arith.maximumf %157, %158 : vector<8x16x64xf32>
    %c0_120 = arith.constant 0 : index
    %c0_121 = arith.constant 0 : index
    %c0_122 = arith.constant 0 : index
    %160 = vector.load %arg10[%c0_120, %c0_121, %c0_122] : memref<8x16x64xf32, #tpu.memory_space<vmem>>, vector<8x16x64xf32>
    tpu.vector_store %arg10[%c0_120, %c0_121, %c0_122], %159 {strides = array<i32>} : memref<8x16x64xf32, #tpu.memory_space<vmem>>, vector<8x16x64xf32>,
    %cst_123 = arith.constant 0.000000e+00 : f32
    %161 = vector.broadcast %cst_123 : f32 to vector<8x64xf32>
    %c0_124 = arith.constant 0 : index
    %c0_125 = arith.constant 0 : index
    %c0_126 = arith.constant 0 : index
    %162 = vector.load %arg10[%c0_124, %c0_125, %c0_126] : memref<8x16x64xf32, #tpu.memory_space<vmem>>, vector<8x1x64xf32>
    %163 = vector.shape_cast %162 : vector<8x1x64xf32> to vector<8x64xf32>
    %c0_127 = arith.constant 0 : index
    %c1_128 = arith.constant 1 : index
    %c0_129 = arith.constant 0 : index
    %164 = vector.load %arg10[%c0_127, %c1_128, %c0_129] : memref<8x16x64xf32, #tpu.memory_space<vmem>>, vector<8x1x64xf32>
    %165 = vector.shape_cast %164 : vector<8x1x64xf32> to vector<8x64xf32>
    %166 = arith.maximumf %163, %165 : vector<8x64xf32>
    %167 = arith.addf %161, %166 : vector<8x64xf32>
    %c0_130 = arith.constant 0 : index
    %c2_131 = arith.constant 2 : index
    %c0_132 = arith.constant 0 : index
    %168 = vector.load %arg10[%c0_130, %c2_131, %c0_132] : memref<8x16x64xf32, #tpu.memory_space<vmem>>, vector<8x1x64xf32>
    %169 = vector.shape_cast %168 : vector<8x1x64xf32> to vector<8x64xf32>
    %c0_133 = arith.constant 0 : index
    %c3_134 = arith.constant 3 : index
    %c0_135 = arith.constant 0 : index
    %170 = vector.load %arg10[%c0_133, %c3_134, %c0_135] : memref<8x16x64xf32, #tpu.memory_space<vmem>>, vector<8x1x64xf32>
    %171 = vector.shape_cast %170 : vector<8x1x64xf32> to vector<8x64xf32>
    %172 = arith.maximumf %169, %171 : vector<8x64xf32>
    %173 = arith.addf %167, %172 : vector<8x64xf32>
    %c0_136 = arith.constant 0 : index
    %c4_137 = arith.constant 4 : index
    %c0_138 = arith.constant 0 : index
    %174 = vector.load %arg10[%c0_136, %c4_137, %c0_138] : memref<8x16x64xf32, #tpu.memory_space<vmem>>, vector<8x1x64xf32>
    %175 = vector.shape_cast %174 : vector<8x1x64xf32> to vector<8x64xf32>
    %c0_139 = arith.constant 0 : index
    %c5_140 = arith.constant 5 : index
    %c0_141 = arith.constant 0 : index
    %176 = vector.load %arg10[%c0_139, %c5_140, %c0_141] : memref<8x16x64xf32, #tpu.memory_space<vmem>>, vector<8x1x64xf32>
    %177 = vector.shape_cast %176 : vector<8x1x64xf32> to vector<8x64xf32>
    %178 = arith.maximumf %175, %177 : vector<8x64xf32>
    %179 = arith.addf %173, %178 : vector<8x64xf32>
    %c0_142 = arith.constant 0 : index
    %c6_143 = arith.constant 6 : index
    %c0_144 = arith.constant 0 : index
    %180 = vector.load %arg10[%c0_142, %c6_143, %c0_144] : memref<8x16x64xf32, #tpu.memory_space<vmem>>, vector<8x1x64xf32>
    %181 = vector.shape_cast %180 : vector<8x1x64xf32> to vector<8x64xf32>
    %c0_145 = arith.constant 0 : index
    %c7_146 = arith.constant 7 : index
    %c0_147 = arith.constant 0 : index
    %182 = vector.load %arg10[%c0_145, %c7_146, %c0_147] : memref<8x16x64xf32, #tpu.memory_space<vmem>>, vector<8x1x64xf32>
    %183 = vector.shape_cast %182 : vector<8x1x64xf32> to vector<8x64xf32>
    %184 = arith.maximumf %181, %183 : vector<8x64xf32>
    %185 = arith.addf %179, %184 : vector<8x64xf32>
    %c0_148 = arith.constant 0 : index
    %c8_149 = arith.constant 8 : index
    %c0_150 = arith.constant 0 : index
    %186 = vector.load %arg10[%c0_148, %c8_149, %c0_150] : memref<8x16x64xf32, #tpu.memory_space<vmem>>, vector<8x1x64xf32>
    %187 = vector.shape_cast %186 : vector<8x1x64xf32> to vector<8x64xf32>
    %c0_151 = arith.constant 0 : index
    %c9 = arith.constant 9 : index
    %c0_152 = arith.constant 0 : index
    %188 = vector.load %arg10[%c0_151, %c9, %c0_152] : memref<8x16x64xf32, #tpu.memory_space<vmem>>, vector<8x1x64xf32>
    %189 = vector.shape_cast %188 : vector<8x1x64xf32> to vector<8x64xf32>
    %190 = arith.maximumf %187, %189 : vector<8x64xf32>
    %191 = arith.addf %185, %190 : vector<8x64xf32>
    %c0_153 = arith.constant 0 : index
    %c10 = arith.constant 10 : index
    %c0_154 = arith.constant 0 : index
    %192 = vector.load %arg10[%c0_153, %c10, %c0_154] : memref<8x16x64xf32, #tpu.memory_space<vmem>>, vector<8x1x64xf32>
    %193 = vector.shape_cast %192 : vector<8x1x64xf32> to vector<8x64xf32>
    %c0_155 = arith.constant 0 : index
    %c11 = arith.constant 11 : index
    %c0_156 = arith.constant 0 : index
    %194 = vector.load %arg10[%c0_155, %c11, %c0_156] : memref<8x16x64xf32, #tpu.memory_space<vmem>>, vector<8x1x64xf32>
    %195 = vector.shape_cast %194 : vector<8x1x64xf32> to vector<8x64xf32>
    %196 = arith.maximumf %193, %195 : vector<8x64xf32>
    %197 = arith.addf %191, %196 : vector<8x64xf32>
    %c0_157 = arith.constant 0 : index
    %c12 = arith.constant 12 : index
    %c0_158 = arith.constant 0 : index
    %198 = vector.load %arg10[%c0_157, %c12, %c0_158] : memref<8x16x64xf32, #tpu.memory_space<vmem>>, vector<8x1x64xf32>
    %199 = vector.shape_cast %198 : vector<8x1x64xf32> to vector<8x64xf32>
    %c0_159 = arith.constant 0 : index
    %c13 = arith.constant 13 : index
    %c0_160 = arith.constant 0 : index
    %200 = vector.load %arg10[%c0_159, %c13, %c0_160] : memref<8x16x64xf32, #tpu.memory_space<vmem>>, vector<8x1x64xf32>
    %201 = vector.shape_cast %200 : vector<8x1x64xf32> to vector<8x64xf32>
    %202 = arith.maximumf %199, %201 : vector<8x64xf32>
    %203 = arith.addf %197, %202 : vector<8x64xf32>
    %c0_161 = arith.constant 0 : index
    %c14 = arith.constant 14 : index
    %c0_162 = arith.constant 0 : index
    %204 = vector.load %arg10[%c0_161, %c14, %c0_162] : memref<8x16x64xf32, #tpu.memory_space<vmem>>, vector<8x1x64xf32>
    %205 = vector.shape_cast %204 : vector<8x1x64xf32> to vector<8x64xf32>
    %c0_163 = arith.constant 0 : index
    %c15 = arith.constant 15 : index
    %c0_164 = arith.constant 0 : index
    %206 = vector.load %arg10[%c0_163, %c15, %c0_164] : memref<8x16x64xf32, #tpu.memory_space<vmem>>, vector<8x1x64xf32>
    %207 = vector.shape_cast %206 : vector<8x1x64xf32> to vector<8x64xf32>
    %208 = arith.maximumf %205, %207 : vector<8x64xf32>
    %209 = arith.addf %203, %208 : vector<8x64xf32>
    %cst_165 = arith.constant dense<0.000000e+00> : vector<64xf32>
    %210 = vector.multi_reduction <add>, %209, %cst_165 [0] : vector<8x64xf32> to vector<64xf32>
    %211 = vector.shape_cast %210 : vector<64xf32> to vector<1x64xf32>
    %cst_166 = arith.constant 1.562500e-02 : f32
    %212 = vector.broadcast %cst_166 : f32 to vector<1x64xf32>
    %213 = arith.mulf %211, %212 : vector<1x64xf32>
    %c0_167 = arith.constant 0 : index
    %c0_168 = arith.constant 0 : index
    %214 = vector.load %arg6[%c0_167, %c0_168] : memref<64x10xf32, #tpu.memory_space<vmem>>, vector<64x10xf32>
    %cst_169 = arith.constant dense<0.000000e+00> : vector<1x10xf32>
    %215 = tpu.matmul %213, %214, %cst_169 {dimension_numbers = #tpu.dot_dimension_numbers<[1], [0], [0], [1], [0, 0, 1, 1], [], []>} : vector<1x64xf32>, vector<64x10xf32>, vector<1x10xf32> -> vector<1x10xf32>
    %c0_170 = arith.constant 0 : index
    %c0_171 = arith.constant 0 : index
    %216 = vector.load %arg7[%c0_170, %c0_171] : memref<1x10xf32, #tpu.memory_space<vmem>>, vector<1x10xf32>
    %217 = arith.addf %215, %216 : vector<1x10xf32>
    %cst_172 = arith.constant dense<0xFF800000> : vector<1xf32>
    %218 = vector.multi_reduction <maximumf>, %217, %cst_172 [1] : vector<1x10xf32> to vector<1xf32>
    %219 = vector.shape_cast %218 : vector<1xf32> to vector<1x1xf32>
    %220 = vector.broadcast %219 : vector<1x1xf32> to vector<1x10xf32>
    %221 = arith.subf %217, %220 : vector<1x10xf32>
    %222 = math.exp %221 : vector<1x10xf32>
    %cst_173 = arith.constant dense<0.000000e+00> : vector<1xf32>
    %223 = vector.multi_reduction <add>, %222, %cst_173 [1] : vector<1x10xf32> to vector<1xf32>
    %224 = vector.shape_cast %223 : vector<1xf32> to vector<1x1xf32>
    %225 = math.log %224 : vector<1x1xf32>
    %226 = arith.addf %225, %219 : vector<1x1xf32>
    %227 = vector.broadcast %226 : vector<1x1xf32> to vector<1x10xf32>
    %228 = arith.subf %217, %227 : vector<1x10xf32>
    %c0_174 = arith.constant 0 : index
    %c0_175 = arith.constant 0 : index
    %c0_176 = arith.constant 0 : index
    %229 = vector.load %arg8[%c0_174, %c0_175, %c0_176] : memref<1x1x10xf32, #tpu.memory_space<vmem>>, vector<1x1x10xf32>
    %230 = vector.shape_cast %229 : vector<1x1x10xf32> to vector<1x10xf32>
    %231 = vector.shape_cast %228 : vector<1x10xf32> to vector<1x1x10xf32>
    tpu.vector_store %arg8[%c0_174, %c0_175, %c0_176], %231 {strides = array<i32>} : memref<1x1x10xf32, #tpu.memory_space<vmem>>, vector<1x1x10xf32>,
    return
  }
  func.func @transform_0(%arg0: i32) -> (i32, i32, i32, i32) {
    %c0_i32 = arith.constant 0 : i32
    %c0_i32_0 = arith.constant 0 : i32
    %c0_i32_1 = arith.constant 0 : i32
    %c0_i32_2 = arith.constant 0 : i32
    return %arg0, %c0_i32, %c0_i32_0, %c0_i32_1 : i32, i32, i32, i32
  }
  func.func @transform_1(%arg0: i32) -> (i32, i32) {
    %c0_i32 = arith.constant 0 : i32
    %c0_i32_0 = arith.constant 0 : i32
    %c0_i32_1 = arith.constant 0 : i32
    return %c0_i32, %c0_i32_0 : i32, i32
  }
  func.func @transform_2(%arg0: i32) -> (i32, i32) {
    %c0_i32 = arith.constant 0 : i32
    %c0_i32_0 = arith.constant 0 : i32
    %c0_i32_1 = arith.constant 0 : i32
    return %c0_i32, %c0_i32_0 : i32, i32
  }
  func.func @transform_3(%arg0: i32) -> (i32, i32, i32) {
    %c0_i32 = arith.constant 0 : i32
    %c0_i32_0 = arith.constant 0 : i32
    %c0_i32_1 = arith.constant 0 : i32
    %c0_i32_2 = arith.constant 0 : i32
    return %c0_i32, %c0_i32_0, %c0_i32_1 : i32, i32, i32
  }
  func.func @transform_4(%arg0: i32) -> (i32, i32) {
    %c0_i32 = arith.constant 0 : i32
    %c0_i32_0 = arith.constant 0 : i32
    %c0_i32_1 = arith.constant 0 : i32
    return %c0_i32, %c0_i32_0 : i32, i32
  }
  func.func @transform_5(%arg0: i32) -> (i32, i32) {
    %c0_i32 = arith.constant 0 : i32
    %c0_i32_0 = arith.constant 0 : i32
    %c0_i32_1 = arith.constant 0 : i32
    return %c0_i32, %c0_i32_0 : i32, i32
  }
  func.func @transform_6(%arg0: i32) -> (i32, i32) {
    %c0_i32 = arith.constant 0 : i32
    %c0_i32_0 = arith.constant 0 : i32
    %c0_i32_1 = arith.constant 0 : i32
    return %c0_i32, %c0_i32_0 : i32, i32
  }
  func.func @transform_7(%arg0: i32) -> (i32, i32, i32) {
    %c0_i32 = arith.constant 0 : i32
    %c0_i32_0 = arith.constant 0 : i32
    %c0_i32_1 = arith.constant 0 : i32
    return %arg0, %c0_i32, %c0_i32_0 : i32, i32, i32
  }
}

</mosaic_0001>

<bundles_post_ra>
// kernel: forward.1
= control target key start
LH: loop header
LB: loop body
LE: loop exit
PB: predicated region body
PF: predicated region fallthrough
CT: control target
= control target key end

     0   :  { %12 = vsyncpa [#allocation5], 0  ;;  %s16265_s0 = inlined_call_operand.vmem [shape: f32[2,20,20,1], index: 0, kind: input, shape index: {}]   ;;  %s16266_s1 = inlined_call_operand.vmem [shape: f32[9,16], index: 1, kind: input, shape index: {}]   ;;  %s16267_s2 = inlined_call_operand.vmem [shape: f32[1,16], index: 2, kind: input, shape index: {}]   ;;  %s16268_s3 = inlined_call_operand.vmem [shape: bf16[9,16,64], index: 3, kind: input, shape index: {}]   ;;  %s16269_s4 = inlined_call_operand.vmem [shape: f32[1,64], index: 4, kind: input, shape index: {}]   ;;  %s16270_s5 = inlined_call_operand.vmem [shape: f32[64,10], index: 5, kind: input, shape index: {}]   ;;  %s16271_s6 = inlined_call_operand.vmem [shape: f32[1,10], index: 6, kind: input, shape index: {}]   ;;  %s16272_s7 = inlined_call_operand.hbm [shape: f32[2,1,10], index: 7, kind: output, shape index: {}]  }
   0x1   :  { %14 = vsyncpa [#allocation5 + $0x1], 0  ;;  %s11657_s24 = smov 0   ;;  %s11659_s25 = smov 0  }
   0x2   :  { %s11661_s26 = smov 0   ;;  %s11663_s27 = smov 0  }
   0x3 LB: > { %s11678_s28 = sadd.s32 4294967295, %s11610_s27   ;;  %s9830_s29 = sadd.s32 4294967294, %s11610_s27   ;;  %s11610_s27 = sphi %s11663_s27, %s17035_s27   ;;  %s11606_s26 = sphi %s11661_s26, %s17034_s26   ;;  %s11602_s25 = sphi %s11659_s25, %s17033_s25   ;;  %s11598_s24 = sphi %s11657_s24, %s17032_s24  }
   0x4   : > { %s11682_s30 = sadd.s32 1, %s11610_s27   ;;  %s179_s8 = sadd.s32 1, %s11606_s26 }
   0x5   : > { %s176_s9 = ssub.s32 %s11610_s27, %s11682_s30  ;;  %p189_p0 = scmp.ne.s32.totalorder %s11606_s26, %s11602_s25 }
   0x6   : > { %p177_p1 = scmp.eq.s32.totalorder %s176_s9, 0  ;;  %p190_p2 = scmp.eq.s32.totalorder %s11678_s28, 1 }
   0x7   : > { %p195_p3 = scmp.ne.s32.totalorder %s11602_s25, %s11598_s24  ;;  %p196_p4 = scmp.eq.s32.totalorder %s9830_s29, 1 }
   0x8   : > { %s11693_s10 = scalar_select %p177_p1, %s11606_s26, %s179_s8  }
   0x9   : > { %p11695_p5 = por %p190_p2, %p189_p0  ;;  %p11699_p6 = por %p196_p4, %p195_p3 }
   0xa   : > { %p9833_p7 = scmp.ge.s32.totalorder %s11610_s27, 1  ;;  %p240_p8 = scmp.lt.s32.totalorder %s11610_s27, 3 }
   0xc   : > { %p241_p9 = pnand %p9833_p7, %p240_p8 }
   0xe   : > { %244 = sbr.rel (%p241_p9) target bundleno = 2044 (0x7fc), region = 48 }
  0x15   : > { %p271_p10 = scmp.lt.s32.totalorder %s11678_s28, 1  ;;  %v11612_v0 = vmov 0   ;;  %vm4652_vm0 = vcmask 122880   ;;  %vm4649_vm1 = vcmask 125952   ;;  %vm4755_vm2 = vsmask.f32 3328 }
  0x16   : > { %11439 = vset.pattern.permute.xlu1 %v11612_v0  ;;  %11438 = vset.pattern.permute.xlu0 %v11612_v0  ;;  %vm4756_vm3 = vsmask.f32 7440  ;;  %vm5199_vm5 = vcmask 130048   ;;  %vm5752_vm8 = vcmask 1042432   ;;  %vm5753_vm9 = vcmask 1046532   ;;  %s269_s18 = sand.u32 1, %s11602_s25  }
  0x17   : > { %s272_s13 = scalar_select %p271_p10, %s11678_s28, 1  ;;  %vm12338_vm4 = vmor %vm4755_vm2, %vm4756_vm3  ;;  %vm11614_vm11 = vmmov 0   ;;  %vm9354_vm12 = vcmask 523264   ;;  %vm9636_vm13 = vcmask 1041409   ;;  %vm9639_vm14 = vcmask 1042434  }
  0x18   : > { %vm12881_vm10 = vmor %vm5752_vm8, %vm5753_vm9  ;;  %vm9642_vm15 = vcmask 1043459   ;;  %vm9651_vm2 = vcmask 1046534   ;;  %vm9654_vm3 = vcmask 1047559   ;;  %s10586_s19 = sshll.u32 %s11678_s28, 4  ;;  %s270_s20 = scalar_lea.vmem [#allocation4], %s269_s18 }
  0x19   : > { %s11394_s14 = smul.u32 480, %s272_s13  ;;  %s9775_s21 = sshll.u32 %s270_s20, 4  ;;  %s16224_s21 = int_to_ptr.vmem [resolvable:$true] %s9775_s21 }
  0x1a   : > { %s9763_s29 = scalar_lea.sflag [#allocation5], %s269_s18  ;;  %s11548_s8 = scalar_lea.vmem %s16224_s21, 16 }
  0x1b   : > { %s11710_s17 = scalar_lea.vmem %s16265_s0, %s11394_s14  ;;  %p11549_p11 = scmp.ne.s32.totalorder %s16224_s21, %s11548_s8 }
  0x1c   : > { %v282_v1 = vld [vmem:[%s11710_s17 + $0x28] sm:$0x3]  ;;  %v280_v2 = vld [vmem:[%s11710_s17 + $0x18] sm:$0xff]  ;;  %v11715_v3 = vld [vmem:[%s11710_s17 + $0x30] sm:$0xff]  ;;  %s11616_s28 = smov [#allocation4]  }
  0x1d   : > { %359 = vperm.xlu1 %11439, %v282_v1   ;;  %349 = vperm.xlu0 %11438, %v280_v2   ;;  %v281_v4 = vld [vmem:[%s11710_s17 + $0x20] sm:$0xff]  ;;  %v11721_v6 = vld [vmem:[%s11710_s17 + $0x38] sm:$0xff]  ;;  %v11725_v7 = vld [vmem:[%s11710_s17 + $0x50] sm:$0xff]  ;;  %p11550_p12 = pnand %p11549_p11, %p11695_p5  ;;  %s11552_s9 = sshll.u32 %s11616_s28, 4  ;;  %s11553_s9 = int_to_ptr.vmem [resolvable:$false] %s11552_s9 }
  0x1e   : > { %v285_v5 = vld [vmem:[%s11710_s17 + $0x40] sm:$0x3]  ;;  %v11728_v8 = vld [vmem:[%s11710_s17 + $0x48] sm:$0xff]  ;;  %v288_v10 = vld [vmem:[%s11710_s17 + $0x58] sm:$0x3]  ;;  %s11554_s13 = scalar_lea.vmem %s11553_s9, 32  ;;  %p11555_p0 = scmp.lt.s32.totalorder %s16224_s21, %s11553_s9 }
  0x1f   : > { %v11733_v9 = vld [vmem:[%s11710_s17 + $0x60] sm:$0xff]  ;;  %v291_v11 = vld [vmem:[%s11710_s17 + $0x70] sm:$0x3]  ;;  %v11739_v12 = vld [vmem:[%s11710_s17 + $0x68] sm:$0xff]  ;;  %p11551_p13 = pneg %p11550_p12  ;;  %p11556_p1 = scmp.lt.s32.totalorder %s11554_s13, %s11548_s8 }
  0x20   : > { %v293_v13 = vld [vmem:[%s11710_s17 + $0x80] sm:$0xff]  ;;  %v11744_v14 = vld [vmem:[%s11710_s17 + $0x78] sm:$0xff]  ;;  %v295_v15 = vld [vmem:[%s11710_s17 + $0x90] sm:$0xff] }
  0x21   : > { %364 = vperm.xlu1 %11439, %v11715_v3   ;;  %354 = vperm.xlu0 %11438, %v281_v4   ;;  %v294_v16 = vld [vmem:[%s11710_s17 + $0x88] sm:$0x3]  ;;  %v297_v17 = vld [vmem:[%s11710_s17 + $0xa0] sm:$0x3]  ;;  %v296_v18 = vld [vmem:[%s11710_s17 + $0x98] sm:$0xff]  ;;  %p11557_p2 = por %p11556_p1, %p11555_p0 }
  0x22   : > { %v299_v19 = vld [vmem:[%s11710_s17 + $0xb0] sm:$0xff]  ;;  %v298_v20 = vld [vmem:[%s11710_s17 + $0xa8] sm:$0xff]  ;;  %v301_v21 = vld [vmem:[%s11710_s17 + $0xc0] sm:$0xff] }
  0x23   : > { %v300_v22 = vld [vmem:[%s11710_s17 + $0xb8] sm:$0x3]  ;;  %v303_v23 = vld [vmem:[%s11710_s17 + $0xd0] sm:$0x3]  ;;  %v302_v24 = vld [vmem:[%s11710_s17 + $0xc8] sm:$0xff]  ;;  %p11558_p3 = pnand %p11557_p2, %p11551_p13 }
  0x24   : > { %v305_v25 = vld [vmem:[%s11710_s17 + $0xe0] sm:$0xff]  ;;  %v304_v26 = vld [vmem:[%s11710_s17 + $0xd8] sm:$0xff]  ;;  %v307_v27 = vld [vmem:[%s11710_s17 + $0xf0] sm:$0xff] }
  0x25   : > { %374 = vperm.xlu1 %11439, %v285_v5   ;;  %369 = vperm.xlu0 %11438, %v11721_v6   ;;  %v306_v28 = vld [vmem:[%s11710_s17 + $0xe8] sm:$0x3]  ;;  %v309_v29 = vld [vmem:[%s11710_s17 + $0x100] sm:$0x3]  ;;  %v308_v30 = vld [vmem:[%s11710_s17 + $0xf8] sm:$0xff] }
  0x26   : > { %v311_v31 = vld [vmem:[%s11710_s17 + $0x110] sm:$0xff]  ;;  %v310_v32 = vld [vmem:[%s11710_s17 + $0x108] sm:$0xff]  ;;  %v313_v33 = vld [vmem:[%s11710_s17 + $0x120] sm:$0xff] }
  0x27   : > { %v312_v34 = vld [vmem:[%s11710_s17 + $0x118] sm:$0x3]  ;;  %v315_v35 = vld [vmem:[%s11710_s17 + $0x130] sm:$0x3]  ;;  %v314_v36 = vld [vmem:[%s11710_s17 + $0x128] sm:$0xff] }
  0x28   : > { %v317_v37 = vld [vmem:[%s11710_s17 + $0x140] sm:$0xff]  ;;  %v316_v38 = vld [vmem:[%s11710_s17 + $0x138] sm:$0xff]  ;;  %v319_v39 = vld [vmem:[%s11710_s17 + $0x150] sm:$0xff] }
  0x29   : > { %384 = vperm.xlu1 %11439, %v11725_v7   ;;  %379 = vperm.xlu0 %11438, %v11728_v8   ;;  %v318_v40 = vld [vmem:[%s11710_s17 + $0x148] sm:$0x3]  ;;  %v321_v41 = vld [vmem:[%s11710_s17 + $0x160] sm:$0x3]  ;;  %v320_v42 = vld [vmem:[%s11710_s17 + $0x158] sm:$0xff] }
  0x2a   : > { %v323_v43 = vld [vmem:[%s11710_s17 + $0x170] sm:$0xff]  ;;  %v322_v44 = vld [vmem:[%s11710_s17 + $0x168] sm:$0xff]  ;;  %v325_v45 = vld [vmem:[%s11710_s17 + $0x180] sm:$0xff] }
  0x2b   : > { %v324_v46 = vld [vmem:[%s11710_s17 + $0x178] sm:$0x3]  ;;  %v327_v47 = vld [vmem:[%s11710_s17 + $0x190] sm:$0x3]  ;;  %v326_v48 = vld [vmem:[%s11710_s17 + $0x188] sm:$0xff] }
  0x2c   : > { %v718_v49 = vld [vmem:[%s11710_s17 + $0x21] sm:$0xff]  ;;  %v717_v50 = vld [vmem:[%s11710_s17 + $0x19] sm:$0xff]  ;;  %v720_v51 = vld [vmem:[%s11710_s17 + $0x31] sm:$0xff] }
  0x2d   : > { %394 = vperm.xlu1 %11439, %v11733_v9   ;;  %389 = vperm.xlu0 %11438, %v288_v10   ;;  %v719_v52 = vld [vmem:[%s11710_s17 + $0x29] sm:$0x3]  ;;  %v722_v53 = vld [vmem:[%s11710_s17 + $0x41] sm:$0x3]  ;;  %v721_v54 = vld [vmem:[%s11710_s17 + $0x39] sm:$0xff] }
  0x2e   : > { %v724_v55 = vld [vmem:[%s11710_s17 + $0x51] sm:$0xff]  ;;  %v723_v56 = vld [vmem:[%s11710_s17 + $0x49] sm:$0xff]  ;;  %v726_v57 = vld [vmem:[%s11710_s17 + $0x61] sm:$0xff] }
  0x2f   : > { %v725_v58 = vld [vmem:[%s11710_s17 + $0x59] sm:$0x3]  ;;  %v728_v59 = vld [vmem:[%s11710_s17 + $0x71] sm:$0x3]  ;;  %v727_v60 = vld [vmem:[%s11710_s17 + $0x69] sm:$0xff] }
  0x30   : > { %v730_v61 = vld [vmem:[%s11710_s17 + $0x81] sm:$0xff]  ;;  %v729_v62 = vld [vmem:[%s11710_s17 + $0x79] sm:$0xff]  ;;  %v732_v63 = vld [vmem:[%s11710_s17 + $0x91] sm:$0xff] }
  0x31   : > { %404 = vperm.xlu1 %11439, %v291_v11   ;;  %399 = vperm.xlu0 %11438, %v11739_v12   ;;  %v731_v0 = vld [vmem:[%s11710_s17 + $0x89] sm:$0x3]  ;;  %v734_v1 = vld [vmem:[%s11710_s17 + $0xa1] sm:$0x3]  ;;  %v733_v2 = vld [vmem:[%s11710_s17 + $0x99] sm:$0xff] }
  0x32   : > { %v736_v10 = vld [vmem:[%s11710_s17 + $0xb1] sm:$0xff]  ;;  %v735_v11 = vld [vmem:[%s11710_s17 + $0xa9] sm:$0xff] }
  0x35   : > { %414 = vperm.xlu1 %11439, %v293_v13   ;;  %409 = vperm.xlu0 %11438, %v11744_v14  }
  0x39   : > { %424 = vperm.xlu1 %11439, %v295_v15   ;;  %419 = vperm.xlu0 %11438, %v294_v16   ;;  %v738_v16 = vld [vmem:[%s11710_s17 + $0xc1] sm:$0xff] }
  0x3d   : > { %434 = vperm.xlu1 %11439, %v297_v17   ;;  %429 = vperm.xlu0 %11438, %v296_v18   ;;  %v737_v17 = vld [vmem:[%s11710_s17 + $0xb9] sm:$0x3] }
  0x41   : > { %444 = vperm.xlu1 %11439, %v299_v19   ;;  %439 = vperm.xlu0 %11438, %v298_v20   ;;  %v740_v20 = vld [vmem:[%s11710_s17 + $0xd1] sm:$0x3] }
  0x45   : > { %454 = vperm.xlu1 %11439, %v301_v21   ;;  %449 = vperm.xlu0 %11438, %v300_v22   ;;  %v739_v21 = vld [vmem:[%s11710_s17 + $0xc9] sm:$0xff] }
  0x49   : > { %464 = vperm.xlu1 %11439, %v303_v23   ;;  %459 = vperm.xlu0 %11438, %v302_v24   ;;  %v742_v24 = vld [vmem:[%s11710_s17 + $0xe1] sm:$0xff] }
  0x4d   : > { %474 = vperm.xlu1 %11439, %v305_v25   ;;  %469 = vperm.xlu0 %11438, %v304_v26   ;;  %v741_v25 = vld [vmem:[%s11710_s17 + $0xd9] sm:$0xff] }
  0x51   : > { %484 = vperm.xlu1 %11439, %v307_v27   ;;  %479 = vperm.xlu0 %11438, %v306_v28   ;;  %v744_v28 = vld [vmem:[%s11710_s17 + $0xf1] sm:$0xff] }
  0x55   : > { %494 = vperm.xlu1 %11439, %v309_v29   ;;  %489 = vperm.xlu0 %11438, %v308_v30   ;;  %v743_v29 = vld [vmem:[%s11710_s17 + $0xe9] sm:$0x3] }
  0x59   : > { %504 = vperm.xlu1 %11439, %v311_v31   ;;  %499 = vperm.xlu0 %11438, %v310_v32   ;;  %v746_v32 = vld [vmem:[%s11710_s17 + $0x101] sm:$0x3] }
  0x5d   : > { %514 = vperm.xlu1 %11439, %v313_v33   ;;  %509 = vperm.xlu0 %11438, %v312_v34   ;;  %v745_v33 = vld [vmem:[%s11710_s17 + $0xf9] sm:$0xff] }
  0x61   : > { %524 = vperm.xlu1 %11439, %v315_v35   ;;  %519 = vperm.xlu0 %11438, %v314_v36   ;;  %v748_v36 = vld [vmem:[%s11710_s17 + $0x111] sm:$0xff] }
  0x65   : > { %534 = vperm.xlu1 %11439, %v317_v37   ;;  %529 = vperm.xlu0 %11438, %v316_v38   ;;  %v747_v37 = vld [vmem:[%s11710_s17 + $0x109] sm:$0xff] }
  0x69   : > { %544 = vperm.xlu1 %11439, %v319_v39   ;;  %539 = vperm.xlu0 %11438, %v318_v40   ;;  %v750_v40 = vld [vmem:[%s11710_s17 + $0x121] sm:$0xff] }
  0x6d   : > { %554 = vperm.xlu1 %11439, %v321_v41   ;;  %549 = vperm.xlu0 %11438, %v320_v42   ;;  %v749_v41 = vld [vmem:[%s11710_s17 + $0x119] sm:$0x3] }
  0x71   : > { %564 = vperm.xlu1 %11439, %v323_v43   ;;  %559 = vperm.xlu0 %11438, %v322_v44   ;;  %v752_v44 = vld [vmem:[%s11710_s17 + $0x131] sm:$0x3] }
  0x75   : > { %574 = vperm.xlu1 %11439, %v325_v45   ;;  %569 = vperm.xlu0 %11438, %v324_v46   ;;  %v751_v45 = vld [vmem:[%s11710_s17 + $0x129] sm:$0xff] }
  0x79   : > { %584 = vperm.xlu1 %11439, %v327_v47   ;;  %579 = vperm.xlu0 %11438, %v326_v48   ;;  %v754_v48 = vld [vmem:[%s11710_s17 + $0x141] sm:$0xff] }
  0x7d   : > { %791 = vperm.xlu1 %11439, %v718_v49   ;;  %786 = vperm.xlu0 %11438, %v717_v50   ;;  %v753_v49 = vld [vmem:[%s11710_s17 + $0x139] sm:$0xff] }
  0x81   : > { %801 = vperm.xlu1 %11439, %v720_v51   ;;  %796 = vperm.xlu0 %11438, %v719_v52   ;;  %v756_v52 = vld [vmem:[%s11710_s17 + $0x151] sm:$0xff] }
  0x85   : > { %811 = vperm.xlu1 %11439, %v722_v53   ;;  %806 = vperm.xlu0 %11438, %v721_v54   ;;  %v755_v53 = vld [vmem:[%s11710_s17 + $0x149] sm:$0x3] }
  0x89   : > { %821 = vperm.xlu1 %11439, %v724_v55   ;;  %816 = vperm.xlu0 %11438, %v723_v56   ;;  %v758_v56 = vld [vmem:[%s11710_s17 + $0x161] sm:$0x3] }
  0x8d   : > { %831 = vperm.xlu1 %11439, %v726_v57   ;;  %826 = vperm.xlu0 %11438, %v725_v58   ;;  %v757_v57 = vld [vmem:[%s11710_s17 + $0x159] sm:$0xff] }
  0x91   : > { %841 = vperm.xlu1 %11439, %v728_v59   ;;  %836 = vperm.xlu0 %11438, %v727_v60   ;;  %v760_v60 = vld [vmem:[%s11710_s17 + $0x171] sm:$0xff] }
  0x95   : > { %851 = vperm.xlu1 %11439, %v730_v61   ;;  %846 = vperm.xlu0 %11438, %v729_v62   ;;  %v759_v61 = vld [vmem:[%s11710_s17 + $0x169] sm:$0xff] }
  0x99   : > { %861 = vperm.xlu1 %11439, %v732_v63   ;;  %856 = vperm.xlu0 %11438, %v731_v0   ;;  %v762_v0 = vld [vmem:[%s11710_s17 + $0x181] sm:$0xff] }
  0x9c   : > { %v11799_v4 = vpop.permute.xlu1 %359  ;;  %v11801_v5 = vpop.permute.xlu0 %349 }
  0x9d   : > { %871 = vperm.xlu1 %11439, %v734_v1   ;;  %866 = vperm.xlu0 %11438, %v733_v2   ;;  %v761_v1 = vld [vmem:[%s11710_s17 + $0x179] sm:$0x3] }
  0xa0   : > { %v11805_v13 = vpop.permute.xlu1 %364  ;;  %v11807_v15 = vpop.permute.xlu0 %354 }
  0xa1   : > { %881 = vperm.xlu1 %11439, %v736_v10   ;;  %876 = vperm.xlu0 %11438, %v735_v11   ;;  %v764_v11 = vld [vmem:[%s11710_s17 + $0x191] sm:$0x3] }
  0xa4   : > { %v11811_v18 = vpop.permute.xlu1 %374  ;;  %v11813_v19 = vpop.permute.xlu0 %369 }
  0xa5   : > { %891 = vperm.xlu1 %11439, %v738_v16   ;;  %886 = vperm.xlu0 %11438, %v737_v17   ;;  %v763_v16 = vld [vmem:[%s11710_s17 + $0x189] sm:$0xff] }
  0xa8   : > { %v11817_v22 = vpop.permute.xlu1 %384  ;;  %v11819_v23 = vpop.permute.xlu0 %379 }
  0xa9   : > { %901 = vperm.xlu1 %11439, %v740_v20   ;;  %896 = vperm.xlu0 %11438, %v739_v21   ;;  %v1155_v21 = vld [vmem:[%s11710_s17 + $0x22] sm:$0xff] }
  0xac   : > { %v11823_v26 = vpop.permute.xlu1 %394  ;;  %v11825_v27 = vpop.permute.xlu0 %389 }
  0xad   : > { %911 = vperm.xlu1 %11439, %v742_v24   ;;  %906 = vperm.xlu0 %11438, %v741_v25   ;;  %v1154_v24 = vld [vmem:[%s11710_s17 + $0x1a] sm:$0xff] }
  0xb0   : > { %v11829_v30 = vpop.permute.xlu1 %404  ;;  %v11831_v31 = vpop.permute.xlu0 %399 }
  0xb1   : > { %921 = vperm.xlu1 %11439, %v744_v28   ;;  %916 = vperm.xlu0 %11438, %v743_v29   ;;  %v11900_v29 = vld [vmem:[%s11710_s17 + $0x32] sm:$0xff] }
  0xb4   : > { %v11835_v34 = vpop.permute.xlu1 %414  ;;  %v11837_v35 = vpop.permute.xlu0 %409 }
  0xb5   : > { %931 = vperm.xlu1 %11439, %v746_v32   ;;  %926 = vperm.xlu0 %11438, %v745_v33   ;;  %v1156_v32 = vld [vmem:[%s11710_s17 + $0x2a] sm:$0x3] }
  0xb8   : > { %v11841_v38 = vpop.permute.xlu1 %424  ;;  %v11843_v39 = vpop.permute.xlu0 %419 }
  0xb9   : > { %941 = vperm.xlu1 %11439, %v748_v36   ;;  %936 = vperm.xlu0 %11438, %v747_v37   ;;  %v1159_v37 = vld [vmem:[%s11710_s17 + $0x42] sm:$0x3] }
  0xbc   : > { %v11847_v42 = vpop.permute.xlu1 %434  ;;  %v11849_v43 = vpop.permute.xlu0 %429 }
  0xbd   : > { %951 = vperm.xlu1 %11439, %v750_v40   ;;  %946 = vperm.xlu0 %11438, %v749_v41   ;;  %v11910_v40 = vld [vmem:[%s11710_s17 + $0x3a] sm:$0xff] }
  0xc0   : > { %v11853_v46 = vpop.permute.xlu1 %444  ;;  %v11855_v47 = vpop.permute.xlu0 %439 }
  0xc1   : > { %961 = vperm.xlu1 %11439, %v752_v44   ;;  %956 = vperm.xlu0 %11438, %v751_v45   ;;  %v11918_v45 = vld [vmem:[%s11710_s17 + $0x52] sm:$0xff] }
  0xc4   : > { %v11859_v50 = vpop.permute.xlu1 %454  ;;  %v11861_v51 = vpop.permute.xlu0 %449 }
  0xc5   : > { %16377 = vst [vmem:[#allocation7_spill] sm:$0xff] %v11859_v50  ;;  %16378 = vst [vmem:[#allocation8_spill] sm:$0xff] %v11861_v51  ;;  %971 = vperm.xlu1 %11439, %v754_v48   ;;  %966 = vperm.xlu0 %11438, %v753_v49   ;;  %v11921_v48 = vld [vmem:[%s11710_s17 + $0x4a] sm:$0xff] }
  0xc8   : > { %v11865_v54 = vpop.permute.xlu1 %464  ;;  %v11867_v55 = vpop.permute.xlu0 %459 }
  0xc9   : > { %16379 = vst [vmem:[#allocation9_spill] sm:$0xff] %v11865_v54  ;;  %16380 = vst [vmem:[#allocation10_spill] sm:$0xff] %v11867_v55  ;;  %981 = vperm.xlu1 %11439, %v756_v52   ;;  %976 = vperm.xlu0 %11438, %v755_v53   ;;  %v11930_v53 = vld [vmem:[%s11710_s17 + $0x62] sm:$0xff] }
  0xcc   : > { %v11871_v58 = vpop.permute.xlu1 %474  ;;  %v11873_v59 = vpop.permute.xlu0 %469 }
  0xcd   : > { %16381 = vst [vmem:[#allocation11_spill] sm:$0xff] %v11871_v58  ;;  %16382 = vst [vmem:[#allocation12_spill] sm:$0xff] %v11873_v59  ;;  %991 = vperm.xlu1 %11439, %v758_v56   ;;  %986 = vperm.xlu0 %11438, %v757_v57   ;;  %v1162_v56 = vld [vmem:[%s11710_s17 + $0x5a] sm:$0x3]  ;;  %v9865_v59 = vld [vmem:[%s11710_s17 + $0xf0] sm:$0xff] }
  0xd0   : > { %v11877_v62 = vpop.permute.xlu1 %484  ;;  %v11879_v63 = vpop.permute.xlu0 %479 }
  0xd1   : > { %16383 = vst [vmem:[#allocation13_spill] sm:$0xff] %v11877_v62  ;;  %16384 = vst [vmem:[#allocation14_spill] sm:$0xff] %v11879_v63  ;;  %1001 = vperm.xlu1 %11439, %v760_v60   ;;  %996 = vperm.xlu0 %11438, %v759_v61   ;;  %v1165_v61 = vld [vmem:[%s11710_s17 + $0x72] sm:$0x3]  ;;  %v9866_v62 = vld [vmem:[%s11710_s17 + $0xf8] sm:$0xff] }
  0xd4   : > { %v11883_v2 = vpop.permute.xlu1 %494  ;;  %v11885_v10 = vpop.permute.xlu0 %489 }
  0xd5   : > { %16385 = vst [vmem:[#allocation15_spill] sm:$0xff] %v11883_v2  ;;  %16386 = vst [vmem:[#allocation16_spill] sm:$0xff] %v11885_v10  ;;  %1011 = vperm.xlu1 %11439, %v762_v0   ;;  %1006 = vperm.xlu0 %11438, %v761_v1   ;;  %v11940_v0 = vld [vmem:[%s11710_s17 + $0x6a] sm:$0xff] }
  0xd8   : > { %v11889_v17 = vpop.permute.xlu1 %504  ;;  %v11891_v20 = vpop.permute.xlu0 %499 }
  0xd9   : > { %16387 = vst [vmem:[#allocation17_spill] sm:$0xff] %v11889_v17  ;;  %16388 = vst [vmem:[#allocation18_spill] sm:$0xff] %v11891_v20  ;;  %1021 = vperm.xlu1 %11439, %v764_v11   ;;  %1016 = vperm.xlu0 %11438, %v763_v16   ;;  %v11948_v16 = vld [vmem:[%s11710_s17 + $0x82] sm:$0xff] }
  0xdc   : > { %v11895_v25 = vpop.permute.xlu1 %514  ;;  %v11897_v28 = vpop.permute.xlu0 %509 }
  0xdd   : > { %16389 = vst [vmem:[#allocation19_spill] sm:$0xff] %v11895_v25  ;;  %16390 = vst [vmem:[#allocation20_spill] sm:$0xff] %v11897_v28  ;;  %1228 = vperm.xlu1 %11439, %v1155_v21   ;;  %1223 = vperm.xlu0 %11438, %v1154_v24   ;;  %v11951_v21 = vld [vmem:[%s11710_s17 + $0x7a] sm:$0xff] }
  0xe0   : > { %v11903_v33 = vpop.permute.xlu1 %524  ;;  %v11905_v36 = vpop.permute.xlu0 %519 }
  0xe1   : > { %16391 = vst [vmem:[#allocation21_spill] sm:$0xff] %v11903_v33  ;;  %16392 = vst [vmem:[#allocation22_spill] sm:$0xff] %v11905_v36  ;;  %1238 = vperm.xlu1 %11439, %v11900_v29   ;;  %1233 = vperm.xlu0 %11438, %v1156_v32  }
  0xe4   : > { %v11912_v41 = vpop.permute.xlu1 %534  ;;  %v11914_v44 = vpop.permute.xlu0 %529 }
  0xe5   : > { %16393 = vst [vmem:[#allocation23_spill] sm:$0xff] %v11912_v41  ;;  %16394 = vst [vmem:[#allocation24_spill] sm:$0xff] %v11914_v44  ;;  %1248 = vperm.xlu1 %11439, %v1159_v37   ;;  %1243 = vperm.xlu0 %11438, %v11910_v40   ;;  %v1169_v37 = vld [vmem:[%s11710_s17 + $0x92] sm:$0xff] }
  0xe8   : > { %v11923_v49 = vpop.permute.xlu1 %544  ;;  %v11925_v52 = vpop.permute.xlu0 %539 }
  0xe9   : > { %16395 = vst [vmem:[#allocation25_spill] sm:$0xff] %v11923_v49  ;;  %16396 = vst [vmem:[#allocation26_spill] sm:$0xff] %v11925_v52  ;;  %1258 = vperm.xlu1 %11439, %v11918_v45   ;;  %1253 = vperm.xlu0 %11438, %v11921_v48   ;;  %v1172_v49 = vld [vmem:[%s11710_s17 + $0xaa] sm:$0xff] }
  0xec   : > { %v11933_v57 = vpop.permute.xlu1 %554  ;;  %v11935_v60 = vpop.permute.xlu0 %549 }
  0xed   : > { %16397 = vst [vmem:[#allocation27_spill] sm:$0xff] %v11933_v57  ;;  %16398 = vst [vmem:[#allocation28_spill] sm:$0xff] %v11935_v60  ;;  %1268 = vperm.xlu1 %11439, %v11930_v53   ;;  %1263 = vperm.xlu0 %11438, %v1162_v56   ;;  %v1168_v56 = vld [vmem:[%s11710_s17 + $0x8a] sm:$0x3]  ;;  %v1173_v57 = vld [vmem:[%s11710_s17 + $0xb2] sm:$0xff] }
  0xf0   : > { %v11942_v1 = vpop.permute.xlu1 %564  ;;  %v11944_v11 = vpop.permute.xlu0 %559 }
  0xf1   : > { %16399 = vst [vmem:[#allocation29_spill] sm:$0xff] %v11942_v1  ;;  %16400 = vst [vmem:[#allocation30_spill] sm:$0xff] %v11944_v11  ;;  %1278 = vperm.xlu1 %11439, %v1165_v61   ;;  %1273 = vperm.xlu0 %11438, %v11940_v0   ;;  %v1171_v1 = vld [vmem:[%s11710_s17 + $0xa2] sm:$0x3] }
  0xf4   : > { %v11953_v24 = vpop.permute.xlu1 %574  ;;  %v11955_v32 = vpop.permute.xlu0 %569 }
  0xf5   : > { %16401 = vst [vmem:[#allocation31_spill] sm:$0xff] %v11953_v24  ;;  %16402 = vst [vmem:[#allocation32_spill] sm:$0xff] %v11955_v32  ;;  %1288 = vperm.xlu1 %11439, %v11948_v16   ;;  %1283 = vperm.xlu0 %11438, %v11951_v21   ;;  %v1170_v24 = vld [vmem:[%s11710_s17 + $0x9a] sm:$0xff] }
  0xf8   : > { %v11961_v11 = vpop.permute.xlu1 %584  ;;  %v11963_v61 = vpop.permute.xlu0 %579 }
  0xf9   : > { %16403 = vst [vmem:[#allocation33_spill] sm:$0xff] %v11961_v11  ;;  %16404 = vst [vmem:[#allocation34_spill] sm:$0xff] %v11963_v61  ;;  %1298 = vperm.xlu1 %11439, %v1169_v37   ;;  %1293 = vperm.xlu0 %11438, %v1168_v56   ;;  %v1175_v37 = vld [vmem:[%s11710_s17 + $0xc2] sm:$0xff]  ;;  %v1174_v56 = vld [vmem:[%s11710_s17 + $0xba] sm:$0x3] }
  0xfc   : > { %v11967_v60 = vpop.permute.xlu1 %791  ;;  %v11969_v32 = vpop.permute.xlu0 %786 }
  0xfd   : > { %1308 = vperm.xlu1 %11439, %v1171_v1   ;;  %1303 = vperm.xlu0 %11438, %v1170_v24   ;;  %v1177_v1 = vld [vmem:[%s11710_s17 + $0xd2] sm:$0x3]  ;;  %v1176_v24 = vld [vmem:[%s11710_s17 + $0xca] sm:$0xff] }
 0x100   : > { %v11973_v36 = vpop.permute.xlu1 %801  ;;  %v11975_v11 = vpop.permute.xlu0 %796 }
 0x101   : > { %16405 = vst [vmem:[#allocation35_spill] sm:$0xff] %v11975_v11  ;;  %1318 = vperm.xlu1 %11439, %v1173_v57   ;;  %1313 = vperm.xlu0 %11438, %v1172_v49   ;;  %v1179_v49 = vld [vmem:[%s11710_s17 + $0xe2] sm:$0xff]  ;;  %v1178_v57 = vld [vmem:[%s11710_s17 + $0xda] sm:$0xff] }
 0x104   : > { %v11979_v61 = vpop.permute.xlu1 %811  ;;  %v11981_v25 = vpop.permute.xlu0 %806 }
 0x105   : > { %16406 = vst [vmem:[#allocation36_spill] sm:$0xff] %v11979_v61  ;;  %1328 = vperm.xlu1 %11439, %v1175_v37   ;;  %1323 = vperm.xlu0 %11438, %v1174_v56   ;;  %v1181_v37 = vld [vmem:[%s11710_s17 + $0xf2] sm:$0xff]  ;;  %v1180_v56 = vld [vmem:[%s11710_s17 + $0xea] sm:$0x3] }
 0x108   : > { %v11985_v52 = vpop.permute.xlu1 %821  ;;  %v11987_v33 = vpop.permute.xlu0 %816 }
 0x109   : > { %16407 = vst [vmem:[#allocation37_spill] sm:$0xff] %v11985_v52  ;;  %16408 = vst [vmem:[#allocation38_spill] sm:$0xff] %v11987_v33  ;;  %1338 = vperm.xlu1 %11439, %v1177_v1   ;;  %1333 = vperm.xlu0 %11438, %v1176_v24   ;;  %v1183_v1 = vld [vmem:[%s11710_s17 + $0x102] sm:$0x3]  ;;  %v1182_v24 = vld [vmem:[%s11710_s17 + $0xfa] sm:$0xff] }
 0x10c   : > { %v11991_v28 = vpop.permute.xlu1 %831  ;;  %v11993_v41 = vpop.permute.xlu0 %826 }
 0x10d   : > { %16409 = vst [vmem:[#allocation39_spill] sm:$0xff] %v11991_v28  ;;  %16410 = vst [vmem:[#allocation40_spill] sm:$0xff] %v11993_v41  ;;  %1348 = vperm.xlu1 %11439, %v1179_v49   ;;  %1343 = vperm.xlu0 %11438, %v1178_v57   ;;  %v1185_v49 = vld [vmem:[%s11710_s17 + $0x112] sm:$0xff]  ;;  %v1184_v57 = vld [vmem:[%s11710_s17 + $0x10a] sm:$0xff] }
 0x110   : > { %v11997_v44 = vpop.permute.xlu1 %841  ;;  %v11999_v20 = vpop.permute.xlu0 %836 }
 0x111   : > { %16411 = vst [vmem:[#allocation41_spill] sm:$0xff] %v11997_v44  ;;  %16412 = vst [vmem:[#allocation42_spill] sm:$0xff] %v11999_v20  ;;  %1358 = vperm.xlu1 %11439, %v1181_v37   ;;  %1353 = vperm.xlu0 %11438, %v1180_v56   ;;  %v1187_v37 = vld [vmem:[%s11710_s17 + $0x122] sm:$0xff]  ;;  %v1186_v56 = vld [vmem:[%s11710_s17 + $0x11a] sm:$0x3] }
 0x114   : > { %v12003_v17 = vpop.permute.xlu1 %851  ;;  %v12005_v10 = vpop.permute.xlu0 %846 }
 0x115   : > { %16413 = vst [vmem:[#allocation43_spill] sm:$0xff] %v12003_v17  ;;  %16414 = vst [vmem:[#allocation44_spill] sm:$0xff] %v12005_v10  ;;  %1368 = vperm.xlu1 %11439, %v1183_v1   ;;  %1363 = vperm.xlu0 %11438, %v1182_v24   ;;  %v1189_v1 = vld [vmem:[%s11710_s17 + $0x132] sm:$0x3]  ;;  %v1188_v24 = vld [vmem:[%s11710_s17 + $0x12a] sm:$0xff] }
 0x118   : > { %v12009_v2 = vpop.permute.xlu1 %861  ;;  %v12011_v44 = vpop.permute.xlu0 %856 }
 0x119   : > { %16415 = vst [vmem:[#allocation45_spill] sm:$0xff] %v12009_v2  ;;  %16416 = vst [vmem:[#allocation46_spill] sm:$0xff] %v12011_v44  ;;  %1378 = vperm.xlu1 %11439, %v1185_v49   ;;  %1373 = vperm.xlu0 %11438, %v1184_v57   ;;  %v1191_v49 = vld [vmem:[%s11710_s17 + $0x142] sm:$0xff]  ;;  %v1190_v57 = vld [vmem:[%s11710_s17 + $0x13a] sm:$0xff] }
 0x11c   : > { %v12015_v63 = vpop.permute.xlu1 %871  ;;  %v12017_v17 = vpop.permute.xlu0 %866 }
 0x11d   : > { %16417 = vst [vmem:[#allocation47_spill] sm:$0xff] %v12015_v63  ;;  %16418 = vst [vmem:[#allocation48_spill] sm:$0xff] %v12017_v17  ;;  %1388 = vperm.xlu1 %11439, %v1187_v37   ;;  %1383 = vperm.xlu0 %11438, %v1186_v56   ;;  %v1193_v37 = vld [vmem:[%s11710_s17 + $0x152] sm:$0xff]  ;;  %v1192_v56 = vld [vmem:[%s11710_s17 + $0x14a] sm:$0x3] }
 0x120   : > { %v12021_v10 = vpop.permute.xlu1 %881  ;;  %v12023_v2 = vpop.permute.xlu0 %876 }
 0x121   : > { %16419 = vst [vmem:[#allocation49_spill] sm:$0xff] %v12021_v10  ;;  %16420 = vst [vmem:[#allocation50_spill] sm:$0xff] %v12023_v2  ;;  %1398 = vperm.xlu1 %11439, %v1189_v1   ;;  %1393 = vperm.xlu0 %11438, %v1188_v24   ;;  %v1195_v1 = vld [vmem:[%s11710_s17 + $0x162] sm:$0x3]  ;;  %v1194_v24 = vld [vmem:[%s11710_s17 + $0x15a] sm:$0xff] }
 0x124   : > { %v12027_v44 = vpop.permute.xlu1 %891  ;;  %v12029_v63 = vpop.permute.xlu0 %886 }
 0x125   : > { %16421 = vst [vmem:[#allocation51_spill] sm:$0xff] %v12027_v44  ;;  %16422 = vst [vmem:[#allocation52_spill] sm:$0xff] %v12029_v63  ;;  %1408 = vperm.xlu1 %11439, %v1191_v49   ;;  %1403 = vperm.xlu0 %11438, %v1190_v57   ;;  %v1197_v49 = vld [vmem:[%s11710_s17 + $0x172] sm:$0xff]  ;;  %v1196_v57 = vld [vmem:[%s11710_s17 + $0x16a] sm:$0xff] }
 0x128   : > { %v12033_v17 = vpop.permute.xlu1 %901  ;;  %v12035_v10 = vpop.permute.xlu0 %896 }
 0x129   : > { %16423 = vst [vmem:[#allocation53_spill] sm:$0xff] %v12033_v17  ;;  %16424 = vst [vmem:[#allocation54_spill] sm:$0xff] %v12035_v10  ;;  %1418 = vperm.xlu1 %11439, %v1193_v37   ;;  %1413 = vperm.xlu0 %11438, %v1192_v56   ;;  %v1199_v37 = vld [vmem:[%s11710_s17 + $0x182] sm:$0xff]  ;;  %v1198_v56 = vld [vmem:[%s11710_s17 + $0x17a] sm:$0x3] }
 0x12c   : > { %v12039_v2 = vpop.permute.xlu1 %911  ;;  %v12041_v44 = vpop.permute.xlu0 %906 }
 0x12d   : > { %16425 = vst [vmem:[#allocation55_spill] sm:$0xff] %v12039_v2  ;;  %16426 = vst [vmem:[#allocation56_spill] sm:$0xff] %v12041_v44  ;;  %1428 = vperm.xlu1 %11439, %v1195_v1   ;;  %1423 = vperm.xlu0 %11438, %v1194_v24   ;;  %v1201_v1 = vld [vmem:[%s11710_s17 + $0x192] sm:$0x3]  ;;  %v1200_v24 = vld [vmem:[%s11710_s17 + $0x18a] sm:$0xff] }
 0x130   : > { %v12045_v63 = vpop.permute.xlu1 %921  ;;  %v12047_v17 = vpop.permute.xlu0 %916 }
 0x131   : > { %16427 = vst [vmem:[#allocation57_spill] sm:$0xff] %v12045_v63  ;;  %16428 = vst [vmem:[#allocation58_spill] sm:$0xff] %v12047_v17  ;;  %1438 = vperm.xlu1 %11439, %v1197_v49   ;;  %1433 = vperm.xlu0 %11438, %v1196_v57  }
 0x134   : > { %v12051_v10 = vpop.permute.xlu1 %931  ;;  %v12053_v2 = vpop.permute.xlu0 %926 }
 0x135   : > { %16429 = vst [vmem:[#allocation59_spill] sm:$0xff] %v12051_v10  ;;  %16430 = vst [vmem:[#allocation60_spill] sm:$0xff] %v12053_v2  ;;  %1448 = vperm.xlu1 %11439, %v1199_v37   ;;  %1443 = vperm.xlu0 %11438, %v1198_v56   ;;  %v9843_v37 = vld [vmem:[%s11710_s17 + $0x40] sm:$0x3] }
 0x136   : > { %v9863_v10 = vld [vmem:[%s11710_s17 + $0xe0] sm:$0xff] }
 0x138   : > { %v12057_v44 = vpop.permute.xlu1 %941  ;;  %v12059_v41 = vpop.permute.xlu0 %936 }
 0x139   : > { %16431 = vst [vmem:[#allocation61_spill] sm:$0xff] %v12057_v44  ;;  %16432 = vst [vmem:[#allocation62_spill] sm:$0xff] %v12059_v41  ;;  %1458 = vperm.xlu1 %11439, %v1201_v1   ;;  %1453 = vperm.xlu0 %11438, %v1200_v24   ;;  %v9846_v1 = vld [vmem:[%s11710_s17 + $0x58] sm:$0x3]  ;;  %v9864_v41 = vld [vmem:[%s11710_s17 + $0xe8] sm:$0x3] }
 0x13c   : > { %v12061_v49 = vpop.permute.xlu1 %951  ;;  %v12063_v57 = vpop.permute.xlu0 %946 }
 0x13d   : > { %16433 = vst [vmem:[#allocation63_spill] sm:$0xff] %v12061_v49  ;;  %16434 = vst [vmem:[#allocation64_spill] sm:$0xff] %v12063_v57  ;;  %1666 = vperm.xlu1 %11439, %v11721_v6   ;;  %1661 = vperm.xlu0 %11438, %v11715_v3  }
 0x140   : > { %v12068_v56 = vpop.permute.xlu1 %961  ;;  %v12070_v2 = vpop.permute.xlu0 %956 }
 0x141   : > { %16435 = vst [vmem:[#allocation65_spill] sm:$0xff] %v12068_v56  ;;  %16436 = vst [vmem:[#allocation66_spill] sm:$0xff] %v12070_v2  ;;  %1676 = vperm.xlu1 %11439, %v11728_v8   ;;  %1671 = vperm.xlu0 %11438, %v9843_v37   ;;  %v9849_v8 = vld [vmem:[%s11710_s17 + $0x70] sm:$0x3]  ;;  %v12134_v56 = vld [vmem:[%s11710_s17 + $0xc0] sm:$0xff] }
 0x144   : > { %v12074_v24 = vpop.permute.xlu1 %971  ;;  %v12076_v49 = vpop.permute.xlu0 %966 }
 0x145   : > { %16437 = vst [vmem:[#allocation67_spill] sm:$0xff] %v12074_v24  ;;  %16438 = vst [vmem:[#allocation68_spill] sm:$0xff] %v12076_v49  ;;  %1686 = vperm.xlu1 %11439, %v9846_v1   ;;  %1681 = vperm.xlu0 %11438, %v11725_v7   ;;  %v9852_v7 = vld [vmem:[%s11710_s17 + $0x88] sm:$0x3]  ;;  %v12093_v1 = vld [vmem:[%s11710_s17 + $0x80] sm:$0xff] }
 0x146   : > { %v9862_v49 = vld [vmem:[%s11710_s17 + $0xd8] sm:$0xff]  ;;  %v9861_v24 = vld [vmem:[%s11710_s17 + $0xd0] sm:$0x3] }
 0x148   : > { %v12079_v3 = vpop.permute.xlu1 %981  ;;  %v12081_v6 = vpop.permute.xlu0 %976 }
 0x149   : > { %16439 = vst [vmem:[#allocation69_spill] sm:$0xff] %v12079_v3  ;;  %16440 = vst [vmem:[#allocation70_spill] sm:$0xff] %v12081_v6  ;;  %1696 = vperm.xlu1 %11439, %v11739_v12   ;;  %1691 = vperm.xlu0 %11438, %v11733_v9   ;;  %v12101_v9 = vld [vmem:[%s11710_s17 + $0x98] sm:$0xff]  ;;  %v12104_v12 = vld [vmem:[%s11710_s17 + $0x90] sm:$0xff] }
 0x14c   : > { %v12086_v37 = vpop.permute.xlu1 %991  ;;  %v12088_v2 = vpop.permute.xlu0 %986 }
 0x14d   : > { %16441 = vst [vmem:[#allocation71_spill] sm:$0xff] %v12086_v37  ;;  %16442 = vst [vmem:[#allocation72_spill] sm:$0xff] %v12088_v2  ;;  %1706 = vperm.xlu1 %11439, %v11744_v14   ;;  %1701 = vperm.xlu0 %11438, %v9849_v8   ;;  %v12113_v8 = vld [vmem:[%s11710_s17 + $0xa8] sm:$0xff]  ;;  %v12123_v37 = vld [vmem:[%s11710_s17 + $0xb0] sm:$0xff] }
 0x150   : > { %v12095_v3 = vpop.permute.xlu1 %1001  ;;  %v12097_v6 = vpop.permute.xlu0 %996 }
 0x151   : > { %16443 = vst [vmem:[#allocation73_spill] sm:$0xff] %v12095_v3  ;;  %16444 = vst [vmem:[#allocation74_spill] sm:$0xff] %v12097_v6  ;;  %1716 = vperm.xlu1 %11439, %v9852_v7   ;;  %1711 = vperm.xlu0 %11438, %v12093_v1   ;;  %v9855_v6 = vld [vmem:[%s11710_s17 + $0xa0] sm:$0x3] }
 0x154   : > { %v12106_v2 = vpop.permute.xlu1 %1011  ;;  %v12108_v14 = vpop.permute.xlu0 %1006 }
 0x155   : > { %16445 = vst [vmem:[#allocation75_spill] sm:$0xff] %v12106_v2  ;;  %16446 = vst [vmem:[#allocation76_spill] sm:$0xff] %v12108_v14  ;;  %1726 = vperm.xlu1 %11439, %v12101_v9   ;;  %1721 = vperm.xlu0 %11438, %v12104_v12   ;;  %v9858_v2 = vld [vmem:[%s11710_s17 + $0xb8] sm:$0x3] }
 0x158   : > { %v12116_v7 = vpop.permute.xlu1 %1021  ;;  %v12118_v3 = vpop.permute.xlu0 %1016 }
 0x159   : > { %16447 = vst [vmem:[#allocation77_spill] sm:$0xff] %v12116_v7  ;;  %16448 = vst [vmem:[#allocation78_spill] sm:$0xff] %v12118_v3  ;;  %1736 = vperm.xlu1 %11439, %v12113_v8   ;;  %1731 = vperm.xlu0 %11438, %v9855_v6   ;;  %v12131_v7 = vld [vmem:[%s11710_s17 + $0xc8] sm:$0xff] }
 0x15c   : > { %v12125_v14 = vpop.permute.xlu1 %1228  ;;  %v12127_v57 = vpop.permute.xlu0 %1223 }
 0x15d   : > { %1746 = vperm.xlu1 %11439, %v9858_v2   ;;  %1741 = vperm.xlu0 %11438, %v12123_v37  }
 0x160   : > { %v12136_v3 = vpop.permute.xlu1 %1238  ;;  %v12138_v6 = vpop.permute.xlu0 %1233 }
 0x161   : > { %16449 = vst [vmem:[#allocation79_spill] sm:$0xff] %v12138_v6  ;;  %1756 = vperm.xlu1 %11439, %v12131_v7   ;;  %1751 = vperm.xlu0 %11438, %v12134_v56  }
 0x164   : > { %v12144_v44 = vpop.permute.xlu1 %1248  ;;  %v12146_v2 = vpop.permute.xlu0 %1243 }
 0x165   : > { %16450 = vst [vmem:[#allocation80_spill] sm:$0xff] %v12144_v44  ;;  %1766 = vperm.xlu1 %11439, %v9862_v49   ;;  %1761 = vperm.xlu0 %11438, %v9861_v24   ;;  %v9868_v49 = vld [vmem:[%s11710_s17 + $0x108] sm:$0xff]  ;;  %v9867_v24 = vld [vmem:[%s11710_s17 + $0x100] sm:$0x3] }
 0x168   : > { %v12150_v17 = vpop.permute.xlu1 %1258  ;;  %v12152_v63 = vpop.permute.xlu0 %1253 }
 0x169   : > { %16451 = vst [vmem:[#allocation81_spill] sm:$0xff] %v12150_v17  ;;  %16452 = vst [vmem:[#allocation82_spill] sm:$0xff] %v12152_v63  ;;  %1776 = vperm.xlu1 %11439, %v9864_v41   ;;  %1771 = vperm.xlu0 %11438, %v9863_v10   ;;  %v9870_v10 = vld [vmem:[%s11710_s17 + $0x118] sm:$0x3]  ;;  %v9869_v41 = vld [vmem:[%s11710_s17 + $0x110] sm:$0xff] }
 0x16c   : > { %v12156_v20 = vpop.permute.xlu1 %1268  ;;  %v12158_v44 = vpop.permute.xlu0 %1263 }
 0x16d   : > { %16453 = vst [vmem:[#allocation83_spill] sm:$0xff] %v12156_v20  ;;  %16454 = vst [vmem:[#allocation84_spill] sm:$0xff] %v12158_v44  ;;  %1786 = vperm.xlu1 %11439, %v9866_v62   ;;  %1781 = vperm.xlu0 %11438, %v9865_v59   ;;  %v9896_v59 = vld [vmem:[%s11710_s17 + $0x31] sm:$0xff]  ;;  %v9871_v62 = vld [vmem:[%s11710_s17 + $0x120] sm:$0xff] }
 0x170   : > { %v12162_v58 = vpop.permute.xlu1 %1278  ;;  %v12164_v17 = vpop.permute.xlu0 %1273 }
 0x171   : > { %16455 = vst [vmem:[#allocation85_spill] sm:$0xff] %v12162_v58  ;;  %16456 = vst [vmem:[#allocation86_spill] sm:$0xff] %v12164_v17  ;;  %1796 = vperm.xlu1 %11439, %v9868_v49   ;;  %1791 = vperm.xlu0 %11438, %v9867_v24   ;;  %v9899_v49 = vld [vmem:[%s11710_s17 + $0x49] sm:$0xff]  ;;  %v9897_v24 = vld [vmem:[%s11710_s17 + $0x39] sm:$0xff] }
 0x174   : > { %v12168_v63 = vpop.permute.xlu1 %1288  ;;  %v12170_v20 = vpop.permute.xlu0 %1283 }
 0x175   : > { %16457 = vst [vmem:[#allocation87_spill] sm:$0xff] %v12168_v63  ;;  %16458 = vst [vmem:[#allocation88_spill] sm:$0xff] %v12170_v20  ;;  %1806 = vperm.xlu1 %11439, %v9870_v10   ;;  %1801 = vperm.xlu0 %11438, %v9869_v41   ;;  %v9900_v10 = vld [vmem:[%s11710_s17 + $0x51] sm:$0xff] }
 0x178   : > { %v12174_v44 = vpop.permute.xlu1 %1298  ;;  %v12176_v58 = vpop.permute.xlu0 %1293 }
 0x179   : > { %16459 = vst [vmem:[#allocation89_spill] sm:$0xff] %v12174_v44  ;;  %16460 = vst [vmem:[#allocation90_spill] sm:$0xff] %v12176_v58  ;;  %2098 = vperm.xlu1 %11439, %v9896_v59   ;;  %1811 = vperm.xlu0 %11438, %v9871_v62   ;;  %v10007_v58 = vld [vmem:[%s11710_s17 + $0x50] sm:$0xff] }
 0x17c   : > { %v12180_v17 = vpop.permute.xlu1 %1308  ;;  %v12182_v28 = vpop.permute.xlu0 %1303 }
 0x17d   : > { %16461 = vst [vmem:[#allocation91_spill] sm:$0xff] %v12180_v17  ;;  %16462 = vst [vmem:[#allocation92_spill] sm:$0xff] %v12182_v28  ;;  %2113 = vperm.xlu1 %11439, %v9899_v49   ;;  %2103 = vperm.xlu0 %11438, %v9897_v24   ;;  %v9898_v24 = vld [vmem:[%s11710_s17 + $0x41] sm:$0x3] }
 0x180   : > { %v12185_v41 = vpop.permute.xlu1 %1318  ;;  %v12187_v20 = vpop.permute.xlu0 %1313 }
 0x181   : > { %16463 = vst [vmem:[#allocation93_spill] sm:$0xff] %v12185_v41  ;;  %16464 = vst [vmem:[#allocation94_spill] sm:$0xff] %v12187_v20  ;;  %2535 = vperm.xlu1 %11439, %v11900_v29   ;;  %2118 = vperm.xlu0 %11438, %v9900_v10   ;;  %v9901_v29 = vld [vmem:[%s11710_s17 + $0x59] sm:$0x3]  ;;  %v10006_v20 = vld [vmem:[%s11710_s17 + $0x48] sm:$0xff] }
 0x184   : > { %v12190_v59 = vpop.permute.xlu1 %1328  ;;  %v12192_v62 = vpop.permute.xlu0 %1323 }
 0x185   : > { %16465 = vst [vmem:[#allocation95_spill] sm:$0xff] %v12190_v59  ;;  %16466 = vst [vmem:[#allocation96_spill] sm:$0xff] %v12192_v62  ;;  %2550 = vperm.xlu1 %11439, %v11921_v48   ;;  %2540 = vperm.xlu0 %11438, %v11910_v40   ;;  %v10009_v40 = vld [vmem:[%s11710_s17 + $0x60] sm:$0xff] }
 0x188   : > { %v12197_v17 = vpop.permute.xlu1 %1338  ;;  %v12199_v41 = vpop.permute.xlu0 %1333 }
 0x189   : > { %16467 = vst [vmem:[#allocation97_spill] sm:$0xff] %v12197_v17  ;;  %16468 = vst [vmem:[#allocation98_spill] sm:$0xff] %v12199_v41  ;;  %2555 = vperm.xlu1 %11439, %v11918_v45   ;;  %2108 = vperm.xlu0 %11438, %v9898_v24   ;;  %v10010_v41 = vld [vmem:[%s11710_s17 + $0x68] sm:$0xff]  ;;  %v9953_v24 = vld [vmem:[%s11710_s17 + $0x42] sm:$0x3] }
 0x18c   : > { %v12204_v59 = vpop.permute.xlu1 %1348  ;;  %v12206_v62 = vpop.permute.xlu0 %1343 }
 0x18d   : > { %16469 = vst [vmem:[#allocation99_spill] sm:$0xff] %v12204_v59  ;;  %16470 = vst [vmem:[#allocation100_spill] sm:$0xff] %v12206_v62  ;;  %2123 = vperm.xlu1 %11439, %v9901_v29   ;;  %2973 = vperm.xlu0 %11438, %v10006_v20   ;;  %v9956_v20 = vld [vmem:[%s11710_s17 + $0x5a] sm:$0x3] }
 0x190   : > { %v12210_v17 = vpop.permute.xlu1 %1358  ;;  %v12212_v28 = vpop.permute.xlu0 %1353 }
 0x191   : > { %16471 = vst [vmem:[#allocation101_spill] sm:$0xff] %v12210_v17  ;;  %16472 = vst [vmem:[#allocation102_spill] sm:$0xff] %v12212_v28  ;;  %2988 = vperm.xlu1 %11439, %v10009_v40   ;;  %2978 = vperm.xlu0 %11438, %v10007_v58   ;;  %v10064_v40 = vld [vmem:[%s11710_s17 + $0x61] sm:$0xff] }
 0x194   : > { %v12216_v44 = vpop.permute.xlu1 %1368  ;;  %v12218_v59 = vpop.permute.xlu0 %1363 }
 0x195   : > { %16473 = vst [vmem:[#allocation103_spill] sm:$0xff] %v12216_v44  ;;  %16474 = vst [vmem:[#allocation104_spill] sm:$0xff] %v12218_v59  ;;  %2993 = vperm.xlu1 %11439, %v10010_v41   ;;  %2545 = vperm.xlu0 %11438, %v9953_v24   ;;  %v10008_v59 = vld [vmem:[%s11710_s17 + $0x58] sm:$0x3]  ;;  %v9962_v44 = vld [vmem:[%s11710_s17 + $0x8a] sm:$0x3] }
 0x198   : > { %v12221_v29 = vpop.permute.xlu1 %1378  ;;  %v12223_v62 = vpop.permute.xlu0 %1373 }
 0x199   : > { %16475 = vst [vmem:[#allocation105_spill] sm:$0xff] %v12221_v29  ;;  %16476 = vst [vmem:[#allocation106_spill] sm:$0xff] %v12223_v62  ;;  %2560 = vperm.xlu1 %11439, %v9956_v20   ;;  %3410 = vperm.xlu0 %11438, %v9899_v49   ;;  %v10065_v29 = vld [vmem:[%s11710_s17 + $0x69] sm:$0xff] }
 0x19c   : > { %v12226_v58 = vpop.permute.xlu1 %1388  ;;  %v12228_v28 = vpop.permute.xlu0 %1383 }
 0x19d   : > { %16477 = vst [vmem:[#allocation107_spill] sm:$0xff] %v12226_v58  ;;  %16478 = vst [vmem:[#allocation108_spill] sm:$0xff] %v12228_v28  ;;  %3425 = vperm.xlu1 %11439, %v10064_v40   ;;  %3415 = vperm.xlu0 %11438, %v9900_v10   ;;  %v12242_v58 = vld [vmem:[%s11710_s17 + $0x79] sm:$0xff] }
 0x1a0   : > { %v12231_v41 = vpop.permute.xlu1 %1398  ;;  %v12233_v24 = vpop.permute.xlu0 %1393 }
 0x1a1   : > { %16479 = vst [vmem:[#allocation109_spill] sm:$0xff] %v12231_v41  ;;  %16480 = vst [vmem:[#allocation110_spill] sm:$0xff] %v12233_v24  ;;  %2983 = vperm.xlu1 %11439, %v10008_v59   ;;  %2128 = vperm.xlu0 %11438, %v10064_v40   ;;  %v10011_v59 = vld [vmem:[%s11710_s17 + $0x70] sm:$0x3] }
 0x1a4   : > { %v12236_v20 = vpop.permute.xlu1 %1408  ;;  %v12238_v49 = vpop.permute.xlu0 %1403 }
 0x1a5   : > { %16481 = vst [vmem:[#allocation111_spill] sm:$0xff] %v12236_v20  ;;  %16482 = vst [vmem:[#allocation112_spill] sm:$0xff] %v12238_v49  ;;  %3847 = vperm.xlu1 %11439, %v11921_v48   ;;  %3430 = vperm.xlu0 %11438, %v10065_v29   ;;  %v12256_v48 = vld [vmem:[%s11710_s17 + $0x81] sm:$0xff] }
 0x1a8   : > { %v12244_v10 = vpop.permute.xlu1 %1418  ;;  %v12246_v28 = vpop.permute.xlu0 %1413 }
 0x1a9   : > { %16483 = vst [vmem:[#allocation113_spill] sm:$0xff] %v12244_v10  ;;  %16484 = vst [vmem:[#allocation114_spill] sm:$0xff] %v12246_v28  ;;  %2143 = vperm.xlu1 %11439, %v12242_v58   ;;  %2133 = vperm.xlu0 %11438, %v10065_v29   ;;  %v10063_v29 = vld [vmem:[%s11710_s17 + $0x59] sm:$0x3] }
 0x1ac   : > { %v12250_v40 = vpop.permute.xlu1 %1428  ;;  %v12252_v24 = vpop.permute.xlu0 %1423 }
 0x1ad   : > { %16485 = vst [vmem:[#allocation115_spill] sm:$0xff] %v12250_v40  ;;  %16486 = vst [vmem:[#allocation116_spill] sm:$0xff] %v12252_v24  ;;  %3852 = vperm.xlu1 %11439, %v11918_v45   ;;  %2998 = vperm.xlu0 %11438, %v10011_v59  }
 0x1b0   : > { %v12258_v41 = vpop.permute.xlu1 %1438  ;;  %v12260_v20 = vpop.permute.xlu0 %1433 }
 0x1b1   : > { %16487 = vst [vmem:[#allocation117_spill] sm:$0xff] %v12258_v41  ;;  %16488 = vst [vmem:[#allocation118_spill] sm:$0xff] %v12260_v20  ;;  %2148 = vperm.xlu1 %11439, %v12256_v48   ;;  %3862 = vperm.xlu0 %11438, %v11930_v53   ;;  %v10066_v20 = vld [vmem:[%s11710_s17 + $0x71] sm:$0x3] }
 0x1b4   : > { %v12265_v10 = vpop.permute.xlu1 %1448  ;;  %v12267_v40 = vpop.permute.xlu0 %1443 }
 0x1b5   : > { %16489 = vst [vmem:[#allocation119_spill] sm:$0xff] %v12265_v10  ;;  %16490 = vst [vmem:[#allocation120_spill] sm:$0xff] %v12267_v40  ;;  %3420 = vperm.xlu1 %11439, %v10063_v29   ;;  %2565 = vperm.xlu0 %11438, %v11930_v53   ;;  %v9904_v29 = vld [vmem:[%s11710_s17 + $0x71] sm:$0x3] }
 0x1b8   : > { %v12270_v45 = vpop.permute.xlu1 %1458  ;;  %v12272_v59 = vpop.permute.xlu0 %1453 }
 0x1b9   : > { %16491 = vst [vmem:[#allocation121_spill] sm:$0xff] %v12270_v45  ;;  %16492 = vst [vmem:[#allocation122_spill] sm:$0xff] %v12272_v59  ;;  %2570 = vperm.xlu1 %11439, %v11940_v0   ;;  %3867 = vperm.xlu0 %11438, %v11940_v0   ;;  %v10118_v59 = vld [vmem:[%s11710_s17 + $0x5a] sm:$0x3] }
 0x1ba   : > { %v10012_v0 = vld [vmem:[%s11710_s17 + $0x78] sm:$0xff] }
 0x1bc   : > { %v12277_v41 = vpop.permute.xlu1 %1666  ;;  %v12279_v10 = vpop.permute.xlu0 %1661 }
 0x1bd   : > { %3435 = vperm.xlu1 %11439, %v10066_v20   ;;  %2580 = vperm.xlu0 %11438, %v11951_v21   ;;  %v9907_v20 = vld [vmem:[%s11710_s17 + $0x89] sm:$0x3] }
 0x1c0   : > { %v12283_v53 = vpop.permute.xlu1 %1676  ;;  %v12285_v45 = vpop.permute.xlu0 %1671 }
 0x1c1   : > { %16493 = vst [vmem:[#allocation123_spill] sm:$0xff] %v12285_v45  ;;  %2585 = vperm.xlu1 %11439, %v11948_v16   ;;  %2138 = vperm.xlu0 %11438, %v9904_v29   ;;  %v10121_v16 = vld [vmem:[%s11710_s17 + $0x72] sm:$0x3]  ;;  %v16273_v29 = vmov 0.0|0.0  }
 0x1c2   : > { %v10169_v49 = vcombine.low %v16273_v29, %v16273_v29  ;;  %v10170_v62 = vcombine.high %v16273_v29, %v16273_v29 }
 0x1c4   : > { %v12290_v40 = vpop.permute.xlu1 %1686  ;;  %v12292_v24 = vpop.permute.xlu0 %1681  ;;  %4650 = vst.msk [vmem:[#allocation2] sm:$0xf] %vm4649_vm1, %v10169_v49  ;;  %4651 = vst.msk [vmem:[#allocation2 + $0x4] sm:$0xf] %vm4649_vm1, %v10170_v62 }
 0x1c5   : > { %16494 = vst [vmem:[#allocation124_spill] sm:$0xff] %v12290_v40  ;;  %3857 = vperm.xlu1 %11439, %v10118_v59   ;;  %3003 = vperm.xlu0 %11438, %v10012_v0   ;;  %4653 = vst.msk [vmem:[#allocation2 + $0x8] sm:$0x1] %vm4652_vm0, %v10169_v49 }
 0x1c6   : > { %4702 = vst.msk [vmem:[#allocation2 + $0xcc] sm:$0xf] %vm4649_vm1, %v10169_v49  ;;  %4703 = vst.msk [vmem:[#allocation2 + $0xd0] sm:$0xf] %vm4649_vm1, %v10170_v62 }
 0x1c7   : > { %4704 = vst.msk [vmem:[#allocation2 + $0xd4] sm:$0x1] %vm4652_vm0, %v10169_v49 }
 0x1c8   : > { %v12295_v28 = vpop.permute.xlu1 %1696  ;;  %v12297_v21 = vpop.permute.xlu0 %1691 }
 0x1c9   : > { %16495 = vst [vmem:[#allocation125_spill] sm:$0xff] %v12295_v28  ;;  %16496 = vst [vmem:[#allocation126_spill] sm:$0xff] %v12297_v21  ;;  %3008 = vperm.xlu1 %11439, %v12093_v1   ;;  %2153 = vperm.xlu0 %11438, %v9907_v20   ;;  %v9959_v1 = vld [vmem:[%s11710_s17 + $0x72] sm:$0x3] }
 0x1cb   : > { %v4705_v17 = vld [vmem:[#allocation2] sm:$0xf]  ;;  %v4706_v63 = vld [vmem:[#allocation2 + $0x4] sm:$0xf] }
 0x1cc   : > { %v12305_v59 = vpop.permute.xlu1 %1706  ;;  %v12307_v0 = vpop.permute.xlu0 %1701  ;;  %v4759_v49 = vshrl.u32 %v4705_v17, 16  ;;  %v4739_v28 = vld [vmem:[#allocation2 + $0x8] sm:$0x1] }
 0x1cd   : > { %16497 = vst [vmem:[#allocation127_spill] sm:$0xff] %v12305_v59  ;;  %16498 = vst [vmem:[#allocation128_spill] sm:$0xff] %v12307_v0  ;;  %3872 = vperm.xlu1 %11439, %v10121_v16   ;;  %3018 = vperm.xlu0 %11438, %v12104_v12   ;;  %v4762_v16 = vshll.u32 %v4705_v17, 16  ;;  %v4768_v59 = vshll.u32 %v4706_v63, 16  ;;  %v4772_v12 = vshrl.u32 %v4706_v63, 16  ;;  %v4778_v45 = vshll.u32 %v4739_v28, 16 }
 0x1ce   : > { %v10014_v63 = vld [vmem:[%s11710_s17 + $0x88] sm:$0x3] }
 0x1cf   : > { %v4764_v21 = vrot.slane %v4762_v16, 5  ;;  %v16505_v16 = vmov 0 }
 0x1d0   : > { %v12317_v20 = vpop.permute.xlu1 %1716  ;;  %v12319_v29 = vpop.permute.xlu0 %1711  ;;  %v16506_v16 = vsel %vm12338_vm4, 4294967295, %v16505_v16 }
 0x1d1   : > { %16499 = vst [vmem:[#allocation129_spill] sm:$0xff] %v12317_v20  ;;  %16500 = vst [vmem:[#allocation130_spill] sm:$0xff] %v12319_v29  ;;  %3023 = vperm.xlu1 %11439, %v12101_v9   ;;  %2575 = vperm.xlu0 %11438, %v9959_v1   ;;  %v10070_v20 = vld [vmem:[%s11710_s17 + $0x91] sm:$0xff]  ;;  %v4761_v29 = vrot.slane %v4759_v49, 4  ;;  %v4770_v9 = vrot.slane %v4768_v59, 5  ;;  %v4774_v1 = vrot.slane %v4772_v12, 4 }
 0x1d2   : > { %v4780_v49 = vrot.slane %v4778_v45, 5  ;;  %16507 = vst [vmem:[#allocation135_spill] sm:$0xff] %v16506_v16  ;;  %v10122_v45 = vld [vmem:[%s11710_s17 + $0x7a] sm:$0xff] }
 0x1d3   : > { %v4775_v17 = vor.u32 %v4774_v1, %v4770_v9  ;;  %v10071_v12 = vld [vmem:[%s11710_s17 + $0x99] sm:$0xff] }
 0x1d4   : > { %v12323_v0 = vpop.permute.xlu1 %1726  ;;  %v12325_v62 = vpop.permute.xlu0 %1721 }
 0x1d5   : > { %16501 = vst [vmem:[#allocation131_spill] sm:$0xff] %v12323_v0  ;;  %16502 = vst [vmem:[#allocation132_spill] sm:$0xff] %v12325_v62  ;;  %2590 = vperm.xlu1 %11439, %v9962_v44   ;;  %3440 = vperm.xlu0 %11438, %v12242_v58   ;;  %v4765_v62 = vor.u32 %v4764_v21, %v4761_v29  ;;  %v11440_v44 = vld [vmem:[%s16268_s3 + $0x8] sm:$0xff]   ;;  %v4776_v59 = vrot.slane %v4775_v17, 4 }
 0x1d6   : > { %10799 = vmatprep.subr.bf16.mxu1 %v11440_v44 }
 0x1d7   : > { %v4766_v58 = vrot.slane %v4765_v62, 4  ;;  %v4781_v29 = vsel %vm12338_vm4, %v4776_v59, %v4780_v49  ;;  %10800 = vmatpush3.bf16.msra.mxu1 %v11440_v44  ;;  %v11441_v44 = vld [vmem:[%s16268_s3 + $0x20] sm:$0xff]  }
 0x1d8   : > { %v12329_v40 = vpop.permute.xlu1 %1736  ;;  %v12331_v0 = vpop.permute.xlu0 %1731  ;;  %v10017_v59 = vld [vmem:[%s11710_s17 + $0xa0] sm:$0x3]  ;;  %10935 = vmatprep.subr.bf16.mxu0 %v11441_v44 }
 0x1d9   : > { %16503 = vst [vmem:[#allocation133_spill] sm:$0xff] %v12329_v40  ;;  %16504 = vst [vmem:[#allocation134_spill] sm:$0xff] %v12331_v0  ;;  %3455 = vperm.xlu1 %11439, %v10070_v20   ;;  %3445 = vperm.xlu0 %11438, %v12256_v48   ;;  %v4771_v48 = vsel %vm12338_vm4, %v4766_v58, %v4770_v9  ;;  %v12358_v9 = vld [vmem:[%s11710_s17 + $0xa9] sm:$0xff]  ;;  %v9968_v40 = vld [vmem:[%s11710_s17 + $0xba] sm:$0x3] }
 0x1da   : > { %v10225_v62 = vcombine.low %v4771_v48, %v4781_v29  ;;  %v10123_v58 = vld [vmem:[%s11710_s17 + $0x82] sm:$0xff]  ;;  %10936 = vmatpush3.bf16.msra.mxu0 %v11441_v44  ;;  %v9912_v29 = vld [vmem:[%s11710_s17 + $0xb1] sm:$0xff] }
 0x1dc   : > { %v12342_v21 = vpop.permute.xlu1 %1746  ;;  %v12344_v28 = vpop.permute.xlu0 %1741  ;;  %10801 = vmatprep.mubr.msk.bf16.mxu1 %vm5199_vm5, %v10225_v62  ;;  %v10125_v62 = vld [vmem:[%s11710_s17 + $0x92] sm:$0xff] }
 0x1dd   : > { %16508 = vst [vmem:[#allocation136_spill] sm:$0xff] %v12342_v21  ;;  %16509 = vst [vmem:[#allocation137_spill] sm:$0xff] %v12344_v28  ;;  %3013 = vperm.xlu1 %11439, %v10014_v63   ;;  %2158 = vperm.xlu0 %11438, %v10070_v20   ;;  %v10127_v21 = vld [vmem:[%s11710_s17 + $0xa2] sm:$0x3] }
 0x1e0   : > { %v12353_v1 = vpop.permute.xlu1 %1756  ;;  %v12355_v17 = vpop.permute.xlu0 %1751 }
 0x1e1   : > { %16510 = vst [vmem:[#allocation138_spill] sm:$0xff] %v12353_v1  ;;  %16511 = vst [vmem:[#allocation139_spill] sm:$0xff] %v12355_v17  ;;  %3877 = vperm.xlu1 %11439, %v10122_v45   ;;  %3460 = vperm.xlu0 %11438, %v10071_v12  }
 0x1e4   : > { %v12360_v20 = vpop.permute.xlu1 %1766  ;;  %v12362_v63 = vpop.permute.xlu0 %1761 }
 0x1e5   : > { %16512 = vst [vmem:[#allocation140_spill] sm:$0xff] %v12360_v20  ;;  %16513 = vst [vmem:[#allocation141_spill] sm:$0xff] %v12362_v63  ;;  %2173 = vperm.xlu1 %11439, %v12358_v9   ;;  %2163 = vperm.xlu0 %11438, %v10071_v12   ;;  %v10069_v12 = vld [vmem:[%s11710_s17 + $0x89] sm:$0x3] }
 0x1e8   : > { %v12370_v49 = vpop.permute.xlu1 %1776  ;;  %v12372_v48 = vpop.permute.xlu0 %1771 }
 0x1e9   : > { %16514 = vst [vmem:[#allocation142_spill] sm:$0xff] %v12370_v49  ;;  %16515 = vst [vmem:[#allocation143_spill] sm:$0xff] %v12372_v48  ;;  %3882 = vperm.xlu1 %11439, %v10123_v58   ;;  %3028 = vperm.xlu0 %11438, %v10017_v59   ;;  %v9964_v58 = vld [vmem:[%s11710_s17 + $0x9a] sm:$0xff] }
 0x1ec   : > { %v12376_v45 = vpop.permute.xlu1 %1786  ;;  %v12378_v63 = vpop.permute.xlu0 %1781 }
 0x1ed   : > { %16516 = vst [vmem:[#allocation144_spill] sm:$0xff] %v12376_v45  ;;  %16517 = vst [vmem:[#allocation145_spill] sm:$0xff] %v12378_v63  ;;  %2178 = vperm.xlu1 %11439, %v9912_v29   ;;  %3892 = vperm.xlu0 %11438, %v10125_v62   ;;  %v10072_v63 = vld [vmem:[%s11710_s17 + $0xa1] sm:$0x3]  ;;  %v12392_v45 = vld [vmem:[%s11710_s17 + $0xaa] sm:$0xff] }
 0x1f0   : > { %v12381_v44 = vpop.permute.xlu1 %1796  ;;  %v12383_v49 = vpop.permute.xlu0 %1791 }
 0x1f1   : > { %16518 = vst [vmem:[#allocation146_spill] sm:$0xff] %v12381_v44  ;;  %16519 = vst [vmem:[#allocation147_spill] sm:$0xff] %v12383_v49  ;;  %3450 = vperm.xlu1 %11439, %v10069_v12   ;;  %2595 = vperm.xlu0 %11438, %v10125_v62   ;;  %v12398_v12 = vld [vmem:[%s11710_s17 + $0xb2] sm:$0xff]  ;;  %v9910_v62 = vld [vmem:[%s11710_s17 + $0xa1] sm:$0x3] }
 0x1f4   : > { %v12386_v59 = vpop.permute.xlu1 %1806  ;;  %v12388_v48 = vpop.permute.xlu0 %1801 }
 0x1f5   : > { %16520 = vst [vmem:[#allocation148_spill] sm:$0xff] %v12386_v59  ;;  %16521 = vst [vmem:[#allocation149_spill] sm:$0xff] %v12388_v48  ;;  %2600 = vperm.xlu1 %11439, %v9964_v58   ;;  %3897 = vperm.xlu0 %11438, %v9964_v58   ;;  %v10124_v58 = vld [vmem:[%s11710_s17 + $0x8a] sm:$0x3] }
 0x1f8   : > { %v2099_v20 = vpop.permute.xlu1 %2098  ;;  %v12394_v17 = vpop.permute.xlu0 %1811 }
 0x1f9   : > { %16522 = vst [vmem:[#allocation150_spill] sm:$0xff] %v12394_v17  ;;  %3465 = vperm.xlu1 %11439, %v10072_v63   ;;  %2610 = vperm.xlu0 %11438, %v12392_v45   ;;  %v9913_v63 = vld [vmem:[%s11710_s17 + $0xb9] sm:$0x3] }
 0x1fc   : > { %v12401_v59 = vpop.permute.xlu1 %2113  ;;  %v12403_v49 = vpop.permute.xlu0 %2103 }
 0x1fd   : > { %2615 = vperm.xlu1 %11439, %v12398_v12   ;;  %2168 = vperm.xlu0 %11438, %v9910_v62  }
 0x200   : > { %v2536_v48 = vpop.permute.xlu1 %2535  ;;  %v12407_v44 = vpop.permute.xlu0 %2118 }
 0x201   : > { %3887 = vperm.xlu1 %11439, %v10124_v58   ;;  %3033 = vperm.xlu0 %11438, %v12113_v8   ;;  %v9965_v58 = vld [vmem:[%s11710_s17 + $0xa2] sm:$0x3] }
 0x204   : > { %v12411_v17 = vpop.permute.xlu1 %2550  ;;  %v12413_v1 = vpop.permute.xlu0 %2540 }
 0x205   : > { %3038 = vperm.xlu1 %11439, %v12123_v37   ;;  %2183 = vperm.xlu0 %11438, %v9913_v63  }
 0x208   : > { %v12417_v62 = vpop.permute.xlu1 %2555  ;;  %v12419_v0 = vpop.permute.xlu0 %2108 }
 0x209   : > { %16523 = vst [vmem:[#allocation151_spill] sm:$0xff] %v12419_v0  ;;  %3902 = vperm.xlu1 %11439, %v10127_v21   ;;  %3048 = vperm.xlu0 %11438, %v12134_v56   ;;  %v12435_v56 = vld [vmem:[%s16266_s1 + $0x1] ss:$0 sm:$0xff]  ;;  %v10020_v0 = vld [vmem:[%s11710_s17 + $0xb8] sm:$0x3] }
 0x20a   : > { %v10076_v21 = vld [vmem:[%s11710_s17 + $0xc1] sm:$0xff] }
 0x20c   : > { %v12423_v8 = vpop.permute.xlu1 %2123  ;;  %v2974_v28 = vpop.permute.xlu0 %2973 }
 0x20d   : > { %16524 = vst [vmem:[#allocation152_spill] sm:$0xff] %v12423_v8  ;;  %3053 = vperm.xlu1 %11439, %v12131_v7   ;;  %2605 = vperm.xlu0 %11438, %v9965_v58   ;;  %v12441_v7 = vld [vmem:[%s16266_s1] ss:$0 sm:$0xff]  ;;  %v12446_v58 = vld [vmem:[%s16266_s1 + $0x2] ss:$0 sm:$0xff] }
 0x20e   : > { %v12457_v8 = vld [vmem:[%s16266_s1 + $0x3] ss:$0 sm:$0xff]  ;;  %v609_v33 = vmul.f32 %v12441_v7, %v11801_v5  ;;  %v1483_v55 = vmul.f32 %v12446_v58, %v12127_v57  ;;  %v12476_v5 = vld [vmem:[%s16266_s1 + $0x5] ss:$0 sm:$0xff]  ;;  %v10077_v57 = vld [vmem:[%s11710_s17 + $0xc9] sm:$0xff] }
 0x20f   : > { %v1921_v52 = vmul.f32 %v12457_v8, %v12279_v10 }
 0x210   : > { %v12427_v37 = vpop.permute.xlu1 %2988  ;;  %v12429_v63 = vpop.permute.xlu0 %2978 }
 0x211   : > { %2620 = vperm.xlu1 %11439, %v9968_v40   ;;  %3470 = vperm.xlu0 %11438, %v12358_v9   ;;  %v1046_v9 = vmul.f32 %v12435_v56, %v11969_v32 }
 0x213   : > { %v1100_v6 = vadd.f32 %v1046_v9, %v609_v33  ;;  %v12485_v33 = vld [vmem:[%s16266_s1 + $0x6] ss:$0 sm:$0xff]  ;;  %v2795_v9 = vmul.f32 %v12476_v5, %v2536_v48  ;;  %v1049_v48 = vmul.f32 %v12435_v56, %v11973_v36  ;;  %v1486_v36 = vmul.f32 %v12446_v58, %v12136_v3 }
 0x214   : > { %v12448_v16 = vpop.permute.xlu1 %2993  ;;  %v12450_v40 = vpop.permute.xlu0 %2545 }
 0x215   : > { %16525 = vst [vmem:[#allocation153_spill] sm:$0xff] %v12450_v40  ;;  %3485 = vperm.xlu1 %11439, %v10076_v21   ;;  %3475 = vperm.xlu0 %11438, %v9912_v29   ;;  %v12467_v40 = vld [vmem:[%s16266_s1 + $0x4] ss:$0 sm:$0xff]  ;;  %v1537_v61 = vadd.f32 %v1483_v55, %v1100_v6  ;;  %v610_v55 = vmul.f32 %v12441_v7, %v11807_v15  ;;  %v12498_v6 = vld [vmem:[%s16266_s1 + $0x7] ss:$0 sm:$0xff] }
 0x216   : > { %v2358_v54 = vmul.f32 %v12467_v40, %v2099_v20  ;;  %v12501_v20 = vld [vmem:[%s11710_s17 + $0xd9] sm:$0xff]  ;;  %v1922_v15 = vmul.f32 %v12457_v8, %v12277_v41  ;;  %v12521_v41 = vld [vmem:[%s16266_s1 + $0x8] ss:$0 sm:$0xff] }
 0x217   : > { %16527 = vst [vmem:[#allocation155_spill] sm:$0xff] %v12501_v20 }
 0x218   : > { %v12469_v32 = vpop.permute.xlu1 %2560  ;;  %v3411_v29 = vpop.permute.xlu0 %3410 }
 0x219   : > { %16526 = vst [vmem:[#allocation154_spill] sm:$0xff] %v12469_v32  ;;  %3043 = vperm.xlu1 %11439, %v10020_v0   ;;  %2188 = vperm.xlu0 %11438, %v10076_v21   ;;  %v1047_v32 = vmul.f32 %v12435_v56, %v11967_v60  ;;  %v1975_v21 = vadd.f32 %v1921_v52, %v1537_v61 }
 0x21a   : > { %v1484_v60 = vmul.f32 %v12446_v58, %v12125_v14  ;;  %v3233_v52 = vmul.f32 %v12485_v33, %v2974_v28  ;;  %v3670_v11 = vmul.f32 %v12498_v6, %v3411_v29 }
 0x21b   : > { %v2412_v51 = vadd.f32 %v2358_v54, %v1975_v21  ;;  %v1101_v61 = vadd.f32 %v1047_v32, %v610_v55  ;;  %v612_v54 = vmul.f32 %v12441_v7, %v11805_v13  ;;  %v4327_v32 = vlaneseq  ;;  %v10023_v21 = vld [vmem:[%s11710_s17 + $0xd0] sm:$0x3] }
 0x21c   : > { %v12487_v10 = vpop.permute.xlu1 %3425  ;;  %v3416_v0 = vpop.permute.xlu0 %3415  ;;  %v1924_v13 = vmul.f32 %v12457_v8, %v12283_v53  ;;  %v12539_v53 = vld [vmem:[%s16267_s2] ss:$0 sm:$0xff] }
 0x21d   : > { %3907 = vperm.xlu1 %11439, %v12392_v45   ;;  %3490 = vperm.xlu0 %11438, %v10077_v57   ;;  %v2849_v50 = vadd.f32 %v2795_v9, %v2412_v51  ;;  %v1538_v28 = vadd.f32 %v1484_v60, %v1101_v61  ;;  %v2359_v51 = vmul.f32 %v12467_v40, %v12403_v49 }
 0x21e   : > { %v2796_v60 = vmul.f32 %v12476_v5, %v12413_v1  ;;  %v10131_v1 = vld [vmem:[%s11710_s17 + $0xc2] sm:$0xff] }
 0x21f   : > { %v3287_v29 = vadd.f32 %v3233_v52, %v2849_v50  ;;  %v1976_v9 = vadd.f32 %v1922_v15, %v1538_v28  ;;  %v2361_v50 = vmul.f32 %v12467_v40, %v12401_v59  ;;  %v12541_v52 = vshrl.u32 %v4327_v32, 7 }
 0x220   : > { %v12508_v45 = vpop.permute.xlu1 %2983  ;;  %v12510_v14 = vpop.permute.xlu0 %2128  ;;  %v3234_v15 = vmul.f32 %v12485_v33, %v12429_v63  ;;  %v12555_v59 = vmul.f32 %v12441_v7, %v11811_v18  ;;  %v1050_v28 = vmul.f32 %v12435_v56, %v11981_v25  ;;  %v2798_v32 = vmul.f32 %v12476_v5, %v12411_v17  ;;  %v10075_v17 = vld [vmem:[%s11710_s17 + $0xb9] sm:$0x3] }
 0x221   : > { %2203 = vperm.xlu1 %11439, %v12501_v20   ;;  %2193 = vperm.xlu0 %11438, %v10077_v57   ;;  %v1103_v57 = vadd.f32 %v1049_v48, %v612_v54  ;;  %v3724_v61 = vadd.f32 %v3670_v11, %v3287_v29  ;;  %v12544_v48 = vld [vmem:[%s11710_s17 + $0xe1] sm:$0xff]  ;;  %v12549_v11 = vmul.f32 %v12441_v7, %v11799_v4  ;;  %vm4331_vm6 = vcmp.ge.s32.totalorder %v12541_v52, 1 }
 0x222   : > { %v3671_v63 = vmul.f32 %v12498_v6, %v3416_v0  ;;  %v613_v18 = vmul.f32 %v12441_v7, %v11813_v19  ;;  %v1487_v25 = vmul.f32 %v12446_v58, %v12146_v2  ;;  %v3236_v0 = vmul.f32 %v12485_v33, %v12427_v37 }
 0x223   : > { %v1540_v49 = vadd.f32 %v1486_v36, %v1103_v57  ;;  %v12576_v57 = vmul.f32 %v12441_v7, %v11817_v22  ;;  %v1925_v2 = vmul.f32 %v12457_v8, %v12292_v24  ;;  %v3673_v22 = vmul.f32 %v12498_v6, %v12487_v10 }
 0x224   : > { %v3848_v55 = vpop.permute.xlu1 %3847  ;;  %v12528_v3 = vpop.permute.xlu0 %3430  ;;  %v1104_v19 = vadd.f32 %v1050_v28, %v613_v18  ;;  %v12599_v24 = vmul.f32 %v12441_v7, %v11825_v27  ;;  %v9970_v28 = vld [vmem:[%s11710_s17 + $0xca] sm:$0xff]  ;;  %v12604_v10 = vmul.f32 %v12441_v7, %v11829_v30  ;;  %v12614_v27 = vmul.f32 %v12441_v7, %v11835_v34 }
 0x225   : > { %v4107_v20 = vmul.f32 %v12521_v41, %v3848_v55  ;;  %3912 = vperm.xlu1 %11439, %v12398_v12   ;;  %3058 = vperm.xlu0 %11438, %v10023_v21   ;;  %v2413_v12 = vadd.f32 %v2359_v51, %v1976_v9  ;;  %v1978_v36 = vadd.f32 %v1924_v13, %v1540_v49 }
 0x226   : > { %v12582_v55 = vmul.f32 %v12441_v7, %v11819_v23  ;;  %v12595_v23 = vmul.f32 %v12441_v7, %v11823_v26  ;;  %16528 = vst [vmem:[#allocation156_spill] sm:$0xff] %v12599_v24  ;;  %16529 = vst [vmem:[#allocation157_spill] sm:$0xff] %v12604_v10  ;;  %v12610_v26 = vmul.f32 %v12441_v7, %v11831_v31 }
 0x227   : > { %v4161_v54 = vadd.f32 %v4107_v20, %v3724_v61  ;;  %v2850_v51 = vadd.f32 %v2796_v60, %v2413_v12  ;;  %v2415_v29 = vadd.f32 %v2361_v50, %v1978_v36  ;;  %v2362_v36 = vmul.f32 %v12467_v40, %v12407_v44  ;;  %16530 = vst [vmem:[#allocation158_spill] sm:$0xff] %v12614_v27 }
 0x228   : > { %v12561_v21 = vpop.permute.xlu1 %2143  ;;  %v12563_v4 = vpop.permute.xlu0 %2133  ;;  %v12625_v34 = vmul.f32 %v12441_v7, %v11837_v35 }
 0x229   : > { %v4222_v20 = vadd.f32 %v12539_v53, %v4161_v54  ;;  %2208 = vperm.xlu1 %11439, %v12544_v48   ;;  %3922 = vperm.xlu0 %11438, %v10131_v1   ;;  %v3288_v9 = vadd.f32 %v3234_v15, %v2850_v51  ;;  %v2852_v60 = vadd.f32 %v2798_v32, %v2415_v29 }
 0x22a   : > { %v1541_v15 = vadd.f32 %v1487_v25, %v1104_v19  ;;  %16531 = vst [vmem:[#allocation159_spill] sm:$0xff] %v12625_v34  ;;  %v12633_v25 = vmul.f32 %v12441_v7, %v11843_v39  ;;  %v12637_v29 = vmul.f32 %v12441_v7, %v11847_v42  ;;  %v12643_v19 = vld [vmem:[%s11710_s17 + $0xda] sm:$0xff]  ;;  %v12651_v39 = vmul.f32 %v12441_v7, %v11853_v46 }
 0x22b   : > { %v4276_v13 = vmax.f32 %v4222_v20, 0.0  ;;  %v3725_v50 = vadd.f32 %v3671_v63, %v3288_v9  ;;  %v3290_v32 = vadd.f32 %v3236_v0, %v2852_v60  ;;  %v2799_v63 = vmul.f32 %v12476_v5, %v12417_v62 }
 0x22c   : > { %v3853_v61 = vpop.permute.xlu1 %3852  ;;  %v12586_v49 = vpop.permute.xlu0 %2998  ;;  %v1979_v51 = vadd.f32 %v1925_v2, %v1541_v15  ;;  %v12629_v62 = vmul.f32 %v12441_v7, %v11841_v38  ;;  %16533 = vst [vmem:[#allocation161_spill] sm:$0xff] %v12633_v25  ;;  %16534 = vst [vmem:[#allocation162_spill] sm:$0xff] %v12637_v29  ;;  %v3237_v9 = vmul.f32 %v12485_v33, %v12448_v16  ;;  %v16538_v2 = vld [vmem:[#allocation35_spill] sm:$0xff] }
 0x22d   : > { %v4364_v37 = vsel %vm4331_vm6, %v4276_v13, 0.0  ;;  %v4108_v12 = vmul.f32 %v12521_v41, %v3853_v61  ;;  %3480 = vperm.xlu1 %11439, %v10075_v17   ;;  %2625 = vperm.xlu0 %11438, %v10131_v1   ;;  %v3727_v20 = vadd.f32 %v3673_v22, %v3290_v32  ;;  %v10078_v17 = vld [vmem:[%s11710_s17 + $0xd1] sm:$0x3]  ;;  %v12647_v38 = vmul.f32 %v12441_v7, %v11849_v43 }
 0x22e   : > { %v10589_v54 = vpack.c.bf16 %v4364_v37, %v4364_v37  ;;  %16532 = vst [vmem:[#allocation160_spill] sm:$0xff] %v12629_v62  ;;  %v2416_v0 = vadd.f32 %v2362_v36, %v1979_v51  ;;  %16536 = vst [vmem:[#allocation164_spill] sm:$0xff] %v12651_v39  ;;  %v12655_v42 = vmul.f32 %v12441_v7, %v11855_v47  ;;  %v16539_v37 = vld [vmem:[#allocation7_spill] sm:$0xff]  ;;  %v16545_v36 = vld [vmem:[#allocation36_spill] sm:$0xff] }
 0x22f   : > { %v4162_v1 = vadd.f32 %v4108_v12, %v3725_v50  ;;  %16535 = vst [vmem:[#allocation163_spill] sm:$0xff] %v12647_v38  ;;  %v1048_v16 = vmul.f32 %v12435_v56, %v16538_v2  ;;  %v3674_v43 = vmul.f32 %v12498_v6, %v12528_v3  ;;  %v12668_v47 = vmul.f32 %v12441_v7, %v16539_v37  ;;  %v16541_v12 = vld [vmem:[#allocation8_spill] sm:$0xff]  ;;  %v16551_v37 = vld [vmem:[#allocation39_spill] sm:$0xff] }
 0x230   : > { %4654 = vst.msk [vmem:[#allocation2 + $0xc] sm:$0xf] %vm4649_vm1, %v10589_v54  ;;  %v12619_v30 = vpop.permute.xlu1 %2148  ;;  %v3863_v44 = vpop.permute.xlu0 %3862  ;;  %16537 = vst [vmem:[#allocation165_spill] sm:$0xff] %v12655_v42  ;;  %v2853_v22 = vadd.f32 %v2799_v63, %v2416_v0  ;;  %v12672_v15 = vmul.f32 %v12441_v7, %v16541_v12  ;;  %v16543_v54 = vld [vmem:[#allocation9_spill] sm:$0xff]  ;;  %v1051_v32 = vmul.f32 %v12435_v56, %v16545_v36  ;;  %v12682_v3 = vld [vmem:[%s11710_s17 + $0xe2] sm:$0xff] }
 0x231   : > { %v4223_v18 = vadd.f32 %v12539_v53, %v4162_v1  ;;  %v4110_v31 = vmul.f32 %v12521_v41, %v3863_v44  ;;  %2630 = vperm.xlu1 %11439, %v9970_v28   ;;  %3927 = vperm.xlu0 %11438, %v9970_v28   ;;  %16540 = vst [vmem:[#allocation35_spill] sm:$0xff] %v12668_v47  ;;  %v16546_v1 = vld [vmem:[#allocation37_spill] sm:$0xff]  ;;  %v16547_v63 = vld [vmem:[#allocation79_spill] sm:$0xff] }
 0x232   : > { %16542 = vst [vmem:[#allocation7_spill] sm:$0xff] %v12672_v15  ;;  %v12676_v28 = vmul.f32 %v12441_v7, %v16543_v54  ;;  %v1053_v51 = vmul.f32 %v12435_v56, %v16546_v1  ;;  %v1485_v44 = vmul.f32 %v12446_v58, %v16547_v63  ;;  %v1055_v12 = vmul.f32 %v12435_v56, %v16551_v37 }
 0x233   : > { %v4277_v13 = vmax.f32 %v4223_v18, 0.0  ;;  %v4164_v35 = vadd.f32 %v4110_v31, %v3727_v20  ;;  %v3291_v20 = vadd.f32 %v3237_v9, %v2853_v22  ;;  %v9916_v31 = vld [vmem:[%s11710_s17 + $0xd1] sm:$0x3]  ;;  %v16552_v22 = vld [vmem:[#allocation123_spill] sm:$0xff]  ;;  %v1105_v63 = vadd.f32 %v1051_v32, %v12555_v59 }
 0x234   : > { %v12659_v60 = vpop.permute.xlu1 %3420  ;;  %v12661_v61 = vpop.permute.xlu0 %2565  ;;  %16544 = vst [vmem:[#allocation8_spill] sm:$0xff] %v12676_v28  ;;  %v10024_v28 = vld [vmem:[%s11710_s17 + $0xd8] sm:$0xff]  ;;  %v16557_v59 = vld [vmem:[#allocation81_spill] sm:$0xff]  ;;  %v2364_v39 = vmul.f32 %v12467_v40, %v12510_v14 }
 0x235   : > { %v10590_v50 = vpack.c.bf16 %v4277_v13, %v4277_v13  ;;  %v4225_v46 = vadd.f32 %v12539_v53, %v4164_v35  ;;  %3495 = vperm.xlu1 %11439, %v10078_v17   ;;  %2640 = vperm.xlu0 %11438, %v12643_v19   ;;  %v16548_v17 = vld [vmem:[#allocation10_spill] sm:$0xff]  ;;  %v1102_v13 = vadd.f32 %v1048_v16, %v12549_v11  ;;  %v16553_v11 = vld [vmem:[#allocation11_spill] sm:$0xff] }
 0x236   : > { %v12692_v0 = vmul.f32 %v12441_v7, %v16548_v17  ;;  %v16550_v35 = vld [vmem:[#allocation38_spill] sm:$0xff]  ;;  %v12709_v16 = vmul.f32 %v12441_v7, %v16553_v11  ;;  %v16555_v17 = vld [vmem:[#allocation80_spill] sm:$0xff]  ;;  %v1109_v11 = vadd.f32 %v1055_v12, %v12595_v23  ;;  %v1490_v32 = vmul.f32 %v12446_v58, %v16557_v59 }
 0x237   : > { %4655 = vst.msk [vmem:[#allocation2 + $0x10] sm:$0xf] %vm4649_vm1, %v10590_v50  ;;  %v4279_v18 = vmax.f32 %v4225_v46, 0.0  ;;  %v1052_v2 = vmul.f32 %v12435_v56, %v16550_v35  ;;  %v1923_v50 = vmul.f32 %v12457_v8, %v16552_v22  ;;  %v3728_v46 = vadd.f32 %v3674_v43, %v3291_v20  ;;  %v10130_v22 = vld [vmem:[%s11710_s17 + $0xba] sm:$0x3]  ;;  %v10025_v59 = vld [vmem:[%s11710_s17 + $0xe0] sm:$0xff] }
 0x238   : > { %16549 = vst [vmem:[#allocation9_spill] sm:$0xff] %v12692_v0  ;;  %v12699_v54 = vpop.permute.xlu1 %2570  ;;  %v3868_v9 = vpop.permute.xlu0 %3867  ;;  %16554 = vst [vmem:[#allocation36_spill] sm:$0xff] %v12709_v16  ;;  %v1488_v35 = vmul.f32 %v12446_v58, %v16555_v17  ;;  %v1107_v43 = vadd.f32 %v1053_v51, %v12576_v57  ;;  %v1539_v20 = vadd.f32 %v1485_v44, %v1102_v13  ;;  %v16558_v17 = vld [vmem:[#allocation82_spill] sm:$0xff]  ;;  %v16559_v44 = vld [vmem:[#allocation83_spill] sm:$0xff] }
 0x239   : > { %v4367_v36 = vsel %vm4331_vm6, %v4279_v18, 0.0  ;;  %v4111_v1 = vmul.f32 %v12521_v41, %v3868_v9  ;;  %2645 = vperm.xlu1 %11439, %v12682_v3   ;;  %2198 = vperm.xlu0 %11438, %v9916_v31   ;;  %v16556_v18 = vld [vmem:[#allocation151_spill] sm:$0xff]  ;;  %v1106_v15 = vadd.f32 %v1052_v2, %v12582_v55  ;;  %v1489_v31 = vmul.f32 %v12446_v58, %v16558_v17  ;;  %v16560_v2 = vld [vmem:[#allocation153_spill] sm:$0xff] }
 0x23a   : > { %v10592_v37 = vpack.c.bf16 %v4367_v36, %v4367_v36  ;;  %v2360_v9 = vmul.f32 %v12467_v40, %v16556_v18  ;;  %v1492_v13 = vmul.f32 %v12446_v58, %v16559_v44  ;;  %v1977_v55 = vadd.f32 %v1923_v50, %v1539_v20  ;;  %v16564_v50 = vld [vmem:[#allocation125_spill] sm:$0xff] }
 0x23b   : > { %v4165_v0 = vadd.f32 %v4111_v1, %v3728_v46  ;;  %v2797_v23 = vmul.f32 %v12476_v5, %v16560_v2  ;;  %v16561_v46 = vld [vmem:[#allocation42_spill] sm:$0xff]  ;;  %v1542_v1 = vadd.f32 %v1488_v35, %v1105_v63  ;;  %v12743_v17 = vadd.s32 16, %v12541_v52  ;;  %v9919_v2 = vld [vmem:[%s11710_s17 + $0xe9] sm:$0x3] }
 0x23c   : > { %4657 = vst.msk [vmem:[#allocation2 + $0x18] sm:$0xf] %vm4649_vm1, %v10592_v37  ;;  %v12726_v57 = vpop.permute.xlu1 %3435  ;;  %v12728_v51 = vpop.permute.xlu0 %2580  ;;  %v12737_v36 = vmul.f32 %v12435_v56, %v16561_v46  ;;  %v16562_v37 = vld [vmem:[#allocation124_spill] sm:$0xff]  ;;  %v1928_v20 = vmul.f32 %v12457_v8, %v16564_v50  ;;  %v2414_v44 = vadd.f32 %v2360_v9, %v1977_v55  ;;  %v1544_v46 = vadd.f32 %v1490_v32, %v1107_v43  ;;  %v16565_v63 = vld [vmem:[#allocation126_spill] sm:$0xff]  ;;  %v12762_v43 = vld [vmem:[#allocation2 + $0xc] sm:$0xf] }
 0x23d   : > { %v4226_v12 = vadd.f32 %v12539_v53, %v4165_v0  ;;  %3917 = vperm.xlu1 %11439, %v10130_v22   ;;  %v1926_v18 = vmul.f32 %v12457_v8, %v16562_v37  ;;  %3063 = vperm.xlu0 %11438, %v10024_v28   ;;  %16563 = vst [vmem:[#allocation37_spill] sm:$0xff] %v12743_v17  ;;  %v16566_v37 = vld [vmem:[#allocation152_spill] sm:$0xff]  ;;  %16569 = vst [vmem:[#allocation38_spill] sm:$0xff] %v12762_v43  ;;  %vm4342_vm7 = vcmp.le.s32.totalorder %v12743_v17, 16 }
 0x23e   : > { %v3235_v0 = vmul.f32 %v12485_v33, %v12508_v45  ;;  %v1543_v16 = vadd.f32 %v1489_v31, %v1106_v15  ;;  %v1927_v35 = vmul.f32 %v12457_v8, %v16565_v63  ;;  %v2363_v28 = vmul.f32 %v12467_v40, %v16566_v37  ;;  %v12758_v50 = vld [vmem:[#allocation2 + $0x10] sm:$0xf]  ;;  %v16570_v31 = vld [vmem:[#allocation127_spill] sm:$0xff] }
 0x23f   : > { %v4280_v22 = vmax.f32 %v4226_v12, 0.0  ;;  %16568 = vst [vmem:[#allocation10_spill] sm:$0xff] %v12758_v50  ;;  %v1546_v9 = vadd.f32 %v1492_v13, %v1109_v11  ;;  %v2851_v55 = vadd.f32 %v2797_v23, %v2414_v44  ;;  %v3672_v45 = vmul.f32 %v12498_v6, %v12659_v60  ;;  %v16571_v63 = vld [vmem:[#allocation154_spill] sm:$0xff]  ;;  %v6528_v13 = vld [vmem:[#allocation2 + $0xc] sm:$0xf] }
 0x240   : > { %v12754_v47 = vpop.permute.xlu1 %2585  ;;  %v12756_v42 = vpop.permute.xlu0 %2138  ;;  %v1980_v32 = vadd.f32 %v1926_v18, %v1542_v1  ;;  %v1930_v12 = vmul.f32 %v12457_v8, %v16570_v31  ;;  %v2800_v37 = vmul.f32 %v12476_v5, %v16571_v63  ;;  %v10133_v11 = vld [vmem:[%s11710_s17 + $0xd2] sm:$0x3]  ;;  %v1982_v23 = vadd.f32 %v1928_v20, %v1544_v46 }
 0x241   : > { %16567 = vst [vmem:[#allocation79_spill] sm:$0xff] %v12756_v42  ;;  %v10593_v15 = vpack.c.bf16 %v4280_v22, %v4280_v22  ;;  %3068 = vperm.xlu1 %11439, %v10025_v59   ;;  %2213 = vperm.xlu0 %11438, %v9919_v2   ;;  %v3289_v44 = vadd.f32 %v3235_v0, %v2851_v55  ;;  %v10027_v60 = vld [vmem:[%s11710_s17 + $0xf0] sm:$0xff]  ;;  %v4783_v14 = vshrl.u32 %v12762_v43, 16  ;;  %v4786_v2 = vshll.u32 %v12762_v43, 16 }
 0x242   : > { %v1981_v18 = vadd.f32 %v1927_v35, %v1543_v16  ;;  %v2417_v59 = vadd.f32 %v2363_v28, %v1980_v32  ;;  %v6577_v46 = vshrl.u32 %v6528_v13, 16  ;;  %v6580_v55 = vshll.u32 %v6528_v13, 16  ;;  %v10028_v28 = vld [vmem:[%s11710_s17 + $0xf8] sm:$0xff]  ;;  %v9971_v13 = vld [vmem:[%s11710_s17 + $0xd2] sm:$0x3] }
 0x243   : > { %4658 = vst.msk [vmem:[#allocation2 + $0x1c] sm:$0xf] %vm4649_vm1, %v10593_v15  ;;  %v3726_v20 = vadd.f32 %v3672_v45, %v3289_v44  ;;  %v12781_v15 = vadd.f32 %v1930_v12, %v1546_v9  ;;  %v2365_v35 = vmul.f32 %v12467_v40, %v12563_v4  ;;  %v3238_v32 = vmul.f32 %v12485_v33, %v12586_v49  ;;  %v12793_v9 = vld [vmem:[#allocation2 + $0x10] sm:$0xf]  ;;  %v12824_v38 = vld [vmem:[#allocation2 + $0x18] sm:$0xf] }
 0x244   : > { %v3858_v22 = vpop.permute.xlu1 %3857  ;;  %v12776_v31 = vpop.permute.xlu0 %3003  ;;  %v2854_v63 = vadd.f32 %v2800_v37, %v2417_v59  ;;  %v2418_v16 = vadd.f32 %v2364_v39, %v1981_v18  ;;  %v2801_v45 = vmul.f32 %v12476_v5, %v12661_v61  ;;  %v4785_v4 = vrot.slane %v4783_v14, 4  ;;  %v12801_v61 = vld [vmem:[#allocation2 + $0xc] sm:$0xe]  ;;  %16573 = vst [vmem:[#allocation123_spill] sm:$0xff] %v12824_v38 }
 0x245   : > { %v4109_v0 = vmul.f32 %v12521_v41, %v3858_v22  ;;  %3932 = vperm.xlu1 %11439, %v10133_v11   ;;  %3078 = vperm.xlu0 %11438, %v10027_v60   ;;  %v2802_v11 = vmul.f32 %v12476_v5, %v12699_v54  ;;  %v4788_v37 = vrot.slane %v4786_v2, 5  ;;  %v4792_v60 = vshll.u32 %v12758_v50, 16 }
 0x246   : > { %v4796_v49 = vshrl.u32 %v12758_v50, 16  ;;  %v3675_v54 = vmul.f32 %v12498_v6, %v12726_v57  ;;  %v6579_v59 = vrot.slane %v6577_v46, 4  ;;  %v6582_v22 = vrot.slane %v6580_v55, 5 }
 0x247   : > { %v4163_v44 = vadd.f32 %v4109_v0, %v3726_v20  ;;  %v12808_v14 = vmul.f32 %v12467_v40, %v12561_v21  ;;  %v2419_v2 = vadd.f32 %v2365_v35, %v1982_v23  ;;  %v9974_v20 = vld [vmem:[%s11710_s17 + $0xea] sm:$0x3]  ;;  %v6586_v0 = vshll.u32 %v12793_v9, 16 }
 0x248   : > { %v12795_v12 = vpop.permute.xlu1 %3008  ;;  %v12797_v39 = vpop.permute.xlu0 %2153  ;;  %v6590_v1 = vshrl.u32 %v12793_v9, 16  ;;  %v3292_v43 = vadd.f32 %v3238_v32, %v2854_v63  ;;  %v4789_v23 = vor.u32 %v4788_v37, %v4785_v4  ;;  %v12822_v35 = vrot.slane %v4792_v60, 5 }
 0x249   : > { %16572 = vst [vmem:[#allocation39_spill] sm:$0xff] %v12797_v39  ;;  %v4224_v18 = vadd.f32 %v12539_v53, %v4163_v44  ;;  %3083 = vperm.xlu1 %11439, %v10028_v28   ;;  %2635 = vperm.xlu0 %11438, %v9971_v13   ;;  %v12813_v39 = vadd.f32 %v2801_v45, %v2418_v16  ;;  %v12816_v28 = vld [vmem:[#allocation2 + $0xc] sm:$0xe]  ;;  %v4798_v13 = vrot.slane %v4796_v49, 4  ;;  %v10082_v44 = vld [vmem:[%s11710_s17 + $0xf1] sm:$0xff]  ;;  %v12833_v4 = vrot.slane %v6586_v0, 5 }
 0x24a   : > { %v12818_v46 = vadd.f32 %v2802_v11, %v2419_v2  ;;  %v3729_v63 = vadd.f32 %v3675_v54, %v3292_v43  ;;  %v6583_v45 = vor.u32 %v6582_v22, %v6579_v59  ;;  %v16575_v2 = vld [vmem:[#allocation155_spill] sm:$0xff]  ;;  %v6592_v37 = vrot.slane %v6590_v1, 4 }
 0x24b   : > { %v4278_v57 = vmax.f32 %v4224_v18, 0.0  ;;  %v12829_v18 = vld [vmem:[#allocation2 + $0x1c] sm:$0xf]  ;;  %v10292_v60 = vrot.slane %v12816_v28, 9  ;;  %v12838_v43 = vmul.f32 %v12476_v5, %v12728_v51  ;;  %v4807_v54 = vshrl.u32 %v12824_v38, 16 }
 0x24c   : > { %v3873_v21 = vpop.permute.xlu1 %3872  ;;  %v12820_v55 = vpop.permute.xlu0 %3018  ;;  %16574 = vst [vmem:[#allocation11_spill] sm:$0xff] %v12829_v18  ;;  %v4810_v59 = vshll.u32 %v12824_v38, 16  ;;  %v12842_v22 = vld [vmem:[#allocation2 + $0x18] sm:$0xf]  ;;  %v12849_v1 = vrot.slane %v4789_v23, 4  ;;  %v5764_v51 = vrot.slane %v12758_v50, 5  ;;  %v6593_v28 = vor.u32 %v6592_v37, %v12833_v4 }
 0x24d   : > { %v4366_v16 = vsel %vm4342_vm7, %v4278_v57, 0.0  ;;  %v4112_v32 = vmul.f32 %v12521_v41, %v3873_v21  ;;  %2650 = vperm.xlu1 %11439, %v9974_v20   ;;  %3500 = vperm.xlu0 %11438, %v16575_v2   ;;  %v4799_v57 = vor.u32 %v4798_v13, %v12822_v35  ;;  %v10026_v23 = vld [vmem:[%s11710_s17 + $0xe8] sm:$0x3] }
 0x24e   : > { %v10591_v11 = vpack.c.bf16 %v4366_v16, %v4366_v16  ;;  %v4816_v16 = vshll.u32 %v12829_v18, 16  ;;  %v6594_v34 = vrot.slane %v6593_v28, 4 }
 0x24f   : > { %v4166_v49 = vadd.f32 %v4112_v32, %v3729_v63  ;;  %v12856_v63 = vrot.slane %v6583_v45, 4  ;;  %v4820_v32 = vshrl.u32 %v12829_v18, 16  ;;  %v6601_v45 = vshrl.u32 %v12842_v22, 16 }
 0x250   : > { %4656 = vst.msk [vmem:[#allocation2 + $0x14] sm:$0x1] %vm4652_vm0, %v10591_v11  ;;  %v12845_v20 = vpop.permute.xlu1 %3023  ;;  %v12847_v0 = vpop.permute.xlu0 %2575  ;;  %v12860_v11 = vld [vmem:[#allocation2 + $0x1c] sm:$0xf]  ;;  %v4800_v42 = vrot.slane %v4799_v57, 4  ;;  %v16581_v57 = vrot.slane %v12801_v61, 9 }
 0x251   : > { %16576 = vst [vmem:[#allocation80_spill] sm:$0xff] %v12847_v0  ;;  %v4227_v21 = vadd.f32 %v12539_v53, %v4166_v49  ;;  %3515 = vperm.xlu1 %11439, %v10082_v44   ;;  %3505 = vperm.xlu0 %11438, %v12544_v48   ;;  %v7324_v49 = vrot.slane %v12793_v9, 5  ;;  %v6589_v50 = vsel %vm12338_vm4, %v12856_v63, %v12833_v4  ;;  %v12875_v0 = vrot.slane %v4807_v54, 4 }
 0x252   : > { %v12877_v48 = vrot.slane %v4810_v59, 5  ;;  %v3239_v9 = vmul.f32 %v12485_v33, %v12776_v31  ;;  %v6604_v4 = vshll.u32 %v12842_v22, 16  ;;  %v6610_v54 = vshll.u32 %v12860_v11, 16  ;;  %v10083_v31 = vld [vmem:[%s11710_s17 + $0xf9] sm:$0xff] }
 0x253   : > { %v4281_v38 = vmax.f32 %v4227_v21, 0.0  ;;  %v12893_v63 = vrot.slane %v4816_v16, 5  ;;  %v4822_v29 = vrot.slane %v4820_v32, 4  ;;  %v6614_v25 = vshrl.u32 %v12860_v11, 16 }
 0x254   : > { %v12887_v37 = vpop.permute.xlu1 %2590  ;;  %v3441_v21 = vpop.permute.xlu0 %3440  ;;  %v12903_v22 = vsel %vm12881_vm10, %v16581_v57, %v7324_v49  ;;  %v4813_v16 = vor.u32 %v12877_v48, %v12875_v0  ;;  %v7326_v32 = vrot.slane %v7324_v49, 4  ;;  %v12918_v49 = vrot.slane %v6610_v54, 5 }
 0x255   : > { %16580 = vst [vmem:[#allocation151_spill] sm:$0xff] %v12887_v37  ;;  %v4369_v59 = vsel %vm4342_vm7, %v4281_v38, 0.0  ;;  %3073 = vperm.xlu1 %11439, %v10026_v23   ;;  %2218 = vperm.xlu0 %11438, %v10082_v44   ;;  %v12897_v37 = vrot.slane %v6601_v45, 4  ;;  %16582 = vst [vmem:[#allocation81_spill] sm:$0xff] %v12903_v22  ;;  %v12909_v23 = vsel %vm12881_vm10, %v10292_v60, %v5764_v51  ;;  %v5766_v44 = vrot.slane %v5764_v51, 4 }
 0x256   : > { %v10594_v62 = vpack.c.bf16 %v4369_v59, %v4369_v59  ;;  %16583 = vst [vmem:[#allocation82_spill] sm:$0xff] %v12909_v23  ;;  %v4823_v0 = vor.u32 %v4822_v29, %v12893_v63  ;;  %v6616_v60 = vrot.slane %v6614_v25, 4  ;;  %v7331_v48 = vrot.slane %v12860_v11, 5  ;;  %v7259_v51 = vld [vmem:[#allocation2 + $0x18] sm:$0xe]  ;;  %v10031_v23 = vld [vmem:[%s11710_s17 + $0x110] sm:$0xff] }
 0x257   : > { %v4740_v17 = vld [vmem:[#allocation2 + $0x14] sm:$0x1]  ;;  %v6606_v29 = vrot.slane %v6604_v4, 5  ;;  %v5771_v54 = vrot.slane %v12829_v18, 5 }
 0x258   : > { %v6530_v38 = vld [vmem:[#allocation2 + $0x14] sm:$0x1]  ;;  %4659 = vst.msk [vmem:[#allocation2 + $0x20] sm:$0x1] %vm4652_vm0, %v10594_v62  ;;  %v12912_v28 = vpop.permute.xlu1 %3455  ;;  %v12914_v61 = vpop.permute.xlu0 %3445  ;;  %v4802_v45 = vshll.u32 %v4740_v17, 16  ;;  %v5767_v59 = vrot.slane %v4740_v17, 5  ;;  %v6617_v25 = vor.u32 %v6616_v60, %v12918_v49 }
 0x259   : > { %v6596_v57 = vshll.u32 %v6530_v38, 16  ;;  %v7327_v27 = vrot.slane %v6530_v38, 5  ;;  %3937 = vperm.xlu1 %11439, %v12643_v19   ;;  %3520 = vperm.xlu0 %11438, %v10083_v31   ;;  %v12922_v62 = vld [vmem:[%s11710_s17 + $0x109] sm:$0xff]  ;;  %v3293_v38 = vadd.f32 %v3239_v9, %v12813_v39  ;;  %v16586_v39 = vsel %vm12338_vm4, %v12849_v1, %v12822_v35 }
 0x25a   : > { %v4804_v10 = vrot.slane %v4802_v45, 5  ;;  %v12930_v19 = vsel %vm12881_vm10, %v5766_v44, %v5767_v59  ;;  %v10413_v44 = vrot.slane %v7259_v51, 9  ;;  %v5706_v59 = vld [vmem:[#allocation2 + $0x18] sm:$0xe]  ;;  %v7333_v51 = vrot.slane %v7331_v48, 4 }
 0x25b   : > { %v6598_v24 = vrot.slane %v6596_v57, 5  ;;  %v12926_v17 = vsel %vm12881_vm10, %v7326_v32, %v7327_v27  ;;  %16585 = vst [vmem:[#allocation153_spill] sm:$0xff] %v12930_v19  ;;  %v3676_v57 = vmul.f32 %v12498_v6, %v3441_v21  ;;  %v6607_v35 = vor.u32 %v6606_v29, %v12897_v37  ;;  %v8096_v29 = vld [vmem:[#allocation2 + $0x1c] sm:$0xf] }
 0x25c   : > { %16584 = vst [vmem:[#allocation83_spill] sm:$0xff] %v12926_v17  ;;  %v12938_v45 = vpop.permute.xlu1 %3013  ;;  %v12940_v27 = vpop.permute.xlu0 %2158  ;;  %v4805_v32 = vsel %vm12338_vm4, %v4800_v42, %v4804_v10  ;;  %v3240_v10 = vmul.f32 %v12485_v33, %v12795_v12  ;;  %v4824_v42 = vrot.slane %v4823_v0, 4  ;;  %v10293_v1 = vrot.slane %v5706_v59, 9 }
 0x25d   : > { %v6599_v4 = vsel %vm12338_vm4, %v6594_v34, %v6598_v24  ;;  %2233 = vperm.xlu1 %11439, %v12922_v62   ;;  %v10226_v9 = vcombine.low %v16586_v39, %v4805_v32  ;;  %2223 = vperm.xlu0 %11438, %v10083_v31   ;;  %v10029_v24 = vld [vmem:[%s11710_s17 + $0x100] sm:$0x3]  ;;  %v4814_v34 = vrot.slane %v4813_v16, 4  ;;  %v5773_v12 = vrot.slane %v5771_v54, 4 }
 0x25e   : > { %v10379_v11 = vcombine.low %v6589_v50, %v6599_v4  ;;  %v12962_v50 = vsel %vm12881_vm10, %v10413_v44, %v7331_v48  ;;  %v6618_v37 = vrot.slane %v6617_v25, 4  ;;  %v12970_v48 = vsel %vm12881_vm10, %v10293_v1, %v5771_v54  ;;  %v12973_v44 = vld [vmem:[%s11710_s17 + $0x111] sm:$0xff] }
 0x25f   : > { %10802 = vmatmul.mubr.msk.bf16.vlgmr.msra.gmra.mrb[0].mxu1 %vm5199_vm5, %v10226_v9  ;;  %v4741_v21 = vld [vmem:[#allocation2 + $0x20] sm:$0x1]  ;;  %16587 = vst [vmem:[#allocation42_spill] sm:$0xff] %v12962_v50  ;;  %16588 = vst [vmem:[#allocation124_spill] sm:$0xff] %v12970_v48  ;;  %v10137_v25 = vld [vmem:[%s11710_s17 + $0xf2] sm:$0xff] }
 0x260   : > { %10937 = vmatprep.mubr.msk.bf16.mxu0 %vm5199_vm5, %v10379_v11  ;;  %v6533_v19 = vld [vmem:[#allocation2 + $0x20] sm:$0x1]  ;;  %v3878_v31 = vpop.permute.xlu1 %3877  ;;  %v12964_v60 = vpop.permute.xlu0 %3460  ;;  %v4826_v16 = vshll.u32 %v4741_v21, 16  ;;  %v5774_v4 = vrot.slane %v4741_v21, 5  ;;  %v3730_v11 = vadd.f32 %v3676_v57, %v3293_v38  ;;  %v6608_v57 = vrot.slane %v6607_v35, 4 }
 0x261   : > { %v6620_v0 = vshll.u32 %v6533_v19, 16  ;;  %v7334_v32 = vrot.slane %v6533_v19, 5  ;;  %v4113_v39 = vmul.f32 %v12521_v41, %v3878_v31  ;;  %3942 = vperm.xlu1 %11439, %v12682_v3   ;;  %3088 = vperm.xlu0 %11438, %v10029_v24   ;;  %v8891_v31 = vrot.slane %v8096_v29, 5  ;;  %v10081_v29 = vld [vmem:[%s11710_s17 + $0xe9] sm:$0x3] }
 0x262   : > { %v4828_v59 = vrot.slane %v4826_v16, 5  ;;  %v12981_v38 = vsel %vm12881_vm10, %v5773_v12, %v5774_v4  ;;  %v3677_v16 = vmul.f32 %v12498_v6, %v12914_v61  ;;  %v8825_v4 = vld [vmem:[#allocation2 + $0x18] sm:$0xe]  ;;  %v2421_v61 = vadd.f32 %v12808_v14, %v12781_v15 }
 0x263   : > { %v6622_v9 = vrot.slane %v6620_v0, 5  ;;  %v12977_v19 = vsel %vm12881_vm10, %v7333_v51, %v7334_v32  ;;  %16590 = vst [vmem:[#allocation126_spill] sm:$0xff] %v12981_v38  ;;  %v4167_v3 = vadd.f32 %v4113_v39, %v3730_v11  ;;  %v4819_v51 = vsel %vm12338_vm4, %v4814_v34, %v12893_v63  ;;  %v8097_v34 = vld [vmem:[#allocation2 + $0x20] sm:$0x1]  ;;  %v16591_v11 = vld [vmem:[#allocation86_spill] sm:$0xff] }
 0x264   : > { %16589 = vst [vmem:[#allocation125_spill] sm:$0xff] %v12977_v19  ;;  %v12988_v21 = vpop.permute.xlu1 %2173  ;;  %v12990_v1 = vpop.permute.xlu0 %2163  ;;  %v4829_v12 = vsel %vm12338_vm4, %v4824_v42, %v4828_v59  ;;  %v6613_v63 = vsel %vm12338_vm4, %v6608_v57, %v12918_v49  ;;  %v1110_v42 = vadd.f32 %v12737_v36, %v12610_v26  ;;  %v1493_v39 = vmul.f32 %v12446_v58, %v16591_v11  ;;  %v16592_v59 = vld [vmem:[#allocation130_spill] sm:$0xff]  ;;  %v16599_v11 = vld [vmem:[#allocation40_spill] sm:$0xff] }
 0x265   : > { %v6623_v35 = vsel %vm12338_vm4, %v6618_v37, %v6622_v9  ;;  %v4228_v0 = vadd.f32 %v12539_v53, %v4167_v3  ;;  %2238 = vperm.xlu1 %11439, %v12973_v44   ;;  %v10227_v32 = vcombine.low %v4819_v51, %v4829_v12  ;;  %3952 = vperm.xlu0 %11438, %v10137_v25   ;;  %v10533_v15 = vrot.slane %v8825_v4, 9  ;;  %v16595_v4 = vld [vmem:[#allocation12_spill] sm:$0xff] }
 0x266   : > { %v10380_v37 = vcombine.low %v6613_v63, %v6623_v35  ;;  %v1931_v9 = vmul.f32 %v12457_v8, %v16592_v59  ;;  %v3294_v3 = vadd.f32 %v3240_v10, %v12818_v46  ;;  %v3242_v49 = vmul.f32 %v12485_v33, %v12820_v55  ;;  %v9976_v35 = vld [vmem:[%s11710_s17 + $0xfa] sm:$0xff] }
 0x267   : > { %v4282_v57 = vmax.f32 %v4228_v0, 0.0  ;;  %10805 = vmatprep.mubr.msk.bf16.mxu1 %vm5199_vm5, %v10227_v32  ;;  %v2858_v58 = vadd.f32 %v12838_v43, %v2421_v61  ;;  %v8893_v14 = vrot.slane %v8891_v31, 4  ;;  %v8894_v51 = vrot.slane %v8097_v34, 5  ;;  %v16626_v34 = vld [vmem:[#allocation51_spill] sm:$0xff] }
 0x268   : > { %10938 = vmatmul.mubr.msk.bf16.vlgmr.msra.gmra.mrb[0].mxu0 %vm5199_vm5, %v10380_v37  ;;  %v3883_v26 = vpop.permute.xlu1 %3882  ;;  %v13021_v36 = vpop.permute.xlu0 %3028  ;;  %v3679_v8 = vmul.f32 %v12498_v6, %v12912_v28  ;;  %v3731_v46 = vadd.f32 %v3677_v16, %v3294_v3  ;;  %v1547_v12 = vadd.f32 %v1493_v39, %v1110_v42  ;;  %v13031_v0 = vsel %vm12881_vm10, %v10533_v15, %v8891_v31  ;;  %v16597_v42 = vld [vmem:[#allocation13_spill] sm:$0xff] }
 0x269   : > { %v4370_v55 = vsel %vm4331_vm6, %v4282_v57, 0.0  ;;  %v4114_v10 = vmul.f32 %v12521_v41, %v3883_v26  ;;  %3510 = vperm.xlu1 %11439, %v10081_v29   ;;  %2655 = vperm.xlu0 %11438, %v10137_v25   ;;  %16593 = vst [vmem:[#allocation152_spill] sm:$0xff] %v13031_v0  ;;  %v13035_v32 = vsel %vm12881_vm10, %v8893_v14, %v8894_v51  ;;  %v16603_v26 = vld [vmem:[#allocation43_spill] sm:$0xff]  ;;  %v16604_v14 = vld [vmem:[#allocation44_spill] sm:$0xff] }
 0x26a   : > { %v10595_v43 = vpack.c.bf16 %v4370_v55, %v4370_v55  ;;  %16594 = vst [vmem:[#allocation127_spill] sm:$0xff] %v13035_v32  ;;  %v2368_v28 = vmul.f32 %v12467_v40, %v12619_v30  ;;  %v3296_v16 = vadd.f32 %v3242_v49, %v2858_v58  ;;  %v13043_v25 = vmul.f32 %v12441_v7, %v16595_v4  ;;  %v16600_v49 = vld [vmem:[#allocation14_spill] sm:$0xff]  ;;  %v16609_v4 = vld [vmem:[#allocation156_spill] sm:$0xff] }
 0x26b   : > { %v4168_v63 = vadd.f32 %v4114_v10, %v3731_v46  ;;  %v13047_v31 = vmul.f32 %v12441_v7, %v16597_v42  ;;  %v1054_v39 = vmul.f32 %v12435_v56, %v16599_v11  ;;  %v1985_v61 = vadd.f32 %v1931_v9, %v1547_v12  ;;  %v16602_v9 = vld [vmem:[#allocation41_spill] sm:$0xff]  ;;  %v16605_v12 = vld [vmem:[#allocation15_spill] sm:$0xff] }
 0x26c   : > { %16596 = vst [vmem:[#allocation154_spill] sm:$0xff] %v13043_v25  ;;  %4660 = vst.msk [vmem:[#allocation2 + $0x24] sm:$0xf] %vm4649_vm1, %v10595_v43  ;;  %v13052_v40 = vpop.permute.xlu1 %2178  ;;  %v3893_v30 = vpop.permute.xlu0 %3892  ;;  %v2805_v37 = vmul.f32 %v12476_v5, %v12754_v47  ;;  %v3733_v29 = vadd.f32 %v3679_v8, %v3296_v16  ;;  %v13060_v57 = vmul.f32 %v12441_v7, %v16600_v49  ;;  %v10084_v5 = vld [vmem:[%s11710_s17 + $0x101] sm:$0x3]  ;;  %v13072_v10 = vld [vmem:[%s11710_s17 + $0x10a] sm:$0xff] }
 0x26d   : > { %16598 = vst [vmem:[#allocation155_spill] sm:$0xff] %v13047_v31  ;;  %v4229_v59 = vadd.f32 %v12539_v53, %v4168_v63  ;;  %v4116_v3 = vmul.f32 %v12521_v41, %v3893_v30  ;;  %2660 = vperm.xlu1 %11439, %v9976_v35   ;;  %v1057_v58 = vmul.f32 %v12435_v56, %v16602_v9  ;;  %v16607_v16 = vld [vmem:[#allocation16_spill] sm:$0xff]  ;;  %v16610_v42 = vld [vmem:[#allocation45_spill] sm:$0xff]  ;;  %v16613_v49 = vld [vmem:[#allocation46_spill] sm:$0xff] }
 0x26e   : > { %16601 = vst [vmem:[#allocation135_spill] sm:$0xff] %v13060_v57  ;;  %v1059_v15 = vmul.f32 %v12435_v56, %v16603_v26  ;;  %v1058_v51 = vmul.f32 %v12435_v56, %v16604_v14  ;;  %3957 = vperm.xlu0 %11438, %v9976_v35   ;;  %v2422_v47 = vadd.f32 %v2368_v28, %v1985_v61  ;;  %v16614_v26 = vld [vmem:[#allocation47_spill] sm:$0xff] }
 0x26f   : > { %v3243_v8 = vmul.f32 %v12485_v33, %v12845_v20  ;;  %v4283_v46 = vmax.f32 %v4229_v59, 0.0  ;;  %v4170_v55 = vadd.f32 %v4116_v3, %v3733_v29  ;;  %v13076_v43 = vmul.f32 %v12441_v7, %v16605_v12  ;;  %v16612_v3 = vld [vmem:[#allocation158_spill] sm:$0xff]  ;;  %v16615_v14 = vld [vmem:[#allocation159_spill] sm:$0xff]  ;;  %v16617_v12 = vld [vmem:[#allocation160_spill] sm:$0xff] }
 0x270   : > { %v13080_v63 = vmul.f32 %v12441_v7, %v16607_v16  ;;  %v1108_v35 = vadd.f32 %v1054_v39, %v16609_v4  ;;  %v1061_v28 = vmul.f32 %v12435_v56, %v16610_v42  ;;  %v13085_v11 = vpop.permute.xlu1 %3450  ;;  %v13087_v33 = vpop.permute.xlu0 %2595  ;;  %v2859_v20 = vadd.f32 %v2805_v37, %v2422_v47  ;;  %v16611_v7 = vld [vmem:[#allocation157_spill] sm:$0xff]  ;;  %v13101_v37 = vld [vmem:[%s16266_s1 + $0x1] ss:$0 sm:$0xff]  ;;  %v16618_v4 = vld [vmem:[#allocation48_spill] sm:$0xff] }
 0x271   : > { %16606 = vst [vmem:[#allocation86_spill] sm:$0xff] %v13076_v43  ;;  %v3680_v61 = vmul.f32 %v12498_v6, %v12964_v60  ;;  %v10596_v30 = vpack.c.bf16 %v4283_v46, %v4283_v46  ;;  %v4231_v29 = vadd.f32 %v12539_v53, %v4170_v55  ;;  %3525 = vperm.xlu1 %11439, %v10084_v5   ;;  %v13107_v60 = vld [vmem:[%s11710_s17 + $0x112] sm:$0xff]  ;;  %v9922_v55 = vld [vmem:[%s11710_s17 + $0x101] sm:$0x3]  ;;  %v16619_v42 = vld [vmem:[#allocation49_spill] sm:$0xff] }
 0x272   : > { %16608 = vst [vmem:[#allocation130_spill] sm:$0xff] %v13080_v63  ;;  %v1111_v59 = vadd.f32 %v1057_v58, %v16611_v7  ;;  %v13094_v39 = vadd.f32 %v1059_v15, %v16612_v3  ;;  %v1060_v9 = vmul.f32 %v12435_v56, %v16613_v49  ;;  %v1063_v6 = vmul.f32 %v13101_v37, %v16614_v26  ;;  %v13115_v15 = vld [vmem:[%s16266_s1 + $0x2] ss:$0 sm:$0xff]  ;;  %v16620_v3 = vld [vmem:[#allocation50_spill] sm:$0xff] }
 0x273   : > { %2670 = vperm.xlu0 %11438, %v13072_v10   ;;  %v13110_v58 = vadd.f32 %v1058_v51, %v16615_v14  ;;  %v16616_v56 = vld [vmem:[#allocation84_spill] sm:$0xff]  ;;  %v3297_v47 = vadd.f32 %v3243_v8, %v2859_v20  ;;  %4661 = vst.msk [vmem:[#allocation2 + $0x28] sm:$0xf] %vm4649_vm1, %v10596_v30  ;;  %v4285_v46 = vmax.f32 %v4231_v29, 0.0  ;;  %v13122_v16 = vadd.f32 %v1061_v28, %v16617_v12  ;;  %v16622_v12 = vld [vmem:[#allocation161_spill] sm:$0xff] }
 0x274   : > { %v1491_v5 = vmul.f32 %v13115_v15, %v16616_v56  ;;  %v1062_v51 = vmul.f32 %v13101_v37, %v16618_v4  ;;  %v1065_v7 = vmul.f32 %v13101_v37, %v16619_v42  ;;  %v1064_v49 = vmul.f32 %v13101_v37, %v16620_v3  ;;  %v13130_v26 = vpop.permute.xlu1 %2600  ;;  %v3898_v8 = vpop.permute.xlu0 %3897  ;;  %v13135_v20 = vld [vmem:[%s16266_s1 + $0x3] ss:$0 sm:$0xff]  ;;  %v16624_v42 = vld [vmem:[#allocation162_spill] sm:$0xff] }
 0x275   : > { %v16621_v28 = vld [vmem:[#allocation128_spill] sm:$0xff]  ;;  %v3734_v29 = vadd.f32 %v3680_v61, %v3297_v47  ;;  %v4373_v14 = vsel %vm4331_vm6, %v4285_v46, 0.0  ;;  %v4117_v56 = vmul.f32 %v12521_v41, %v3898_v8  ;;  %2675 = vperm.xlu1 %11439, %v13107_v60   ;;  %v13144_v4 = vadd.f32 %v1060_v9, %v16622_v12  ;;  %v16627_v47 = vld [vmem:[#allocation85_spill] sm:$0xff]  ;;  %v16628_v9 = vld [vmem:[#allocation79_spill] sm:$0xff] }
 0x276   : > { %v1929_v30 = vmul.f32 %v13135_v20, %v16621_v28  ;;  %v13147_v3 = vadd.f32 %v1063_v6, %v16624_v42  ;;  %v1067_v24 = vmul.f32 %v13101_v37, %v16626_v34  ;;  %v10598_v54 = vpack.c.bf16 %v4373_v14, %v4373_v14  ;;  %v10136_v28 = vld [vmem:[%s11710_s17 + $0xea] sm:$0x3]  ;;  %v13157_v41 = vld [vmem:[%s16266_s1 + $0x4] ss:$0 sm:$0xff]  ;;  %v16629_v42 = vld [vmem:[#allocation163_spill] sm:$0xff] }
 0x277   : > { %16623 = vst [vmem:[#allocation12_spill] sm:$0xff] %v13144_v4  ;;  %2228 = vperm.xlu0 %11438, %v9922_v55   ;;  %v1545_v61 = vadd.f32 %v1491_v5, %v1108_v35  ;;  %v1494_v46 = vmul.f32 %v13115_v15, %v16627_v47  ;;  %v2366_v8 = vmul.f32 %v13157_v41, %v16628_v9  ;;  %v10030_v12 = vld [vmem:[%s11710_s17 + $0x108] sm:$0xff] }
 0x278   : > { %16625 = vst [vmem:[#allocation13_spill] sm:$0xff] %v13147_v3  ;;  %v4171_v6 = vadd.f32 %v4117_v56, %v3734_v29  ;;  %v13163_v32 = vadd.f32 %v1062_v51, %v16629_v42  ;;  %v16630_v34 = vld [vmem:[#allocation164_spill] sm:$0xff]  ;;  %v16632_v35 = vld [vmem:[#allocation165_spill] sm:$0xff]  ;;  %4663 = vst.msk [vmem:[#allocation2 + $0x30] sm:$0xf] %vm4649_vm1, %v10598_v54  ;;  %v13176_v0 = vpop.permute.xlu1 %3465  ;;  %v13178_v29 = vpop.permute.xlu0 %2610 }
 0x279   : > { %v13166_v55 = vadd.f32 %v1065_v7, %v16630_v34  ;;  %v13169_v5 = vadd.f32 %v1064_v49, %v16632_v35  ;;  %v16634_v14 = vld [vmem:[#allocation52_spill] sm:$0xff]  ;;  %v16635_v56 = vld [vmem:[#allocation87_spill] sm:$0xff]  ;;  %v1983_v9 = vadd.f32 %v1929_v30, %v1545_v61  ;;  %3947 = vperm.xlu1 %11439, %v10136_v28   ;;  %v1548_v18 = vadd.f32 %v1494_v46, %v1111_v59 }
 0x27a   : > { %v13173_v47 = vmul.f32 %v13101_v37, %v16634_v14  ;;  %v1496_v51 = vmul.f32 %v13115_v15, %v16635_v56  ;;  %v13185_v7 = vld [vmem:[%s16266_s1 + $0x5] ss:$0 sm:$0xff]  ;;  %v4232_v34 = vadd.f32 %v12539_v53, %v4171_v6  ;;  %v16637_v54 = vld [vmem:[#allocation35_spill] sm:$0xff]  ;;  %v16639_v14 = vld [vmem:[#allocation53_spill] sm:$0xff] }
 0x27b   : > { %16631 = vst [vmem:[#allocation40_spill] sm:$0xff] %v13166_v55  ;;  %16633 = vst [vmem:[#allocation14_spill] sm:$0xff] %v13169_v5  ;;  %v16636_v49 = vld [vmem:[#allocation80_spill] sm:$0xff]  ;;  %v13191_v35 = vadd.f32 %v1067_v24, %v16637_v54  ;;  %v13195_v38 = vmul.f32 %v13101_v37, %v16639_v14  ;;  %v16641_v56 = vld [vmem:[#allocation129_spill] sm:$0xff]  ;;  %3093 = vperm.xlu0 %11438, %v10030_v12  }
 0x27c   : > { %v2803_v42 = vmul.f32 %v13185_v7, %v16636_v49  ;;  %v16640_v30 = vld [vmem:[#allocation88_spill] sm:$0xff]  ;;  %v1932_v48 = vmul.f32 %v13135_v20, %v16641_v56  ;;  %v2420_v49 = vadd.f32 %v2366_v8, %v1983_v9  ;;  %v4286_v28 = vmax.f32 %v4232_v34, 0.0  ;;  %v9925_v6 = vld [vmem:[%s11710_s17 + $0x119] sm:$0x3]  ;;  %v16642_v54 = vld [vmem:[#allocation89_spill] sm:$0xff]  ;;  %v13218_v9 = vpop.permute.xlu1 %2615  ;;  %v13220_v19 = vpop.permute.xlu0 %2168 }
 0x27d   : > { %16638 = vst [vmem:[#allocation41_spill] sm:$0xff] %v13191_v35  ;;  %v1495_v61 = vmul.f32 %v13115_v15, %v16640_v30  ;;  %v13205_v53 = vld [vmem:[%s16266_s1 + $0x6] ss:$0 sm:$0xff]  ;;  %v1498_v14 = vmul.f32 %v13115_v15, %v16642_v54  ;;  %v16643_v30 = vld [vmem:[#allocation131_spill] sm:$0xff]  ;;  %16646 = vst [vmem:[#allocation43_spill] sm:$0xff] %v13218_v9  ;;  %v1550_v54 = vadd.f32 %v1496_v51, %v13094_v39  ;;  %3098 = vperm.xlu1 %11439, %v10031_v23  }
 0x27e   : > { %v3241_v24 = vmul.f32 %v13205_v53, %v12938_v45  ;;  %v1934_v56 = vmul.f32 %v13135_v20, %v16643_v30  ;;  %v16644_v12 = vld [vmem:[#allocation132_spill] sm:$0xff]  ;;  %v16645_v46 = vld [vmem:[#allocation39_spill] sm:$0xff]  ;;  %16647 = vst [vmem:[#allocation44_spill] sm:$0xff] %v13220_v19  ;;  %v2857_v50 = vadd.f32 %v2803_v42, %v2420_v49  ;;  %v1986_v22 = vadd.f32 %v1932_v48, %v1548_v18  ;;  %v16650_v35 = vld [vmem:[#allocation133_spill] sm:$0xff] }
 0x27f   : > { %v1933_v59 = vmul.f32 %v13135_v20, %v16644_v12  ;;  %v2369_v8 = vmul.f32 %v13157_v41, %v16645_v46  ;;  %v13222_v45 = vld [vmem:[#allocation2 + $0x24] sm:$0xf]  ;;  %v13224_v34 = vld [vmem:[#allocation2 + $0x28] sm:$0xf]  ;;  %v10599_v46 = vpack.c.bf16 %v4286_v28, %v4286_v28  ;;  %v1549_v17 = vadd.f32 %v1495_v61, %v13110_v58  ;;  %v16651_v55 = vld [vmem:[#allocation151_spill] sm:$0xff]  ;;  %2243 = vperm.xlu0 %11438, %v9925_v6  }
 0x280   : > { %16648 = vst [vmem:[#allocation15_spill] sm:$0xff] %v13222_v45  ;;  %16649 = vst [vmem:[#allocation16_spill] sm:$0xff] %v13224_v34  ;;  %v13230_v30 = vld [vmem:[%s16266_s1 + $0x7] ss:$0 sm:$0xff]  ;;  %v1936_v5 = vmul.f32 %v13135_v20, %v16650_v35  ;;  %v2806_v39 = vmul.f32 %v13185_v7, %v16651_v55  ;;  %v10139_v51 = vld [vmem:[%s11710_s17 + $0x102] sm:$0x3]  ;;  %v3295_v49 = vadd.f32 %v3241_v24, %v2857_v50  ;;  %v3888_v61 = vpop.permute.xlu1 %3887  ;;  %v13247_v28 = vpop.permute.xlu0 %3033 }
 0x281   : > { %v3678_v12 = vmul.f32 %v13230_v30, %v13085_v11  ;;  %v6534_v42 = vld [vmem:[#allocation2 + $0x24] sm:$0xf]  ;;  %4664 = vst.msk [vmem:[#allocation2 + $0x34] sm:$0xf] %vm4649_vm1, %v10599_v46  ;;  %v4831_v11 = vshrl.u32 %v13222_v45, 16  ;;  %v4834_v23 = vshll.u32 %v13222_v45, 16  ;;  %v1552_v48 = vadd.f32 %v1498_v14, %v13122_v16  ;;  %3962 = vperm.xlu1 %11439, %v10139_v51  }
 0x282   : > { %v10033_v3 = vld [vmem:[%s11710_s17 + $0x120] sm:$0xff]  ;;  %v1988_v58 = vadd.f32 %v1934_v56, %v1550_v54  ;;  %v1987_v35 = vadd.f32 %v1933_v59, %v1549_v17  ;;  %v2423_v55 = vadd.f32 %v2369_v8, %v1986_v22  ;;  %v13252_v24 = vld [vmem:[%s16266_s1 + $0x8] ss:$0 sm:$0xff]  ;;  %v6625_v16 = vshrl.u32 %v6534_v42, 16  ;;  %v9980_v45 = vld [vmem:[%s11710_s17 + $0x11a] sm:$0x3] }
 0x283   : > { %v3732_v50 = vadd.f32 %v3678_v12, %v3295_v49  ;;  %v4115_v6 = vmul.f32 %v13252_v24, %v3888_v61  ;;  %v13255_v46 = vld [vmem:[#allocation2 + $0x28] sm:$0xf]  ;;  %v6628_v14 = vshll.u32 %v6534_v42, 16  ;;  %v13257_v17 = vadd.f32 %v1936_v5, %v1552_v48  ;;  %3108 = vperm.xlu0 %11438, %v10033_v3   ;;  %v9977_v51 = vld [vmem:[%s11710_s17 + $0x102] sm:$0x3] }
 0x284   : > { %v2860_v22 = vadd.f32 %v2806_v39, %v2423_v55  ;;  %v2370_v56 = vmul.f32 %v13157_v41, %v12940_v27  ;;  %v2371_v59 = vmul.f32 %v13157_v41, %v12990_v1  ;;  %v13264_v8 = vld [vmem:[%s11710_s17 + $0x128] sm:$0xff]  ;;  %v3244_v54 = vmul.f32 %v13205_v53, %v13021_v36  ;;  %v13269_v42 = vpop.permute.xlu1 %3038  ;;  %v13271_v5 = vpop.permute.xlu0 %2183 }
 0x285   : > { %v4169_v12 = vadd.f32 %v4115_v6, %v3732_v50  ;;  %v4833_v49 = vrot.slane %v4831_v11, 4  ;;  %v4836_v61 = vrot.slane %v4834_v23, 5  ;;  %16652 = vst [vmem:[#allocation156_spill] sm:$0xff] %v13271_v5  ;;  %v4840_v27 = vshll.u32 %v13224_v34, 16  ;;  %v13282_v11 = vld [vmem:[%s16267_s2] ss:$0 sm:$0xff]  ;;  %3113 = vperm.xlu1 %11439, %v13264_v8  }
 0x286   : > { %v4844_v39 = vshrl.u32 %v13224_v34, 16  ;;  %v6634_v1 = vshll.u32 %v13255_v46, 16  ;;  %v6638_v3 = vshrl.u32 %v13255_v46, 16  ;;  %v3681_v36 = vmul.f32 %v13230_v30, %v13176_v0  ;;  %v13293_v5 = vld [vmem:[#allocation2 + $0x24] sm:$0xe] }
 0x287   : > { %v4230_v23 = vadd.f32 %v13282_v11, %v4169_v12  ;;  %v6627_v48 = vrot.slane %v6625_v16, 4  ;;  %v6630_v55 = vrot.slane %v6628_v14, 5  ;;  %v2424_v50 = vadd.f32 %v2370_v56, %v1987_v35  ;;  %2665 = vperm.xlu0 %11438, %v9977_v51   ;;  %v13297_v14 = vld [vmem:[#allocation2 + $0x30] sm:$0xf]  ;;  %v13299_v35 = vld [vmem:[#allocation2 + $0x24] sm:$0xe] }
 0x288   : > { %v13288_v6 = vmul.f32 %v13157_v41, %v12988_v21  ;;  %v2425_v18 = vadd.f32 %v2371_v59, %v1988_v58  ;;  %v2807_v0 = vmul.f32 %v13185_v7, %v13087_v33  ;;  %v3298_v63 = vadd.f32 %v3244_v54, %v2860_v22  ;;  %16653 = vst [vmem:[#allocation45_spill] sm:$0xff] %v13297_v14  ;;  %v3903_v21 = vpop.permute.xlu1 %3902  ;;  %v13301_v58 = vpop.permute.xlu0 %3048 }
 0x289   : > { %v2808_v12 = vmul.f32 %v13185_v7, %v13130_v26  ;;  %v4284_v43 = vmax.f32 %v4230_v23, 0.0  ;;  %v4837_v16 = vor.u32 %v4836_v61, %v4833_v49  ;;  %v13303_v56 = vrot.slane %v4840_v27, 5  ;;  %2680 = vperm.xlu1 %11439, %v9980_v45   ;;  %v13310_v23 = vld [vmem:[#allocation2 + $0x34] sm:$0xf]  ;;  %v13316_v27 = vld [vmem:[%s11710_s17 + $0x121] sm:$0xff] }
 0x28a   : > { %v4846_v33 = vrot.slane %v4844_v39, 4  ;;  %v13305_v59 = vrot.slane %v6634_v1, 5  ;;  %v6640_v51 = vrot.slane %v6638_v3, 4  ;;  %v3735_v22 = vadd.f32 %v3681_v36, %v3298_v63  ;;  %16655 = vst [vmem:[#allocation157_spill] sm:$0xff] %v13310_v23  ;;  %16656 = vst [vmem:[#allocation158_spill] sm:$0xff] %v13316_v27 }
 0x28b   : > { %v4372_v26 = vsel %vm4342_vm7, %v4284_v43, 0.0  ;;  %v4118_v49 = vmul.f32 %v13252_v24, %v3903_v21  ;;  %v6631_v61 = vor.u32 %v6630_v55, %v6627_v48  ;;  %v13312_v57 = vadd.f32 %v2807_v0, %v2424_v50  ;;  %3530 = vperm.xlu0 %11438, %v12922_v62   ;;  %v13323_v45 = vld [vmem:[#allocation2 + $0x30] sm:$0xf]  ;;  %v13335_v50 = vld [vmem:[#allocation2 + $0x34] sm:$0xf] }
 0x28c   : > { %v10597_v19 = vpack.c.bf16 %v4372_v26, %v4372_v26  ;;  %v4855_v39 = vshrl.u32 %v13297_v14, 16  ;;  %v10414_v63 = vrot.slane %v13293_v5, 9  ;;  %v13320_v1 = vadd.f32 %v2808_v12, %v2425_v18  ;;  %v13327_v48 = vpop.permute.xlu1 %3053  ;;  %v13329_v62 = vpop.permute.xlu0 %2605  ;;  %v13347_v21 = vld [vmem:[%s11710_s17 + $0x129] sm:$0xff] }
 0x28d   : > { %v4172_v43 = vadd.f32 %v4118_v49, %v3735_v22  ;;  %v4858_v3 = vshll.u32 %v13297_v14, 16  ;;  %v10294_v36 = vrot.slane %v13299_v35, 9  ;;  %16657 = vst [vmem:[#allocation46_spill] sm:$0xff] %v13327_v48  ;;  %16658 = vst [vmem:[#allocation47_spill] sm:$0xff] %v13329_v62  ;;  %v13331_v55 = vrot.slane %v4837_v16, 4  ;;  %3545 = vperm.xlu1 %11439, %v13316_v27  }
 0x28e   : > { %4662 = vst.msk [vmem:[#allocation2 + $0x2c] sm:$0x1] %vm4652_vm0, %v10597_v19  ;;  %v4847_v5 = vor.u32 %v4846_v33, %v13303_v56  ;;  %v6641_v18 = vor.u32 %v6640_v51, %v13305_v59  ;;  %v13341_v19 = vrot.slane %v6631_v61, 4  ;;  %v4864_v35 = vshll.u32 %v13310_v23, 16  ;;  %16659 = vst [vmem:[#allocation159_spill] sm:$0xff] %v13347_v21 }
 0x28f   : > { %v4233_v12 = vadd.f32 %v13282_v11, %v4172_v43  ;;  %v4868_v16 = vshrl.u32 %v13310_v23, 16  ;;  %3535 = vperm.xlu0 %11438, %v12973_v44   ;;  %v13353_v51 = vrot.slane %v4855_v39, 4  ;;  %v6649_v22 = vshrl.u32 %v13323_v45, 16  ;;  %v10032_v61 = vld [vmem:[%s11710_s17 + $0x118] sm:$0x3] }
 0x290   : > { %v7338_v26 = vrot.slane %v13255_v46, 5  ;;  %v13358_v43 = vrot.slane %v4858_v3, 5  ;;  %v6658_v44 = vshll.u32 %v13335_v50, 16  ;;  %v5778_v0 = vrot.slane %v13224_v34, 5  ;;  %v13364_v62 = vpop.permute.xlu1 %2620  ;;  %v3471_v39 = vpop.permute.xlu0 %3470 }
 0x291   : > { %v4287_v49 = vmax.f32 %v4233_v12, 0.0  ;;  %v3245_v14 = vmul.f32 %v13205_v53, %v13247_v28  ;;  %16660 = vst [vmem:[#allocation84_spill] sm:$0xff] %v13364_v62  ;;  %v4848_v33 = vrot.slane %v4847_v5, 4  ;;  %v6637_v46 = vsel %vm12338_vm4, %v13341_v19, %v13305_v59  ;;  %3550 = vperm.xlu1 %11439, %v13347_v21   ;;  %v10035_v62 = vld [vmem:[%s11710_s17 + $0x130] sm:$0x3] }
 0x292   : > { %v6642_v12 = vrot.slane %v6641_v18, 4  ;;  %v13373_v4 = vrot.slane %v4864_v35, 5  ;;  %v4870_v34 = vrot.slane %v4868_v16, 4  ;;  %v6662_v28 = vshrl.u32 %v13335_v50, 16 }
 0x293   : > { %v4375_v3 = vsel %vm4342_vm7, %v4287_v49, 0.0  ;;  %3103 = vperm.xlu0 %11438, %v10032_v61   ;;  %v13377_v5 = vrot.slane %v6649_v22, 4  ;;  %v6652_v25 = vshll.u32 %v13323_v45, 16  ;;  %v7340_v27 = vrot.slane %v7338_v26, 4 }
 0x294   : > { %v10600_v31 = vpack.c.bf16 %v4375_v3, %v4375_v3  ;;  %v4861_v19 = vor.u32 %v13358_v43, %v13353_v51  ;;  %v13382_v49 = vrot.slane %v6658_v44, 5  ;;  %v13386_v35 = vsel %vm12881_vm10, %v10414_v63, %v7338_v26  ;;  %v13389_v22 = vpop.permute.xlu1 %3485  ;;  %v13391_v61 = vpop.permute.xlu0 %3475  ;;  %v7261_v44 = vld [vmem:[#allocation2 + $0x30] sm:$0xe] }
 0x295   : > { %v4742_v59 = vld [vmem:[#allocation2 + $0x2c] sm:$0x1]  ;;  %16661 = vst [vmem:[#allocation160_spill] sm:$0xff] %v13386_v35  ;;  %v5780_v16 = vrot.slane %v5778_v0, 4  ;;  %3118 = vperm.xlu1 %11439, %v10035_v62   ;;  %v4871_v51 = vor.u32 %v4870_v34, %v13373_v4  ;;  %v6664_v43 = vrot.slane %v6662_v28, 4  ;;  %v7345_v63 = vrot.slane %v13335_v50, 5 }
 0x296   : > { %v6536_v18 = vld [vmem:[#allocation2 + $0x2c] sm:$0x1]  ;;  %4665 = vst.msk [vmem:[#allocation2 + $0x38] sm:$0x1] %vm4652_vm0, %v10600_v31  ;;  %v4850_v45 = vshll.u32 %v4742_v59, 16  ;;  %v5781_v48 = vrot.slane %v4742_v59, 5  ;;  %v13397_v26 = vsel %vm12881_vm10, %v10294_v36, %v5778_v0  ;;  %v3299_v0 = vadd.f32 %v3245_v14, %v13312_v57 }
 0x297   : > { %v6644_v3 = vshll.u32 %v6536_v18, 16  ;;  %v7341_v54 = vrot.slane %v6536_v18, 5  ;;  %16662 = vst [vmem:[#allocation48_spill] sm:$0xff] %v13397_v26  ;;  %3967 = vperm.xlu0 %11438, %v13072_v10   ;;  %v13401_v31 = vld [vmem:[%s11710_s17 + $0x122] sm:$0xff]  ;;  %v6654_v62 = vrot.slane %v6652_v25, 5  ;;  %v5785_v10 = vrot.slane %v13310_v23, 5 }
 0x298   : > { %v4852_v21 = vrot.slane %v4850_v45, 5  ;;  %v13409_v34 = vsel %vm12881_vm10, %v5780_v16, %v5781_v48  ;;  %v13417_v28 = vpop.permute.xlu1 %3043  ;;  %v10415_v48 = vrot.slane %v7261_v44, 9  ;;  %v5708_v18 = vld [vmem:[#allocation2 + $0x30] sm:$0xe]  ;;  %v3682_v16 = vmul.f32 %v13230_v30, %v3471_v39 }
 0x299   : > { %v6646_v9 = vrot.slane %v6644_v3, 5  ;;  %v13405_v59 = vsel %vm12881_vm10, %v7340_v27, %v7341_v54  ;;  %16664 = vst [vmem:[#allocation50_spill] sm:$0xff] %v13409_v34  ;;  %v13419_v54 = vpop.permute.xlu0 %2188  ;;  %3982 = vperm.xlu1 %11439, %v13401_v31   ;;  %v16665_v57 = vsel %vm12338_vm4, %v13331_v55, %v13303_v56  ;;  %v6665_v3 = vor.u32 %v6664_v43, %v13382_v49 }
 0x29a   : > { %16663 = vst [vmem:[#allocation49_spill] sm:$0xff] %v13405_v59  ;;  %v4853_v27 = vsel %vm12338_vm4, %v4848_v33, %v4852_v21  ;;  %v3246_v21 = vmul.f32 %v13205_v53, %v13269_v42  ;;  %v10087_v33 = vld [vmem:[%s11710_s17 + $0x119] sm:$0x3]  ;;  %v4862_v39 = vrot.slane %v4861_v19, 4  ;;  %v7347_v44 = vrot.slane %v7345_v63, 4 }
 0x29b   : > { %v6647_v25 = vsel %vm12338_vm4, %v6642_v12, %v6646_v9  ;;  %v10228_v14 = vcombine.low %v16665_v57, %v4853_v27  ;;  %3972 = vperm.xlu0 %11438, %v13107_v60   ;;  %v13437_v9 = vld [vmem:[%s11710_s17 + $0x12a] sm:$0xff]  ;;  %v4872_v12 = vrot.slane %v4871_v51, 4  ;;  %v13445_v42 = vsel %vm12881_vm10, %v10415_v48, %v7345_v63 }
 0x29c   : > { %v10381_v45 = vcombine.low %v6637_v46, %v6647_v25  ;;  %v6655_v46 = vor.u32 %v6654_v62, %v13377_v5  ;;  %16666 = vst [vmem:[#allocation128_spill] sm:$0xff] %v13445_v42  ;;  %v10295_v60 = vrot.slane %v5708_v18, 9  ;;  %v5787_v43 = vrot.slane %v5785_v10, 4  ;;  %v3908_v27 = vpop.permute.xlu1 %3907  ;;  %v10142_v62 = vld [vmem:[%s11710_s17 + $0x11a] sm:$0x3] }
 0x29d   : > { %10806 = vmatmul.mubr.msk.bf16.gmra.mrb[4].mxu1 %vm5199_vm5, %v10228_v14  ;;  %v4743_v56 = vld [vmem:[#allocation2 + $0x38] sm:$0x1]  ;;  %v13447_v25 = vpop.permute.xlu0 %3490  ;;  %v4119_v36 = vmul.f32 %v13252_v24, %v3908_v27  ;;  %3987 = vperm.xlu1 %11439, %v13437_v9   ;;  %v6666_v5 = vrot.slane %v6665_v3, 4  ;;  %v3683_v27 = vmul.f32 %v13230_v30, %v13391_v61  ;;  %v16672_v61 = vld [vmem:[#allocation7_spill] sm:$0xff] }
 0x29e   : > { %10941 = vmatprep.mubr.msk.bf16.mxu0 %vm5199_vm5, %v10381_v45  ;;  %v6539_v55 = vld [vmem:[#allocation2 + $0x38] sm:$0x1]  ;;  %v4874_v19 = vshll.u32 %v4743_v56, 16  ;;  %v5788_v14 = vrot.slane %v4743_v56, 5  ;;  %v3736_v45 = vadd.f32 %v3682_v16, %v3299_v0  ;;  %v13453_v63 = vsel %vm12881_vm10, %v10295_v60, %v5785_v10  ;;  %v10090_v56 = vld [vmem:[%s11710_s17 + $0x131] sm:$0x3] }
 0x29f   : > { %v6668_v51 = vshll.u32 %v6539_v55, 16  ;;  %v7348_v57 = vrot.slane %v6539_v55, 5  ;;  %16667 = vst [vmem:[#allocation161_spill] sm:$0xff] %v13453_v63  ;;  %3540 = vperm.xlu0 %11438, %v10087_v33   ;;  %v6656_v55 = vrot.slane %v6655_v46, 4  ;;  %v2810_v33 = vmul.f32 %v13185_v7, %v13178_v29  ;;  %v9873_v10 = vld [vmem:[%s11710_s17 + $0x130] sm:$0x3] }
 0x2a0   : > { %v4876_v48 = vrot.slane %v4874_v19, 5  ;;  %v13462_v0 = vsel %vm12881_vm10, %v5787_v43, %v5788_v14  ;;  %v4173_v16 = vadd.f32 %v4119_v36, %v3736_v45  ;;  %v13471_v60 = vpop.permute.xlu1 %2203  ;;  %v4867_v43 = vsel %vm12338_vm4, %v4862_v39, %v13373_v4  ;;  %v16671_v39 = vld [vmem:[#allocation92_spill] sm:$0xff] }
 0x2a1   : > { %v6670_v18 = vrot.slane %v6668_v51, 5  ;;  %v13458_v50 = vsel %vm12881_vm10, %v7347_v44, %v7348_v57  ;;  %16669 = vst [vmem:[#allocation51_spill] sm:$0xff] %v13462_v0  ;;  %v13473_v44 = vpop.permute.xlu0 %2193  ;;  %3977 = vperm.xlu1 %11439, %v10142_v62   ;;  %v6661_v51 = vsel %vm12338_vm4, %v6656_v55, %v13382_v49  ;;  %v16670_v57 = vld [vmem:[#allocation54_spill] sm:$0xff]  ;;  %v2427_v14 = vadd.f32 %v13288_v6, %v13257_v17  ;;  %v16674_v17 = vld [vmem:[#allocation55_spill] sm:$0xff] }
 0x2a2   : > { %16668 = vst [vmem:[#allocation162_spill] sm:$0xff] %v13458_v50  ;;  %v4877_v36 = vsel %vm12338_vm4, %v4872_v12, %v4876_v48  ;;  %v4234_v29 = vadd.f32 %v13282_v11, %v4173_v16  ;;  %v1068_v4 = vmul.f32 %v13101_v37, %v16670_v57  ;;  %v1499_v12 = vmul.f32 %v13115_v15, %v16671_v39  ;;  %v16673_v16 = vld [vmem:[#allocation8_spill] sm:$0xff] }
 0x2a3   : > { %v6671_v46 = vsel %vm12338_vm4, %v6666_v5, %v6670_v18  ;;  %v10229_v19 = vcombine.low %v4867_v43, %v4877_v36  ;;  %3555 = vperm.xlu0 %11438, %v10090_v56   ;;  %v13496_v5 = vadd.f32 %v13173_v47, %v16672_v61  ;;  %v3300_v62 = vadd.f32 %v3246_v21, %v13320_v1  ;;  %v10145_v18 = vld [vmem:[%s11710_s17 + $0x132] sm:$0x3]  ;;  %v16675_v56 = vld [vmem:[#allocation137_spill] sm:$0xff] }
 0x2a4   : > { %v10382_v45 = vcombine.low %v6661_v51, %v6671_v46  ;;  %v3248_v49 = vmul.f32 %v13205_v53, %v13301_v58  ;;  %v4288_v48 = vmax.f32 %v4234_v29, 0.0  ;;  %v13505_v55 = vadd.f32 %v13195_v38, %v16673_v16  ;;  %v3913_v1 = vpop.permute.xlu1 %3912  ;;  %v8099_v58 = vld [vmem:[#allocation2 + $0x28] sm:$0xf] }
 0x2a5   : > { %10809 = vmatprep.mubr.msk.bf16.mxu1 %vm5199_vm5, %v10229_v19  ;;  %v1071_v6 = vmul.f32 %v13101_v37, %v16674_v17  ;;  %v1937_v47 = vmul.f32 %v13135_v20, %v16675_v56  ;;  %v2864_v43 = vadd.f32 %v2810_v33, %v2427_v14  ;;  %v13512_v21 = vpop.permute.xlu0 %3058  ;;  %v3685_v36 = vmul.f32 %v13230_v30, %v13389_v22  ;;  %v8100_v19 = vld [vmem:[#allocation2 + $0x2c] sm:$0x1]  ;;  %v16677_v22 = vld [vmem:[#allocation56_spill] sm:$0xff] }
 0x2a6   : > { %10942 = vmatmul.mubr.msk.bf16.gmra.mrb[4].mxu0 %vm5199_vm5, %v10382_v45  ;;  %v3737_v46 = vadd.f32 %v3683_v27, %v3300_v62  ;;  %v4376_v38 = vsel %vm4331_vm6, %v4288_v48, 0.0  ;;  %v4120_v29 = vmul.f32 %v13252_v24, %v3913_v1  ;;  %1816 = vperm.xlu1 %11439, %v13264_v8   ;;  %v16676_v51 = vld [vmem:[#allocation9_spill] sm:$0xff]  ;;  %v1553_v57 = vadd.f32 %v1499_v12, %v13163_v32  ;;  %v8102_v62 = vld [vmem:[#allocation2 + $0x34] sm:$0xf]  ;;  %v16678_v16 = vld [vmem:[#allocation36_spill] sm:$0xff] }
 0x2a7   : > { %v13521_v33 = vadd.f32 %v1068_v4, %v16676_v51  ;;  %v2374_v39 = vmul.f32 %v13157_v41, %v13052_v40  ;;  %v10601_v14 = vpack.c.bf16 %v4376_v38, %v4376_v38  ;;  %3992 = vperm.xlu0 %11438, %v10145_v18   ;;  %v1070_v27 = vmul.f32 %v13101_v37, %v16677_v22  ;;  %v16679_v4 = vld [vmem:[#allocation43_spill] sm:$0xff]  ;;  %v8103_v12 = vld [vmem:[#allocation2 + $0x38] sm:$0x1]  ;;  %v8826_v18 = vld [vmem:[#allocation2 + $0x24] sm:$0xe] }
 0x2a8   : > { %v3302_v45 = vadd.f32 %v3248_v49, %v2864_v43  ;;  %v4174_v61 = vadd.f32 %v4120_v29, %v3737_v46  ;;  %v8898_v48 = vrot.slane %v8099_v58, 5  ;;  %v13529_v8 = vadd.f32 %v1071_v6, %v16678_v16  ;;  %v13534_v32 = vpop.permute.xlu1 %2208  ;;  %v16680_v49 = vld [vmem:[#allocation57_spill] sm:$0xff]  ;;  %v16681_v46 = vld [vmem:[#allocation159_spill] sm:$0xff]  ;;  %v16682_v51 = vld [vmem:[#allocation46_spill] sm:$0xff] }
 0x2a9   : > { %v1991_v17 = vadd.f32 %v1937_v47, %v1553_v57  ;;  %v2811_v56 = vmul.f32 %v13185_v7, %v16679_v4  ;;  %4666 = vst.msk [vmem:[#allocation2 + $0x3c] sm:$0xf] %vm4649_vm1, %v10601_v14  ;;  %v3923_v40 = vpop.permute.xlu0 %3922  ;;  %v8901_v1 = vrot.slane %v8100_v19, 5  ;;  %v1073_v43 = vmul.f32 %v13101_v37, %v16680_v49  ;;  %v8827_v38 = vld [vmem:[#allocation2 + $0x30] sm:$0xe] }
 0x2aa   : > { %v3739_v58 = vadd.f32 %v3685_v36, %v3302_v45  ;;  %v4235_v6 = vadd.f32 %v13282_v11, %v4174_v61  ;;  %v4122_v47 = vmul.f32 %v13252_v24, %v3923_v40  ;;  %2253 = vperm.xlu1 %11439, %v16681_v46   ;;  %v3249_v57 = vmul.f32 %v13205_v53, %v16682_v51  ;;  %v16683_v14 = vld [vmem:[#allocation158_spill] sm:$0xff]  ;;  %v16690_v51 = vld [vmem:[#allocation155_spill] sm:$0xff] }
 0x2ab   : > { %v2428_v29 = vadd.f32 %v2374_v39, %v1991_v17  ;;  %2248 = vperm.xlu0 %11438, %v16683_v14   ;;  %v8900_v22 = vrot.slane %v8898_v48, 4  ;;  %v8905_v16 = vrot.slane %v8102_v62, 5  ;;  %v10534_v36 = vrot.slane %v8826_v18, 9 }
 0x2ac   : > { %v4289_v19 = vmax.f32 %v4235_v6, 0.0  ;;  %v4176_v4 = vadd.f32 %v4122_v47, %v3739_v58  ;;  %v8908_v45 = vrot.slane %v8103_v12, 5  ;;  %v13545_v49 = vpop.permute.xlu1 %3480  ;;  %v10535_v17 = vrot.slane %v8827_v38, 9  ;;  %v16686_v12 = vld [vmem:[#allocation154_spill] sm:$0xff] }
 0x2ad   : > { %v2865_v61 = vadd.f32 %v2811_v56, %v2428_v29  ;;  %v13547_v40 = vpop.permute.xlu0 %2625  ;;  %v13551_v39 = vsel %vm12881_vm10, %v8900_v22, %v8901_v1  ;;  %v8907_v46 = vrot.slane %v8905_v16, 4  ;;  %v3686_v62 = vmul.f32 %v13230_v30, %v13447_v25  ;;  %v9928_v1 = vld [vmem:[%s11710_s17 + $0x131] sm:$0x3] }
 0x2ae   : > { %16684 = vst [vmem:[#allocation85_spill] sm:$0xff] %v13551_v39  ;;  %v10602_v6 = vpack.c.bf16 %v4289_v19, %v4289_v19  ;;  %v4237_v58 = vadd.f32 %v13282_v11, %v4176_v4  ;;  %2685 = vperm.xlu1 %11439, %v13401_v31   ;;  %v13559_v56 = vsel %vm12881_vm10, %v10534_v36, %v8898_v48  ;;  %v16689_v31 = vld [vmem:[#allocation90_spill] sm:$0xff]  ;;  %v16692_v19 = vld [vmem:[#allocation59_spill] sm:$0xff]  ;;  %v16693_v36 = vld [vmem:[#allocation60_spill] sm:$0xff] }
 0x2af   : > { %16685 = vst [vmem:[#allocation79_spill] sm:$0xff] %v13559_v56  ;;  %v13562_v18 = vadd.f32 %v1070_v27, %v16686_v12  ;;  %1821 = vperm.xlu0 %11438, %v9873_v10   ;;  %v13569_v25 = vsel %vm12881_vm10, %v10535_v17, %v8905_v16  ;;  %v13573_v38 = vsel %vm12881_vm10, %v8907_v46, %v8908_v45  ;;  %v16691_v22 = vld [vmem:[#allocation58_spill] sm:$0xff]  ;;  %v16695_v12 = vld [vmem:[#allocation91_spill] sm:$0xff] }
 0x2b0   : > { %16687 = vst [vmem:[#allocation163_spill] sm:$0xff] %v13569_v25  ;;  %16688 = vst [vmem:[#allocation164_spill] sm:$0xff] %v13573_v38  ;;  %v1497_v48 = vmul.f32 %v13115_v15, %v16689_v31  ;;  %v3303_v29 = vadd.f32 %v3249_v57, %v2865_v61  ;;  %v4291_v27 = vmax.f32 %v4237_v58, 0.0  ;;  %v13581_v14 = vadd.f32 %v1073_v43, %v16690_v51  ;;  %v13589_v57 = vpop.permute.xlu1 %2630  ;;  %v16694_v17 = vld [vmem:[#allocation134_spill] sm:$0xff]  ;;  %v16696_v51 = vld [vmem:[#allocation93_spill] sm:$0xff] }
 0x2b1   : > { %4667 = vst.msk [vmem:[#allocation2 + $0x40] sm:$0xf] %vm4649_vm1, %v10602_v6  ;;  %v1072_v16 = vmul.f32 %v13101_v37, %v16691_v22  ;;  %v1075_v4 = vmul.f32 %v13101_v37, %v16692_v19  ;;  %v1074_v45 = vmul.f32 %v13101_v37, %v16693_v36  ;;  %v3928_v61 = vpop.permute.xlu0 %3927  ;;  %v1935_v46 = vmul.f32 %v13135_v20, %v16694_v17  ;;  %v16697_v37 = vld [vmem:[#allocation94_spill] sm:$0xff]  ;;  %v16699_v10 = vld [vmem:[#allocation95_spill] sm:$0xff] }
 0x2b2   : > { %v3740_v6 = vadd.f32 %v3686_v62, %v3303_v29  ;;  %v4379_v43 = vsel %vm4331_vm6, %v4291_v27, 0.0  ;;  %v4123_v58 = vmul.f32 %v13252_v24, %v3928_v61  ;;  %2258 = vperm.xlu1 %11439, %v9928_v1   ;;  %v1500_v31 = vmul.f32 %v13115_v15, %v16695_v12  ;;  %v9874_v17 = vld [vmem:[%s11710_s17 + $0x138] sm:$0xff]  ;;  %v16698_v62 = vld [vmem:[#allocation12_spill] sm:$0xff] }
 0x2b3   : > { %v1502_v22 = vmul.f32 %v13115_v15, %v16696_v51  ;;  %v1501_v19 = vmul.f32 %v13115_v15, %v16697_v37  ;;  %v10604_v36 = vpack.c.bf16 %v4379_v43, %v4379_v43  ;;  %2690 = vperm.xlu0 %11438, %v13437_v9   ;;  %v1551_v29 = vadd.f32 %v1497_v48, %v16698_v62  ;;  %v16700_v61 = vld [vmem:[#allocation44_spill] sm:$0xff]  ;;  %v16701_v12 = vld [vmem:[#allocation135_spill] sm:$0xff]  ;;  %v16702_v51 = vld [vmem:[#allocation86_spill] sm:$0xff] }
 0x2b4   : > { %v1504_v27 = vmul.f32 %v13115_v15, %v16699_v10  ;;  %v2372_v1 = vmul.f32 %v13157_v41, %v16700_v61  ;;  %v4177_v47 = vadd.f32 %v4123_v58, %v3740_v6  ;;  %v13610_v3 = vadd.f32 %v1072_v16, %v16701_v12  ;;  %v16703_v37 = vld [vmem:[#allocation96_spill] sm:$0xff]  ;;  %v16704_v43 = vld [vmem:[#allocation97_spill] sm:$0xff]  ;;  %v13620_v10 = vpop.permute.xlu1 %3495  ;;  %v16705_v62 = vld [vmem:[#allocation98_spill] sm:$0xff] }
 0x2b5   : > { %v13613_v38 = vadd.f32 %v1075_v4, %v16702_v51  ;;  %v1503_v9 = vmul.f32 %v13115_v15, %v16703_v37  ;;  %v1506_v48 = vmul.f32 %v13115_v15, %v16704_v43  ;;  %4669 = vst.msk [vmem:[#allocation2 + $0x48] sm:$0xf] %vm4649_vm1, %v10604_v36  ;;  %v1505_v6 = vmul.f32 %v13115_v15, %v16705_v62  ;;  %v16706_v16 = vld [vmem:[#allocation47_spill] sm:$0xff]  ;;  %v13627_v12 = vpop.permute.xlu0 %2640  ;;  %v16707_v51 = vld [vmem:[#allocation130_spill] sm:$0xff]  ;;  %v16708_v43 = vld [vmem:[#allocation13_spill] sm:$0xff] }
 0x2b6   : > { %v1989_v58 = vadd.f32 %v1935_v46, %v1551_v29  ;;  %v2809_v61 = vmul.f32 %v13185_v7, %v16706_v16  ;;  %v4238_v4 = vadd.f32 %v13282_v11, %v4177_v47  ;;  %1826 = vperm.xlu1 %11439, %v9874_v17   ;;  %v13630_v37 = vadd.f32 %v1074_v45, %v16707_v51  ;;  %v16709_v36 = vld [vmem:[#allocation40_spill] sm:$0xff]  ;;  %v16710_v56 = vld [vmem:[#allocation14_spill] sm:$0xff]  ;;  %v16711_v46 = vld [vmem:[#allocation41_spill] sm:$0xff] }
 0x2b7   : > { %v1554_v25 = vadd.f32 %v1500_v31, %v16708_v43  ;;  %v1556_v39 = vadd.f32 %v1502_v22, %v16709_v36  ;;  %v1555_v0 = vadd.f32 %v1501_v19, %v16710_v56  ;;  %3123 = vperm.xlu0 %11438, %v9874_v17   ;;  %v9875_v62 = vld [vmem:[%s11710_s17 + $0x140] sm:$0xff]  ;;  %v13637_v29 = vadd.f32 %v1504_v27, %v16711_v46  ;;  %v16715_v56 = vld [vmem:[#allocation138_spill] sm:$0xff]  ;;  %v13653_v27 = vld [vmem:[#allocation2 + $0x3c] sm:$0xf] }
 0x2b8   : > { %v2426_v16 = vadd.f32 %v2372_v1, %v1989_v58  ;;  %v3247_v47 = vmul.f32 %v13205_v53, %v13417_v28  ;;  %v4292_v63 = vmax.f32 %v4238_v4, 0.0  ;;  %v13642_v34 = vadd.f32 %v1503_v9, %v13496_v5  ;;  %v16714_v31 = vld [vmem:[#allocation136_spill] sm:$0xff]  ;;  %v13651_v17 = vpop.permute.xlu1 %2645  ;;  %16716 = vst [vmem:[#allocation87_spill] sm:$0xff] %v13653_v27  ;;  %v16718_v58 = vld [vmem:[#allocation99_spill] sm:$0xff] }
 0x2b9   : > { %v13645_v45 = vadd.f32 %v1506_v48, %v13505_v55  ;;  %v1938_v22 = vmul.f32 %v13135_v20, %v16714_v31  ;;  %v1940_v19 = vmul.f32 %v13135_v20, %v16715_v56  ;;  %v13655_v1 = vld [vmem:[#allocation2 + $0x40] sm:$0xf]  ;;  %v13658_v28 = vadd.f32 %v1505_v6, %v13521_v33  ;;  %v13662_v48 = vpop.permute.xlu0 %2198 }
 0x2ba   : > { %16712 = vst [vmem:[#allocation165_spill] sm:$0xff] %v13642_v34  ;;  %16717 = vst [vmem:[#allocation80_spill] sm:$0xff] %v13655_v1  ;;  %v2863_v5 = vadd.f32 %v2809_v61, %v2426_v16  ;;  %v3684_v55 = vmul.f32 %v13230_v30, %v13545_v49  ;;  %v10605_v9 = vpack.c.bf16 %v4292_v63, %v4292_v63  ;;  %1831 = vperm.xlu1 %11439, %v9875_v62   ;;  %v16719_v51 = vld [vmem:[#allocation100_spill] sm:$0xff]  ;;  %v16720_v36 = vld [vmem:[#allocation139_spill] sm:$0xff] }
 0x2bb   : > { %16713 = vst [vmem:[#allocation52_spill] sm:$0xff] %v13645_v45  ;;  %v13666_v4 = vmul.f32 %v13115_v15, %v16718_v58  ;;  %v13670_v43 = vmul.f32 %v13115_v15, %v16719_v51  ;;  %v1939_v33 = vmul.f32 %v13135_v20, %v16720_v36  ;;  %v16721_v6 = vld [vmem:[#allocation156_spill] sm:$0xff]  ;;  %3128 = vperm.xlu0 %11438, %v9875_v62   ;;  %v9983_v49 = vld [vmem:[%s11710_s17 + $0x132] sm:$0x3]  ;;  %v6540_v63 = vld [vmem:[#allocation2 + $0x3c] sm:$0xf] }
 0x2bc   : > { %v2375_v61 = vmul.f32 %v13157_v41, %v16721_v6  ;;  %v3301_v46 = vadd.f32 %v3247_v47, %v2863_v5  ;;  %4670 = vst.msk [vmem:[#allocation2 + $0x4c] sm:$0xf] %vm4649_vm1, %v10605_v9  ;;  %v13679_v16 = vld [vmem:[%s11710_s17 + $0x150] sm:$0xff]  ;;  %v4879_v31 = vshrl.u32 %v13653_v27, 16  ;;  %v4882_v56 = vshll.u32 %v13653_v27, 16  ;;  %v16722_v36 = vld [vmem:[#allocation84_spill] sm:$0xff]  ;;  %v3918_v5 = vpop.permute.xlu1 %3917 }
 0x2bd   : > { %v1992_v58 = vadd.f32 %v1938_v22, %v1554_v25  ;;  %v1994_v51 = vadd.f32 %v1940_v19, %v1556_v39  ;;  %v2812_v62 = vmul.f32 %v13185_v7, %v16722_v36  ;;  %v2376_v47 = vmul.f32 %v13157_v41, %v13419_v54  ;;  %v13690_v26 = vpop.permute.xlu0 %3063  ;;  %v16723_v25 = vld [vmem:[#allocation140_spill] sm:$0xff]  ;;  %v13700_v54 = vld [vmem:[%s11710_s17 + $0x158] sm:$0xff] }
 0x2be   : > { %v3738_v9 = vadd.f32 %v3684_v55, %v3301_v46  ;;  %v4121_v6 = vmul.f32 %v13252_v24, %v3918_v5  ;;  %2695 = vperm.xlu1 %11439, %v9983_v49   ;;  %v6673_v23 = vshrl.u32 %v6540_v63, 16  ;;  %v6676_v50 = vshll.u32 %v6540_v63, 16  ;;  %v10091_v49 = vld [vmem:[%s11710_s17 + $0x139] sm:$0xff] }
 0x2bf   : > { %v1993_v15 = vadd.f32 %v1939_v33, %v1555_v0  ;;  %v13694_v39 = vmul.f32 %v13135_v20, %v16723_v25  ;;  %v2429_v22 = vadd.f32 %v2375_v61, %v1992_v58  ;;  %v2377_v19 = vmul.f32 %v13157_v41, %v13473_v44  ;;  %1841 = vperm.xlu0 %11438, %v13679_v16   ;;  %v13705_v0 = vld [vmem:[#allocation2 + $0x40] sm:$0xf]  ;;  %v13748_v45 = vld [vmem:[#allocation2 + $0x3c] sm:$0xe] }
 0x2c0   : > { %v3250_v55 = vmul.f32 %v13205_v53, %v13512_v21  ;;  %v4175_v46 = vadd.f32 %v4121_v6, %v3738_v9  ;;  %v4881_v36 = vrot.slane %v4879_v31, 4  ;;  %v4884_v63 = vrot.slane %v4882_v56, 5  ;;  %v13707_v61 = vpop.permute.xlu1 %3068  ;;  %v13717_v6 = vld [vmem:[#allocation2 + $0x48] sm:$0xf]  ;;  %v16994_v13 = vld [vmem:[#allocation79_spill] sm:$0xff] }
 0x2c1   : > { %v2866_v20 = vadd.f32 %v2812_v62, %v2429_v22  ;;  %v2430_v33 = vadd.f32 %v2376_v47, %v1993_v15  ;;  %v4888_v44 = vshll.u32 %v13655_v1, 16  ;;  %v4892_v58 = vshrl.u32 %v13655_v1, 16  ;;  %v13714_v9 = vpop.permute.xlu0 %2213  ;;  %16725 = vst [vmem:[#allocation53_spill] sm:$0xff] %v13717_v6  ;;  %v10092_v47 = vld [vmem:[%s11710_s17 + $0x141] sm:$0xff] }
 0x2c2   : > { %v3687_v5 = vmul.f32 %v13230_v30, %v13620_v10  ;;  %v4236_v21 = vadd.f32 %v13282_v11, %v4175_v46  ;;  %16724 = vst [vmem:[#allocation35_spill] sm:$0xff] %v13714_v9  ;;  %1846 = vperm.xlu1 %11439, %v13700_v54   ;;  %v6675_v31 = vrot.slane %v6673_v23, 4  ;;  %v6678_v56 = vrot.slane %v6676_v50, 5  ;;  %v6543_v46 = vld [vmem:[#allocation2 + $0x48] sm:$0xf] }
 0x2c3   : > { %v13721_v15 = vmul.f32 %v13157_v41, %v13471_v60  ;;  %v13723_v62 = vadd.f32 %v2377_v19, %v1994_v51  ;;  %3560 = vperm.xlu0 %11438, %v10091_v49   ;;  %v6682_v30 = vshll.u32 %v13705_v0, 16  ;;  %v6686_v10 = vshrl.u32 %v13705_v0, 16 }
 0x2c4   : > { %v3304_v25 = vadd.f32 %v3250_v55, %v2866_v20  ;;  %v2813_v22 = vmul.f32 %v13185_v7, %v13547_v40  ;;  %v4290_v23 = vmax.f32 %v4236_v21, 0.0  ;;  %v4885_v50 = vor.u32 %v4884_v63, %v4881_v36  ;;  %v3933_v27 = vpop.permute.xlu1 %3932  ;;  %v13739_v36 = vld [vmem:[#allocation2 + $0x4c] sm:$0xf]  ;;  %v13741_v63 = vld [vmem:[#allocation2 + $0x3c] sm:$0xe] }
 0x2c5   : > { %v13730_v42 = vrot.slane %v4888_v44, 5  ;;  %v4894_v41 = vrot.slane %v4892_v58, 4  ;;  %v4903_v60 = vshrl.u32 %v13717_v6, 16  ;;  %v4906_v51 = vshll.u32 %v13717_v6, 16  ;;  %v13737_v20 = vpop.permute.xlu0 %3078  ;;  %16727 = vst [vmem:[#allocation88_spill] sm:$0xff] %v13739_v36  ;;  %v13744_v58 = vld [vmem:[%s11710_s17 + $0x151] sm:$0xff] }
 0x2c6   : > { %v3741_v19 = vadd.f32 %v3687_v5, %v3304_v25  ;;  %v4378_v35 = vsel %vm4342_vm7, %v4290_v23, 0.0  ;;  %v4124_v55 = vmul.f32 %v13252_v24, %v3933_v27  ;;  %3565 = vperm.xlu1 %11439, %v10092_v47   ;;  %v6679_v40 = vor.u32 %v6678_v56, %v6675_v31  ;;  %16728 = vst [vmem:[#allocation129_spill] sm:$0xff] %v13744_v58 }
 0x2c7   : > { %v10603_v44 = vpack.c.bf16 %v4378_v35, %v4378_v35  ;;  %2263 = vperm.xlu0 %11438, %v10091_v49   ;;  %v13746_v21 = vrot.slane %v6682_v30, 5  ;;  %v6688_v5 = vrot.slane %v6686_v10, 4  ;;  %v6697_v25 = vshrl.u32 %v6543_v46, 16 }
 0x2c8   : > { %v13750_v23 = vadd.f32 %v2813_v22, %v2430_v33  ;;  %v13754_v24 = vmul.f32 %v13185_v7, %v13589_v57  ;;  %v4178_v27 = vadd.f32 %v4124_v55, %v3741_v19  ;;  %v6700_v31 = vshll.u32 %v6543_v46, 16  ;;  %v13757_v35 = vpop.permute.xlu1 %3083  ;;  %v11442_v33 = vld [vmem:[%s16268_s3 + $0x28] sm:$0xff]  }
 0x2c9   : > { %4668 = vst.msk [vmem:[#allocation2 + $0x44] sm:$0x1] %vm4652_vm0, %v10603_v44  ;;  %v4895_v49 = vor.u32 %v4894_v41, %v13730_v42  ;;  %v4905_v56 = vrot.slane %v4903_v60, 4  ;;  %v4908_v30 = vrot.slane %v4906_v51, 5  ;;  %v13766_v57 = vpop.permute.xlu0 %2635  ;;  %v13769_v22 = vrot.slane %v4885_v50, 4  ;;  %v13774_v60 = vld [vmem:[%s11710_s17 + $0x13a] sm:$0xff]  ;;  %10969 = vmatprep.subr.bf16.mxu0 %v11442_v33 }
 0x2ca   : > { %v4239_v7 = vadd.f32 %v13282_v11, %v4178_v27  ;;  %16729 = vst [vmem:[#allocation89_spill] sm:$0xff] %v13766_v57  ;;  %2278 = vperm.xlu1 %11439, %v13744_v58   ;;  %v10416_v46 = vrot.slane %v13741_v63, 9  ;;  %v10296_v41 = vrot.slane %v13748_v45, 9  ;;  %v13776_v51 = vrot.slane %v6679_v40, 4  ;;  %v13779_v55 = vld [vmem:[#allocation2 + $0x4c] sm:$0xf]  ;;  %10970 = vmatpush3.bf16.msra.mxu0 %v11442_v33 }
 0x2cb   : > { %2268 = vperm.xlu0 %11438, %v10092_v47   ;;  %v6689_v19 = vor.u32 %v6688_v5, %v13746_v21  ;;  %v13781_v11 = vrot.slane %v6697_v25, 4  ;;  %v7352_v44 = vrot.slane %v13705_v0, 5  ;;  %v10038_v27 = vld [vmem:[%s11710_s17 + $0x148] sm:$0x3]  ;;  %v4912_v63 = vshll.u32 %v13739_v36, 16 }
 0x2cc   : > { %v4293_v50 = vmax.f32 %v4239_v7, 0.0  ;;  %v4916_v45 = vshrl.u32 %v13739_v36, 16  ;;  %v6702_v47 = vrot.slane %v6700_v31, 5  ;;  %v13787_v40 = vpop.permute.xlu1 %2650  ;;  %v4891_v5 = vsel %vm12338_vm4, %v13769_v22, %v13730_v42  ;;  %v13806_v22 = vld [vmem:[%s11710_s17 + $0x159] sm:$0xff] }
 0x2cd   : > { %16730 = vst [vmem:[#allocation131_spill] sm:$0xff] %v13787_v40  ;;  %v4896_v25 = vrot.slane %v4895_v49, 4  ;;  %v6685_v0 = vsel %vm12338_vm4, %v13776_v51, %v13746_v21  ;;  %v4909_v7 = vor.u32 %v4908_v30, %v4905_v56  ;;  %v3501_v10 = vpop.permute.xlu0 %3500  ;;  %v6706_v33 = vshll.u32 %v13779_v55, 16  ;;  %16731 = vst [vmem:[#allocation132_spill] sm:$0xff] %v13806_v22  ;;  %v9876_v21 = vld [vmem:[%s11710_s17 + $0x148] sm:$0x3] }
 0x2ce   : > { %v4381_v31 = vsel %vm4342_vm7, %v4293_v50, 0.0  ;;  %3997 = vperm.xlu1 %11439, %v13774_v60   ;;  %v6710_v6 = vshrl.u32 %v13779_v55, 16  ;;  %v5792_v58 = vrot.slane %v13655_v1, 5  ;;  %v3251_v42 = vmul.f32 %v13205_v53, %v13690_v26 }
 0x2cf   : > { %v10606_v49 = vpack.c.bf16 %v4381_v31, %v4381_v31  ;;  %3133 = vperm.xlu0 %11438, %v10038_v27   ;;  %v6690_v56 = vrot.slane %v6689_v19, 4  ;;  %v7354_v30 = vrot.slane %v7352_v44, 4  ;;  %v13809_v59 = vrot.slane %v4912_v63, 5 }
 0x2d0   : > { %v4744_v51 = vld [vmem:[#allocation2 + $0x44] sm:$0x1]  ;;  %v4918_v40 = vrot.slane %v4916_v45, 4  ;;  %v6703_v57 = vor.u32 %v6702_v47, %v13781_v11  ;;  %v13814_v1 = vsel %vm12881_vm10, %v10416_v46, %v7352_v44  ;;  %v13817_v53 = vpop.permute.xlu1 %3515  ;;  %v13819_v19 = vrot.slane %v4909_v7, 4 }
 0x2d1   : > { %v6542_v50 = vld [vmem:[#allocation2 + $0x44] sm:$0x1]  ;;  %16732 = vst [vmem:[#allocation39_spill] sm:$0xff] %v13814_v1  ;;  %4671 = vst.msk [vmem:[#allocation2 + $0x50] sm:$0x1] %vm4652_vm0, %v10606_v49  ;;  %v4898_v26 = vshll.u32 %v4744_v51, 16  ;;  %v13821_v9 = vpop.permute.xlu0 %3505 }
 0x2d2   : > { %v6692_v27 = vshll.u32 %v6542_v50, 16  ;;  %v7355_v31 = vrot.slane %v6542_v50, 5  ;;  %2283 = vperm.xlu1 %11439, %v13806_v22   ;;  %v13824_v63 = vrot.slane %v6706_v33, 5  ;;  %v6712_v11 = vrot.slane %v6710_v6, 4  ;;  %v10147_v46 = vld [vmem:[%s11710_s17 + $0x142] sm:$0xff] }
 0x2d3   : > { %v5794_v45 = vrot.slane %v5792_v58, 4  ;;  %v5795_v47 = vrot.slane %v4744_v51, 5  ;;  %1836 = vperm.xlu0 %11438, %v9876_v21   ;;  %v4900_v44 = vrot.slane %v4898_v26, 5  ;;  %v7359_v7 = vrot.slane %v13779_v55, 5  ;;  %v7263_v33 = vld [vmem:[#allocation2 + $0x48] sm:$0xe] }
 0x2d4   : > { %v6694_v49 = vrot.slane %v6692_v27, 5  ;;  %v13829_v34 = vsel %vm12881_vm10, %v7354_v30, %v7355_v31  ;;  %v4919_v50 = vor.u32 %v4918_v40, %v13809_v59  ;;  %v13837_v6 = vsel %vm12881_vm10, %v10296_v41, %v5792_v58  ;;  %v13843_v51 = vpop.permute.xlu1 %3073  ;;  %v13855_v58 = vld [vmem:[%s16266_s1 + $0x7] ss:$0 sm:$0xff]  ;;  %v5710_v22 = vld [vmem:[#allocation2 + $0x48] sm:$0xe] }
 0x2d5   : > { %16733 = vst [vmem:[#allocation133_spill] sm:$0xff] %v13829_v34  ;;  %16734 = vst [vmem:[#allocation151_spill] sm:$0xff] %v13837_v6  ;;  %v13841_v21 = vsel %vm12881_vm10, %v5794_v45, %v5795_v47  ;;  %v4901_v55 = vsel %vm12338_vm4, %v4896_v25, %v4900_v44  ;;  %v5799_v26 = vrot.slane %v13739_v36, 5  ;;  %v3688_v41 = vmul.f32 %v13855_v58, %v3501_v10  ;;  %v13858_v27 = vpop.permute.xlu0 %2218  ;;  %v9879_v44 = vld [vmem:[%s11710_s17 + $0x160] sm:$0x3] }
 0x2d6   : > { %16735 = vst [vmem:[#allocation54_spill] sm:$0xff] %v13841_v21  ;;  %v6695_v40 = vsel %vm12338_vm4, %v6690_v56, %v6694_v49  ;;  %4002 = vperm.xlu1 %11439, %v10147_v46   ;;  %v10230_v31 = vcombine.low %v4891_v5, %v4901_v55  ;;  %v6704_v45 = vrot.slane %v6703_v57, 4  ;;  %v2868_v56 = vadd.f32 %v13754_v24, %v13723_v62  ;;  %v13869_v10 = vld [vmem:[%s16266_s1 + $0x6] ss:$0 sm:$0xff] }
 0x2d7   : > { %v10383_v25 = vcombine.low %v6685_v0, %v6695_v40  ;;  %v3305_v47 = vadd.f32 %v3251_v42, %v13750_v23  ;;  %2700 = vperm.xlu0 %11438, %v13774_v60   ;;  %v6713_v49 = vor.u32 %v6712_v11, %v13824_v63  ;;  %v10417_v30 = vrot.slane %v7263_v33, 9  ;;  %v13885_v40 = vld [vmem:[%s16266_s1 + $0x8] ss:$0 sm:$0xff] }
 0x2d8   : > { %v3252_v57 = vmul.f32 %v13869_v10, %v13707_v61  ;;  %10810 = vmatmul.mubr.msk.bf16.gmra.mrb[8].mxu1 %vm5199_vm5, %v10230_v31  ;;  %v4745_v62 = vld [vmem:[#allocation2 + $0x50] sm:$0x1]  ;;  %v4915_v23 = vsel %vm12338_vm4, %v13819_v19, %v13809_v59  ;;  %v4920_v24 = vrot.slane %v4919_v50, 4  ;;  %v6709_v5 = vsel %vm12338_vm4, %v6704_v45, %v13824_v63  ;;  %v3938_v0 = vpop.permute.xlu1 %3937  ;;  %v10093_v63 = vld [vmem:[%s11710_s17 + $0x149] sm:$0x3] }
 0x2d9   : > { %10945 = vmatprep.mubr.msk.bf16.mxu0 %vm5199_vm5, %v10383_v25  ;;  %v6545_v60 = vld [vmem:[#allocation2 + $0x50] sm:$0x1]  ;;  %v4922_v42 = vshll.u32 %v4745_v62, 16  ;;  %v7361_v11 = vrot.slane %v7359_v7, 4  ;;  %v5801_v33 = vrot.slane %v5799_v26, 4  ;;  %v3742_v55 = vadd.f32 %v3688_v41, %v3305_v47  ;;  %v13888_v19 = vpop.permute.xlu0 %3520  ;;  %v13892_v41 = vld [vmem:[%s11710_s17 + $0x152] sm:$0xff] }
 0x2da   : > { %v6716_v61 = vshll.u32 %v6545_v60, 16  ;;  %v4125_v59 = vmul.f32 %v13885_v40, %v3938_v0  ;;  %2705 = vperm.xlu1 %11439, %v10147_v46   ;;  %v7362_v50 = vrot.slane %v6545_v60, 5  ;;  %v5802_v31 = vrot.slane %v4745_v62, 5  ;;  %v13923_v60 = vld [vmem:[%s16267_s2] ss:$0 sm:$0xff] }
 0x2db   : > { %1851 = vperm.xlu0 %11438, %v9879_v44   ;;  %v4924_v25 = vrot.slane %v4922_v42, 5  ;;  %v6714_v45 = vrot.slane %v6713_v49, 4  ;;  %v10297_v6 = vrot.slane %v5710_v22, 9  ;;  %v13896_v47 = vsel %vm12881_vm10, %v10417_v30, %v7359_v7 }
 0x2dc   : > { %v6718_v21 = vrot.slane %v6716_v61, 5  ;;  %v4179_v36 = vadd.f32 %v4125_v59, %v3742_v55  ;;  %16736 = vst [vmem:[#allocation92_spill] sm:$0xff] %v13896_v47  ;;  %v13900_v0 = vsel %vm12881_vm10, %v7361_v11, %v7362_v50  ;;  %v13904_v46 = vsel %vm12881_vm10, %v5801_v33, %v5802_v31  ;;  %v13906_v44 = vpop.permute.xlu1 %2233  ;;  %v13937_v33 = vld [vmem:[%s16266_s1 + $0x5] ss:$0 sm:$0xff]  ;;  %v16741_v55 = vld [vmem:[#allocation102_spill] sm:$0xff] }
 0x2dd   : > { %16737 = vst [vmem:[#allocation7_spill] sm:$0xff] %v13900_v0  ;;  %16738 = vst [vmem:[#allocation8_spill] sm:$0xff] %v13904_v46  ;;  %v4925_v22 = vsel %vm12338_vm4, %v4920_v24, %v4924_v25  ;;  %v13916_v30 = vsel %vm12881_vm10, %v10297_v6, %v5799_v26  ;;  %v3689_v62 = vmul.f32 %v13855_v58, %v13821_v9  ;;  %v13926_v42 = vpop.permute.xlu0 %2223  ;;  %v11498_v6 = vld [vmem:[%s16266_s1 + $0x2] ss:$0 sm:$0xff]  ;;  %v16740_v26 = vld [vmem:[#allocation101_spill] sm:$0xff] }
 0x2de   : > { %v6719_v49 = vsel %vm12338_vm4, %v6714_v45, %v6718_v21  ;;  %16739 = vst [vmem:[#allocation55_spill] sm:$0xff] %v13916_v30  ;;  %v4240_v24 = vadd.f32 %v13923_v60, %v4179_v36  ;;  %3570 = vperm.xlu1 %11439, %v10093_v63   ;;  %v10231_v21 = vcombine.low %v4915_v23, %v4925_v22  ;;  %v13943_v23 = vld [vmem:[%s11710_s17 + $0x15a] sm:$0xff] }
 0x2df   : > { %v10384_v61 = vcombine.low %v6709_v5, %v6719_v49  ;;  %v1510_v11 = vmul.f32 %v11498_v6, %v16740_v26  ;;  %v1996_v9 = vadd.f32 %v13694_v39, %v13637_v29  ;;  %v2816_v36 = vmul.f32 %v13937_v33, %v13627_v12  ;;  %2715 = vperm.xlu0 %11438, %v13892_v41   ;;  %v13951_v29 = vld [vmem:[%s16266_s1 + $0x3] ss:$0 sm:$0xff]  ;;  %v16742_v39 = vld [vmem:[#allocation143_spill] sm:$0xff]  ;;  %v9931_v12 = vld [vmem:[%s11710_s17 + $0x149] sm:$0x3] }
 0x2e0   : > { %v1509_v59 = vmul.f32 %v11498_v6, %v16741_v55  ;;  %v1943_v50 = vmul.f32 %v13951_v29, %v16742_v39  ;;  %v3306_v31 = vadd.f32 %v3252_v57, %v2868_v56  ;;  %v4294_v63 = vmax.f32 %v4240_v24, 0.0  ;;  %10813 = vmatprep.mubr.msk.bf16.mxu1 %vm5199_vm5, %v10231_v21  ;;  %v3943_v56 = vpop.permute.xlu1 %3942  ;;  %v8105_v57 = vld [vmem:[#allocation2 + $0x40] sm:$0xf]  ;;  %v13972_v24 = vld [vmem:[%s16266_s1 + $0x4] ss:$0 sm:$0xff] }
 0x2e1   : > { %10946 = vmatmul.mubr.msk.bf16.gmra.mrb[8].mxu0 %vm5199_vm5, %v10384_v61  ;;  %v13960_v25 = vadd.f32 %v13666_v4, %v13529_v8  ;;  %v13964_v45 = vadd.f32 %v13670_v43, %v13562_v18  ;;  %v2433_v22 = vadd.f32 %v13721_v15, %v1996_v9  ;;  %v3254_v49 = vmul.f32 %v13869_v10, %v13737_v20  ;;  %v13979_v15 = vpop.permute.xlu0 %3088  ;;  %v8106_v20 = vld [vmem:[#allocation2 + $0x44] sm:$0x1]  ;;  %v8108_v21 = vld [vmem:[#allocation2 + $0x4c] sm:$0xf]  ;;  %v16743_v5 = vld [vmem:[#allocation103_spill] sm:$0xff] }
 0x2e2   : > { %v2380_v8 = vmul.f32 %v13972_v24, %v13534_v32  ;;  %v3743_v4 = vadd.f32 %v3689_v62, %v3306_v31  ;;  %v4382_v18 = vsel %vm4331_vm6, %v4294_v63, 0.0  ;;  %v4126_v43 = vmul.f32 %v13885_v40, %v3943_v56  ;;  %2720 = vperm.xlu1 %11439, %v13943_v23   ;;  %v9934_v62 = vld [vmem:[%s11710_s17 + $0x161] sm:$0x3]  ;;  %v8828_v63 = vld [vmem:[#allocation2 + $0x3c] sm:$0xe] }
 0x2e3   : > { %v13983_v61 = vadd.f32 %v1510_v11, %v13581_v14  ;;  %v2870_v26 = vadd.f32 %v2816_v36, %v2433_v22  ;;  %v3691_v9 = vmul.f32 %v13855_v58, %v13817_v53  ;;  %v10607_v32 = vpack.c.bf16 %v4382_v18, %v4382_v18  ;;  %2273 = vperm.xlu0 %11438, %v9931_v12   ;;  %v8109_v53 = vld [vmem:[#allocation2 + $0x50] sm:$0x1]  ;;  %v8829_v36 = vld [vmem:[#allocation2 + $0x48] sm:$0xe] }
 0x2e4   : > { %v13989_v55 = vadd.f32 %v1509_v59, %v13610_v3  ;;  %v1997_v39 = vadd.f32 %v1943_v50, %v13658_v28  ;;  %v4180_v31 = vadd.f32 %v4126_v43, %v3743_v4  ;;  %v8912_v56 = vrot.slane %v8105_v57, 5  ;;  %v13994_v14 = vpop.permute.xlu1 %2238  ;;  %v16744_v22 = vld [vmem:[#allocation104_spill] sm:$0xff] }
 0x2e5   : > { %v1512_v7 = vmul.f32 %v11498_v6, %v16743_v5  ;;  %v3308_v46 = vadd.f32 %v3254_v49, %v2870_v26  ;;  %4672 = vst.msk [vmem:[#allocation2 + $0x54] sm:$0xf] %vm4649_vm1, %v10607_v32  ;;  %v8915_v11 = vrot.slane %v8106_v20, 5  ;;  %v8919_v12 = vrot.slane %v8108_v21, 5  ;;  %v3953_v57 = vpop.permute.xlu0 %3952  ;;  %v10042_v4 = vld [vmem:[%s11710_s17 + $0x168] sm:$0xff] }
 0x2e6   : > { %v1511_v3 = vmul.f32 %v11498_v6, %v16744_v22  ;;  %v2434_v59 = vadd.f32 %v2380_v8, %v1997_v39  ;;  %v2817_v28 = vmul.f32 %v13937_v33, %v13651_v17  ;;  %v4241_v50 = vadd.f32 %v13923_v60, %v4180_v31  ;;  %2288 = vperm.xlu1 %11439, %v9934_v62   ;;  %v16750_v22 = vld [vmem:[#allocation142_spill] sm:$0xff] }
 0x2e7   : > { %v3745_v5 = vadd.f32 %v3691_v9, %v3308_v46  ;;  %v4128_v49 = vmul.f32 %v13885_v40, %v3953_v57  ;;  %3138 = vperm.xlu0 %11438, %v13679_v16   ;;  %v10536_v18 = vrot.slane %v8828_v63, 9  ;;  %v8914_v43 = vrot.slane %v8912_v56, 4  ;;  %v16747_v9 = vld [vmem:[#allocation141_spill] sm:$0xff] }
 0x2e8   : > { %v3255_v20 = vmul.f32 %v13869_v10, %v13757_v35  ;;  %v4295_v6 = vmax.f32 %v4241_v50, 0.0  ;;  %v10537_v8 = vrot.slane %v8829_v36, 9  ;;  %v8922_v21 = vrot.slane %v8109_v53, 5  ;;  %v14005_v17 = vpop.permute.xlu1 %3510  ;;  %v16752_v57 = vld [vmem:[#allocation145_spill] sm:$0xff] }
 0x2e9   : > { %v4182_v26 = vadd.f32 %v4128_v49, %v3745_v5  ;;  %v14009_v32 = vsel %vm12881_vm10, %v10536_v18, %v8912_v56  ;;  %v14013_v46 = vsel %vm12881_vm10, %v8914_v43, %v8915_v11  ;;  %v8921_v16 = vrot.slane %v8919_v12, 4  ;;  %v14017_v31 = vpop.permute.xlu0 %2655  ;;  %v16753_v5 = vld [vmem:[#allocation146_spill] sm:$0xff] }
 0x2ea   : > { %16745 = vst [vmem:[#allocation137_spill] sm:$0xff] %v14009_v32  ;;  %16746 = vst [vmem:[#allocation9_spill] sm:$0xff] %v14013_v46  ;;  %v1941_v62 = vmul.f32 %v13951_v29, %v16747_v9  ;;  %v2871_v35 = vadd.f32 %v2817_v28, %v2434_v59  ;;  %v10608_v39 = vpack.c.bf16 %v4295_v6, %v4295_v6  ;;  %3153 = vperm.xlu1 %11439, %v10042_v4   ;;  %v16751_v28 = vld [vmem:[#allocation144_spill] sm:$0xff] }
 0x2eb   : > { %v3692_v56 = vmul.f32 %v13855_v58, %v13888_v19  ;;  %v4243_v53 = vadd.f32 %v13923_v60, %v4182_v26  ;;  %3143 = vperm.xlu0 %11438, %v13700_v54   ;;  %v14027_v11 = vsel %vm12881_vm10, %v10537_v8, %v8919_v12  ;;  %v14031_v36 = vsel %vm12881_vm10, %v8921_v16, %v8922_v21  ;;  %v10148_v54 = vld [vmem:[%s11710_s17 + $0x14a] sm:$0x3] }
 0x2ec   : > { %16748 = vst [vmem:[#allocation56_spill] sm:$0xff] %v14027_v11  ;;  %16749 = vst [vmem:[#allocation36_spill] sm:$0xff] %v14031_v36  ;;  %v1944_v59 = vmul.f32 %v13951_v29, %v16750_v22  ;;  %v1946_v50 = vmul.f32 %v13951_v29, %v16751_v28  ;;  %v1945_v19 = vmul.f32 %v13951_v29, %v16752_v57  ;;  %v14047_v8 = vpop.permute.xlu1 %2660  ;;  %v16754_v16 = vld [vmem:[#allocation165_spill] sm:$0xff]  ;;  %v16756_v57 = vld [vmem:[#allocation35_spill] sm:$0xff] }
 0x2ed   : > { %4673 = vst.msk [vmem:[#allocation2 + $0x58] sm:$0xf] %vm4649_vm1, %v10608_v39  ;;  %v1948_v49 = vmul.f32 %v13951_v29, %v16753_v5  ;;  %v2378_v18 = vmul.f32 %v13972_v24, %v13662_v48  ;;  %v3309_v43 = vadd.f32 %v3255_v20, %v2871_v35  ;;  %v4297_v6 = vmax.f32 %v4243_v53, 0.0  ;;  %v16755_v39 = vld [vmem:[#allocation147_spill] sm:$0xff]  ;;  %v3958_v28 = vpop.permute.xlu0 %3957 }
 0x2ee   : > { %v14050_v21 = vadd.f32 %v1512_v7, %v13613_v38  ;;  %v1565_v26 = vadd.f32 %v1511_v3, %v13630_v37  ;;  %v1995_v9 = vadd.f32 %v1941_v62, %v16754_v16  ;;  %v1947_v22 = vmul.f32 %v13951_v29, %v16755_v39  ;;  %1856 = vperm.xlu1 %11439, %v10042_v4   ;;  %v10043_v7 = vld [vmem:[%s11710_s17 + $0x170] sm:$0xff]  ;;  %v16758_v62 = vld [vmem:[#allocation52_spill] sm:$0xff] }
 0x2ef   : > { %v2381_v48 = vmul.f32 %v13972_v24, %v16756_v57  ;;  %v3746_v20 = vadd.f32 %v3692_v56, %v3309_v43  ;;  %v4385_v35 = vsel %vm4331_vm6, %v4297_v6, 0.0  ;;  %v4129_v38 = vmul.f32 %v13885_v40, %v3958_v28  ;;  %4007 = vperm.xlu0 %11438, %v10148_v54   ;;  %v14062_v37 = vld [vmem:[#allocation2 + $0x54] sm:$0xf]  ;;  %v16759_v16 = vld [vmem:[#allocation89_spill] sm:$0xff] }
 0x2f0   : > { %16757 = vst [vmem:[#allocation43_spill] sm:$0xff] %v14062_v37  ;;  %v6546_v3 = vld [vmem:[#allocation2 + $0x54] sm:$0xf]  ;;  %v1998_v53 = vadd.f32 %v1944_v59, %v16758_v62  ;;  %v2000_v5 = vadd.f32 %v1946_v50, %v13960_v25  ;;  %v2815_v4 = vmul.f32 %v13937_v33, %v16759_v16  ;;  %v10610_v39 = vpack.c.bf16 %v4385_v35, %v4385_v35  ;;  %v9986_v57 = vld [vmem:[%s11710_s17 + $0x14a] sm:$0x3]  ;;  %v3526_v54 = vpop.permute.xlu1 %3525 }
 0x2f1   : > { %v1999_v56 = vadd.f32 %v1945_v19, %v13964_v45  ;;  %v2002_v43 = vadd.f32 %v1948_v49, %v13983_v61  ;;  %v2432_v6 = vadd.f32 %v2378_v18, %v1995_v9  ;;  %v4183_v28 = vadd.f32 %v4129_v38, %v3746_v20  ;;  %v16760_v45 = vld [vmem:[#allocation149_spill] sm:$0xff]  ;;  %v16761_v9 = vld [vmem:[#allocation131_spill] sm:$0xff] }
 0x2f2   : > { %4675 = vst.msk [vmem:[#allocation2 + $0x60] sm:$0xf] %vm4649_vm1, %v10610_v39  ;;  %v14072_v12 = vpop.permute.xlu0 %2670  ;;  %3158 = vperm.xlu1 %11439, %v10043_v7   ;;  %v4927_v59 = vshrl.u32 %v14062_v37, 16  ;;  %v4930_v25 = vshll.u32 %v14062_v37, 16  ;;  %v6721_v50 = vshrl.u32 %v6546_v3, 16  ;;  %v6724_v62 = vshll.u32 %v6546_v3, 16 }
 0x2f3   : > { %v14077_v35 = vadd.f32 %v1947_v22, %v13989_v55  ;;  %v1949_v61 = vmul.f32 %v13951_v29, %v16760_v45  ;;  %v2435_v19 = vadd.f32 %v2381_v48, %v1998_v53  ;;  %v4244_v49 = vadd.f32 %v13923_v60, %v4183_v28  ;;  %2710 = vperm.xlu0 %11438, %v9986_v57   ;;  %v16762_v28 = vld [vmem:[#allocation129_spill] sm:$0xff]  ;;  %v9989_v45 = vld [vmem:[%s11710_s17 + $0x162] sm:$0x3] }
 0x2f4   : > { %v2869_v18 = vadd.f32 %v2815_v4, %v2432_v6  ;;  %v2818_v20 = vmul.f32 %v13937_v33, %v16761_v9  ;;  %v3253_v38 = vmul.f32 %v13869_v10, %v13843_v51  ;;  %v2382_v3 = vmul.f32 %v13972_v24, %v13858_v27  ;;  %v2676_v16 = vpop.permute.xlu1 %2675 }
 0x2f5   : > { %v2385_v55 = vmul.f32 %v13972_v24, %v13906_v44  ;;  %v2383_v22 = vmul.f32 %v13972_v24, %v13926_v42  ;;  %v3690_v48 = vmul.f32 %v13855_v58, %v14005_v17  ;;  %v4298_v53 = vmax.f32 %v4244_v49, 0.0  ;;  %v16763_v49 = vld [vmem:[#allocation148_spill] sm:$0xff] }
 0x2f6   : > { %v14094_v4 = vpop.permute.xlu0 %2228  ;;  %1861 = vperm.xlu1 %11439, %v10043_v7   ;;  %v4929_v51 = vrot.slane %v4927_v59, 4  ;;  %v4932_v39 = vrot.slane %v4930_v25, 5  ;;  %v6723_v57 = vrot.slane %v6721_v50, 4  ;;  %v6726_v27 = vrot.slane %v6724_v62, 5  ;;  %v14109_v62 = vld [vmem:[%s11710_s17 + $0x180] sm:$0xff] }
 0x2f7   : > { %v3256_v44 = vmul.f32 %v13869_v10, %v13979_v15  ;;  %v2386_v6 = vmul.f32 %v13972_v24, %v13994_v14  ;;  %v2819_v42 = vmul.f32 %v13937_v33, %v14017_v31  ;;  %v10611_v17 = vpack.c.bf16 %v4298_v53, %v4298_v53  ;;  %3575 = vperm.xlu0 %11438, %v16762_v28   ;;  %v14114_v53 = vld [vmem:[#allocation2 + $0x58] sm:$0xf]  ;;  %v14116_v28 = vld [vmem:[#allocation2 + $0x54] sm:$0xe] }
 0x2f8   : > { %v14106_v7 = vmul.f32 %v13951_v29, %v16763_v49  ;;  %v2003_v59 = vadd.f32 %v1949_v61, %v1565_v26  ;;  %v2872_v25 = vadd.f32 %v2818_v20, %v2435_v19  ;;  %v3307_v50 = vadd.f32 %v3253_v38, %v2869_v18  ;;  %v3948_v31 = vpop.permute.xlu1 %3947  ;;  %16764 = vst [vmem:[#allocation57_spill] sm:$0xff] %v14114_v53  ;;  %v10097_v38 = vld [vmem:[%s11710_s17 + $0x169] sm:$0xff] }
 0x2f9   : > { %v2436_v15 = vadd.f32 %v2382_v3, %v1999_v56  ;;  %v2439_v9 = vadd.f32 %v2385_v55, %v2002_v43  ;;  %v2437_v63 = vadd.f32 %v2383_v22, %v2000_v5  ;;  %v2820_v14 = vmul.f32 %v13937_v33, %v14047_v8  ;;  %4676 = vst.msk [vmem:[#allocation2 + $0x64] sm:$0xf] %vm4649_vm1, %v10611_v17  ;;  %v14121_v43 = vld [vmem:[#allocation2 + $0x58] sm:$0xf]  ;;  %v14128_v3 = vld [vmem:[#allocation2 + $0x54] sm:$0xe] }
 0x2fa   : > { %v3744_v29 = vadd.f32 %v3690_v48, %v3307_v50  ;;  %v4127_v26 = vmul.f32 %v13885_v40, %v3948_v31  ;;  %v14119_v61 = vpop.permute.xlu0 %3093  ;;  %2725 = vperm.xlu1 %11439, %v9989_v45   ;;  %v4933_v56 = vor.u32 %v4932_v39, %v4929_v51  ;;  %v6727_v5 = vor.u32 %v6726_v27, %v6723_v57  ;;  %v14132_v51 = vld [vmem:[#allocation2 + $0x60] sm:$0xf] }
 0x2fb   : > { %v3310_v19 = vadd.f32 %v3256_v44, %v2872_v25  ;;  %v2440_v8 = vadd.f32 %v2386_v6, %v2003_v59  ;;  %v14123_v18 = vadd.f32 %v2819_v42, %v2436_v15  ;;  %v3693_v20 = vmul.f32 %v13855_v58, %v3526_v54  ;;  %1871 = vperm.xlu0 %11438, %v14109_v62   ;;  %v16766_v50 = vld [vmem:[#allocation132_spill] sm:$0xff] }
 0x2fc   : > { %v4181_v55 = vadd.f32 %v4127_v26, %v3744_v29  ;;  %v4936_v22 = vshll.u32 %v14114_v53, 16  ;;  %v4940_v48 = vshrl.u32 %v14114_v53, 16  ;;  %16765 = vst [vmem:[#allocation159_spill] sm:$0xff] %v14132_v51  ;;  %v10418_v39 = vrot.slane %v14116_v28, 9  ;;  %v14137_v27 = vpop.permute.xlu1 %3098  ;;  %v6549_v31 = vld [vmem:[#allocation2 + $0x60] sm:$0xf] }
 0x2fd   : > { %v14135_v57 = vadd.f32 %v2820_v14, %v2437_v63  ;;  %v6730_v54 = vshll.u32 %v14121_v43, 16  ;;  %v6734_v44 = vshrl.u32 %v14121_v43, 16  ;;  %v14146_v45 = vrot.slane %v4933_v56, 4  ;;  %v14158_v26 = vld [vmem:[%s11710_s17 + $0x188] sm:$0xff] }
 0x2fe   : > { %v4242_v42 = vadd.f32 %v13923_v60, %v4181_v55  ;;  %v14144_v17 = vpop.permute.xlu0 %2243  ;;  %3590 = vperm.xlu1 %11439, %v10097_v38   ;;  %v14148_v49 = vrot.slane %v6727_v5, 4  ;;  %v3747_v59 = vadd.f32 %v3693_v20, %v3310_v19  ;;  %v2822_v25 = vmul.f32 %v13937_v33, %v14072_v12 }
 0x2ff   : > { %3580 = vperm.xlu0 %11438, %v16766_v50   ;;  %v4951_v15 = vshrl.u32 %v14132_v51, 16  ;;  %v4954_v14 = vshll.u32 %v14132_v51, 16  ;;  %v2823_v28 = vmul.f32 %v13937_v33, %v2676_v16  ;;  %v14160_v56 = vrot.slane %v4936_v22, 5 }
 0x300   : > { %v4296_v29 = vmax.f32 %v4242_v42, 0.0  ;;  %v4942_v5 = vrot.slane %v4940_v48, 4  ;;  %v2384_v19 = vmul.f32 %v13972_v24, %v14094_v4  ;;  %v3963_v12 = vpop.permute.xlu1 %3962  ;;  %v14164_v20 = vrot.slane %v6730_v54, 5  ;;  %v14170_v22 = vld [vmem:[#allocation2 + $0x64] sm:$0xf]  ;;  %v10098_v54 = vld [vmem:[%s11710_s17 + $0x171] sm:$0xff] }
 0x301   : > { %v6736_v55 = vrot.slane %v6734_v44, 4  ;;  %v7366_v50 = vrot.slane %v14121_v43, 5  ;;  %v4130_v42 = vmul.f32 %v13885_v40, %v3963_v12  ;;  %16768 = vst [vmem:[#allocation46_spill] sm:$0xff] %v14170_v22  ;;  %v6745_v48 = vshrl.u32 %v6549_v31, 16 }
 0x302   : > { %v4384_v16 = vsel %vm4342_vm7, %v4296_v29, 0.0  ;;  %v3109_v63 = vpop.permute.xlu0 %3108  ;;  %2293 = vperm.xlu1 %11439, %v10097_v38   ;;  %v6748_v36 = vshll.u32 %v6549_v31, 16  ;;  %v14172_v11 = vadd.f32 %v2822_v25, %v2439_v9  ;;  %v4953_v44 = vrot.slane %v4951_v15, 4  ;;  %v10041_v29 = vld [vmem:[%s11710_s17 + $0x160] sm:$0x3] }
 0x303   : > { %v10609_v4 = vpack.c.bf16 %v4384_v16, %v4384_v16  ;;  %1876 = vperm.xlu0 %11438, %v14158_v26   ;;  %v4956_v43 = vrot.slane %v4954_v14, 5  ;;  %v14176_v46 = vadd.f32 %v2823_v28, %v2440_v8  ;;  %v4184_v32 = vadd.f32 %v4130_v42, %v3747_v59  ;;  %v14191_v8 = vld [vmem:[#allocation2 + $0x64] sm:$0xf] }
 0x304   : > { %v4943_v12 = vor.u32 %v4942_v5, %v14160_v56  ;;  %v14185_v9 = vadd.f32 %v2384_v19, %v14077_v35  ;;  %v14188_v25 = vpop.permute.xlu1 %3113  ;;  %v6737_v15 = vor.u32 %v6736_v55, %v14164_v20  ;;  %v14195_v59 = vsel %vm12881_vm10, %v10418_v39, %v7366_v50  ;;  %v14204_v55 = vld [vmem:[#allocation2 + $0x60] sm:$0xe] }
 0x305   : > { %4674 = vst.msk [vmem:[#allocation2 + $0x5c] sm:$0x1] %vm4652_vm0, %v10609_v4  ;;  %v3257_v31 = vmul.f32 %v13869_v10, %v14119_v61  ;;  %v4245_v35 = vadd.f32 %v13923_v60, %v4184_v32  ;;  %v6747_v5 = vrot.slane %v6745_v48, 4  ;;  %v6750_v19 = vrot.slane %v6748_v36, 5  ;;  %v14215_v48 = vld [vmem:[#allocation2 + $0x60] sm:$0xe] }
 0x306   : > { %v14202_v28 = vpop.permute.xlu0 %2665  ;;  %3595 = vperm.xlu1 %11439, %v10098_v54   ;;  %v4957_v16 = vor.u32 %v4956_v43, %v4953_v44  ;;  %v4960_v42 = vshll.u32 %v14170_v22, 16  ;;  %v7368_v4 = vrot.slane %v7366_v50, 4  ;;  %v3258_v32 = vmul.f32 %v13869_v10, %v14137_v27 }
 0x307   : > { %3148 = vperm.xlu0 %11438, %v10041_v29   ;;  %v4299_v61 = vmax.f32 %v4245_v35, 0.0  ;;  %v4964_v14 = vshrl.u32 %v14170_v22, 16  ;;  %v6754_v36 = vshll.u32 %v14191_v8, 16  ;;  %v4944_v38 = vrot.slane %v4943_v12, 4  ;;  %v10044_v12 = vld [vmem:[%s11710_s17 + $0x178] sm:$0x3] }
 0x308   : > { %v14217_v29 = vpop.permute.xlu1 %2680  ;;  %v6738_v39 = vrot.slane %v6737_v15, 4  ;;  %v6758_v44 = vshrl.u32 %v14191_v8, 16  ;;  %v14222_v43 = vadd.f32 %v3257_v31, %v14123_v18  ;;  %v6751_v30 = vor.u32 %v6750_v19, %v6747_v5  ;;  %v14230_v15 = vld [vmem:[%s11710_s17 + $0x181] sm:$0xff] }
 0x309   : > { %v4387_v27 = vsel %vm4342_vm7, %v4299_v61, 0.0  ;;  %v5806_v51 = vrot.slane %v14114_v53, 5  ;;  %v14232_v0 = vrot.slane %v4957_v16, 4  ;;  %v14234_v50 = vrot.slane %v4960_v42, 5 }
 0x30a   : > { %v3531_v35 = vpop.permute.xlu0 %3530  ;;  %2298 = vperm.xlu1 %11439, %v10098_v54   ;;  %v10612_v37 = vpack.c.bf16 %v4387_v27, %v4387_v27  ;;  %v14238_v31 = vadd.f32 %v3258_v32, %v14135_v57  ;;  %v3260_v54 = vmul.f32 %v13869_v10, %v3109_v63  ;;  %v4966_v61 = vrot.slane %v4964_v14, 4 }
 0x30b   : > { %4012 = vperm.xlu0 %11438, %v13892_v41   ;;  %v14241_v27 = vrot.slane %v6754_v36, 5  ;;  %v6760_v42 = vrot.slane %v6758_v44, 4  ;;  %v14244_v18 = vrot.slane %v6751_v30, 4  ;;  %v16769_v57 = vrot.slane %v14128_v3, 9 }
 0x30c   : > { %v4746_v5 = vld [vmem:[#allocation2 + $0x5c] sm:$0x1]  ;;  %4677 = vst.msk [vmem:[#allocation2 + $0x68] sm:$0x1] %vm4652_vm0, %v10612_v37  ;;  %v3546_v41 = vpop.permute.xlu1 %3545  ;;  %v5808_v14 = vrot.slane %v5806_v51, 4  ;;  %v14254_v37 = vld [vmem:[%s11710_s17 + $0x16a] sm:$0xff]  ;;  %v3314_v3 = vadd.f32 %v3260_v54, %v14172_v11  ;;  %v3694_v54 = vmul.f32 %v13855_v58, %v3531_v35  ;;  %v3261_v35 = vmul.f32 %v13869_v10, %v14188_v25 }
 0x30d   : > { %v6548_v19 = vld [vmem:[#allocation2 + $0x5c] sm:$0x1]  ;;  %v4946_v16 = vshll.u32 %v4746_v5, 16  ;;  %v14250_v63 = vsel %vm12881_vm10, %v16769_v57, %v5806_v51  ;;  %v5809_v32 = vrot.slane %v4746_v5, 5  ;;  %v7373_v30 = vrot.slane %v14191_v8, 5  ;;  %v14295_v57 = vld [vmem:[%s11710_s17 + $0x189] sm:$0xff] }
 0x30e   : > { %v6740_v53 = vshll.u32 %v6548_v19, 16  ;;  %v7369_v47 = vrot.slane %v6548_v19, 5  ;;  %v3536_v34 = vpop.permute.xlu0 %3535  ;;  %3163 = vperm.xlu1 %11439, %v10044_v12   ;;  %16770 = vst [vmem:[#allocation158_spill] sm:$0xff] %v14250_v63  ;;  %v4967_v12 = vor.u32 %v4966_v61, %v14234_v50  ;;  %v6761_v11 = vor.u32 %v6760_v42, %v14241_v27  ;;  %v16791_v51 = vld [vmem:[#allocation62_spill] sm:$0xff] }
 0x30f   : > { %2308 = vperm.xlu0 %11438, %v14230_v15   ;;  %v4948_v36 = vrot.slane %v4946_v16, 5  ;;  %v14267_v5 = vsel %vm12881_vm10, %v5808_v14, %v5809_v32  ;;  %v16772_v61 = vsel %vm12338_vm4, %v14146_v45, %v14160_v56  ;;  %v2821_v42 = vmul.f32 %v13937_v33, %v14202_v28  ;;  %v9882_v45 = vld [vmem:[%s11710_s17 + $0x178] sm:$0x3] }
 0x310   : > { %v6742_v1 = vrot.slane %v6740_v53, 5  ;;  %v14258_v44 = vsel %vm12881_vm10, %v7368_v4, %v7369_v47  ;;  %16771 = vst [vmem:[#allocation154_spill] sm:$0xff] %v14267_v5  ;;  %v3551_v53 = vpop.permute.xlu1 %3550  ;;  %v4963_v56 = vsel %vm12338_vm4, %v14232_v0, %v14234_v50  ;;  %v4968_v25 = vrot.slane %v4967_v12, 4 }
 0x311   : > { %v4949_v47 = vsel %vm12338_vm4, %v4944_v38, %v4948_v36  ;;  %v16774_v14 = vrot.slane %v14204_v55, 9  ;;  %v7375_v50 = vrot.slane %v7373_v30, 4 }
 0x312   : > { %v6743_v8 = vsel %vm12338_vm4, %v6738_v39, %v6742_v1  ;;  %v3104_v19 = vpop.permute.xlu0 %3103  ;;  %4027 = vperm.xlu1 %11439, %v14254_v37   ;;  %v10232_v16 = vcombine.low %v16772_v61, %v4949_v47  ;;  %v16773_v1 = vsel %vm12338_vm4, %v14148_v49, %v14164_v20  ;;  %v5813_v39 = vrot.slane %v14170_v22, 5  ;;  %v16796_v22 = vld [vmem:[#allocation67_spill] sm:$0xff] }
 0x313   : > { %v10385_v38 = vcombine.low %v16773_v1, %v6743_v8  ;;  %4017 = vperm.xlu0 %11438, %v13943_v23   ;;  %v6757_v49 = vsel %vm12338_vm4, %v14244_v18, %v14241_v27  ;;  %v3697_v20 = vmul.f32 %v13855_v58, %v3546_v41  ;;  %v4747_v23 = vld [vmem:[#allocation2 + $0x68] sm:$0x1]  ;;  %v14313_v0 = vsel %vm12881_vm10, %v16774_v14, %v7373_v30  ;;  %v10096_v1 = vld [vmem:[%s11710_s17 + $0x161] sm:$0x3] }
 0x314   : > { %10814 = vmatmul.mubr.msk.bf16.gmra.mrb[12].mxu1 %vm5199_vm5, %v10232_v16  ;;  %v6551_v28 = vld [vmem:[#allocation2 + $0x68] sm:$0x1]  ;;  %16775 = vst [vmem:[#allocation90_spill] sm:$0xff] %v14313_v0  ;;  %v14315_v32 = vpop.permute.xlu1 %3118  ;;  %v4970_v18 = vshll.u32 %v4747_v23, 16  ;;  %v6762_v27 = vrot.slane %v6761_v11, 4  ;;  %v3748_v47 = vadd.f32 %v3694_v54, %v14222_v43  ;;  %v3695_v8 = vmul.f32 %v13855_v58, %v3536_v34 }
 0x315   : > { %10949 = vmatprep.mubr.msk.bf16.mxu0 %vm5199_vm5, %v10385_v38  ;;  %v6764_v41 = vshll.u32 %v6551_v28, 16  ;;  %v7376_v36 = vrot.slane %v6551_v28, 5  ;;  %v5815_v55 = vrot.slane %v5813_v39, 4  ;;  %v5816_v61 = vrot.slane %v4747_v23, 5  ;;  %v14506_v43 = vld [vmem:[%s16266_s1 + $0x1] ss:$0 sm:$0xff] }
 0x316   : > { %v3968_v12 = vpop.permute.xlu0 %3967  ;;  %2313 = vperm.xlu1 %11439, %v14295_v57   ;;  %v4972_v30 = vrot.slane %v4970_v18, 5  ;;  %v3751_v28 = vadd.f32 %v3697_v20, %v3314_v3  ;;  %v16777_v34 = vrot.slane %v14215_v48, 9  ;;  %v3698_v20 = vmul.f32 %v13855_v58, %v3551_v53  ;;  %v14474_v48 = vld [vmem:[%s11710_s17 + $0x1a0] sm:$0xff] }
 0x317   : > { %v4131_v16 = vmul.f32 %v13885_v40, %v3968_v12  ;;  %1866 = vperm.xlu0 %11438, %v9882_v45   ;;  %v6766_v38 = vrot.slane %v6764_v41, 5  ;;  %v14324_v11 = vsel %vm12881_vm10, %v7375_v50, %v7376_v36  ;;  %v14336_v45 = vsel %vm12881_vm10, %v5815_v55, %v5816_v61  ;;  %v9885_v55 = vld [vmem:[%s11710_s17 + $0x190] sm:$0x3] }
 0x318   : > { %16776 = vst [vmem:[#allocation155_spill] sm:$0xff] %v14324_v11  ;;  %v14332_v54 = vsel %vm12881_vm10, %v16777_v34, %v5813_v39  ;;  %16779 = vst [vmem:[#allocation59_spill] sm:$0xff] %v14336_v45  ;;  %v3983_v14 = vpop.permute.xlu1 %3982  ;;  %v4973_v50 = vsel %vm12338_vm4, %v4968_v25, %v4972_v30  ;;  %v3259_v12 = vmul.f32 %v13869_v10, %v3104_v19 }
 0x319   : > { %16778 = vst [vmem:[#allocation58_spill] sm:$0xff] %v14332_v54  ;;  %v4185_v23 = vadd.f32 %v4131_v16, %v3748_v47  ;;  %v6767_v3 = vsel %vm12338_vm4, %v6762_v27, %v6766_v38  ;;  %v4134_v39 = vmul.f32 %v13885_v40, %v3983_v14  ;;  %v10233_v41 = vcombine.low %v4963_v56, %v4973_v50  ;;  %v8830_v38 = vld [vmem:[#allocation2 + $0x54] sm:$0xe]  ;;  %v16794_v54 = vld [vmem:[#allocation61_spill] sm:$0xff] }
 0x31a   : > { %v3973_v18 = vpop.permute.xlu0 %3972  ;;  %3585 = vperm.xlu1 %11439, %v10096_v1   ;;  %v10386_v36 = vcombine.low %v6757_v49, %v6767_v3  ;;  %v3749_v47 = vadd.f32 %v3695_v8, %v14238_v31  ;;  %v2004_v53 = vadd.f32 %v14106_v7, %v14050_v21  ;;  %v3315_v61 = vadd.f32 %v3261_v35, %v14176_v46  ;;  %v10153_v31 = vld [vmem:[%s11710_s17 + $0x172] sm:$0xff] }
 0x31b   : > { %v4246_v25 = vadd.f32 %v13923_v60, %v4185_v23  ;;  %v4132_v27 = vmul.f32 %v13885_v40, %v3973_v18  ;;  %2730 = vperm.xlu0 %11438, %v14254_v37   ;;  %v4188_v16 = vadd.f32 %v4134_v39, %v3751_v28  ;;  %10817 = vmatprep.mubr.msk.bf16.mxu1 %vm5199_vm5, %v10233_v41  ;;  %v8111_v1 = vld [vmem:[#allocation2 + $0x58] sm:$0xf]  ;;  %v8112_v39 = vld [vmem:[#allocation2 + $0x5c] sm:$0x1]  ;;  %v10538_v18 = vrot.slane %v8830_v38, 9 }
 0x31c   : > { %10950 = vmatmul.mubr.msk.bf16.gmra.mrb[12].mxu0 %vm5199_vm5, %v10386_v36  ;;  %v2387_v19 = vmul.f32 %v13972_v24, %v14144_v17  ;;  %v2875_v56 = vadd.f32 %v2821_v42, %v14185_v9  ;;  %v3988_v8 = vpop.permute.xlu1 %3987  ;;  %v2824_v21 = vmul.f32 %v13937_v33, %v14217_v29  ;;  %v3752_v46 = vadd.f32 %v3698_v20, %v3315_v61  ;;  %v14370_v42 = vld [vmem:[%s11710_s17 + $0x182] sm:$0xff] }
 0x31d   : > { %v4300_v49 = vmax.f32 %v4246_v25, 0.0  ;;  %v4186_v37 = vadd.f32 %v4132_v27, %v3749_v47  ;;  %v4249_v7 = vadd.f32 %v13923_v60, %v4188_v16  ;;  %v4135_v35 = vmul.f32 %v13885_v40, %v3988_v8  ;;  %v14382_v61 = vld [vmem:[#allocation2 + $0x64] sm:$0xf] }
 0x31e   : > { %v3541_v30 = vpop.permute.xlu0 %3540  ;;  %1881 = vperm.xlu1 %11439, %v9885_v55   ;;  %v3313_v28 = vadd.f32 %v3259_v12, %v2875_v56  ;;  %v8926_v23 = vrot.slane %v8111_v1, 5  ;;  %v2441_v14 = vadd.f32 %v2387_v19, %v2004_v53  ;;  %v3262_v50 = vmul.f32 %v13869_v10, %v14315_v32  ;;  %v9937_v53 = vld [vmem:[%s11710_s17 + $0x179] sm:$0x3] }
 0x31f   : > { %v4388_v24 = vsel %vm4331_vm6, %v4300_v49, 0.0  ;;  %v4247_v17 = vadd.f32 %v13923_v60, %v4186_v37  ;;  %v3696_v9 = vmul.f32 %v13855_v58, %v3541_v30  ;;  %4032 = vperm.xlu0 %11438, %v10153_v31   ;;  %v4303_v29 = vmax.f32 %v4249_v7, 0.0  ;;  %v10099_v56 = vld [vmem:[%s11710_s17 + $0x179] sm:$0x3] }
 0x320   : > { %v10613_v33 = vpack.c.bf16 %v4388_v24, %v4388_v24  ;;  %v4189_v34 = vadd.f32 %v4135_v35, %v3752_v46  ;;  %v3978_v20 = vpop.permute.xlu1 %3977  ;;  %v2878_v10 = vadd.f32 %v2824_v21, %v2441_v14  ;;  %v8928_v49 = vrot.slane %v8926_v23, 4  ;;  %v8115_v21 = vld [vmem:[#allocation2 + $0x68] sm:$0x1] }
 0x321   : > { %v4301_v3 = vmax.f32 %v4247_v17, 0.0  ;;  %v4391_v41 = vsel %vm4331_vm6, %v4303_v29, 0.0  ;;  %v3750_v47 = vadd.f32 %v3696_v9, %v3313_v28  ;;  %v4133_v12 = vmul.f32 %v13885_v40, %v3978_v20  ;;  %v14404_v9 = vld [vmem:[%s11710_s17 + $0x18a] sm:$0xff] }
 0x322   : > { %4678 = vst.msk [vmem:[#allocation2 + $0x6c] sm:$0xf] %vm4649_vm1, %v10613_v33  ;;  %v4250_v36 = vadd.f32 %v13923_v60, %v4189_v34  ;;  %v3556_v25 = vpop.permute.xlu0 %3555  ;;  %2745 = vperm.xlu1 %11439, %v14370_v42   ;;  %v10616_v32 = vpack.c.bf16 %v4391_v41, %v4391_v41  ;;  %v8929_v37 = vrot.slane %v8112_v39, 5  ;;  %v3316_v8 = vadd.f32 %v3262_v50, %v2878_v10 }
 0x323   : > { %v10614_v27 = vpack.c.bf16 %v4301_v3, %v4301_v3  ;;  %v3699_v55 = vmul.f32 %v13855_v58, %v3556_v25  ;;  %2735 = vperm.xlu0 %11438, %v10153_v31   ;;  %v4187_v19 = vadd.f32 %v4133_v12, %v3750_v47  ;;  %v14391_v58 = vsel %vm12881_vm10, %v10538_v18, %v8926_v23  ;;  %v10151_v12 = vld [vmem:[%s11710_s17 + $0x162] sm:$0x3] }
 0x324   : > { %v4304_v16 = vmax.f32 %v4250_v36, 0.0  ;;  %4681 = vst.msk [vmem:[#allocation2 + $0x78] sm:$0xf] %vm4649_vm1, %v10616_v32  ;;  %16780 = vst [vmem:[#allocation60_spill] sm:$0xff] %v14391_v58  ;;  %v14396_v35 = vsel %vm12881_vm10, %v8928_v49, %v8929_v37  ;;  %v16335_v30 = vrot.slane %v14382_v61, 5  ;;  %v8936_v33 = vrot.slane %v8115_v21, 5 }
 0x325   : > { %4679 = vst.msk [vmem:[#allocation2 + $0x70] sm:$0xf] %vm4649_vm1, %v10614_v27  ;;  %v14387_v1 = vpop.permute.xlu1 %1816  ;;  %v4248_v46 = vadd.f32 %v13923_v60, %v4187_v19  ;;  %16781 = vst [vmem:[#allocation134_spill] sm:$0xff] %v14396_v35  ;;  %v3753_v38 = vadd.f32 %v3699_v55, %v3316_v8  ;;  %v9940_v36 = vld [vmem:[%s11710_s17 + $0x191] sm:$0x3]  ;;  %v14441_v8 = vld [vmem:[%s11710_s17 + $0x198] sm:$0xff] }
 0x326   : > { %v10617_v31 = vpack.c.bf16 %v4304_v16, %v4304_v16  ;;  %v3993_v7 = vpop.permute.xlu0 %3992  ;;  %2303 = vperm.xlu1 %11439, %v9937_v53   ;;  %v8935_v39 = vrot.slane %v16335_v30, 4  ;;  %v1076_v30 = vmul.f32 %v14506_v43, %v16791_v51 }
 0x327   : > { %v4136_v28 = vmul.f32 %v13885_v40, %v3993_v7  ;;  %3600 = vperm.xlu0 %11438, %v10099_v56   ;;  %v4302_v17 = vmax.f32 %v4248_v46, 0.0 }
 0x328   : > { %4682 = vst.msk [vmem:[#allocation2 + $0x7c] sm:$0xf] %vm4649_vm1, %v10617_v31  ;;  %v14427_v32 = vsel %vm12881_vm10, %v8935_v39, %v8936_v33  ;;  %v10154_v39 = vld [vmem:[%s11710_s17 + $0x17a] sm:$0x3] }
 0x329   : > { %v4190_v29 = vadd.f32 %v4136_v28, %v3753_v38  ;;  %v14406_v34 = vpop.permute.xlu1 %2253  ;;  %v14408_v23 = vld [vmem:[#allocation2 + $0x6c] sm:$0xf]  ;;  %v4390_v40 = vsel %vm4342_vm7, %v4302_v17, 0.0  ;;  %16784 = vst [vmem:[#allocation94_spill] sm:$0xff] %v14427_v32 }
 0x32a   : > { %16782 = vst [vmem:[#allocation91_spill] sm:$0xff] %v14408_v23  ;;  %v6552_v14 = vld [vmem:[#allocation2 + $0x6c] sm:$0xf]  ;;  %v14412_v50 = vpop.permute.xlu0 %2248  ;;  %3168 = vperm.xlu1 %11439, %v14109_v62   ;;  %v4975_v3 = vshrl.u32 %v14408_v23, 16  ;;  %v4978_v20 = vshll.u32 %v14408_v23, 16  ;;  %v10615_v18 = vpack.c.bf16 %v4390_v40, %v4390_v40 }
 0x32b   : > { %v4251_v41 = vadd.f32 %v13923_v60, %v4190_v29  ;;  %2750 = vperm.xlu0 %11438, %v14404_v9   ;;  %v6769_v47 = vshrl.u32 %v6552_v14, 16  ;;  %v6772_v49 = vshll.u32 %v6552_v14, 16  ;;  %v14443_v46 = vld [vmem:[#allocation2 + $0x78] sm:$0xf]  ;;  %v10047_v23 = vld [vmem:[%s11710_s17 + $0x190] sm:$0x3] }
 0x32c   : > { %v14423_v25 = vld [vmem:[#allocation2 + $0x70] sm:$0xf]  ;;  %v4977_v10 = vrot.slane %v4975_v3, 4  ;;  %v4980_v62 = vrot.slane %v4978_v20, 5  ;;  %4680 = vst.msk [vmem:[#allocation2 + $0x74] sm:$0x1] %vm4652_vm0, %v10615_v18 }
 0x32d   : > { %16783 = vst [vmem:[#allocation93_spill] sm:$0xff] %v14423_v25  ;;  %v4305_v27 = vmax.f32 %v4251_v41, 0.0  ;;  %v14430_v55 = vpop.permute.xlu1 %2685  ;;  %v4984_v60 = vshll.u32 %v14423_v25, 16  ;;  %v4988_v53 = vshrl.u32 %v14423_v25, 16  ;;  %v14436_v19 = vld [vmem:[#allocation2 + $0x70] sm:$0xf] }
 0x32e   : > { %v14434_v16 = vpop.permute.xlu0 %1821  ;;  %2318 = vperm.xlu1 %11439, %v9940_v36   ;;  %v6771_v56 = vrot.slane %v6769_v47, 4  ;;  %16785 = vst [vmem:[#allocation12_spill] sm:$0xff] %v14443_v46  ;;  %v4981_v38 = vor.u32 %v4980_v62, %v4977_v10  ;;  %v6774_v28 = vrot.slane %v6772_v49, 5  ;;  %v6778_v33 = vshll.u32 %v14436_v19, 16  ;;  %v9992_v40 = vld [vmem:[%s11710_s17 + $0x17a] sm:$0x3] }
 0x32f   : > { %v4393_v37 = vsel %vm4342_vm7, %v4305_v27, 0.0  ;;  %4022 = vperm.xlu0 %11438, %v10151_v12   ;;  %v4986_v21 = vrot.slane %v4984_v60, 5  ;;  %v4990_v31 = vrot.slane %v4988_v53, 4  ;;  %v6782_v29 = vshrl.u32 %v14436_v19, 16  ;;  %v14457_v47 = vld [vmem:[#allocation2 + $0x7c] sm:$0xf] }
 0x330   : > { %v10618_v7 = vpack.c.bf16 %v4393_v37, %v4393_v37  ;;  %v6775_v3 = vor.u32 %v6774_v28, %v6771_v56  ;;  %v4999_v20 = vshrl.u32 %v14443_v46, 16  ;;  %v6780_v41 = vrot.slane %v6778_v33, 5  ;;  %16786 = vst [vmem:[#allocation95_spill] sm:$0xff] %v14457_v47  ;;  %v16829_v32 = vld [vmem:[#allocation109_spill] sm:$0xff] }
 0x331   : > { %v14445_v17 = vpop.permute.xlu1 %2258  ;;  %v4991_v18 = vor.u32 %v4990_v31, %v4986_v21  ;;  %v6784_v36 = vrot.slane %v6782_v29, 4  ;;  %v4982_v10 = vrot.slane %v4981_v38, 4  ;;  %v6555_v31 = vld [vmem:[#allocation2 + $0x78] sm:$0xf]  ;;  %v5002_v38 = vshll.u32 %v14443_v46, 16 }
 0x332   : > { %4683 = vst.msk [vmem:[#allocation2 + $0x80] sm:$0x1] %vm4652_vm0, %v10618_v7  ;;  %v14450_v14 = vpop.permute.xlu0 %2690  ;;  %3183 = vperm.xlu1 %11439, %v14441_v8   ;;  %v6776_v27 = vrot.slane %v6775_v3, 4  ;;  %v5001_v37 = vrot.slane %v4999_v20, 4  ;;  %v5008_v28 = vshll.u32 %v14457_v47, 16 }
 0x333   : > { %3173 = vperm.xlu0 %11438, %v14158_v26   ;;  %v14459_v12 = vld [vmem:[#allocation2 + $0x74] sm:$0x1]  ;;  %v6785_v56 = vor.u32 %v6784_v36, %v6780_v41  ;;  %v4992_v33 = vrot.slane %v4991_v18, 4  ;;  %v4987_v36 = vsel %vm12338_vm4, %v4982_v10, %v4986_v21  ;;  %v5004_v4 = vrot.slane %v5002_v38, 5  ;;  %v16789_v10 = vld [vmem:[#allocation17_spill] sm:$0xff] }
 0x334   : > { %v14461_v62 = vld [vmem:[#allocation2 + $0x74] sm:$0x1]  ;;  %v4994_v26 = vshll.u32 %v14459_v12, 16  ;;  %v6781_v20 = vsel %vm12338_vm4, %v6776_v27, %v6780_v41  ;;  %v6793_v21 = vshrl.u32 %v6555_v31, 16  ;;  %v14494_v41 = vld [vmem:[%s16266_s1] ss:$0 sm:$0xff] }
 0x335   : > { %v14465_v53 = vpop.permute.xlu1 %1826  ;;  %v6788_v49 = vshll.u32 %v14461_v62, 16  ;;  %v6786_v3 = vrot.slane %v6785_v56, 4  ;;  %v5010_v56 = vrot.slane %v5008_v28, 5  ;;  %v640_v27 = vmul.f32 %v14494_v41, %v16789_v10  ;;  %v9995_v10 = vld [vmem:[%s11710_s17 + $0x192] sm:$0x3] }
 0x336   : > { %16787 = vst [vmem:[#allocation44_spill] sm:$0xff] %v14465_v53  ;;  %v14469_v7 = vpop.permute.xlu0 %3123  ;;  %2740 = vperm.xlu1 %11439, %v9992_v40   ;;  %v4996_v29 = vrot.slane %v4994_v26, 5  ;;  %v5012_v40 = vshrl.u32 %v14457_v47, 16  ;;  %v16797_v53 = vld [vmem:[#allocation68_spill] sm:$0xff] }
 0x337   : > { %4037 = vperm.xlu0 %11438, %v10154_v39   ;;  %v6790_v24 = vrot.slane %v6788_v49, 5  ;;  %v14489_v49 = vld [vmem:[#allocation2 + $0x7c] sm:$0xf]  ;;  %v1082_v6 = vmul.f32 %v14506_v43, %v16797_v53 }
 0x338   : > { %v4997_v39 = vsel %vm12338_vm4, %v4992_v33, %v4996_v29  ;;  %v5005_v29 = vor.u32 %v5004_v4, %v5001_v37  ;;  %v5014_v35 = vrot.slane %v5012_v40, 4  ;;  %v6806_v45 = vshrl.u32 %v14489_v49, 16 }
 0x339   : > { %v14481_v60 = vpop.permute.xlu1 %1831  ;;  %v6791_v18 = vsel %vm12338_vm4, %v6786_v3, %v6790_v24  ;;  %v14487_v26 = vld [vmem:[#allocation2 + $0x80] sm:$0x1]  ;;  %v10234_v24 = vcombine.low %v4987_v36, %v4997_v39  ;;  %v16790_v3 = vld [vmem:[#allocation18_spill] sm:$0xff]  ;;  %v16792_v36 = vld [vmem:[#allocation24_spill] sm:$0xff]  ;;  %v6796_v39 = vshll.u32 %v6555_v31, 16 }
 0x33a   : > { %16788 = vst [vmem:[#allocation135_spill] sm:$0xff] %v14481_v60  ;;  %v14498_v38 = vpop.permute.xlu0 %3128  ;;  %3605 = vperm.xlu1 %11439, %v14230_v15   ;;  %v10387_v33 = vcombine.low %v6781_v20, %v6791_v18  ;;  %v639_v28 = vmul.f32 %v14494_v41, %v16790_v3  ;;  %v5018_v15 = vshll.u32 %v14487_v26, 16  ;;  %v645_v4 = vmul.f32 %v14494_v41, %v16792_v36  ;;  %v14517_v37 = vld [vmem:[#allocation2 + $0x80] sm:$0x1] }
 0x33b   : > { %3188 = vperm.xlu0 %11438, %v14474_v48   ;;  %10818 = vmatmul.mubr.msk.bf16.gmra.mrb[16].mxu1 %vm5199_vm5, %v10234_v24  ;;  %16793 = vst [vmem:[#allocation86_spill] sm:$0xff] %v14517_v37  ;;  %v6795_v20 = vrot.slane %v6793_v21, 4  ;;  %v6802_v18 = vshll.u32 %v14489_v49, 16  ;;  %v5006_v3 = vrot.slane %v5005_v29, 4  ;;  %v5015_v40 = vor.u32 %v5014_v35, %v5010_v56  ;;  %v14528_v24 = vld [vmem:[%s16266_s1 + $0x2] ss:$0 sm:$0xff] }
 0x33c   : > { %10953 = vmatprep.mubr.msk.bf16.mxu0 %vm5199_vm5, %v10387_v33  ;;  %v5020_v58 = vrot.slane %v5018_v15, 5  ;;  %v1077_v36 = vmul.f32 %v14506_v43, %v16794_v54  ;;  %v16795_v21 = vld [vmem:[#allocation106_spill] sm:$0xff]  ;;  %v6798_v29 = vrot.slane %v6796_v39, 5  ;;  %v1130_v15 = vadd.f32 %v1076_v30, %v639_v28 }
 0x33d   : > { %v14520_v51 = vpop.permute.xlu1 %2695  ;;  %v1513_v31 = vmul.f32 %v14528_v24, %v16795_v21  ;;  %v6804_v35 = vrot.slane %v6802_v18, 5  ;;  %v5016_v5 = vrot.slane %v5015_v40, 4  ;;  %v6808_v63 = vrot.slane %v6806_v45, 4  ;;  %v14542_v21 = vld [vmem:[%s16266_s1 + $0x3] ss:$0 sm:$0xff]  ;;  %v16799_v40 = vld [vmem:[#allocation105_spill] sm:$0xff] }
 0x33e   : > { %v1842_v33 = vpop.permute.xlu0 %1841  ;;  %3610 = vperm.xlu1 %11439, %v14295_v57   ;;  %v6812_v54 = vshll.u32 %v14517_v37, 16  ;;  %v1083_v60 = vmul.f32 %v14506_v43, %v16796_v22  ;;  %v16798_v57 = vld [vmem:[#allocation150_spill] sm:$0xff]  ;;  %v6799_v28 = vor.u32 %v6798_v29, %v6795_v20  ;;  %v5011_v45 = vsel %vm12338_vm4, %v5006_v3, %v5010_v56  ;;  %v11443_v56 = vld [vmem:[%s16268_s3] sm:$0xff]  }
 0x33f   : > { %2755 = vperm.xlu0 %11438, %v9995_v10   ;;  %v1951_v30 = vmul.f32 %v14542_v21, %v16798_v57  ;;  %v14547_v10 = vld [vmem:[%s11710_s17 + $0x199] sm:$0xff]  ;;  %v5021_v22 = vsel %vm12338_vm4, %v5016_v5, %v5020_v58  ;;  %v6809_v39 = vor.u32 %v6808_v63, %v6804_v35  ;;  %v1514_v11 = vmul.f32 %v14528_v24, %v16799_v40  ;;  %v16801_v63 = vld [vmem:[#allocation112_spill] sm:$0xff] }
 0x340   : > { %v6814_v18 = vrot.slane %v6812_v54, 5  ;;  %v1567_v0 = vadd.f32 %v1513_v31, %v1130_v15  ;;  %v10235_v37 = vcombine.low %v5011_v45, %v5021_v22  ;;  %v6800_v57 = vrot.slane %v6799_v28, 4  ;;  %v16800_v3 = vld [vmem:[#allocation23_spill] sm:$0xff]  ;;  %v14567_v29 = vld [vmem:[%s16266_s1 + $0x4] ss:$0 sm:$0xff]  ;;  %10833 = vmatprep.subr.bf16.mxu1 %v11443_v56 }
 0x341   : > { %v14553_v53 = vpop.permute.xlu1 %1846  ;;  %v646_v5 = vmul.f32 %v14494_v41, %v16800_v3  ;;  %v1519_v58 = vmul.f32 %v14528_v24, %v16801_v63  ;;  %v2388_v31 = vmul.f32 %v14567_v29, %v14412_v50  ;;  %v6810_v15 = vrot.slane %v6809_v39, 4  ;;  %v14574_v45 = vld [vmem:[%s11710_s17 + $0x1a1] sm:$0xff]  ;;  %10834 = vmatpush3.bf16.msra.mxu1 %v11443_v56 }
 0x342   : > { %v3561_v20 = vpop.permute.xlu0 %3560  ;;  %3178 = vperm.xlu1 %11439, %v10047_v23   ;;  %v1131_v23 = vadd.f32 %v1077_v36, %v640_v27  ;;  %v1136_v54 = vadd.f32 %v1082_v6, %v645_v4  ;;  %v2005_v28 = vadd.f32 %v1951_v30, %v1567_v0  ;;  %10821 = vmatprep.mubr.msk.bf16.mxu1 %vm5199_vm5, %v10235_v37  ;;  %v14579_v22 = vld [vmem:[%s16266_s1 + $0x5] ss:$0 sm:$0xff]  ;;  %v5820_v56 = vrot.slane %v14423_v25, 5 }
 0x343   : > { %3620 = vperm.xlu0 %11438, %v14547_v10   ;;  %v2825_v40 = vmul.f32 %v14579_v22, %v14430_v55  ;;  %v1957_v50 = vmul.f32 %v14542_v21, %v1842_v33  ;;  %v6805_v27 = vsel %vm12338_vm4, %v6800_v57, %v6804_v35  ;;  %v6815_v6 = vsel %vm12338_vm4, %v6810_v15, %v6814_v18  ;;  %v5713_v18 = vld [vmem:[#allocation2 + $0x6c] sm:$0xe]  ;;  %v16802_v57 = vld [vmem:[#allocation111_spill] sm:$0xff]  ;;  %v16828_v35 = vld [vmem:[#allocation70_spill] sm:$0xff] }
 0x344   : > { %v1137_v4 = vadd.f32 %v1083_v60, %v646_v5  ;;  %v1568_v37 = vadd.f32 %v1514_v11, %v1131_v23  ;;  %v10388_v36 = vcombine.low %v6805_v27, %v6815_v6  ;;  %v1573_v55 = vadd.f32 %v1519_v58, %v1136_v54  ;;  %v14603_v11 = vld [vmem:[%s16266_s1 + $0x6] ss:$0 sm:$0xff]  ;;  %v5714_v5 = vld [vmem:[#allocation2 + $0x78] sm:$0xe]  ;;  %v14620_v27 = vld [vmem:[%s16266_s1 + $0x7] ss:$0 sm:$0xff] }
 0x345   : > { %v14588_v0 = vpop.permute.xlu1 %3565  ;;  %v1952_v33 = vmul.f32 %v14542_v21, %v14387_v1  ;;  %v2442_v39 = vadd.f32 %v2388_v31, %v2005_v28  ;;  %v1520_v60 = vmul.f32 %v14528_v24, %v16802_v57  ;;  %v10050_v1 = vld [vmem:[%s11710_s17 + $0x1a8] sm:$0x3]  ;;  %v5823_v3 = vrot.slane %v14459_v12, 5  ;;  %v16803_v31 = vld [vmem:[#allocation81_spill] sm:$0xff]  ;;  %v16804_v15 = vld [vmem:[#allocation83_spill] sm:$0xff] }
 0x346   : > { %v14590_v30 = vpop.permute.xlu0 %2263  ;;  %4042 = vperm.xlu1 %11439, %v14370_v42   ;;  %v3263_v42 = vmul.f32 %v14603_v11, %v14469_v7  ;;  %10954 = vmatmul.mubr.msk.bf16.gmra.mrb[16].mxu0 %vm5199_vm5, %v10388_v36  ;;  %v2011_v58 = vadd.f32 %v1957_v50, %v1573_v55  ;;  %v16805_v23 = vcombine.low %v16803_v31, %v16804_v15  ;;  %v5827_v28 = vrot.slane %v14457_v47, 5  ;;  %v16859_v47 = vld [vmem:[#allocation135_spill] sm:$0xff] }
 0x347   : > { %3625 = vperm.xlu0 %11438, %v14574_v45   ;;  %v2879_v63 = vadd.f32 %v2825_v40, %v2442_v39  ;;  %v5830_v7 = vrot.slane %v14487_v26, 5  ;;  %v3700_v12 = vmul.f32 %v14620_v27, %v3561_v20  ;;  %v10300_v6 = vrot.slane %v5713_v18, 9  ;;  %v10102_v39 = vld [vmem:[%s11710_s17 + $0x191] sm:$0x3]  ;;  %v14633_v20 = vld [vmem:[%s11710_s17 + $0x19a] sm:$0xff] }
 0x348   : > { %10971 = vmatprep.mubr.msk.bf16.mxu0 %vm5199_vm5, %v16805_v23  ;;  %v5822_v36 = vrot.slane %v5820_v56, 4  ;;  %v2006_v55 = vadd.f32 %v1952_v33, %v1568_v37  ;;  %v2389_v26 = vmul.f32 %v14567_v29, %v14406_v34  ;;  %v10301_v57 = vrot.slane %v5714_v5, 9 }
 0x349   : > { %v2279_v54 = vpop.permute.xlu1 %2278  ;;  %v5829_v31 = vrot.slane %v5827_v28, 4  ;;  %v3317_v15 = vadd.f32 %v3263_v42, %v2879_v63  ;;  %v2826_v34 = vmul.f32 %v14579_v22, %v14450_v14  ;;  %v14660_v14 = vld [vmem:[%s16266_s1 + $0x8] ss:$0 sm:$0xff] }
 0x34a   : > { %v2394_v40 = vmul.f32 %v14567_v29, %v2279_v54  ;;  %v14624_v50 = vpop.permute.xlu0 %2268  ;;  %4047 = vperm.xlu1 %11439, %v14404_v9   ;;  %v14637_v54 = vsel %vm12881_vm10, %v10300_v6, %v5820_v56  ;;  %v14641_v9 = vsel %vm12881_vm10, %v5822_v36, %v5823_v3  ;;  %v14649_v18 = vsel %vm12881_vm10, %v10301_v57, %v5827_v28  ;;  %v10105_v28 = vld [vmem:[%s11710_s17 + $0x1a9] sm:$0x3] }
 0x34b   : > { %3193 = vperm.xlu0 %11438, %v10050_v1   ;;  %16806 = vst [vmem:[#allocation96_spill] sm:$0xff] %v14637_v54  ;;  %16807 = vst [vmem:[#allocation97_spill] sm:$0xff] %v14641_v9  ;;  %v14653_v42 = vsel %vm12881_vm10, %v5829_v31, %v5830_v7  ;;  %v1958_v1 = vmul.f32 %v14542_v21, %v14553_v53  ;;  %v3754_v56 = vadd.f32 %v3700_v12, %v3317_v15  ;;  %v16810_v12 = vld [vmem:[#allocation42_spill] sm:$0xff]  ;;  %v14676_v57 = vld [vmem:[%s11710_s17 + $0x1a2] sm:$0xff] }
 0x34c   : > { %v14630_v23 = vadd.f32 %v2394_v40, %v2011_v58  ;;  %16808 = vst [vmem:[#allocation98_spill] sm:$0xff] %v14649_v18  ;;  %16809 = vst [vmem:[#allocation47_spill] sm:$0xff] %v14653_v42  ;;  %v2443_v58 = vadd.f32 %v2389_v26, %v2006_v55  ;;  %v1574_v7 = vadd.f32 %v1520_v60, %v1137_v4  ;;  %v16811_v40 = vld [vmem:[#allocation125_spill] sm:$0xff]  ;;  %v16813_v15 = vld [vmem:[#allocation160_spill] sm:$0xff] }
 0x34d   : > { %v3998_v37 = vpop.permute.xlu1 %3997  ;;  %v3264_v53 = vmul.f32 %v14603_v11, %v14498_v38  ;;  %v16812_v6 = vcombine.low %v16810_v12, %v16811_v40  ;;  %v16814_v55 = vld [vmem:[#allocation49_spill] sm:$0xff]  ;;  %v3701_v38 = vmul.f32 %v14620_v27, %v14588_v0  ;;  %v10157_v0 = vld [vmem:[%s11710_s17 + $0x192] sm:$0x3]  ;;  %v16827_v63 = vld [vmem:[#allocation64_spill] sm:$0xff] }
 0x34e   : > { %v4137_v3 = vmul.f32 %v14660_v14, %v3998_v37  ;;  %v14663_v5 = vpop.permute.xlu0 %3133  ;;  %3615 = vperm.xlu1 %11439, %v10102_v39   ;;  %v8831_v39 = vld [vmem:[#allocation2 + $0x60] sm:$0xe]  ;;  %v2880_v31 = vadd.f32 %v2826_v34, %v2443_v58  ;;  %v16815_v26 = vcombine.low %v16813_v15, %v16814_v55  ;;  %v2012_v60 = vadd.f32 %v1958_v1, %v1574_v7  ;;  %v14687_v37 = vld [vmem:[%s16267_s2] ss:$0 sm:$0xff]  ;;  %v10160_v58 = vld [vmem:[%s11710_s17 + $0x1aa] sm:$0x3] }
 0x34f   : > { %4057 = vperm.xlu0 %11438, %v14633_v20   ;;  %10972 = vmatmul.mubr.msk.bf16.vlgmr.msra.gmra.mrb[0].mxu0 %vm5199_vm5, %v16812_v6  ;;  %v10539_v12 = vrot.slane %v8831_v39, 9  ;;  %v16816_v15 = vrot.slane %v14382_v61, 5  ;;  %v8118_v61 = vld [vmem:[#allocation2 + $0x74] sm:$0x1]  ;;  %v16826_v39 = vld [vmem:[#allocation21_spill] sm:$0xff] }
 0x350   : > { %v4191_v36 = vadd.f32 %v4137_v3, %v3754_v56  ;;  %10975 = vmatprep.mubr.msk.bf16.mxu0 %vm5199_vm5, %v16815_v26  ;;  %v3318_v40 = vadd.f32 %v3264_v53, %v2880_v31  ;;  %v8117_v53 = vld [vmem:[#allocation2 + $0x70] sm:$0xf] }
 0x351   : > { %v2284_v4 = vpop.permute.xlu1 %2283  ;;  %v14700_v55 = vsel %vm12881_vm10, %v10539_v12, %v16816_v15  ;;  %v8832_v12 = vld [vmem:[#allocation2 + $0x6c] sm:$0xe]  ;;  %v14720_v15 = vld [vmem:[#allocation2 + $0x7c] sm:$0xf]  ;;  %v16834_v9 = vld [vmem:[#allocation114_spill] sm:$0xff] }
 0x352   : > { %v4252_v56 = vadd.f32 %v14687_v37, %v4191_v36  ;;  %v2395_v34 = vmul.f32 %v14567_v29, %v2284_v4  ;;  %v1837_v3 = vpop.permute.xlu0 %1836  ;;  %3630 = vperm.xlu1 %11439, %v10105_v28   ;;  %16817 = vst [vmem:[#allocation130_spill] sm:$0xff] %v14700_v55  ;;  %v3755_v36 = vadd.f32 %v3701_v38, %v3318_v40  ;;  %v16821_v40 = vld [vmem:[#allocation39_spill] sm:$0xff]  ;;  %v16832_v55 = vld [vmem:[#allocation26_spill] sm:$0xff] }
 0x353   : > { %4062 = vperm.xlu0 %11438, %v14676_v57   ;;  %v647_v42 = vmul.f32 %v14494_v41, %v16832_v55  ;;  %v7383_v55 = vrot.slane %v14461_v62, 5  ;;  %v11444_v62 = vld [vmem:[%s16268_s3 + $0x30] sm:$0xff]  }
 0x354   : > { %v4306_v1 = vmax.f32 %v4252_v56, 0.0  ;;  %v14693_v7 = vadd.f32 %v2395_v34, %v2012_v60  ;;  %v16818_v60 = vld [vmem:[#allocation128_spill] sm:$0xff]  ;;  %v16819_v56 = vld [vmem:[#allocation162_spill] sm:$0xff]  ;;  %11003 = vmatprep.subr.bf16.mxu0 %v11444_v62 }
 0x355   : > { %v4003_v6 = vpop.permute.xlu1 %4002  ;;  %v16820_v34 = vcombine.low %v16818_v60, %v16819_v56  ;;  %v16825_v56 = vld [vmem:[#allocation65_spill] sm:$0xff]  ;;  %11004 = vmatpush3.bf16.msra.mxu0 %v11444_v62 }
 0x356   : > { %v4394_v28 = vsel %vm4331_vm6, %v4306_v1, 0.0  ;;  %v4138_v26 = vmul.f32 %v14660_v14, %v4003_v6  ;;  %v14705_v4 = vpop.permute.xlu0 %2700  ;;  %4067 = vperm.xlu1 %11439, %v10160_v58   ;;  %v16822_v1 = vld [vmem:[#allocation133_spill] sm:$0xff] }
 0x357   : > { %v10619_v31 = vpack.c.bf16 %v4394_v28, %v4394_v28  ;;  %4052 = vperm.xlu0 %11438, %v10157_v0   ;;  %10976 = vmatmul.mubr.msk.bf16.gmra.mrb[4].mxu0 %vm5199_vm5, %v16820_v34  ;;  %v16823_v6 = vcombine.low %v16821_v40, %v16822_v1  ;;  %v8940_v0 = vrot.slane %v8117_v53, 5  ;;  %v1081_v34 = vmul.f32 %v14506_v43, %v16825_v56  ;;  %v8121_v40 = vld [vmem:[#allocation2 + $0x80] sm:$0x1] }
 0x358   : > { %v4192_v38 = vadd.f32 %v4138_v26, %v3755_v36  ;;  %v8943_v36 = vrot.slane %v8118_v61, 5  ;;  %v16824_v26 = vld [vmem:[#allocation20_spill] sm:$0xff]  ;;  %v10540_v1 = vrot.slane %v8832_v12, 9  ;;  %v644_v53 = vmul.f32 %v14494_v41, %v16826_v39 }
 0x359   : > { %4684 = vst.msk [vmem:[#allocation2 + $0x84] sm:$0xf] %vm4649_vm1, %v10619_v31  ;;  %10979 = vmatprep.mubr.msk.bf16.mxu0 %vm5199_vm5, %v16823_v6  ;;  %v14718_v58 = vpop.permute.xlu1 %2705  ;;  %v641_v31 = vmul.f32 %v14494_v41, %v16824_v26  ;;  %v8942_v6 = vrot.slane %v8940_v0, 4  ;;  %v8947_v61 = vrot.slane %v14720_v15, 5  ;;  %v1084_v26 = vmul.f32 %v14506_v43, %v16828_v35 }
 0x35a   : > { %v4253_v28 = vadd.f32 %v14687_v37, %v4192_v38  ;;  %v1852_v60 = vpop.permute.xlu0 %1851  ;;  %1886 = vperm.xlu1 %11439, %v14441_v8   ;;  %v1078_v38 = vmul.f32 %v14506_v43, %v16827_v63  ;;  %v9888_v8 = vld [vmem:[%s11710_s17 + $0x1a8] sm:$0x3]  ;;  %v14743_v12 = vsel %vm12881_vm10, %v10540_v1, %v8940_v0  ;;  %v7380_v35 = vrot.slane %v14436_v19, 5 }
 0x35b   : > { %1891 = vperm.xlu0 %11438, %v14474_v48   ;;  %v1518_v48 = vmul.f32 %v14528_v24, %v16829_v32  ;;  %16830 = vst [vmem:[#allocation13_spill] sm:$0xff] %v14743_v12  ;;  %v14747_v63 = vsel %vm12881_vm10, %v8942_v6, %v8943_v36  ;;  %v8950_v15 = vrot.slane %v8121_v40, 5  ;;  %v1135_v0 = vadd.f32 %v1081_v34, %v644_v53  ;;  %v16833_v1 = vld [vmem:[#allocation108_spill] sm:$0xff]  ;;  %v8833_v6 = vld [vmem:[#allocation2 + $0x78] sm:$0xe] }
 0x35c   : > { %v4307_v33 = vmax.f32 %v4253_v28, 0.0  ;;  %16831 = vst [vmem:[#allocation40_spill] sm:$0xff] %v14747_v63  ;;  %v1515_v18 = vmul.f32 %v14528_v24, %v16833_v1  ;;  %v1956_v36 = vmul.f32 %v14542_v21, %v1837_v3  ;;  %v16835_v19 = vld [vmem:[#allocation92_spill] sm:$0xff]  ;;  %v16836_v32 = vld [vmem:[#allocation7_spill] sm:$0xff]  ;;  %v8949_v34 = vrot.slane %v8947_v61, 4 }
 0x35d   : > { %v14739_v56 = vpop.permute.xlu1 %3570  ;;  %v16837_v40 = vcombine.low %v16835_v19, %v16836_v32  ;;  %v1132_v53 = vadd.f32 %v1078_v38, %v641_v31  ;;  %v1138_v1 = vadd.f32 %v1084_v26, %v647_v42  ;;  %v1572_v63 = vadd.f32 %v1518_v48, %v1135_v0 }
 0x35e   : > { %v10620_v39 = vpack.c.bf16 %v4307_v33, %v4307_v33  ;;  %v14749_v28 = vpop.permute.xlu0 %2715  ;;  %2328 = vperm.xlu1 %11439, %v14574_v45   ;;  %v9943_v33 = vld [vmem:[%s11710_s17 + $0x1a9] sm:$0x3]  ;;  %v1521_v45 = vmul.f32 %v14528_v24, %v16834_v9  ;;  %v16838_v3 = vcombine.low %v14195_v59, %v14258_v44  ;;  %v7266_v9 = vld [vmem:[#allocation2 + $0x6c] sm:$0xe]  ;;  %v7382_v12 = vrot.slane %v7380_v35, 4 }
 0x35f   : > { %1896 = vperm.xlu0 %11438, %v9888_v8   ;;  %10980 = vmatmul.mubr.msk.bf16.gmra.mrb[8].mxu0 %vm5199_vm5, %v16837_v40  ;;  %v10541_v31 = vrot.slane %v8833_v6, 9  ;;  %v14781_v42 = vsel %vm12881_vm10, %v8949_v34, %v8950_v15  ;;  %v1569_v59 = vadd.f32 %v1515_v18, %v1132_v53  ;;  %v1953_v44 = vmul.f32 %v14542_v21, %v14434_v16  ;;  %v9998_v34 = vld [vmem:[%s11710_s17 + $0x1aa] sm:$0x3] }
 0x360   : > { %4685 = vst.msk [vmem:[#allocation2 + $0x88] sm:$0xf] %vm4649_vm1, %v10620_v39  ;;  %10983 = vmatprep.mubr.msk.bf16.mxu0 %vm5199_vm5, %v16838_v3  ;;  %v1959_v39 = vmul.f32 %v14542_v21, %v1852_v60  ;;  %16839 = vst [vmem:[#allocation14_spill] sm:$0xff] %v14781_v42  ;;  %v2010_v38 = vadd.f32 %v1956_v36, %v1572_v63  ;;  %v1575_v60 = vadd.f32 %v1521_v45, %v1138_v1  ;;  %v16845_v1 = vld [vmem:[#allocation155_spill] sm:$0xff] }
 0x361   : > { %v14773_v8 = vpop.permute.xlu1 %2720  ;;  %v10420_v48 = vrot.slane %v7266_v9, 9  ;;  %v7384_v0 = vsel %vm12881_vm10, %v7382_v12, %v7383_v55  ;;  %v2390_v18 = vmul.f32 %v14567_v29, %v14445_v17  ;;  %v2007_v17 = vadd.f32 %v1953_v44, %v1569_v59  ;;  %v10052_v55 = vld [vmem:[%s11710_s17 + $0x1b8] sm:$0xff] }
 0x362   : > { %v2274_v32 = vpop.permute.xlu0 %2273  ;;  %2333 = vperm.xlu1 %11439, %v9943_v33   ;;  %v14791_v33 = vsel %vm12881_vm10, %v10541_v31, %v8947_v61  ;;  %v2013_v12 = vadd.f32 %v1959_v39, %v1575_v60  ;;  %v2827_v45 = vmul.f32 %v14579_v22, %v14520_v51  ;;  %v14820_v51 = vld [vmem:[#allocation2 + $0x84] sm:$0xf]  ;;  %v10053_v60 = vld [vmem:[%s11710_s17 + $0x1c0] sm:$0x3]  ;;  %v2391_v42 = vmul.f32 %v14567_v29, %v14590_v30 }
 0x363   : > { %v2393_v26 = vmul.f32 %v14567_v29, %v2274_v32  ;;  %2323 = vperm.xlu0 %11438, %v14547_v10   ;;  %16840 = vst [vmem:[#allocation41_spill] sm:$0xff] %v14791_v33  ;;  %v7387_v10 = vrot.slane %v14489_v49, 5  ;;  %v7381_v36 = vsel %vm12881_vm10, %v10420_v48, %v7380_v35  ;;  %v16842_v49 = vld [vmem:[#allocation86_spill] sm:$0xff]  ;;  %16848 = vst [vmem:[#allocation100_spill] sm:$0xff] %v14820_v51 }
 0x364   : > { %v10438_v19 = vcombine.low %v7381_v36, %v7384_v0  ;;  %v7390_v40 = vrot.slane %v16842_v49, 5  ;;  %v16844_v35 = vld [vmem:[#allocation90_spill] sm:$0xff]  ;;  %v2444_v39 = vadd.f32 %v2390_v18, %v2007_v17 }
 0x365   : > { %v14795_v16 = vadd.f32 %v2393_v26, %v2010_v38  ;;  %v2289_v63 = vpop.permute.xlu1 %2288  ;;  %v16846_v3 = vcombine.low %v16844_v35, %v16845_v1  ;;  %v7389_v32 = vrot.slane %v7387_v10, 4  ;;  %v3702_v38 = vmul.f32 %v14620_v27, %v14739_v56  ;;  %v10051_v48 = vld [vmem:[%s11710_s17 + $0x1b0] sm:$0xff]  ;;  %v16849_v1 = vld [vmem:[#allocation63_spill] sm:$0xff] }
 0x366   : > { %v2396_v61 = vmul.f32 %v14567_v29, %v2289_v63  ;;  %v14803_v6 = vpop.permute.xlu0 %3138  ;;  %2760 = vperm.xlu1 %11439, %v14633_v20   ;;  %v7267_v20 = vld [vmem:[#allocation2 + $0x78] sm:$0xe]  ;;  %v2881_v44 = vadd.f32 %v2827_v45, %v2444_v39  ;;  %v10106_v17 = vld [vmem:[%s11710_s17 + $0x1b1] sm:$0xff]  ;;  %v5026_v35 = vshll.u32 %v14820_v51, 16 }
 0x367   : > { %16841 = vst [vmem:[#allocation136_spill] sm:$0xff] %v14795_v16  ;;  %2765 = vperm.xlu0 %11438, %v14676_v57   ;;  %v14812_v53 = vld [vmem:[#allocation2 + $0x88] sm:$0xf]  ;;  %10984 = vmatmul.mubr.msk.bf16.gmra.mrb[12].mxu0 %vm5199_vm5, %v16846_v3  ;;  %v3265_v57 = vmul.f32 %v14603_v11, %v14663_v5  ;;  %v10421_v26 = vrot.slane %v7267_v20, 9  ;;  %v7391_v5 = vsel %vm12881_vm10, %v7389_v32, %v7390_v40  ;;  %v10107_v45 = vld [vmem:[%s11710_s17 + $0x1b9] sm:$0xff]  ;;  %v5023_v40 = vshrl.u32 %v14820_v51, 16 }
 0x368   : > { %16843 = vst [vmem:[#allocation138_spill] sm:$0xff] %v14812_v53  ;;  %v14818_v9 = vadd.f32 %v2396_v61, %v2013_v12  ;;  %10987 = vmatprep.mubr.msk.bf16.mxu0 %vm5199_vm5, %v10438_v19  ;;  %v1079_v3 = vmul.f32 %v14506_v43, %v16849_v1  ;;  %v10108_v20 = vld [vmem:[%s11710_s17 + $0x1c1] sm:$0x3]  ;;  %v5834_v30 = vrot.slane %v14812_v53, 5  ;;  %v16858_v51 = vld [vmem:[#allocation110_spill] sm:$0xff] }
 0x369   : > { %v14825_v62 = vpop.permute.xlu1 %3153  ;;  %v3319_v0 = vadd.f32 %v3265_v57, %v2881_v44  ;;  %v7388_v18 = vsel %vm12881_vm10, %v10421_v26, %v7387_v10  ;;  %v16850_v32 = vld [vmem:[#allocation19_spill] sm:$0xff]  ;;  %v16854_v1 = vld [vmem:[#allocation44_spill] sm:$0xff] }
 0x36a   : > { %16847 = vst [vmem:[#allocation99_spill] sm:$0xff] %v14818_v9  ;;  %v14829_v59 = vpop.permute.xlu0 %3143  ;;  %3203 = vperm.xlu1 %11439, %v10052_v55   ;;  %v10439_v12 = vcombine.low %v7388_v18, %v7391_v5  ;;  %v642_v44 = vmul.f32 %v14494_v41, %v16850_v32  ;;  %v5836_v18 = vrot.slane %v5834_v30, 4 }
 0x36b   : > { %2770 = vperm.xlu0 %11438, %v9998_v34   ;;  %v3756_v61 = vadd.f32 %v3702_v38, %v3319_v0  ;;  %v10162_v34 = vld [vmem:[%s11710_s17 + $0x1ba] sm:$0xff]  ;;  %v6558_v0 = vld [vmem:[#allocation2 + $0x84] sm:$0xf] }
 0x36c   : > { %v16851_v38 = vld [vmem:[#allocation107_spill] sm:$0xff] }
 0x36d   : > { %v14839_v63 = vpop.permute.xlu1 %1856  ;;  %v1516_v26 = vmul.f32 %v14528_v24, %v16851_v38  ;;  %v16855_v38 = vld [vmem:[#allocation22_spill] sm:$0xff] }
 0x36e   : > { %v4008_v36 = vpop.permute.xlu0 %4007  ;;  %3208 = vperm.xlu1 %11439, %v10053_v60   ;;  %v10163_v60 = vld [vmem:[%s11710_s17 + $0x1c2] sm:$0x3]  ;;  %v643_v15 = vmul.f32 %v14494_v41, %v16855_v38 }
 0x36f   : > { %v4139_v56 = vmul.f32 %v14660_v14, %v4008_v36  ;;  %3198 = vperm.xlu0 %11438, %v10051_v48   ;;  %10988 = vmatmul.mubr.msk.bf16.gmra.mrb[16].mxu0 %vm5199_vm5, %v10439_v12  ;;  %v5025_v48 = vrot.slane %v5023_v40, 4  ;;  %v6559_v36 = vld [vmem:[#allocation2 + $0x88] sm:$0xf]  ;;  %v10161_v40 = vld [vmem:[%s11710_s17 + $0x1b2] sm:$0xff]  ;;  %s16222_s17 = scalar_lea.hbm %s16272_s7, %s10586_s19 }
 0x371   : > { %v4193_v19 = vadd.f32 %v4139_v56, %v3756_v61  ;;  %v14845_v49 = vpop.permute.xlu1 %3158  ;;  %v5028_v61 = vrot.slane %v5026_v35, 5  ;;  %v5032_v56 = vshll.u32 %v14812_v53, 16  ;;  %v6820_v35 = vshll.u32 %v6558_v0, 16 }
 0x372   : > { %v14847_v10 = vpop.permute.xlu0 %2710  ;;  %3635 = vperm.xlu1 %11439, %v10106_v17   ;;  %v5036_v17 = vshrl.u32 %v14812_v53, 16 }
 0x373   : > { %v4254_v55 = vadd.f32 %v14687_v37, %v4193_v19  ;;  %3640 = vperm.xlu0 %11438, %v10107_v45   ;;  %v1133_v45 = vadd.f32 %v1079_v3, %v642_v44  ;;  %v16853_v19 = vld [vmem:[#allocation66_spill] sm:$0xff]  ;;  %v6826_v44 = vshll.u32 %v6559_v36, 16 }
 0x374   : > { %v5038_v38 = vrot.slane %v5036_v17, 4 }
 0x375   : > { %v4308_v39 = vmax.f32 %v4254_v55, 0.0  ;;  %v14856_v57 = vpop.permute.xlu1 %1861  ;;  %v1080_v55 = vmul.f32 %v14506_v43, %v16853_v19  ;;  %v1570_v31 = vadd.f32 %v1516_v26, %v1133_v45  ;;  %v6830_v19 = vshrl.u32 %v6559_v36, 16  ;;  %v5715_v45 = vld [vmem:[#allocation2 + $0x84] sm:$0xe] }
 0x376   : > { %v14862_v5 = vpop.permute.xlu0 %3575  ;;  %4077 = vperm.xlu1 %11439, %v10162_v34   ;;  %v1954_v34 = vmul.f32 %v14542_v21, %v16854_v1  ;;  %v14883_v1 = vrot.slane %v5032_v56, 5  ;;  %v7394_v26 = vrot.slane %v6559_v36, 5  ;;  %v6822_v56 = vrot.slane %v6820_v35, 5 }
 0x377   : > { %v4396_v12 = vsel %vm4342_vm7, %v4308_v39, 0.0  ;;  %3645 = vperm.xlu0 %11438, %v10108_v20   ;;  %v6817_v20 = vshrl.u32 %v6558_v0, 16  ;;  %v14885_v33 = vadd.f32 %v1080_v55, %v643_v15  ;;  %v7268_v0 = vld [vmem:[#allocation2 + $0x84] sm:$0xe]  ;;  %v6828_v17 = vrot.slane %v6826_v44, 5 }
 0x378   : > { %v10621_v32 = vpack.c.bf16 %v4396_v12, %v4396_v12  ;;  %v5029_v12 = vor.u32 %v5028_v61, %v5025_v48  ;;  %v2008_v54 = vadd.f32 %v1954_v34, %v1570_v31  ;;  %v8123_v48 = vld [vmem:[#allocation2 + $0x88] sm:$0xf]  ;;  %v2828_v31 = vmul.f32 %v14579_v22, %v14705_v4 }
 0x379   : > { %v14876_v39 = vpop.permute.xlu1 %2725  ;;  %v6819_v61 = vrot.slane %v6817_v20, 4  ;;  %v6832_v55 = vrot.slane %v6830_v19, 4  ;;  %v10422_v34 = vrot.slane %v7268_v0, 9  ;;  %v10302_v46 = vrot.slane %v5715_v45, 9  ;;  %v8834_v20 = vld [vmem:[#allocation2 + $0x84] sm:$0xe] }
 0x37a   : > { %16856 = vst [vmem:[#allocation139_spill] sm:$0xff] %v14876_v39  ;;  %4686 = vst.msk [vmem:[#allocation2 + $0x8c] sm:$0x1] %vm4652_vm0, %v10621_v32  ;;  %v14881_v3 = vpop.permute.xlu0 %1871  ;;  %4082 = vperm.xlu1 %11439, %v10163_v60   ;;  %v1517_v32 = vmul.f32 %v14528_v24, %v16858_v51  ;;  %v14892_v60 = vmul.f32 %v14542_v21, %v16859_v47  ;;  %v2445_v15 = vadd.f32 %v2391_v42, %v2008_v54 }
 0x37b   : > { %16857 = vst [vmem:[#allocation156_spill] sm:$0xff] %v14881_v3  ;;  %4072 = vperm.xlu0 %11438, %v10161_v40   ;;  %v5030_v53 = vrot.slane %v5029_v12, 4  ;;  %v5039_v51 = vor.u32 %v5038_v38, %v14883_v1  ;;  %v3266_v47 = vmul.f32 %v14603_v11, %v14803_v6  ;;  %v7396_v25 = vrot.slane %v7394_v26, 4 }
 0x37c   : > { %v8954_v35 = vrot.slane %v8123_v48, 5  ;;  %v7395_v4 = vsel %vm12881_vm10, %v10422_v34, %v7394_v26  ;;  %v14912_v12 = vsel %vm12881_vm10, %v10302_v46, %v5834_v30  ;;  %v6823_v38 = vor.u32 %v6822_v56, %v6819_v61 }
 0x37d   : > { %v14894_v40 = vpop.permute.xlu1 %3590  ;;  %v5035_v19 = vsel %vm12338_vm4, %v5030_v53, %v14883_v1  ;;  %16861 = vst [vmem:[#allocation140_spill] sm:$0xff] %v14912_v12  ;;  %v5040_v3 = vrot.slane %v5039_v51, 4  ;;  %v10542_v26 = vrot.slane %v8834_v20, 9 }
 0x37e   : > { %v14898_v36 = vpop.permute.xlu0 %3580  ;;  %v8956_v1 = vrot.slane %v8954_v35, 4 }
 0x37f   : > { %v14928_v51 = vsel %vm12881_vm10, %v10542_v26, %v8954_v35  ;;  %v3703_v35 = vmul.f32 %v14620_v27, %v14862_v5  ;;  %v3267_v26 = vmul.f32 %v14603_v11, %v14829_v59 }
 0x380   : > { %16863 = vst [vmem:[#allocation102_spill] sm:$0xff] %v14928_v51 }
 0x381   : > { %v14903_v54 = vpop.permute.xlu1 %2293  ;;  %v6560_v42 = vld [vmem:[#allocation2 + $0x8c] sm:$0x1] }
 0x382   : > { %16860 = vst [vmem:[#allocation84_spill] sm:$0xff] %v14903_v54  ;;  %v4750_v44 = vld [vmem:[#allocation2 + $0x8c] sm:$0x1]  ;;  %v14914_v0 = vpop.permute.xlu0 %1876  ;;  %v7397_v45 = vrot.slane %v6560_v42, 5  ;;  %v6833_v54 = vor.u32 %v6832_v55, %v6828_v17  ;;  %v6836_v39 = vshll.u32 %v6560_v42, 16  ;;  %v6824_v55 = vrot.slane %v6823_v38, 4 }
 0x383   : > { %v8124_v6 = vld [vmem:[#allocation2 + $0x8c] sm:$0x1]  ;;  %v5042_v48 = vshll.u32 %v4750_v44, 16  ;;  %v5837_v9 = vrot.slane %v4750_v44, 5  ;;  %v2831_v38 = vmul.f32 %v14579_v22, %v14749_v28 }
 0x384   : > { %v8957_v34 = vrot.slane %v8124_v6, 5  ;;  %v7398_v16 = vsel %vm12881_vm10, %v7396_v25, %v7397_v45  ;;  %v6838_v42 = vrot.slane %v6836_v39, 5  ;;  %v6829_v6 = vsel %vm12338_vm4, %v6824_v55, %v6828_v17 }
 0x385   : > { %v5044_v53 = vrot.slane %v5042_v48, 5  ;;  %v14920_v46 = vsel %vm12881_vm10, %v5836_v18, %v5837_v9  ;;  %v14922_v30 = vpop.permute.xlu1 %3595  ;;  %v10440_v61 = vcombine.low %v7395_v4, %v7398_v16  ;;  %v11445_v9 = vld [vmem:[%s16268_s3 + $0x10] sm:$0xff]   ;;  %v6834_v18 = vrot.slane %v6833_v54, 4 }
 0x386   : > { %16862 = vst [vmem:[#allocation101_spill] sm:$0xff] %v14920_v46  ;;  %v14930_v20 = vpop.permute.xlu0 %3148  ;;  %v14939_v16 = vsel %vm12881_vm10, %v8956_v1, %v8957_v34  ;;  %v2882_v4 = vadd.f32 %v2828_v31, %v2445_v15  ;;  %10867 = vmatprep.subr.bf16.mxu1 %v11445_v9  ;;  %v1571_v54 = vadd.f32 %v1517_v32, %v14885_v33 }
 0x387   : > { %v5045_v25 = vsel %vm12338_vm4, %v5040_v3, %v5044_v53  ;;  %16864 = vst [vmem:[#allocation143_spill] sm:$0xff] %v14939_v16  ;;  %10991 = vmatprep.mubr.msk.bf16.mxu0 %vm5199_vm5, %v10440_v61  ;;  %v6839_v39 = vsel %vm12338_vm4, %v6834_v18, %v6838_v42  ;;  %v2392_v15 = vmul.f32 %v14567_v29, %v14624_v50  ;;  %v16890_v3 = vld [vmem:[#allocation136_spill] sm:$0xff] }
 0x388   : > { %v10236_v44 = vcombine.low %v5035_v19, %v5045_v25  ;;  %v3320_v31 = vadd.f32 %v3266_v47, %v2882_v4  ;;  %v14956_v19 = vcombine.low %v6829_v6, %v6839_v39  ;;  %v2009_v17 = vadd.f32 %v14892_v60, %v1571_v54 }
 0x389   : > { %v14954_v5 = vpop.permute.xlu1 %2298  ;;  %v2829_v48 = vmul.f32 %v14579_v22, %v14718_v58  ;;  %v3269_v50 = vmul.f32 %v14603_v11, %v14825_v62  ;;  %v2885_v28 = vadd.f32 %v2831_v38, %v14630_v23  ;;  %v3706_v60 = vmul.f32 %v14620_v27, %v14894_v40 }
 0x38a   : > { %10822 = vmatmul.mubr.msk.bf16.gmra.mrb[20].mxu1 %vm5199_vm5, %v10236_v44  ;;  %16865 = vst [vmem:[#allocation103_spill] sm:$0xff] %v14956_v19  ;;  %v4013_v45 = vpop.permute.xlu0 %4012  ;;  %v3757_v33 = vadd.f32 %v3703_v35, %v3320_v31  ;;  %v2446_v47 = vadd.f32 %v2392_v15, %v2009_v17  ;;  %v3704_v61 = vmul.f32 %v14620_v27, %v14898_v36 }
 0x38b   : > { %v4140_v32 = vmul.f32 %v14660_v14, %v4013_v45  ;;  %v3323_v55 = vadd.f32 %v3269_v50, %v2885_v28  ;;  %v2832_v31 = vmul.f32 %v14579_v22, %v14773_v8  ;;  %v3270_v17 = vmul.f32 %v14603_v11, %v14845_v49  ;;  %v11447_v49 = vld [vmem:[%s16268_s3 + $0x38] sm:$0xff]  }
 0x38c   : > { %v2883_v58 = vadd.f32 %v2829_v48, %v2446_v47  ;;  %v16867_v47 = vld [vmem:[#allocation27_spill] sm:$0xff]  ;;  %11037 = vmatprep.subr.bf16.mxu0 %v11447_v49 }
 0x38d   : > { %v4194_v34 = vadd.f32 %v4140_v32, %v3757_v33  ;;  %v14968_v53 = vpop.permute.xlu1 %3163  ;;  %v3760_v18 = vadd.f32 %v3706_v60, %v3323_v55  ;;  %v16866_v32 = vld [vmem:[#allocation25_spill] sm:$0xff] }
 0x38e   : > { %v14973_v1 = vpop.permute.xlu0 %2308  ;;  %v3321_v25 = vadd.f32 %v3267_v26, %v2883_v58  ;;  %v648_v50 = vmul.f32 %v14494_v41, %v16866_v32  ;;  %v650_v26 = vmul.f32 %v14494_v41, %v16867_v47  ;;  %v2886_v58 = vadd.f32 %v2832_v31, %v14693_v7  ;;  %v16878_v47 = vld [vmem:[#allocation34_spill] sm:$0xff] }
 0x38f   : > { %v4255_v62 = vadd.f32 %v14687_v37, %v4194_v34  ;;  %v16868_v34 = vld [vmem:[#allocation69_spill] sm:$0xff] }
 0x390   : > { %v3758_v23 = vadd.f32 %v3704_v61, %v3321_v25  ;;  %v1085_v28 = vmul.f32 %v14506_v43, %v16868_v34  ;;  %v3707_v61 = vmul.f32 %v14620_v27, %v14922_v30  ;;  %v16869_v25 = vld [vmem:[#allocation28_spill] sm:$0xff]  ;;  %v15037_v34 = vmul.f32 %v14494_v41, %v16878_v47 }
 0x391   : > { %v4309_v9 = vmax.f32 %v4255_v62, 0.0  ;;  %v4028_v59 = vpop.permute.xlu1 %4027 }
 0x392   : > { %v4143_v42 = vmul.f32 %v14660_v14, %v4028_v59  ;;  %v4018_v4 = vpop.permute.xlu0 %4017  ;;  %v16870_v59 = vld [vmem:[#allocation29_spill] sm:$0xff] }
 0x393   : > { %v4397_v40 = vsel %vm4331_vm6, %v4309_v9, 0.0  ;;  %v4141_v35 = vmul.f32 %v14660_v14, %v4018_v4  ;;  %v649_v9 = vmul.f32 %v14494_v41, %v16869_v25 }
 0x394   : > { %v10622_v44 = vpack.c.bf16 %v4397_v40, %v4397_v40  ;;  %v4197_v6 = vadd.f32 %v4143_v42, %v3760_v18  ;;  %v652_v18 = vmul.f32 %v14494_v41, %v16870_v59  ;;  %v16871_v42 = vld [vmem:[#allocation71_spill] sm:$0xff] }
 0x395   : > { %v4195_v39 = vadd.f32 %v4141_v35, %v3758_v23  ;;  %v14982_v36 = vpop.permute.xlu1 %2313  ;;  %v1087_v4 = vmul.f32 %v14506_v43, %v16871_v42  ;;  %v16872_v23 = vld [vmem:[#allocation72_spill] sm:$0xff]  ;;  %v16873_v35 = vld [vmem:[#allocation30_spill] sm:$0xff] }
 0x396   : > { %4687 = vst.msk [vmem:[#allocation2 + $0x90] sm:$0xf] %vm4649_vm1, %v10622_v44  ;;  %v4258_v54 = vadd.f32 %v14687_v37, %v4197_v6  ;;  %v14986_v15 = vpop.permute.xlu0 %1866  ;;  %v1086_v40 = vmul.f32 %v14506_v43, %v16872_v23  ;;  %v651_v7 = vmul.f32 %v14494_v41, %v16873_v35  ;;  %v16874_v44 = vld [vmem:[#allocation31_spill] sm:$0xff]  ;;  %v16875_v6 = vld [vmem:[#allocation73_spill] sm:$0xff]  ;;  %v16881_v35 = vld [vmem:[#allocation76_spill] sm:$0xff] }
 0x397   : > { %v4256_v38 = vadd.f32 %v14687_v37, %v4195_v39  ;;  %v654_v30 = vmul.f32 %v14494_v41, %v16874_v44  ;;  %v1089_v39 = vmul.f32 %v14506_v43, %v16875_v6  ;;  %v1141_v42 = vadd.f32 %v1087_v4, %v650_v26  ;;  %v16882_v6 = vld [vmem:[#allocation113_spill] sm:$0xff] }
 0x398   : > { %v4312_v45 = vmax.f32 %v4258_v54, 0.0  ;;  %v3324_v54 = vadd.f32 %v3270_v17, %v2886_v58  ;;  %v16879_v17 = vld [vmem:[#allocation74_spill] sm:$0xff]  ;;  %v1140_v23 = vadd.f32 %v1086_v40, %v649_v9  ;;  %v1090_v44 = vmul.f32 %v14506_v43, %v16881_v35  ;;  %v16887_v40 = vld [vmem:[#allocation120_spill] sm:$0xff] }
 0x399   : > { %v4310_v48 = vmax.f32 %v4256_v38, 0.0  ;;  %v14993_v33 = vpop.permute.xlu1 %3585  ;;  %v16876_v38 = vld [vmem:[#allocation32_spill] sm:$0xff]  ;;  %v1088_v58 = vmul.f32 %v14506_v43, %v16879_v17  ;;  %v16886_v9 = vld [vmem:[#allocation118_spill] sm:$0xff] }
 0x39a   : > { %v4400_v8 = vsel %vm4331_vm6, %v4312_v45, 0.0  ;;  %v15003_v60 = vpop.permute.xlu0 %2730  ;;  %v653_v45 = vmul.f32 %v14494_v41, %v16876_v38  ;;  %v3761_v25 = vadd.f32 %v3707_v61, %v3324_v54  ;;  %v1143_v38 = vadd.f32 %v1089_v39, %v652_v18  ;;  %v16885_v61 = vld [vmem:[#allocation117_spill] sm:$0xff] }
 0x39b   : > { %v10625_v62 = vpack.c.bf16 %v4400_v8, %v4400_v8  ;;  %v10623_v55 = vpack.c.bf16 %v4310_v48, %v4310_v48  ;;  %v16877_v48 = vld [vmem:[#allocation33_spill] sm:$0xff]  ;;  %v1139_v8 = vadd.f32 %v1085_v28, %v648_v50  ;;  %v16883_v50 = vld [vmem:[#allocation115_spill] sm:$0xff]  ;;  %v1526_v26 = vmul.f32 %v14528_v24, %v16885_v61  ;;  %v16889_v61 = vld [vmem:[#allocation78_spill] sm:$0xff] }
 0x39c   : > { %v15033_v32 = vmul.f32 %v14494_v41, %v16877_v48  ;;  %v1522_v41 = vmul.f32 %v14528_v24, %v16882_v6  ;;  %v1524_v28 = vmul.f32 %v14528_v24, %v16883_v50  ;;  %v16884_v48 = vld [vmem:[#allocation116_spill] sm:$0xff]  ;;  %v1525_v4 = vmul.f32 %v14528_v24, %v16886_v9  ;;  %v16888_v50 = vld [vmem:[#allocation77_spill] sm:$0xff] }
 0x39d   : > { %4690 = vst.msk [vmem:[#allocation2 + $0x9c] sm:$0xf] %vm4649_vm1, %v10625_v62  ;;  %4688 = vst.msk [vmem:[#allocation2 + $0x94] sm:$0xf] %vm4649_vm1, %v10623_v55  ;;  %v15027_v31 = vpop.permute.xlu1 %1881  ;;  %v16880_v62 = vld [vmem:[#allocation75_spill] sm:$0xff]  ;;  %v1523_v47 = vmul.f32 %v14528_v24, %v16884_v48  ;;  %v1527_v54 = vmul.f32 %v14528_v24, %v16887_v40  ;;  %v1960_v18 = vmul.f32 %v14542_v21, %v14839_v63 }
 0x39e   : > { %v4033_v49 = vpop.permute.xlu0 %4032  ;;  %v1091_v55 = vmul.f32 %v14506_v43, %v16880_v62  ;;  %v1144_v6 = vadd.f32 %v1090_v44, %v653_v45  ;;  %v15071_v48 = vmul.f32 %v14506_v43, %v16888_v50  ;;  %v15075_v24 = vmul.f32 %v14506_v43, %v16889_v61  ;;  %v15081_v50 = vld [vmem:[#allocation2 + $0x90] sm:$0xf]  ;;  %v16891_v43 = vld [vmem:[#allocation139_spill] sm:$0xff] }
 0x39f   : > { %v4144_v59 = vmul.f32 %v14660_v14, %v4033_v49  ;;  %v1142_v49 = vadd.f32 %v1088_v58, %v651_v7  ;;  %v1576_v63 = vadd.f32 %v1522_v41, %v1139_v8  ;;  %v1578_v9 = vadd.f32 %v1524_v28, %v1141_v42  ;;  %v16892_v42 = vld [vmem:[#allocation156_spill] sm:$0xff] }
 0x3a0   : > { %v15064_v35 = vadd.f32 %v1091_v55, %v654_v30  ;;  %v1577_v40 = vadd.f32 %v1523_v47, %v1140_v23  ;;  %v1961_v7 = vmul.f32 %v14542_v21, %v14856_v57  ;;  %v1581_v45 = vadd.f32 %v1527_v54, %v1144_v6  ;;  %v16893_v57 = vld [vmem:[#allocation84_spill] sm:$0xff]  ;;  %v16894_v6 = vld [vmem:[#allocation99_spill] sm:$0xff] }
 0x3a1   : > { %v4198_v17 = vadd.f32 %v4144_v59, %v3761_v25  ;;  %v15052_v62 = vpop.permute.xlu1 %2745  ;;  %v2830_v25 = vmul.f32 %v14579_v22, %v14847_v10  ;;  %v1580_v10 = vadd.f32 %v1526_v26, %v1143_v38  ;;  %v1579_v55 = vadd.f32 %v1525_v4, %v1142_v49 }
 0x3a2   : > { %v15062_v39 = vpop.permute.xlu0 %2735  ;;  %v2014_v44 = vadd.f32 %v1960_v18, %v1576_v63  ;;  %v2833_v8 = vmul.f32 %v14579_v22, %v16891_v43  ;;  %v1963_v23 = vmul.f32 %v14542_v21, %v16892_v42  ;;  %v2397_v28 = vmul.f32 %v14567_v29, %v16893_v57 }
 0x3a3   : > { %v4259_v59 = vadd.f32 %v14687_v37, %v4198_v17  ;;  %v2884_v56 = vadd.f32 %v2830_v25, %v16890_v3  ;;  %v1964_v38 = vmul.f32 %v14542_v21, %v14914_v0  ;;  %v3268_v47 = vmul.f32 %v14603_v11, %v14930_v20 }
 0x3a4   : > { %v2398_v26 = vmul.f32 %v14567_v29, %v14954_v5  ;;  %v15096_v3 = vld [vmem:[#allocation2 + $0x94] sm:$0xf]  ;;  %v2015_v4 = vadd.f32 %v1961_v7, %v1577_v40  ;;  %v3271_v54 = vmul.f32 %v14603_v11, %v14968_v53  ;;  %v5047_v49 = vshrl.u32 %v15081_v50, 16 }
 0x3a5   : > { %v4313_v30 = vmax.f32 %v4259_v59, 0.0  ;;  %v15079_v58 = vpop.permute.xlu1 %2303  ;;  %v5050_v0 = vshll.u32 %v15081_v50, 16  ;;  %v2400_v20 = vmul.f32 %v14567_v29, %v14973_v1  ;;  %v2401_v5 = vmul.f32 %v14567_v29, %v14982_v36  ;;  %v15120_v43 = vld [vmem:[#allocation2 + $0x94] sm:$0xf]  ;;  %v7270_v1 = vld [vmem:[#allocation2 + $0x9c] sm:$0xe] }
 0x3a6   : > { %v3601_v17 = vpop.permute.xlu0 %3600  ;;  %v1962_v25 = vmul.f32 %v14542_v21, %v14986_v15  ;;  %v3705_v53 = vmul.f32 %v14620_v27, %v14993_v33  ;;  %v2887_v61 = vadd.f32 %v2833_v8, %v16894_v6  ;;  %v2017_v63 = vadd.f32 %v1963_v23, %v1579_v55  ;;  %v15122_v15 = vld [vmem:[#allocation2 + $0x90] sm:$0xe]  ;;  %v15148_v6 = vld [vmem:[#allocation2 + $0x9c] sm:$0xf] }
 0x3a7   : > { %v10626_v41 = vpack.c.bf16 %v4313_v30, %v4313_v30  ;;  %v2834_v40 = vmul.f32 %v14579_v22, %v15003_v60  ;;  %v2451_v7 = vadd.f32 %v2397_v28, %v2014_v44  ;;  %v2018_v30 = vadd.f32 %v1964_v38, %v1580_v10  ;;  %v15128_v60 = vld [vmem:[#allocation2 + $0x90] sm:$0xe] }
 0x3a8   : > { %v3322_v29 = vadd.f32 %v3268_v47, %v2884_v56  ;;  %v2452_v36 = vadd.f32 %v2398_v26, %v2015_v4  ;;  %v3325_v33 = vadd.f32 %v3271_v54, %v2887_v61  ;;  %v1965_v42 = vmul.f32 %v14542_v21, %v15027_v31 }
 0x3a9   : > { %4691 = vst.msk [vmem:[#allocation2 + $0xa0] sm:$0xf] %vm4649_vm1, %v10626_v41  ;;  %v15101_v18 = vpop.permute.xlu1 %3168  ;;  %v5049_v55 = vrot.slane %v5047_v49, 4  ;;  %v5052_v23 = vrot.slane %v5050_v0, 5  ;;  %v15130_v41 = vld [vmem:[#allocation2 + $0x90] sm:$0xf]  ;;  %v2454_v44 = vadd.f32 %v2400_v20, %v2017_v63  ;;  %v15132_v10 = vadd.f32 %v2401_v5, %v2018_v30 }
 0x3aa   : > { %v15113_v59 = vpop.permute.xlu0 %2750  ;;  %v2016_v56 = vadd.f32 %v1962_v25, %v1578_v9  ;;  %v3759_v57 = vadd.f32 %v3705_v53, %v3322_v29  ;;  %v2888_v38 = vadd.f32 %v2834_v40, %v2451_v7  ;;  %v6850_v26 = vshll.u32 %v15120_v43, 16 }
 0x3ab   : > { %v6854_v21 = vshrl.u32 %v15120_v43, 16  ;;  %v2837_v31 = vmul.f32 %v14579_v22, %v15052_v62  ;;  %v10423_v4 = vrot.slane %v15122_v15, 9  ;;  %v10303_v49 = vrot.slane %v15128_v60, 9 }
 0x3ac   : > { %v6841_v9 = vshrl.u32 %v15130_v41, 16  ;;  %v15144_v0 = vadd.f32 %v1965_v42, %v1581_v45  ;;  %v2835_v20 = vmul.f32 %v14579_v22, %v15062_v39  ;;  %v5053_v53 = vor.u32 %v5052_v23, %v5049_v55  ;;  %v15168_v42 = vld [vmem:[%s16266_s1 + $0x4] ss:$0 sm:$0xff] }
 0x3ad   : > { %v15126_v8 = vpop.permute.xlu1 %2318  ;;  %v3708_v62 = vmul.f32 %v14620_v27, %v3601_v17  ;;  %v5056_v63 = vshll.u32 %v15096_v3, 16  ;;  %v5060_v40 = vshrl.u32 %v15096_v3, 16  ;;  %v15156_v30 = vrot.slane %v6850_v26, 5 }
 0x3ae   : > { %v4023_v28 = vpop.permute.xlu0 %4022  ;;  %v6856_v22 = vrot.slane %v6854_v21, 4  ;;  %v6844_v39 = vshll.u32 %v15130_v41, 16  ;;  %v15159_v29 = vadd.f32 %v2837_v31, %v2454_v44  ;;  %v5071_v15 = vshrl.u32 %v15148_v6, 16 }
 0x3af   : > { %v4142_v47 = vmul.f32 %v14660_v14, %v4023_v28  ;;  %v5074_v27 = vshll.u32 %v15148_v6, 16  ;;  %v15163_v17 = vrot.slane %v6841_v9, 4  ;;  %v2399_v55 = vmul.f32 %v15168_v42, %v15079_v58 }
 0x3b0   : > { %v15140_v54 = vld [vmem:[#allocation2 + $0xa0] sm:$0xf]  ;;  %v7401_v41 = vrot.slane %v15120_v43, 5  ;;  %v15175_v44 = vrot.slane %v5053_v53, 4  ;;  %v2889_v28 = vadd.f32 %v2835_v20, %v2452_v36  ;;  %v15177_v21 = vrot.slane %v5056_v63, 5 }
 0x3b1   : > { %v4196_v5 = vadd.f32 %v4142_v47, %v3759_v57  ;;  %v3184_v25 = vpop.permute.xlu1 %3183  ;;  %v3762_v47 = vadd.f32 %v3708_v62, %v3325_v33  ;;  %v5062_v31 = vrot.slane %v5060_v40, 4  ;;  %v3272_v9 = vmul.f32 %v14603_v11, %v15101_v18  ;;  %v15188_v36 = vld [vmem:[%s16266_s1 + $0x5] ss:$0 sm:$0xff] }
 0x3b2   : > { %v3174_v61 = vpop.permute.xlu0 %3173  ;;  %v2838_v43 = vmul.f32 %v15188_v36, %v15113_v59  ;;  %v5073_v20 = vrot.slane %v5071_v15, 4  ;;  %v5076_v53 = vrot.slane %v5074_v27, 5  ;;  %v15192_v11 = vadd.f32 %v2399_v55, %v2016_v56  ;;  %v15206_v56 = vld [vmem:[#allocation2 + $0xa0] sm:$0xf] }
 0x3b3   : > { %v4257_v45 = vadd.f32 %v14687_v37, %v4196_v5  ;;  %v7403_v63 = vrot.slane %v7401_v41, 4  ;;  %v5841_v15 = vrot.slane %v15096_v3, 5  ;;  %v3326_v27 = vadd.f32 %v3272_v9, %v2888_v38 }
 0x3b5   : > { %v4311_v23 = vmax.f32 %v4257_v45, 0.0  ;;  %v15172_v57 = vpop.permute.xlu1 %2740  ;;  %v6857_v45 = vor.u32 %v6856_v22, %v15156_v30  ;;  %v10424_v22 = vrot.slane %v7270_v1, 9  ;;  %v15222_v1 = vld [vmem:[%s16266_s1 + $0x6] ss:$0 sm:$0xff] }
 0x3b6   : > { %v4038_v26 = vpop.permute.xlu0 %4037 }
 0x3b7   : > { %v4399_v7 = vsel %vm4342_vm7, %v4311_v23, 0.0  ;;  %v4145_v58 = vmul.f32 %v14660_v14, %v4038_v26  ;;  %v15196_v14 = vsel %vm12881_vm10, %v10423_v4, %v7401_v41  ;;  %v2402_v4 = vmul.f32 %v15168_v42, %v15126_v8  ;;  %v5717_v41 = vld [vmem:[#allocation2 + $0x9c] sm:$0xe] }
 0x3b8   : > { %v10624_v33 = vpack.c.bf16 %v4399_v7, %v4399_v7  ;;  %v5063_v7 = vor.u32 %v5062_v31, %v15177_v21  ;;  %v15212_v23 = vrot.slane %v6857_v45, 4  ;;  %v5077_v26 = vor.u32 %v5076_v53, %v5073_v20 }
 0x3b9   : > { %v4199_v18 = vadd.f32 %v4145_v58, %v3762_v47  ;;  %v3606_v62 = vpop.permute.xlu1 %3605  ;;  %v15215_v47 = vadd.f32 %v2838_v43, %v15132_v10  ;;  %v5080_v31 = vshll.u32 %v15140_v54, 16  ;;  %v5084_v58 = vshrl.u32 %v15140_v54, 16 }
 0x3ba   : > { %4689 = vst.msk [vmem:[#allocation2 + $0x98] sm:$0x1] %vm4652_vm0, %v10624_v33  ;;  %v15199_v40 = vpop.permute.xlu0 %3188  ;;  %v3275_v8 = vmul.f32 %v15222_v1, %v3184_v25  ;;  %v7408_v45 = vrot.slane %v15206_v56, 5  ;;  %v5064_v43 = vrot.slane %v5063_v7, 4  ;;  %v15233_v33 = vsel %vm12881_vm10, %v10303_v49, %v5841_v15 }
 0x3bb   : > { %v4260_v55 = vadd.f32 %v14687_v37, %v4199_v18  ;;  %v3273_v37 = vmul.f32 %v15222_v1, %v3174_v61  ;;  %16896 = vst [vmem:[#allocation104_spill] sm:$0xff] %v15233_v33  ;;  %v5843_v20 = vrot.slane %v5841_v15, 4  ;;  %v10304_v53 = vrot.slane %v5717_v41, 9 }
 0x3bc   : > { %v15236_v18 = vadd.f32 %v2402_v4, %v15144_v0  ;;  %v5848_v61 = vrot.slane %v15140_v54, 5  ;;  %v15241_v16 = vrot.slane %v5077_v26, 4  ;;  %v15243_v7 = vrot.slane %v5080_v31, 5 }
 0x3bd   : > { %v4314_v38 = vmax.f32 %v4260_v55, 0.0  ;;  %v3611_v9 = vpop.permute.xlu1 %3610  ;;  %v6846_v55 = vrot.slane %v6844_v39, 5  ;;  %v5086_v60 = vrot.slane %v5084_v58, 4  ;;  %v15246_v49 = vadd.f32 %v3275_v8, %v15159_v29  ;;  %v15258_v39 = vld [vmem:[%s16266_s1 + $0x7] ss:$0 sm:$0xff] }
 0x3be   : > { %v15227_v10 = vpop.permute.xlu0 %2755  ;;  %v3327_v15 = vadd.f32 %v3273_v37, %v2889_v28  ;;  %v7410_v51 = vrot.slane %v7408_v45, 4  ;;  %v3709_v29 = vmul.f32 %v15258_v39, %v3606_v62  ;;  %v2836_v8 = vmul.f32 %v15188_v36, %v15172_v57 }
 0x3bf   : > { %v4402_v25 = vsel %vm4342_vm7, %v4314_v38, 0.0  ;;  %v15252_v38 = vsel %vm12881_vm10, %v10424_v22, %v7408_v45  ;;  %v15265_v22 = vsel %vm12881_vm10, %v10304_v53, %v5848_v61  ;;  %v5087_v62 = vor.u32 %v5086_v60, %v15243_v7 }
 0x3c0   : > { %v10627_v59 = vpack.c.bf16 %v4402_v25, %v4402_v25  ;;  %16897 = vst [vmem:[#allocation141_spill] sm:$0xff] %v15265_v22  ;;  %v5083_v57 = vsel %vm12338_vm4, %v15241_v16, %v15243_v7  ;;  %v3763_v53 = vadd.f32 %v3709_v29, %v3326_v27  ;;  %v15291_v16 = vld [vmem:[#allocation2 + $0x9c] sm:$0xf]  ;;  %v16899_v27 = vsel %vm12338_vm4, %v15175_v44, %v15177_v21 }
 0x3c1   : > { %v15248_v41 = vpop.permute.xlu1 %3178  ;;  %v6563_v0 = vld [vmem:[#allocation2 + $0x98] sm:$0x1]  ;;  %v5088_v29 = vrot.slane %v5087_v62, 4 }
 0x3c2   : > { %v4751_v4 = vld [vmem:[#allocation2 + $0x98] sm:$0x1]  ;;  %4692 = vst.msk [vmem:[#allocation2 + $0xa4] sm:$0x1] %vm4652_vm0, %v10627_v59  ;;  %v3621_v26 = vpop.permute.xlu0 %3620  ;;  %v6860_v28 = vshll.u32 %v6563_v0, 16  ;;  %v7404_v31 = vrot.slane %v6563_v0, 5  ;;  %v6847_v59 = vor.u32 %v6846_v55, %v15163_v17  ;;  %v3710_v0 = vmul.f32 %v15258_v39, %v3611_v9 }
 0x3c3   : > { %v5066_v58 = vshll.u32 %v4751_v4, 16  ;;  %v5844_v37 = vrot.slane %v4751_v4, 5 }
 0x3c4   : > { %v6862_v45 = vrot.slane %v6860_v28, 5  ;;  %v7405_v25 = vsel %vm12881_vm10, %v7403_v63, %v7404_v31  ;;  %v15284_v63 = vld [vmem:[%s16266_s1 + $0x8] ss:$0 sm:$0xff]  ;;  %v6848_v4 = vrot.slane %v6847_v59, 4  ;;  %v2839_v59 = vmul.f32 %v15188_v36, %v15227_v10 }
 0x3c5   : > { %v5068_v19 = vrot.slane %v5066_v58, 5  ;;  %v4043_v46 = vpop.permute.xlu1 %4042  ;;  %v10441_v12 = vcombine.low %v15196_v14, %v7405_v25  ;;  %v15279_v17 = vsel %vm12881_vm10, %v5843_v20, %v5844_v37  ;;  %v2890_v20 = vadd.f32 %v2836_v8, %v15192_v11 }
 0x3c6   : > { %16898 = vst [vmem:[#allocation142_spill] sm:$0xff] %v15279_v17  ;;  %v4146_v9 = vmul.f32 %v15284_v63, %v4043_v46  ;;  %v3626_v55 = vpop.permute.xlu0 %3625  ;;  %v5850_v46 = vrot.slane %v5848_v61, 4  ;;  %v6863_v28 = vsel %vm12338_vm4, %v15212_v23, %v6862_v45  ;;  %v3764_v11 = vadd.f32 %v3710_v0, %v3327_v15  ;;  %v15316_v61 = vld [vmem:[%s16267_s2] ss:$0 sm:$0xff] }
 0x3c7   : > { %v5069_v14 = vsel %vm12338_vm4, %v5064_v43, %v5068_v19  ;;  %10992 = vmatmul.mubr.msk.bf16.gmra.mrb[20].mxu0 %vm5199_vm5, %v10441_v12  ;;  %v3276_v19 = vmul.f32 %v15222_v1, %v15199_v40  ;;  %v3712_v12 = vmul.f32 %v15258_v39, %v3621_v26  ;;  %v6853_v21 = vsel %vm12338_vm4, %v6848_v4, %v15156_v30 }
 0x3c8   : > { %v10237_v7 = vcombine.low %v16899_v27, %v5069_v14  ;;  %v4200_v43 = vadd.f32 %v4146_v9, %v3763_v53  ;;  %v6865_v40 = vshrl.u32 %v15291_v16, 16  ;;  %v15323_v30 = vcombine.low %v6853_v21, %v6863_v28 }
 0x3c9   : > { %v4048_v31 = vpop.permute.xlu1 %4047  ;;  %v15307_v58 = vld [vmem:[#allocation2 + $0xa4] sm:$0x1]  ;;  %v6868_v25 = vshll.u32 %v15291_v16, 16  ;;  %v3274_v14 = vmul.f32 %v15222_v1, %v15248_v41  ;;  %v3766_v27 = vadd.f32 %v3712_v12, %v15246_v49  ;;  %v11518_v12 = vld [vmem:[%s16266_s1 + $0x2] ss:$0 sm:$0xff] }
 0x3ca   : > { %10825 = vmatprep.mubr.msk.bf16.mxu1 %vm5199_vm5, %v10237_v7  ;;  %v4752_v44 = vld [vmem:[#allocation2 + $0xa4] sm:$0x1]  ;;  %v4261_v23 = vadd.f32 %v15316_v61, %v4200_v43  ;;  %v4147_v15 = vmul.f32 %v15284_v63, %v4048_v31  ;;  %v3194_v26 = vpop.permute.xlu0 %3193  ;;  %v7411_v8 = vrot.slane %v15307_v58, 5  ;;  %16900 = vst [vmem:[#allocation144_spill] sm:$0xff] %v15323_v30  ;;  %v3713_v43 = vmul.f32 %v15258_v39, %v3626_v55  ;;  %v16902_v55 = vld [vmem:[#allocation119_spill] sm:$0xff] }
 0x3cb   : > { %v5090_v37 = vshll.u32 %v4752_v44, 16  ;;  %v5851_v45 = vrot.slane %v4752_v44, 5  ;;  %v15350_v31 = vmul.f32 %v11518_v12, %v16902_v55  ;;  %v3277_v21 = vmul.f32 %v15222_v1, %v3194_v26  ;;  %v8127_v26 = vld [vmem:[#allocation2 + $0x98] sm:$0x1] }
 0x3cc   : > { %v4315_v62 = vmax.f32 %v4261_v23, 0.0  ;;  %v4201_v0 = vadd.f32 %v4147_v15, %v3764_v11  ;;  %v7412_v53 = vsel %vm12881_vm10, %v7410_v51, %v7411_v8  ;;  %v3330_v23 = vadd.f32 %v3276_v19, %v15215_v47 }
 0x3cd   : > { %v5092_v9 = vrot.slane %v5090_v37, 5  ;;  %v3616_v7 = vpop.permute.xlu1 %3615  ;;  %v10442_v4 = vcombine.low %v15252_v38, %v7412_v53  ;;  %v15334_v10 = vsel %vm12881_vm10, %v5850_v46, %v5851_v45  ;;  %v2893_v15 = vadd.f32 %v2839_v59, %v15236_v18  ;;  %v15358_v45 = vld [vmem:[#allocation2 + $0x94] sm:$0xf] }
 0x3ce   : > { %16901 = vst [vmem:[#allocation145_spill] sm:$0xff] %v15334_v10  ;;  %v4403_v16 = vsel %vm4331_vm6, %v4315_v62, 0.0  ;;  %v4262_v51 = vadd.f32 %v15316_v61, %v4201_v0  ;;  %v4058_v28 = vpop.permute.xlu0 %4057  ;;  %v3767_v19 = vadd.f32 %v3713_v43, %v3330_v23  ;;  %v6884_v23 = vshll.u32 %v15307_v58, 16 }
 0x3cf   : > { %v5093_v41 = vsel %vm12338_vm4, %v5088_v29, %v5092_v9  ;;  %v10628_v11 = vpack.c.bf16 %v4403_v16, %v4403_v16  ;;  %v4149_v49 = vmul.f32 %v15284_v63, %v4058_v28  ;;  %10995 = vmatprep.mubr.msk.bf16.mxu0 %vm5199_vm5, %v10442_v4  ;;  %v3711_v29 = vmul.f32 %v15258_v39, %v3616_v7  ;;  %v16903_v4 = vld [vmem:[#allocation121_spill] sm:$0xff] }
 0x3d0   : > { %v10238_v38 = vcombine.low %v5083_v57, %v5093_v41  ;;  %v4316_v44 = vmax.f32 %v4262_v51, 0.0  ;;  %v3328_v57 = vadd.f32 %v3274_v14, %v2890_v20  ;;  %v6867_v9 = vrot.slane %v6865_v40, 4 }
 0x3d1   : > { %4693 = vst.msk [vmem:[#allocation2 + $0xa8] sm:$0xf] %vm4649_vm1, %v10628_v11  ;;  %v4203_v8 = vadd.f32 %v4149_v49, %v3766_v27  ;;  %v3631_v37 = vpop.permute.xlu1 %3630  ;;  %v6870_v7 = vrot.slane %v6868_v25, 5  ;;  %v1530_v47 = vmul.f32 %v11518_v12, %v16903_v4  ;;  %v3331_v59 = vadd.f32 %v3277_v21, %v2893_v15  ;;  %v8835_v15 = vld [vmem:[#allocation2 + $0x90] sm:$0xe] }
 0x3d2   : > { %10826 = vmatmul.mubr.msk.bf16.gmra.mrb[24].mxu1 %vm5199_vm5, %v10238_v38  ;;  %v10629_v62 = vpack.c.bf16 %v4316_v44, %v4316_v44  ;;  %v3714_v0 = vmul.f32 %v15258_v39, %v3631_v37  ;;  %v4063_v53 = vpop.permute.xlu0 %4062  ;;  %v3765_v14 = vadd.f32 %v3711_v29, %v3328_v57  ;;  %v6874_v27 = vshll.u32 %v15206_v56, 16  ;;  %v16905_v4 = vld [vmem:[#allocation122_spill] sm:$0xff] }
 0x3d3   : > { %v4264_v18 = vadd.f32 %v15316_v61, %v4203_v8  ;;  %v4150_v20 = vmul.f32 %v15284_v63, %v4063_v53  ;;  %v8961_v16 = vrot.slane %v15358_v45, 5  ;;  %v6878_v40 = vshrl.u32 %v15206_v56, 16 }
 0x3d4   : > { %4694 = vst.msk [vmem:[#allocation2 + $0xac] sm:$0xf] %vm4649_vm1, %v10629_v62  ;;  %v8964_v25 = vrot.slane %v8127_v26, 5  ;;  %v3768_v11 = vadd.f32 %v3714_v0, %v3331_v59  ;;  %v6871_v38 = vor.u32 %v6870_v7, %v6867_v9  ;;  %v15378_v37 = vrot.slane %v6874_v27, 5 }
 0x3d5   : > { %v4318_v51 = vmax.f32 %v4264_v18, 0.0  ;;  %v4204_v28 = vadd.f32 %v4150_v20, %v3767_v19  ;;  %v4068_v41 = vpop.permute.xlu1 %4067  ;;  %v8963_v55 = vrot.slane %v8961_v16, 4  ;;  %v6880_v7 = vrot.slane %v6878_v40, 4 }
 0x3d6   : > { %v4151_v43 = vmul.f32 %v15284_v63, %v4068_v41  ;;  %v4053_v49 = vpop.permute.xlu0 %4052  ;;  %v1147_v58 = vadd.f32 %v15071_v48, %v15033_v32  ;;  %v1529_v19 = vmul.f32 %v11518_v12, %v16905_v4  ;;  %v1146_v41 = vadd.f32 %v15075_v24, %v15037_v34 }
 0x3d7   : > { %v4406_v44 = vsel %vm4331_vm6, %v4318_v51, 0.0  ;;  %v4265_v21 = vadd.f32 %v15316_v61, %v4204_v28  ;;  %v4148_v29 = vmul.f32 %v15284_v63, %v4053_v49  ;;  %v15382_v62 = vsel %vm12881_vm10, %v8963_v55, %v8964_v25 }
 0x3d8   : > { %v10631_v56 = vpack.c.bf16 %v4406_v44, %v4406_v44  ;;  %v4205_v57 = vadd.f32 %v4151_v43, %v3768_v11  ;;  %v15376_v8 = vld [vmem:[#allocation2 + $0xa8] sm:$0xf]  ;;  %16904 = vst [vmem:[#allocation146_spill] sm:$0xff] %v15382_v62  ;;  %v10543_v28 = vrot.slane %v8835_v15, 9  ;;  %v15398_v32 = vadd.f32 %v15350_v31, %v15064_v35 }
 0x3d9   : > { %v4319_v0 = vmax.f32 %v4265_v21, 0.0  ;;  %v4202_v53 = vadd.f32 %v4148_v29, %v3765_v14  ;;  %v1887_v26 = vpop.permute.xlu1 %1886  ;;  %v5095_v9 = vshrl.u32 %v15376_v8, 16  ;;  %v5098_v59 = vshll.u32 %v15376_v8, 16  ;;  %v15412_v21 = vld [vmem:[#allocation2] sm:$0xf] }
 0x3da   : > { %4696 = vst.msk [vmem:[#allocation2 + $0xb4] sm:$0xf] %vm4649_vm1, %v10631_v56  ;;  %v4266_v18 = vadd.f32 %v15316_v61, %v4205_v57  ;;  %v1892_v20 = vpop.permute.xlu0 %1891  ;;  %v15392_v14 = vrot.slane %v6871_v38, 4  ;;  %v15402_v40 = vrot.slane %v6884_v23, 5  ;;  %v15404_v25 = vadd.f32 %v1530_v47, %v1147_v58  ;;  %v7271_v38 = vld [vmem:[#allocation2 + $0xa8] sm:$0xe] }
 0x3db   : > { %v10632_v27 = vpack.c.bf16 %v4319_v0, %v4319_v0  ;;  %v4263_v51 = vadd.f32 %v15316_v61, %v4202_v53  ;;  %v15400_v12 = vld [vmem:[#allocation2 + $0xac] sm:$0xf]  ;;  %v5097_v55 = vrot.slane %v5095_v9, 4  ;;  %v6881_v34 = vor.u32 %v6880_v7, %v15378_v37  ;;  %v15414_v47 = vld [vmem:[#allocation2 + $0x4] sm:$0xf] }
 0x3dc   : > { %v4320_v48 = vmax.f32 %v4266_v18, 0.0  ;;  %v15407_v49 = vld [vmem:[#allocation2 + $0xac] sm:$0xf]  ;;  %v1583_v24 = vadd.f32 %v1529_v19, %v1146_v41  ;;  %v5100_v44 = vrot.slane %v5098_v59, 5  ;;  %v11521_v56 = vld [vmem:[%s16266_s1 + $0x3] ss:$0 sm:$0xff]  ;;  %v6877_v4 = vsel %vm12338_vm4, %v15392_v14, %v15378_v37 }
 0x3dd   : > { %4697 = vst.msk [vmem:[#allocation2 + $0xb8] sm:$0xf] %vm4649_vm1, %v10632_v27  ;;  %v4317_v11 = vmax.f32 %v4263_v51, 0.0  ;;  %v2329_v43 = vpop.permute.xlu1 %2328  ;;  %v1967_v57 = vmul.f32 %v11521_v56, %v1892_v20  ;;  %v5104_v0 = vshll.u32 %v15400_v12, 16  ;;  %v15424_v53 = vld [vmem:[#allocation2 + $0xa8] sm:$0xe]  ;;  %v15441_v51 = vsel %vm12881_vm10, %v10543_v28, %v8961_v16 }
 0x3de   : > { %v4408_v35 = vsel %vm4342_vm7, %v4320_v48, 0.0  ;;  %v1897_v31 = vpop.permute.xlu0 %1896  ;;  %v7415_v7 = vrot.slane %v15407_v49, 5  ;;  %v5108_v58 = vshrl.u32 %v15400_v12, 16  ;;  %v10425_v18 = vrot.slane %v7271_v38, 9  ;;  %16907 = vst [vmem:[#allocation147_spill] sm:$0xff] %v15441_v51 }
 0x3df   : > { %v10633_v23 = vpack.c.bf16 %v4408_v35, %v4408_v35  ;;  %v4405_v15 = vsel %vm4342_vm7, %v4317_v11, 0.0  ;;  %v6882_v27 = vrot.slane %v6881_v34, 4  ;;  %v15444_v41 = vmul.f32 %v11521_v56, %v1887_v26 }
 0x3e0   : > { %v10630_v9 = vpack.c.bf16 %v4405_v15, %v4405_v15  ;;  %v5101_v14 = vor.u32 %v5100_v44, %v5097_v55  ;;  %v10305_v11 = vrot.slane %v15424_v53, 9  ;;  %v2021_v38 = vadd.f32 %v1967_v57, %v1583_v24 }
 0x3e1   : > { %4698 = vst.msk [vmem:[#allocation2 + $0xbc] sm:$0x1] %vm4652_vm0, %v10633_v23  ;;  %v2334_v19 = vpop.permute.xlu1 %2333  ;;  %v15433_v59 = vld [vmem:[#allocation2 + $0xb4] sm:$0xf]  ;;  %v2404_v34 = vmul.f32 %v15168_v42, %v2329_v43  ;;  %v5106_v45 = vrot.slane %v5104_v0, 5  ;;  %v7416_v16 = vsel %vm12881_vm10, %v10425_v18, %v7415_v7  ;;  %v5110_v26 = vrot.slane %v5108_v58, 4 }
 0x3e2   : > { %16906 = vst [vmem:[#allocation165_spill] sm:$0xff] %v15433_v59  ;;  %4695 = vst.msk [vmem:[#allocation2 + $0xb0] sm:$0x1] %vm4652_vm0, %v10630_v9  ;;  %v15446_v37 = vpop.permute.xlu0 %2323  ;;  %v5119_v48 = vshrl.u32 %v15433_v59, 16  ;;  %v7272_v35 = vld [vmem:[#allocation2 + $0xb4] sm:$0xe]  ;;  %v6887_v44 = vsel %vm12338_vm4, %v6882_v27, %v15402_v40  ;;  %v15465_v9 = vmul.f32 %v11521_v56, %v1897_v31 }
 0x3e3   : > { %v5122_v23 = vshll.u32 %v15433_v59, 16  ;;  %v7417_v43 = vrot.slane %v7415_v7, 4  ;;  %v5102_v46 = vrot.slane %v5101_v14, 4  ;;  %v2458_v60 = vadd.f32 %v2404_v34, %v2021_v38 }
 0x3e4   : > { %v15454_v28 = vld [vmem:[#allocation2 + $0xb8] sm:$0xf]  ;;  %v5121_v55 = vrot.slane %v5119_v48, 4  ;;  %v10426_v20 = vrot.slane %v7272_v35, 9  ;;  %v5855_v27 = vrot.slane %v15400_v12, 5  ;;  %v5111_v29 = vor.u32 %v5110_v26, %v5106_v45 }
 0x3e5   : > { %v15456_v15 = vld [vmem:[#allocation2 + $0xb8] sm:$0xf]  ;;  %v15461_v24 = vpop.permute.xlu1 %2760  ;;  %v7422_v57 = vrot.slane %v15454_v28, 5  ;;  %v5124_v0 = vrot.slane %v5122_v23, 5  ;;  %v15475_v56 = vcombine.low %v6877_v4, %v6887_v44  ;;  %v2405_v14 = vmul.f32 %v15168_v42, %v2334_v19 }
 0x3e6   : > { %v5128_v53 = vshll.u32 %v15456_v15, 16  ;;  %v2766_v18 = vpop.permute.xlu0 %2765  ;;  %v5132_v58 = vshrl.u32 %v15456_v15, 16  ;;  %v5112_v51 = vrot.slane %v5111_v29, 4 }
 0x3e7   : > { %v5125_v40 = vor.u32 %v5124_v0, %v5121_v55  ;;  %16908 = vst [vmem:[#allocation35_spill] sm:$0xff] %v15475_v56  ;;  %v7424_v48 = vrot.slane %v7422_v57, 4  ;;  %v5107_v0 = vsel %vm12338_vm4, %v5102_v46, %v5106_v45  ;;  %v7423_v19 = vsel %vm12881_vm10, %v10426_v20, %v7422_v57 }
 0x3e8   : > { %v15471_v7 = vld [vmem:[#allocation2 + $0xbc] sm:$0x1]  ;;  %v5130_v30 = vrot.slane %v5128_v53, 5  ;;  %v5134_v31 = vrot.slane %v5132_v58, 4  ;;  %v2841_v20 = vmul.f32 %v15188_v36, %v2766_v18 }
 0x3e9   : > { %v15473_v23 = vld [vmem:[#allocation2 + $0xbc] sm:$0x1]  ;;  %v3204_v10 = vpop.permute.xlu1 %3203  ;;  %v15478_v22 = vld [vmem:[#allocation2 + $0xb0] sm:$0x1]  ;;  %v7425_v38 = vrot.slane %v15471_v7, 5  ;;  %v5126_v58 = vrot.slane %v5125_v40, 4 }
 0x3ea   : > { %v4753_v34 = vld [vmem:[#allocation2 + $0xb0] sm:$0x1]  ;;  %v2771_v55 = vpop.permute.xlu0 %2770  ;;  %v7418_v26 = vrot.slane %v15478_v22, 5  ;;  %v5135_v44 = vor.u32 %v5134_v31, %v5130_v30  ;;  %v5138_v56 = vshll.u32 %v15473_v23, 16  ;;  %v15495_v31 = vsel %vm12881_vm10, %v10305_v11, %v5855_v27 }
 0x3eb   : > { %v5114_v4 = vshll.u32 %v4753_v34, 16  ;;  %v7426_v53 = vsel %vm12881_vm10, %v7424_v48, %v7425_v38  ;;  %v5857_v40 = vrot.slane %v5855_v27, 4  ;;  %v5858_v38 = vrot.slane %v4753_v34, 5 }
 0x3ec   : > { %v7419_v35 = vsel %vm12881_vm10, %v7417_v43, %v7418_v26  ;;  %v10444_v62 = vcombine.low %v7423_v19, %v7426_v53  ;;  %v5136_v46 = vrot.slane %v5135_v44, 4  ;;  %v5140_v45 = vrot.slane %v5138_v56, 5  ;;  %v5719_v43 = vld [vmem:[#allocation2 + $0xb4] sm:$0xe] }
 0x3ed   : > { %v5116_v17 = vrot.slane %v5114_v4, 5  ;;  %v3209_v33 = vpop.permute.xlu1 %3208  ;;  %v10443_v59 = vcombine.low %v7416_v16, %v7419_v35  ;;  %v5131_v16 = vsel %vm12338_vm4, %v5126_v58, %v5130_v30  ;;  %v5862_v11 = vrot.slane %v15456_v15, 5 }
 0x3ee   : > { %v3199_v57 = vpop.permute.xlu0 %3198  ;;  %v5141_v56 = vsel %vm12338_vm4, %v5136_v46, %v5140_v45  ;;  %v3279_v18 = vmul.f32 %v15222_v1, %v3204_v10  ;;  %v10306_v34 = vrot.slane %v5719_v43, 9  ;;  %v2022_v26 = vadd.f32 %v15465_v9, %v15404_v25 }
 0x3ef   : > { %v5117_v48 = vsel %vm12338_vm4, %v5112_v51, %v5116_v17  ;;  %10996 = vmatmul.mubr.msk.bf16.gmra.mrb[24].mxu0 %vm5199_vm5, %v10443_v59  ;;  %v10240_v35 = vcombine.low %v5131_v16, %v5141_v56  ;;  %v15510_v17 = vsel %vm12881_vm10, %v5857_v40, %v5858_v38  ;;  %v5865_v59 = vrot.slane %v15473_v23, 5  ;;  %v16910_v16 = vld [vmem:[#allocation38_spill] sm:$0xff] }
 0x3f0   : > { %v10239_v29 = vcombine.low %v5107_v0, %v5117_v48  ;;  %10999 = vmatprep.mubr.msk.bf16.mxu0 %vm5199_vm5, %v10444_v62  ;;  %v2403_v51 = vmul.f32 %v15168_v42, %v15446_v37  ;;  %v5864_v10 = vrot.slane %v5862_v11, 4  ;;  %v2020_v62 = vadd.f32 %v15444_v41, %v15398_v32  ;;  %v16911_v56 = vld [vmem:[#allocation10_spill] sm:$0xff] }
 0x3f1   : > { %v3636_v30 = vpop.permute.xlu1 %3635  ;;  %v2895_v0 = vadd.f32 %v2841_v20, %v2458_v60  ;;  %v2842_v23 = vmul.f32 %v15188_v36, %v2771_v55  ;;  %v2840_v37 = vmul.f32 %v15188_v36, %v15461_v24  ;;  %v16909_v44 = vcombine.low %v15412_v21, %v15414_v47 }
 0x3f2   : > { %10829 = vmatprep.mubr.msk.bf16.mxu1 %vm5199_vm5, %v10239_v29  ;;  %v3641_v42 = vpop.permute.xlu0 %3640  ;;  %v15533_v32 = vsel %vm12881_vm10, %v10306_v34, %v5862_v11  ;;  %v15537_v60 = vsel %vm12881_vm10, %v5864_v10, %v5865_v59  ;;  %v2459_v25 = vadd.f32 %v2405_v14, %v2022_v26  ;;  %v3280_v9 = vmul.f32 %v15222_v1, %v3209_v33  ;;  %v15549_v33 = vld [vmem:[%s16268_s3 + $0x18] sm:$0xff]   ;;  %v11522_v10 = vld [vmem:[%s16268_s3 + $0x10] sm:$0xff]  }
 0x3f3   : > { %10830 = vmatmul.mubr.msk.bf16.gmra.mrb[28].mxu1 %vm5199_vm5, %v10240_v35  ;;  %v3716_v4 = vmul.f32 %v15258_v39, %v3641_v42  ;;  %v3333_v41 = vadd.f32 %v3279_v18, %v2895_v0  ;;  %v2457_v24 = vadd.f32 %v2403_v51, %v2020_v62  ;;  %v3278_v21 = vmul.f32 %v15222_v1, %v3199_v57  ;;  %v6567_v18 = vld [vmem:[#allocation2 + $0xa8] sm:$0xf]  ;;  %v16913_v51 = vld [vmem:[#allocation123_spill] sm:$0xff] }
 0x3f4   : > { %10835 = vmatprep.mubr.msk.bf16.mxu1 %vm5199_vm5, %v16909_v44  ;;  %v2896_v19 = vadd.f32 %v2842_v23, %v2459_v25  ;;  %v3715_v20 = vmul.f32 %v15258_v39, %v3636_v30  ;;  %v16912_v11 = vcombine.low %v16910_v16, %v16911_v56  ;;  %v16914_v30 = vld [vmem:[#allocation11_spill] sm:$0xff]  ;;  %v6889_v23 = vshrl.u32 %v6567_v18, 16 }
 0x3f5   : > { %v4078_v55 = vpop.permute.xlu1 %4077  ;;  %v3770_v53 = vadd.f32 %v3716_v4, %v3333_v41  ;;  %v2894_v45 = vadd.f32 %v2840_v37, %v2457_v24  ;;  %v16915_v34 = vcombine.low %v16913_v51, %v16914_v30  ;;  %v6570_v4 = vld [vmem:[#allocation2 + $0xb4] sm:$0xf]  ;;  %v6898_v41 = vshll.u32 %v15407_v49, 16 }
 0x3f6   : > { %v4153_v58 = vmul.f32 %v15284_v63, %v4078_v55  ;;  %v3646_v46 = vpop.permute.xlu0 %3645  ;;  %v3334_v48 = vadd.f32 %v3280_v9, %v2896_v19  ;;  %v6891_v25 = vrot.slane %v6889_v23, 4  ;;  %v16922_v23 = vld [vmem:[#allocation87_spill] sm:$0xff] }
 0x3f7   : > { %v3717_v14 = vmul.f32 %v15258_v39, %v3646_v46  ;;  %v3332_v38 = vadd.f32 %v3278_v21, %v2894_v45  ;;  %v6902_v21 = vshrl.u32 %v15407_v49, 16  ;;  %v6900_v19 = vrot.slane %v6898_v41, 5  ;;  %v16916_v45 = vld [vmem:[#allocation15_spill] sm:$0xff] }
 0x3f8   : > { %v4207_v40 = vadd.f32 %v4153_v58, %v3770_v53  ;;  %v6908_v53 = vshll.u32 %v15478_v22, 16  ;;  %v6913_v58 = vshrl.u32 %v6570_v4, 16 }
 0x3f9   : > { %v4083_v1 = vpop.permute.xlu1 %4082  ;;  %v3771_v43 = vadd.f32 %v3717_v14, %v3334_v48  ;;  %v3769_v35 = vadd.f32 %v3715_v20, %v3332_v38  ;;  %v16917_v20 = vld [vmem:[#allocation16_spill] sm:$0xff]  ;;  %v6904_v48 = vrot.slane %v6902_v21, 4 }
 0x3fa   : > { %v4268_v57 = vadd.f32 %v15316_v61, %v4207_v40  ;;  %v4154_v29 = vmul.f32 %v15284_v63, %v4083_v1  ;;  %v4073_v39 = vpop.permute.xlu0 %4072  ;;  %v6916_v40 = vshll.u32 %v6570_v4, 16  ;;  %v16919_v1 = vld [vmem:[#allocation45_spill] sm:$0xff]  ;;  %v6910_v22 = vrot.slane %v6908_v53, 5 }
 0x3fb   : > { %10836 = vmatmul.mubr.msk.bf16.vlgmr.msra.gmra.mrb[0].mxu1 %vm5199_vm5, %v16912_v11  ;;  %v4152_v59 = vmul.f32 %v15284_v63, %v4073_v39  ;;  %v6892_v63 = vshll.u32 %v6567_v18, 16  ;;  %v6915_v5 = vrot.slane %v6913_v58, 4  ;;  %v6905_v56 = vor.u32 %v6904_v48, %v6900_v19  ;;  %v15603_v53 = vld [vmem:[#allocation2 + $0xac] sm:$0xf] }
 0x3fc   : > { %10839 = vmatprep.mubr.msk.bf16.mxu1 %vm5199_vm5, %v16915_v34  ;;  %10868 = vmatpush3.bf16.msra.mxu1 %v11522_v10  ;;  %v4322_v62 = vmax.f32 %v4268_v57, 0.0  ;;  %v4208_v26 = vadd.f32 %v4154_v29, %v3771_v43  ;;  %v16920_v57 = vld [vmem:[#allocation157_spill] sm:$0xff]  ;;  %v6918_v11 = vrot.slane %v6916_v40, 5  ;;  %v6922_v39 = vshll.u32 %v15454_v28, 16  ;;  %v16928_v40 = vld [vmem:[#allocation43_spill] sm:$0xff] }
 0x3fd   : > { %10901 = vmatprep.subr.bf16.mxu1 %v15549_v33  ;;  %v4206_v0 = vadd.f32 %v4152_v59, %v3769_v35  ;;  %v6894_v24 = vrot.slane %v6892_v63, 5  ;;  %v16921_v43 = vcombine.low %v16919_v1, %v16920_v57  ;;  %v6926_v18 = vshrl.u32 %v15454_v28, 16  ;;  %v16923_v28 = vld [vmem:[#allocation80_spill] sm:$0xff]  ;;  %v15618_v1 = vld [vmem:[#allocation2 + $0xb0] sm:$0x1] }
 0x3fe   : > { %v10635_v42 = vpack.c.bf16 %v4322_v62, %v4322_v62  ;;  %v4269_v37 = vadd.f32 %v15316_v61, %v4208_v26  ;;  %v6906_v52 = vrot.slane %v6905_v56, 4  ;;  %v6919_v34 = vor.u32 %v6918_v11, %v6915_v5  ;;  %v16926_v63 = vld [vmem:[#allocation88_spill] sm:$0xff]  ;;  %v16931_v5 = vld [vmem:[#allocation159_spill] sm:$0xff] }
 0x3ff   : > { %v4267_v44 = vadd.f32 %v15316_v61, %v4206_v0  ;;  %v16918_v61 = vcombine.low %v16916_v45, %v16917_v20  ;;  %v6895_v14 = vor.u32 %v6894_v24, %v6891_v25  ;;  %v6924_v62 = vrot.slane %v6922_v39, 5  ;;  %v11446_v20 = vld [vmem:[#allocation2 + $0x18] sm:$0xff]  }
 0x400   : > { %4700 = vst.msk [vmem:[#allocation2 + $0xc4] sm:$0xf] %vm4649_vm1, %v10635_v42  ;;  %v4323_v9 = vmax.f32 %v4269_v37, 0.0  ;;  %v6911_v30 = vsel %vm12338_vm4, %v6906_v52, %v6910_v22  ;;  %v6928_v26 = vrot.slane %v6926_v18, 4  ;;  %v6932_v0 = vshll.u32 %v15471_v7, 16  ;;  %v16925_v37 = vld [vmem:[#allocation53_spill] sm:$0xff] }
 0x401   : > { %v4321_v55 = vmax.f32 %v4267_v44, 0.0  ;;  %v6896_v16 = vrot.slane %v6895_v14, 4  ;;  %v16924_v42 = vcombine.low %v16922_v23, %v16923_v28  ;;  %v16927_v4 = vcombine.low %v16925_v37, %v16926_v63  ;;  %v15629_v52 = vld [vmem:[#allocation2 + $0xb8] sm:$0xf]  ;;  %v15646_v23 = vld [vmem:[#allocation2 + $0xbc] sm:$0x1] }
 0x402   : > { %v4411_v46 = vsel %vm4342_vm7, %v4323_v9, 0.0  ;;  %v6929_v44 = vor.u32 %v6928_v26, %v6924_v62  ;;  %v6920_v9 = vrot.slane %v6919_v34, 4  ;;  %v8975_v48 = vrot.slane %v15603_v53, 5  ;;  %v15642_v34 = vld [vmem:[%s16268_s3 + $0x40] sm:$0xff]  }
 0x403   : > { %10840 = vmatmul.mubr.msk.bf16.gmra.mrb[4].mxu1 %vm5199_vm5, %v16918_v61  ;;  %v10636_v38 = vpack.c.bf16 %v4411_v46, %v4411_v46  ;;  %v4409_v49 = vsel %vm4331_vm6, %v4321_v55, 0.0  ;;  %v6901_v51 = vsel %vm12338_vm4, %v6896_v16, %v6900_v19  ;;  %v6934_v55 = vrot.slane %v6932_v0, 5  ;;  %v8838_v0 = vld [vmem:[#allocation2 + $0xb4] sm:$0xe] }
 0x404   : > { %10843 = vmatprep.mubr.msk.bf16.mxu1 %vm5199_vm5, %v16921_v43  ;;  %v10634_v29 = vpack.c.bf16 %v4409_v49, %v4409_v49  ;;  %v15592_v10 = vcombine.low %v6901_v51, %v6911_v30  ;;  %v6930_v58 = vrot.slane %v6929_v44, 4  ;;  %v6925_v61 = vsel %vm12338_vm4, %v6920_v9, %v6924_v62  ;;  %v8837_v43 = vld [vmem:[#allocation2 + $0xa8] sm:$0xe]  ;;  %v11449_v9 = vld [vmem:[#allocation2 + $0x30] sm:$0xff]  }
 0x405   : > { %4701 = vst.msk [vmem:[#allocation2 + $0xc8] sm:$0x1] %vm4652_vm0, %v10636_v38  ;;  %v16929_v38 = vld [vmem:[#allocation57_spill] sm:$0xff]  ;;  %v10545_v56 = vrot.slane %v8837_v43, 9  ;;  %v8977_v11 = vrot.slane %v8975_v48, 4  ;;  %v8978_v39 = vrot.slane %v15618_v1, 5 }
 0x406   : > { %4699 = vst.msk [vmem:[#allocation2 + $0xc0] sm:$0xf] %vm4649_vm1, %v10634_v29  ;;  %v6935_v14 = vsel %vm12338_vm4, %v6930_v58, %v6934_v55  ;;  %v16930_v49 = vcombine.low %v16928_v40, %v16929_v38  ;;  %v16932_v29 = vld [vmem:[#allocation46_spill] sm:$0xff]  ;;  %v11448_v30 = vld [vmem:[#allocation2 + $0x24] sm:$0xff]   ;;  %v8982_v55 = vrot.slane %v15629_v52, 5  ;;  %vm9645_vm0 = vcmask 1044484  }
 0x407   : > { %v6574_v35 = vld [vmem:[#allocation2 + $0xc4] sm:$0xf]  ;;  %v15620_v57 = vcombine.low %v6925_v61, %v6935_v14  ;;  %v16933_v16 = vcombine.low %v16931_v5, %v16932_v29  ;;  %v15637_v51 = vsel %vm12881_vm10, %v8977_v11, %v8978_v39  ;;  %v16935_v44 = vld [vmem:[#allocation93_spill] sm:$0xff]  ;;  %v10546_v14 = vrot.slane %v8838_v0, 9  ;;  %v8119_v39 = vld [vmem:[#allocation2 + $0x78] sm:$0xf] }
 0x408   : > { %v7429_v59 = vrot.slane %v6574_v35, 5  ;;  %v6950_v37 = vshrl.u32 %v6574_v35, 16  ;;  %v8984_v38 = vrot.slane %v8982_v55, 4  ;;  %v16973_v62 = vld [vmem:[#allocation96_spill] sm:$0xff]  ;;  %vm9648_vm1 = vcmask 1045509  }
 0x40a   : > { %v7431_v41 = vrot.slane %v7429_v59, 4 }
 0x40b   : > { %10844 = vmatmul.mubr.msk.bf16.gmra.mrb[8].mxu1 %vm5199_vm5, %v16924_v42  ;;  %v6946_v42 = vshll.u32 %v6574_v35, 16 }
 0x40c   : > { %10847 = vmatprep.mubr.msk.bf16.mxu1 %vm5199_vm5, %v16927_v4  ;;  %v6575_v25 = vld [vmem:[#allocation2 + $0xc8] sm:$0x1]  ;;  %v16934_v4 = vld [vmem:[#allocation91_spill] sm:$0xff] }
 0x40d   : > { %v7273_v24 = vld [vmem:[#allocation2 + $0xc0] sm:$0xe]  ;;  %v7432_v21 = vrot.slane %v6575_v25, 5  ;;  %v6956_v63 = vshll.u32 %v6575_v25, 16  ;;  %v6948_v25 = vrot.slane %v6946_v42, 5 }
 0x40e   : > { %v10427_v19 = vrot.slane %v7273_v24, 9  ;;  %v6573_v22 = vld [vmem:[#allocation2 + $0xc0] sm:$0xf]  ;;  %v15652_v24 = vld [vmem:[#allocation2 + $0xc4] sm:$0xf] }
 0x40f   : > { %v7433_v7 = vsel %vm12881_vm10, %v7431_v41, %v7432_v21  ;;  %v6937_v18 = vshrl.u32 %v6573_v22, 16  ;;  %v6940_v28 = vshll.u32 %v6573_v22, 16  ;;  %v16936_v41 = vcombine.low %v16934_v4, %v16935_v44  ;;  %v15654_v21 = vld [vmem:[#allocation2 + $0xc8] sm:$0x1] }
 0x410   : > { %v7430_v46 = vsel %vm12881_vm10, %v10427_v19, %v7429_v59  ;;  %v15633_v59 = vsel %vm12881_vm10, %v10545_v56, %v8975_v48  ;;  %v16937_v19 = vld [vmem:[#allocation12_spill] sm:$0xff]  ;;  %v6958_v61 = vrot.slane %v6956_v63, 5  ;;  %v8989_v22 = vrot.slane %v15652_v24, 5 }
 0x411   : > { %v10445_v45 = vcombine.low %v7430_v46, %v7433_v7  ;;  %v6939_v26 = vrot.slane %v6937_v18, 4  ;;  %v16938_v7 = vld [vmem:[#allocation95_spill] sm:$0xff]  ;;  %v6942_v35 = vrot.slane %v6940_v28, 5  ;;  %v6952_v46 = vrot.slane %v6950_v37, 4  ;;  %v16940_v42 = vld [vmem:[#allocation100_spill] sm:$0xff]  ;;  %v16941_v37 = vld [vmem:[#allocation138_spill] sm:$0xff] }
 0x412   : > { %v16939_v58 = vcombine.low %v16937_v19, %v16938_v7  ;;  %v8992_v5 = vrot.slane %v15654_v21, 5  ;;  %v15672_v56 = vsel %vm12881_vm10, %v10546_v14, %v8982_v55  ;;  %v16942_v63 = vcombine.low %v16940_v42, %v16941_v37  ;;  %v11451_v4 = vld [vmem:[#allocation2 + $0x48] sm:$0xff]   ;;  %v5704_v7 = vld [vmem:[#allocation2] sm:$0xe] }
 0x413   : > { %10848 = vmatmul.mubr.msk.bf16.gmra.mrb[12].mxu1 %vm5199_vm5, %v16930_v49  ;;  %11000 = vmatmul.mubr.msk.bf16.gmra.mrb[28].mxu0 %vm5199_vm5, %v10445_v45  ;;  %v8839_v45 = vld [vmem:[#allocation2 + $0xc0] sm:$0xe]  ;;  %v6943_v48 = vor.u32 %v6942_v35, %v6939_v26  ;;  %v6953_v40 = vor.u32 %v6952_v46, %v6948_v25  ;;  %v8985_v49 = vrot.slane %v15646_v23, 5  ;;  %v5757_v19 = vrot.slane %v15414_v47, 5 }
 0x414   : > { %10851 = vmatprep.mubr.msk.bf16.mxu1 %vm5199_vm5, %v16933_v16  ;;  %11005 = vmatprep.mubr.msk.bf16.mxu0 %vm5199_vm5, %v11446_v20  ;;  %v11523_v20 = vld [vmem:[%s16268_s3 + $0x38] sm:$0xff]   ;;  %v10547_v43 = vrot.slane %v8839_v45, 9 }
 0x415   : > { %v6944_v29 = vrot.slane %v6943_v48, 4  ;;  %v6954_v16 = vrot.slane %v6953_v40, 4  ;;  %v15676_v11 = vsel %vm12881_vm10, %v8984_v38, %v8985_v49  ;;  %v11450_v26 = vld [vmem:[#allocation2 + $0x3c] sm:$0xff]   ;;  %v5759_v46 = vrot.slane %v5757_v19, 4  ;;  %v11452_v45 = vld [vmem:[#allocation2 + $0x54] sm:$0xff]   ;;  %v11456_v49 = vld [vmem:[#allocation2 + $0x84] sm:$0xff]  }
 0x416   : > { %v15682_v18 = vsel %vm12881_vm10, %v10547_v43, %v8989_v22  ;;  %v16948_v43 = vld [vmem:[#allocation82_spill] sm:$0xff]  ;;  %v17028_v2 = vcombine.low %v15672_v56, %v15676_v11 }
 0x417   : > { %v6949_v0 = vsel %vm12338_vm4, %v6944_v29, %v6948_v25  ;;  %v6959_v28 = vsel %vm12338_vm4, %v6954_v16, %v6958_v61  ;;  %v10291_v25 = vrot.slane %v5704_v7, 9  ;;  %v11457_v29 = vld [vmem:[#allocation2 + $0x90] sm:$0xff]  }
 0x418   : > { %v15692_v44 = vcombine.low %v6949_v0, %v6959_v28  ;;  %v16952_v16 = vld [vmem:[#allocation126_spill] sm:$0xff]  ;;  %v11525_v28 = vld [vmem:[#allocation2 + $0x1c] sm:$0xf] }
 0x419   : > { %v5758_v47 = vsel %vm12881_vm10, %v10291_v25, %v5757_v19  ;;  %v8153_v42 = vshll.u32 %v11525_v28, 16  ;;  %v8157_v37 = vshrl.u32 %v11525_v28, 16  ;;  %v9667_v56 = vld [vmem:[%s16270_s5 + $0x10] sm:$0xff] }
 0x41b   : > { %10852 = vmatmul.mubr.msk.bf16.gmra.mrb[16].mxu1 %vm5199_vm5, %v16936_v41  ;;  %11006 = vmatmul.mubr.msk.bf16.vlgmr.msra.gmra.mrb[0].mxu0 %vm5199_vm5, %v11448_v30  ;;  %v8991_v30 = vrot.slane %v8989_v22, 4  ;;  %v16949_v22 = vld [vmem:[#allocation153_spill] sm:$0xff] }
 0x41c   : > { %10855 = vmatprep.mubr.msk.bf16.mxu1 %vm5199_vm5, %v16939_v58  ;;  %11038 = vmatpush3.bf16.msra.mxu0 %v11523_v20  ;;  %v11524_v58 = vld [vmem:[#allocation2 + $0x8] sm:$0x1]  ;;  %v16945_v20 = vcombine.low %v15376_v8, %v15400_v12  ;;  %v11455_v8 = vld [vmem:[#allocation2 + $0x78] sm:$0xff]  }
 0x41d   : > { %11009 = vmatprep.mubr.msk.bf16.mxu0 %vm5199_vm5, %v11449_v9  ;;  %11071 = vmatprep.subr.bf16.mxu0 %v15642_v34  ;;  %v15696_v41 = vsel %vm12881_vm10, %v8991_v30, %v8992_v5  ;;  %v16943_v9 = vcombine.low %v15081_v50, %v15096_v3  ;;  %v5760_v35 = vrot.slane %v11524_v58, 5  ;;  %v16944_v50 = vcombine.low %v15148_v6, %v15140_v54  ;;  %v11453_v3 = vld [vmem:[#allocation2 + $0x60] sm:$0xff]   ;;  %v11454_v54 = vld [vmem:[#allocation2 + $0x6c] sm:$0xff]   ;;  %v8095_v12 = vld [vmem:[#allocation2 + $0x18] sm:$0xf] }
 0x41e   : > { %v16946_v6 = vld [vmem:[#allocation165_spill] sm:$0xff]  ;;  %v8144_v40 = vshrl.u32 %v8095_v12, 16  ;;  %v8147_v38 = vshll.u32 %v8095_v12, 16  ;;  %v16950_v5 = vcombine.low %v16948_v43, %v16949_v22 }
 0x41f   : > { %v5761_v61 = vsel %vm12881_vm10, %v5759_v46, %v5760_v35  ;;  %v16947_v48 = vcombine.low %v16946_v6, %v15456_v15  ;;  %v16951_v15 = vld [vmem:[#allocation124_spill] sm:$0xff]  ;;  %v15745_v35 = vrot.slane %v8153_v42, 5  ;;  %v8101_v46 = vld [vmem:[#allocation2 + $0x30] sm:$0xf] }
 0x420   : > { %v10309_v14 = vcombine.low %v5758_v47, %v5761_v61  ;;  %v16953_v30 = vcombine.low %v16951_v15, %v16952_v16  ;;  %v8149_v0 = vrot.slane %v8147_v38, 5  ;;  %v16954_v61 = vld [vmem:[#allocation48_spill] sm:$0xff]  ;;  %v16957_v12 = vld [vmem:[#allocation161_spill] sm:$0xff]  ;;  %v8192_v22 = vshrl.u32 %v8101_v46, 16 }
 0x421   : > { %v11460_v6 = vld [vmem:[#allocation2 + $0xa8] sm:$0xff]  }
 0x423   : > { %10856 = vmatmul.mubr.msk.bf16.gmra.mrb[20].mxu1 %vm5199_vm5, %v16942_v63  ;;  %11010 = vmatmul.mubr.msk.bf16.gmra.mrb[4].mxu0 %vm5199_vm5, %v11450_v26  ;;  %v8146_v26 = vrot.slane %v8144_v40, 4  ;;  %v8098_v63 = vld [vmem:[#allocation2 + $0x24] sm:$0xf]  ;;  %v16958_v40 = vld [vmem:[#allocation51_spill] sm:$0xff] }
 0x424   : > { %10859 = vmatprep.mubr.msk.bf16.mxu1 %vm5199_vm5, %v16943_v9  ;;  %11013 = vmatprep.mubr.msk.bf16.mxu0 %vm5199_vm5, %v11451_v4  ;;  %v15742_v4 = vld [vmem:[%s16268_s3 + $0x20] sm:$0xff]   ;;  %v11527_v9 = vld [vmem:[#allocation2 + $0x28] sm:$0xf]  ;;  %v8168_v25 = vshrl.u32 %v8098_v63, 16  ;;  %v16959_v38 = vcombine.low %v16957_v12, %v16958_v40  ;;  %v16961_v40 = vld [vmem:[#allocation54_spill] sm:$0xff] }
 0x425   : > { %v8177_v19 = vshll.u32 %v11527_v9, 16  ;;  %v8181_v7 = vshrl.u32 %v11527_v9, 16  ;;  %v8150_v58 = vor.u32 %v8149_v0, %v8146_v26  ;;  %v11530_v0 = vld [vmem:[#allocation2 + $0x2c] sm:$0x1]  ;;  %v11531_v9 = vld [vmem:[#allocation2 + $0x38] sm:$0x1] }
 0x426   : > { %v8187_v28 = vshll.u32 %v11530_v0, 16  ;;  %v16960_v12 = vld [vmem:[#allocation151_spill] sm:$0xff] }
 0x427   : > { %v15759_v15 = vrot.slane %v8150_v58, 4  ;;  %v11532_v58 = vld [vmem:[#allocation2 + $0x40] sm:$0xf] }
 0x428   : > { %v16963_v0 = vld [vmem:[#allocation55_spill] sm:$0xff] }
 0x42b   : > { %10860 = vmatmul.mubr.msk.bf16.gmra.mrb[24].mxu1 %vm5199_vm5, %v16944_v50  ;;  %11014 = vmatmul.mubr.msk.bf16.gmra.mrb[8].mxu0 %vm5199_vm5, %v11452_v45  ;;  %v11459_v45 = vld [vmem:[#allocation2 + $0x9c] sm:$0xff]   ;;  %v8171_v50 = vshll.u32 %v8098_v63, 16 }
 0x42c   : > { %10863 = vmatprep.mubr.msk.bf16.mxu1 %vm5199_vm5, %v16945_v20  ;;  %11017 = vmatprep.mubr.msk.bf16.mxu0 %vm5199_vm5, %v11453_v3  ;;  %v11528_v3 = vld [vmem:[#allocation2 + $0x34] sm:$0xf] }
 0x42d   : > { %v8201_v20 = vshll.u32 %v11528_v3, 16  ;;  %v8205_v47 = vshrl.u32 %v11528_v3, 16  ;;  %v8173_v26 = vrot.slane %v8171_v50, 5  ;;  %v8194_v3 = vrot.slane %v8192_v22, 4  ;;  %v8107_v50 = vld [vmem:[#allocation2 + $0x48] sm:$0xf] }
 0x42f   : > { %v15762_v42 = vrot.slane %v8201_v20, 5  ;;  %v11461_v20 = vld [vmem:[#allocation2 + $0xb4] sm:$0xff]  }
 0x433   : > { %10864 = vmatmul.mubr.msk.bf16.gmra.mrb[28].mxu1 %vm5199_vm5, %v16947_v48  ;;  %11018 = vmatmul.mubr.msk.bf16.gmra.mrb[12].mxu0 %vm5199_vm5, %v11454_v54  ;;  %v15751_v48 = vrot.slane %v8177_v19, 5  ;;  %v8211_v19 = vshll.u32 %v11531_v9, 16 }
 0x434   : > { %10869 = vmatprep.mubr.msk.bf16.mxu1 %vm5199_vm5, %v10309_v14  ;;  %11021 = vmatprep.mubr.msk.bf16.mxu0 %vm5199_vm5, %v11455_v8  ;;  %v16955_v14 = vld [vmem:[#allocation50_spill] sm:$0xff]  ;;  %v8183_v8 = vrot.slane %v8181_v7, 4 }
 0x435   : > { %v16956_v54 = vcombine.low %v16954_v61, %v16955_v14  ;;  %v8225_v14 = vshll.u32 %v11532_v58, 16  ;;  %v8213_v22 = vrot.slane %v8211_v19, 5  ;;  %v8243_v19 = vshll.u32 %v8107_v50, 16 }
 0x436   : > { %v8184_v63 = vor.u32 %v8183_v8, %v15751_v48 }
 0x43b   : > { %10870 = vmatmul.mubr.msk.bf16.vlgmr.msra.gmra.mrb[0].mxu1 %vm5199_vm5, %v16950_v5  ;;  %11022 = vmatmul.mubr.msk.bf16.gmra.mrb[16].mxu0 %vm5199_vm5, %v11456_v49  ;;  %v11529_v49 = vld [vmem:[#allocation2 + $0x20] sm:$0x1]  ;;  %v8195_v5 = vshll.u32 %v8101_v46, 16 }
 0x43c   : > { %10873 = vmatprep.mubr.msk.bf16.mxu1 %vm5199_vm5, %v16953_v30  ;;  %11025 = vmatprep.mubr.msk.bf16.mxu0 %vm5199_vm5, %v11457_v29  ;;  %v8163_v43 = vshll.u32 %v11529_v49, 16  ;;  %v8104_v29 = vld [vmem:[#allocation2 + $0x3c] sm:$0xf]  ;;  %v8170_v30 = vrot.slane %v8168_v25, 4  ;;  %v8229_v25 = vshrl.u32 %v11532_v58, 16  ;;  %v11462_v49 = vld [vmem:[#allocation2 + $0xc0] sm:$0xff]  }
 0x43d   : > { %10902 = vmatpush3.bf16.msra.mxu1 %v15549_v33  ;;  %v8159_v33 = vrot.slane %v8157_v37, 4  ;;  %v8207_v37 = vrot.slane %v8205_v47, 4  ;;  %v8216_v7 = vshrl.u32 %v8104_v29, 16  ;;  %v8219_v46 = vshll.u32 %v8104_v29, 16 }
 0x43e   : > { %11136 = vmatprep.subr.bf16.mxu1 %v15742_v4  ;;  %v8197_v61 = vrot.slane %v8195_v5, 5  ;;  %v8231_v9 = vrot.slane %v8229_v25, 4 }
 0x43f   : > { %v8160_v16 = vor.u32 %v8159_v33, %v15745_v35  ;;  %v8156_v33 = vsel %vm12338_vm4, %v15759_v15, %v15745_v35  ;;  %v8208_v8 = vor.u32 %v8207_v37, %v15762_v42  ;;  %v8218_v5 = vrot.slane %v8216_v7, 4  ;;  %v16964_v35 = vld [vmem:[#allocation8_spill] sm:$0xff]  ;;  %v15783_v37 = vld [vmem:[#allocation2 + $0xd0] sm:$0xf]  ;;  %v8840_v7 = vld [vmem:[#allocation2 + $0xcc] sm:$0xe] }
 0x440   : > { %v8221_v29 = vrot.slane %v8219_v46, 5  ;;  %v16965_v15 = vcombine.low %v16963_v0, %v16964_v35  ;;  %v8996_v46 = vrot.slane %v15783_v37, 5  ;;  %v11463_v0 = vld [vmem:[#allocation2 + $0xcc] sm:$0xff]  }
 0x441   : > { %v8161_v47 = vrot.slane %v8160_v16, 4 }
 0x443   : > { %10874 = vmatmul.mubr.msk.bf16.gmra.mrb[4].mxu1 %vm5199_vm5, %v16956_v54  ;;  %11026 = vmatmul.mubr.msk.bf16.gmra.mrb[20].mxu0 %vm5199_vm5, %v11459_v45  ;;  %v8165_v45 = vrot.slane %v8163_v43, 5  ;;  %v8174_v54 = vor.u32 %v8173_v26, %v8170_v30  ;;  %v8185_v43 = vrot.slane %v8184_v63, 4  ;;  %v8198_v30 = vor.u32 %v8197_v61, %v8194_v3  ;;  %v15785_v63 = vld [vmem:[#allocation2 + $0xd4] sm:$0x1] }
 0x444   : > { %10877 = vmatprep.mubr.msk.bf16.mxu1 %vm5199_vm5, %v16959_v38  ;;  %11029 = vmatprep.mubr.msk.bf16.mxu0 %vm5199_vm5, %v11460_v6  ;;  %v8189_v6 = vrot.slane %v8187_v28, 5  ;;  %v16962_v38 = vcombine.low %v16960_v12, %v16961_v40  ;;  %v15781_v26 = vrot.slane %v8225_v14, 5  ;;  %v8240_v28 = vshrl.u32 %v8107_v50, 16  ;;  %v11533_v12 = vld [vmem:[#allocation2 + $0x4c] sm:$0xf] }
 0x445   : > { %v8166_v16 = vsel %vm12338_vm4, %v8161_v47, %v8165_v45  ;;  %v8999_v58 = vrot.slane %v15785_v63, 5  ;;  %v8249_v45 = vshll.u32 %v11533_v12, 16  ;;  %v8253_v3 = vshrl.u32 %v11533_v12, 16  ;;  %v11534_v50 = vld [vmem:[#allocation2 + $0x44] sm:$0x1] }
 0x446   : > { %v10548_v61 = vrot.slane %v8840_v7, 9  ;;  %v8175_v14 = vrot.slane %v8174_v54, 4  ;;  %v8190_v47 = vsel %vm12338_vm4, %v8185_v43, %v8189_v6  ;;  %v8222_v40 = vor.u32 %v8221_v29, %v8218_v5  ;;  %v8110_v12 = vld [vmem:[#allocation2 + $0x54] sm:$0xf]  ;;  %v11535_v29 = vld [vmem:[#allocation2 + $0x50] sm:$0x1] }
 0x447   : > { %v8235_v35 = vshll.u32 %v11534_v50, 16  ;;  %v8242_v7 = vrot.slane %v8240_v28, 4  ;;  %v8245_v54 = vrot.slane %v8243_v19, 5  ;;  %v15803_v43 = vrot.slane %v8249_v45, 5  ;;  %v16970_v45 = vld [vmem:[#allocation58_spill] sm:$0xff] }
 0x448   : > { %v8255_v5 = vrot.slane %v8253_v3, 4  ;;  %v10500_v28 = vcombine.low %v8156_v33, %v8166_v16  ;;  %v16971_v3 = vld [vmem:[#allocation59_spill] sm:$0xff]  ;;  %v8264_v50 = vshrl.u32 %v8110_v12, 16 }
 0x449   : > { %v11536_v33 = vld [vmem:[#allocation2 + $0x58] sm:$0xf] }
 0x44a   : > { %v8273_v16 = vshll.u32 %v11536_v33, 16 }
 0x44b   : > { %10878 = vmatmul.mubr.msk.bf16.gmra.mrb[8].mxu1 %vm5199_vm5, %v16962_v38  ;;  %11030 = vmatmul.mubr.msk.bf16.gmra.mrb[24].mxu0 %vm5199_vm5, %v11461_v20  ;;  %v8209_v20 = vrot.slane %v8208_v8, 4  ;;  %v8998_v38 = vrot.slane %v8996_v46, 4  ;;  %v15796_v8 = vsel %vm12881_vm10, %v10548_v61, %v8996_v46  ;;  %v16968_v46 = vld [vmem:[#allocation154_spill] sm:$0xff] }
 0x44c   : > { %10881 = vmatprep.mubr.msk.bf16.mxu1 %vm5199_vm5, %v16965_v15  ;;  %11033 = vmatprep.mubr.msk.bf16.mxu0 %vm5199_vm5, %v11462_v49  ;;  %v8199_v49 = vrot.slane %v8198_v30, 4  ;;  %v8232_v15 = vor.u32 %v8231_v9, %v15781_v26  ;;  %v8180_v9 = vsel %vm12338_vm4, %v8175_v14, %v15751_v48 }
 0x44d   : > { %v8214_v25 = vsel %vm12338_vm4, %v8209_v20, %v8213_v22  ;;  %v15801_v6 = vsel %vm12881_vm10, %v8998_v38, %v8999_v58  ;;  %v8259_v22 = vshll.u32 %v11535_v29, 16  ;;  %v16967_v20 = vld [vmem:[#allocation158_spill] sm:$0xff]  ;;  %v15817_v58 = vrot.slane %v8222_v40, 4 }
 0x44e   : > { %16966 = vst [vmem:[#allocation52_spill] sm:$0xff] %v15801_v6  ;;  %v16969_v61 = vcombine.low %v16967_v20, %v16968_v46  ;;  %v8204_v19 = vsel %vm12338_vm4, %v8199_v49, %v15762_v42  ;;  %v16972_v38 = vcombine.low %v16970_v45, %v16971_v3  ;;  %v8267_v29 = vshll.u32 %v8110_v12, 16  ;;  %v8113_v46 = vld [vmem:[#allocation2 + $0x60] sm:$0xf]  ;;  %v8116_v12 = vld [vmem:[#allocation2 + $0x6c] sm:$0xf] }
 0x44f   : > { %v8277_v20 = vshrl.u32 %v11536_v33, 16  ;;  %v10501_v48 = vcombine.low %v8180_v9, %v8190_v47  ;;  %v10502_v14 = vcombine.low %v8204_v19, %v8214_v25  ;;  %v8228_v42 = vsel %vm12338_vm4, %v15817_v58, %v15781_v26  ;;  %v11537_v33 = vld [vmem:[#allocation2 + $0x64] sm:$0xf]  ;;  %v11539_v19 = vld [vmem:[#allocation2 + $0x5c] sm:$0x1] }
 0x450   : > { %v8237_v40 = vrot.slane %v8235_v35, 5  ;;  %v8233_v49 = vrot.slane %v8232_v15, 4  ;;  %v8261_v45 = vrot.slane %v8259_v22, 5  ;;  %v8288_v3 = vshrl.u32 %v8113_v46, 16 }
 0x451   : > { %v8297_v30 = vshll.u32 %v11537_v33, 16  ;;  %v8301_v55 = vshrl.u32 %v11537_v33, 16  ;;  %v8269_v47 = vrot.slane %v8267_v29, 5  ;;  %v15830_v25 = vrot.slane %v8273_v16, 5  ;;  %v16974_v33 = vld [vmem:[#allocation97_spill] sm:$0xff] }
 0x452   : > { %v8279_v9 = vrot.slane %v8277_v20, 4  ;;  %v8238_v26 = vsel %vm12338_vm4, %v8233_v49, %v8237_v40  ;;  %v8312_v35 = vshrl.u32 %v8116_v12, 16  ;;  %v8315_v15 = vshll.u32 %v8116_v12, 16  ;;  %v16976_v49 = vld [vmem:[#allocation98_spill] sm:$0xff]  ;;  %v16977_v12 = vld [vmem:[#allocation47_spill] sm:$0xff] }
 0x453   : > { %10882 = vmatmul.mubr.msk.bf16.gmra.mrb[12].mxu1 %vm5199_vm5, %v16969_v61  ;;  %11034 = vmatmul.mubr.msk.bf16.gmra.mrb[28].mxu0 %vm5199_vm5, %v11463_v0  ;;  %v8246_v61 = vor.u32 %v8245_v54, %v8242_v7  ;;  %v8256_v0 = vor.u32 %v8255_v5, %v15803_v43  ;;  %v11538_v7 = vld [vmem:[#allocation2 + $0x70] sm:$0xf]  ;;  %v8283_v58 = vshll.u32 %v11539_v19, 16  ;;  %v8290_v29 = vrot.slane %v8288_v3, 4 }
 0x454   : > { %10885 = vmatprep.mubr.msk.bf16.mxu1 %vm5199_vm5, %v16972_v38  ;;  %11039 = vmatprep.mubr.msk.bf16.mxu0 %vm5199_vm5, %v10500_v28  ;;  %v8291_v38 = vshll.u32 %v8113_v46, 16  ;;  %v8266_v28 = vrot.slane %v8264_v50, 4  ;;  %v8321_v54 = vshll.u32 %v11538_v7, 16  ;;  %v8325_v46 = vshrl.u32 %v11538_v7, 16  ;;  %v11540_v7 = vld [vmem:[#allocation2 + $0x68] sm:$0x1] }
 0x455   : > { %v8247_v5 = vrot.slane %v8246_v61, 4  ;;  %v8257_v22 = vrot.slane %v8256_v0, 4  ;;  %v16975_v50 = vcombine.low %v16973_v62, %v16974_v33  ;;  %v15838_v20 = vrot.slane %v8297_v30, 5 }
 0x456   : > { %v8293_v16 = vrot.slane %v8291_v38, 5  ;;  %v8303_v40 = vrot.slane %v8301_v55, 4  ;;  %v16978_v36 = vcombine.low %v16976_v49, %v16977_v12  ;;  %v8270_v0 = vor.u32 %v8269_v47, %v8266_v28  ;;  %v11542_v12 = vld [vmem:[#allocation2 + $0x74] sm:$0x1] }
 0x457   : > { %v8262_v61 = vsel %vm12338_vm4, %v8257_v22, %v8261_v45  ;;  %v8280_v62 = vor.u32 %v8279_v9, %v15830_v25  ;;  %v8307_v19 = vshll.u32 %v11540_v7, 16  ;;  %v8314_v55 = vrot.slane %v8312_v35, 4  ;;  %v8122_v7 = vld [vmem:[#allocation2 + $0x84] sm:$0xf] }
 0x458   : > { %v8317_v30 = vrot.slane %v8315_v15, 5  ;;  %v15850_v3 = vrot.slane %v8321_v54, 5  ;;  %v8336_v38 = vshrl.u32 %v8119_v39, 16  ;;  %v8339_v33 = vshll.u32 %v8119_v39, 16 }
 0x459   : > { %v8252_v45 = vsel %vm12338_vm4, %v8247_v5, %v15803_v43  ;;  %v8285_v28 = vrot.slane %v8283_v58, 5  ;;  %v8294_v47 = vor.u32 %v8293_v16, %v8290_v29  ;;  %v10503_v9 = vcombine.low %v8228_v42, %v8238_v26  ;;  %v16979_v5 = vld [vmem:[#allocation140_spill] sm:$0xff]  ;;  %v16980_v58 = vld [vmem:[#allocation101_spill] sm:$0xff] }
 0x45a   : > { %v8271_v35 = vrot.slane %v8270_v0, 4  ;;  %v8281_v15 = vrot.slane %v8280_v62, 4  ;;  %v8309_v54 = vrot.slane %v8307_v19, 5  ;;  %v8318_v22 = vor.u32 %v8317_v30, %v8314_v55  ;;  %v16983_v0 = vld [vmem:[#allocation142_spill] sm:$0xff]  ;;  %v11543_v30 = vld [vmem:[#allocation2 + $0x88] sm:$0xf] }
 0x45b   : > { %10886 = vmatmul.mubr.msk.bf16.gmra.mrb[16].mxu1 %vm5199_vm5, %v16975_v50  ;;  %11040 = vmatmul.mubr.msk.bf16.vlgmr.msra.gmra.mrb[0].mxu0 %vm5199_vm5, %v10501_v48  ;;  %v11541_v48 = vld [vmem:[#allocation2 + $0x7c] sm:$0xf]  ;;  %v8338_v39 = vrot.slane %v8336_v38, 4  ;;  %v8341_v27 = vrot.slane %v8339_v33, 5  ;;  %v16981_v29 = vcombine.low %v16979_v5, %v16980_v58  ;;  %v8295_v16 = vrot.slane %v8294_v47, 4 }
 0x45c   : > { %10889 = vmatprep.mubr.msk.bf16.mxu1 %vm5199_vm5, %v16978_v36  ;;  %11072 = vmatpush3.bf16.msra.mxu0 %v15642_v34  ;;  %v8327_v36 = vrot.slane %v8325_v46, 4  ;;  %v8345_v50 = vshll.u32 %v11541_v48, 16  ;;  %v8349_v49 = vshrl.u32 %v11541_v48, 16  ;;  %v8304_v34 = vor.u32 %v8303_v40, %v15838_v20  ;;  %v8125_v33 = vld [vmem:[#allocation2 + $0x90] sm:$0xf] }
 0x45d   : > { %11043 = vmatprep.mubr.msk.bf16.mxu0 %vm5199_vm5, %v10502_v14  ;;  %v10504_v14 = vcombine.low %v8252_v45, %v8262_v61  ;;  %v8331_v46 = vshll.u32 %v11542_v12, 16  ;;  %v8276_v42 = vsel %vm12338_vm4, %v8271_v35, %v15830_v25  ;;  %v8286_v26 = vsel %vm12338_vm4, %v8281_v15, %v8285_v28  ;;  %v16982_v61 = vld [vmem:[#allocation104_spill] sm:$0xff] }
 0x45e   : > { %v8328_v48 = vor.u32 %v8327_v36, %v15850_v3  ;;  %v15857_v6 = vrot.slane %v8345_v50, 5  ;;  %v8351_v43 = vrot.slane %v8349_v49, 4  ;;  %v8305_v40 = vrot.slane %v8304_v34, 4 }
 0x45f   : > { %v16984_v62 = vcombine.low %v16982_v61, %v16983_v0  ;;  %v8360_v19 = vshrl.u32 %v8122_v7, 16  ;;  %v8363_v55 = vshll.u32 %v8122_v7, 16  ;;  %v8369_v38 = vshll.u32 %v11543_v30, 16  ;;  %v11545_v7 = vld [vmem:[#allocation2 + $0x94] sm:$0xf]  ;;  %v16985_v0 = vld [vmem:[#allocation141_spill] sm:$0xff] }
 0x460   : > { %v8373_v36 = vshrl.u32 %v11543_v30, 16  ;;  %v8300_v25 = vsel %vm12338_vm4, %v8295_v16, %v15838_v20  ;;  %v8310_v50 = vsel %vm12338_vm4, %v8305_v40, %v8309_v54  ;;  %v8319_v49 = vrot.slane %v8318_v22, 4  ;;  %v8128_v22 = vld [vmem:[#allocation2 + $0x9c] sm:$0xf]  ;;  %v15887_v40 = vld [vmem:[#allocation2 + $0xa0] sm:$0xf] }
 0x461   : > { %v8333_v45 = vrot.slane %v8331_v46, 5  ;;  %v8329_v28 = vrot.slane %v8328_v48, 4  ;;  %v8342_v47 = vor.u32 %v8341_v27, %v8338_v39  ;;  %v8352_v34 = vor.u32 %v8351_v43, %v15857_v6 }
 0x462   : > { %v8384_v15 = vshrl.u32 %v8125_v33, 16  ;;  %v8387_v12 = vshll.u32 %v8125_v33, 16  ;;  %v8393_v5 = vshll.u32 %v11545_v7, 16  ;;  %v8362_v58 = vrot.slane %v8360_v19, 4  ;;  %v11546_v33 = vld [vmem:[#allocation2 + $0x8c] sm:$0x1] }
 0x463   : > { %10890 = vmatmul.mubr.msk.bf16.gmra.mrb[20].mxu1 %vm5199_vm5, %v16981_v29  ;;  %11044 = vmatmul.mubr.msk.bf16.gmra.mrb[4].mxu0 %vm5199_vm5, %v10503_v9  ;;  %v11544_v9 = vld [vmem:[#allocation2 + $0x80] sm:$0x1]  ;;  %v8365_v29 = vrot.slane %v8363_v55, 5  ;;  %v15880_v61 = vrot.slane %v8369_v38, 5  ;;  %v8375_v20 = vrot.slane %v8373_v36, 4  ;;  %v10505_v16 = vcombine.low %v8276_v42, %v8286_v26 }
 0x464   : > { %10893 = vmatprep.mubr.msk.bf16.mxu1 %vm5199_vm5, %v16984_v62  ;;  %11047 = vmatprep.mubr.msk.bf16.mxu0 %vm5199_vm5, %v10504_v14  ;;  %v8355_v35 = vshll.u32 %v11544_v9, 16  ;;  %v8397_v14 = vshrl.u32 %v11545_v7, 16  ;;  %v10506_v54 = vcombine.low %v8300_v25, %v8310_v50  ;;  %v8324_v27 = vsel %vm12338_vm4, %v8319_v49, %v15850_v3  ;;  %v16986_v62 = vld [vmem:[#allocation145_spill] sm:$0xff]  ;;  %v11547_v49 = vld [vmem:[#allocation2 + $0x98] sm:$0x1] }
 0x465   : > { %v8334_v46 = vsel %vm12338_vm4, %v8329_v28, %v8333_v45  ;;  %v8343_v39 = vrot.slane %v8342_v47, 4  ;;  %v8353_v48 = vrot.slane %v8352_v34, 4  ;;  %v16987_v19 = vcombine.low %v16985_v0, %v16986_v62 }
 0x466   : > { %v8357_v43 = vrot.slane %v8355_v35, 5  ;;  %v8386_v42 = vrot.slane %v8384_v15, 4  ;;  %v8389_v26 = vrot.slane %v8387_v12, 5  ;;  %v15893_v55 = vrot.slane %v8393_v5, 5  ;;  %v8131_v12 = vld [vmem:[#allocation2 + $0xa8] sm:$0xf] }
 0x467   : > { %v8399_v30 = vrot.slane %v8397_v14, 4  ;;  %v16988_v3 = vcombine.low %v15495_v31, %v15510_v17  ;;  %v8366_v38 = vor.u32 %v8365_v29, %v8362_v58  ;;  %v8376_v36 = vor.u32 %v8375_v20, %v15880_v61 }
 0x468   : > { %v8379_v25 = vshll.u32 %v11546_v33, 16  ;;  %v8408_v50 = vshrl.u32 %v8128_v22, 16  ;;  %v8403_v45 = vshll.u32 %v11547_v49, 16  ;;  %v8411_v28 = vshll.u32 %v8128_v22, 16 }
 0x469   : > { %v8417_v47 = vshll.u32 %v15887_v40, 16  ;;  %v8421_v34 = vshrl.u32 %v15887_v40, 16  ;;  %v10507_v31 = vcombine.low %v8324_v27, %v8334_v46  ;;  %v8348_v17 = vsel %vm12338_vm4, %v8343_v39, %v15857_v6  ;;  %v11465_v27 = vld [vmem:[#allocation2 + $0xc] sm:$0xff]  }
 0x46a   : > { %v8358_v9 = vsel %vm12338_vm4, %v8353_v48, %v8357_v43  ;;  %v8390_v35 = vor.u32 %v8389_v26, %v8386_v42  ;;  %v8400_v15 = vor.u32 %v8399_v30, %v15893_v55  ;;  %v8367_v7 = vrot.slane %v8366_v38, 4  ;;  %v8137_v38 = vld [vmem:[#allocation2 + $0xc0] sm:$0xf] }
 0x46b   : > { %10894 = vmatmul.mubr.msk.bf16.gmra.mrb[24].mxu1 %vm5199_vm5, %v16987_v19  ;;  %11048 = vmatmul.mubr.msk.bf16.gmra.mrb[8].mxu0 %vm5199_vm5, %v10505_v16  ;;  %v8377_v5 = vrot.slane %v8376_v36, 4  ;;  %v8381_v14 = vrot.slane %v8379_v25, 5  ;;  %v8410_v58 = vrot.slane %v8408_v50, 4  ;;  %v8405_v29 = vrot.slane %v8403_v45, 5 }
 0x46c   : > { %10897 = vmatprep.mubr.msk.bf16.mxu1 %vm5199_vm5, %v16988_v3  ;;  %11051 = vmatprep.mubr.msk.bf16.mxu0 %vm5199_vm5, %v10506_v54  ;;  %v8413_v20 = vrot.slane %v8411_v28, 5  ;;  %v15910_v16 = vrot.slane %v8417_v47, 5  ;;  %v8423_v54 = vrot.slane %v8421_v34, 4  ;;  %v8432_v22 = vshrl.u32 %v8131_v12, 16  ;;  %v8134_v3 = vld [vmem:[#allocation2 + $0xb4] sm:$0xf] }
 0x46d   : > { %v8435_v46 = vshll.u32 %v8131_v12, 16  ;;  %v8441_v6 = vshll.u32 %v15603_v53, 16  ;;  %v8445_v39 = vshrl.u32 %v15603_v53, 16  ;;  %v16989_v48 = vcombine.low %v15533_v32, %v15537_v60  ;;  %v15925_v53 = vld [vmem:[#allocation2 + $0xa4] sm:$0x1] }
 0x46e   : > { %v10508_v43 = vcombine.low %v8348_v17, %v8358_v9  ;;  %v8391_v0 = vrot.slane %v8390_v35, 4  ;;  %v8401_v62 = vrot.slane %v8400_v15, 4  ;;  %v8372_v19 = vsel %vm12338_vm4, %v8367_v7, %v15880_v61  ;;  %v11466_v17 = vld [vmem:[#allocation2 + $0x18] sm:$0xff]   ;;  %v11467_v7 = vld [vmem:[#allocation2 + $0x24] sm:$0xff]  }
 0x46f   : > { %v8382_v42 = vsel %vm12338_vm4, %v8377_v5, %v8381_v14  ;;  %v8414_v26 = vor.u32 %v8413_v20, %v8410_v58  ;;  %v8424_v30 = vor.u32 %v8423_v54, %v15910_v16  ;;  %v8434_v61 = vrot.slane %v8432_v22, 4 }
 0x470   : > { %v8396_v32 = vsel %vm12338_vm4, %v8391_v0, %v15893_v55  ;;  %v8406_v60 = vsel %vm12338_vm4, %v8401_v62, %v8405_v29  ;;  %v8437_v36 = vrot.slane %v8435_v46, 5  ;;  %v8443_v33 = vrot.slane %v8441_v6, 5  ;;  %v8140_v29 = vld [vmem:[#allocation2 + $0xcc] sm:$0xf] }
 0x471   : > { %v8447_v25 = vrot.slane %v8445_v39, 4  ;;  %v8427_v50 = vshll.u32 %v15925_v53, 16  ;;  %v8451_v49 = vshll.u32 %v15618_v1, 16  ;;  %v8465_v45 = vshll.u32 %v15629_v52, 16 }
 0x472   : > { %v8469_v55 = vshrl.u32 %v15629_v52, 16  ;;  %v8456_v28 = vshrl.u32 %v8134_v3, 16  ;;  %v8459_v47 = vshll.u32 %v8134_v3, 16  ;;  %v8480_v34 = vshrl.u32 %v8137_v38, 16 }
 0x473   : > { %10898 = vmatmul.mubr.msk.bf16.gmra.mrb[28].mxu1 %vm5199_vm5, %v16989_v48  ;;  %11052 = vmatmul.mubr.msk.bf16.gmra.mrb[12].mxu0 %vm5199_vm5, %v10507_v31  ;;  %v8483_v31 = vshll.u32 %v8137_v38, 16  ;;  %v10509_v9 = vcombine.low %v8372_v19, %v8382_v42  ;;  %v10510_v35 = vcombine.low %v8396_v32, %v8406_v60  ;;  %v8415_v15 = vrot.slane %v8414_v26, 4 }
 0x474   : > { %10903 = vmatprep.mubr.msk.bf16.mxu1 %vm5199_vm5, %v11465_v27  ;;  %11055 = vmatprep.mubr.msk.bf16.mxu0 %vm5199_vm5, %v10508_v43  ;;  %v8425_v12 = vrot.slane %v8424_v30, 4  ;;  %v8438_v5 = vor.u32 %v8437_v36, %v8434_v61  ;;  %v8448_v14 = vor.u32 %v8447_v25, %v8443_v33  ;;  %v8489_v58 = vshll.u32 %v15652_v24, 16  ;;  %v11468_v36 = vld [vmem:[#allocation2 + $0x30] sm:$0xff]  }
 0x475   : > { %v8493_v1 = vshrl.u32 %v15652_v24, 16  ;;  %v8429_v52 = vrot.slane %v8427_v50, 5  ;;  %v8453_v20 = vrot.slane %v8451_v49, 5  ;;  %v8467_v54 = vrot.slane %v8465_v45, 5 }
 0x476   : > { %v8471_v27 = vrot.slane %v8469_v55, 4  ;;  %v8458_v22 = vrot.slane %v8456_v28, 4  ;;  %v8461_v46 = vrot.slane %v8459_v47, 5  ;;  %v8482_v6 = vrot.slane %v8480_v34, 4  ;;  %v11469_v55 = vld [vmem:[#allocation2 + $0x3c] sm:$0xff]  }
 0x477   : > { %v8485_v39 = vrot.slane %v8483_v31, 5  ;;  %v8504_v24 = vshrl.u32 %v8140_v29, 16  ;;  %v8507_v48 = vshll.u32 %v8140_v29, 16  ;;  %v8513_v43 = vshll.u32 %v15783_v37, 16 }
 0x478   : > { %v8517_v0 = vshrl.u32 %v15783_v37, 16  ;;  %v8439_v62 = vrot.slane %v8438_v5, 4  ;;  %v8449_v19 = vrot.slane %v8448_v14, 4  ;;  %v8491_v42 = vrot.slane %v8489_v58, 5  ;;  %v11470_v58 = vld [vmem:[#allocation2 + $0x48] sm:$0xff]  }
 0x479   : > { %v8495_v32 = vrot.slane %v8493_v1, 4  ;;  %v16990_v60 = vmov 0.0|0.0   ;;  %v8430_v26 = vsel %vm12338_vm4, %v8425_v12, %v8429_v52  ;;  %v8472_v30 = vor.u32 %v8471_v27, %v8467_v54  ;;  %v11471_v27 = vld [vmem:[#allocation2 + $0x54] sm:$0xff]  }
 0x47a   : > { %v8475_v3 = vshll.u32 %v15646_v23, 16  ;;  %v8454_v38 = vsel %vm12338_vm4, %v8449_v19, %v8453_v20  ;;  %v8462_v37 = vor.u32 %v8461_v46, %v8458_v22  ;;  %v8486_v61 = vor.u32 %v8485_v39, %v8482_v6  ;;  %v11474_v19 = vld [vmem:[#allocation2 + $0x78] sm:$0xff]  }
 0x47b   : > { %10904 = vmatmul.mubr.msk.bf16.vlgmr.msra.gmra.mrb[0].mxu1 %vm5199_vm5, %v11466_v17  ;;  %11056 = vmatmul.mubr.msk.bf16.gmra.mrb[16].mxu0 %vm5199_vm5, %v10509_v9  ;;  %v8506_v25 = vrot.slane %v8504_v24, 4  ;;  %v8509_v50 = vrot.slane %v8507_v48, 5  ;;  %v8515_v49 = vrot.slane %v8513_v43, 5  ;;  %v8519_v45 = vrot.slane %v8517_v0, 4  ;;  %v11472_v24 = vld [vmem:[#allocation2 + $0x60] sm:$0xff]   ;;  %v11473_v48 = vld [vmem:[#allocation2 + $0x6c] sm:$0xff]  }
 0x47c   : > { %10907 = vmatprep.mubr.msk.bf16.mxu1 %vm5199_vm5, %v11467_v7  ;;  %11059 = vmatprep.mubr.msk.bf16.mxu0 %vm5199_vm5, %v10510_v35  ;;  %v8444_v47 = vsel %vm12338_vm4, %v8439_v62, %v8443_v33  ;;  %v8496_v23 = vor.u32 %v8495_v32, %v8491_v42  ;;  %v8499_v34 = vshll.u32 %v15654_v21, 16  ;;  %v8473_v31 = vrot.slane %v8472_v30, 4  ;;  %v16991_v43 = vld [vmem:[#allocation152_spill] sm:$0xff]  ;;  %v16992_v0 = vld [vmem:[#allocation127_spill] sm:$0xff]  ;;  %v16995_v32 = vld [vmem:[#allocation85_spill] sm:$0xff] }
 0x47d   : > { %11137 = vmatpush3.bf16.msra.mxu1 %v15742_v4  ;;  %v8420_v4 = vsel %vm12338_vm4, %v8415_v15, %v15910_v16  ;;  %v10512_v16 = vcombine.low %v8444_v47, %v8454_v38  ;;  %v8477_v17 = vrot.slane %v8475_v3, 5  ;;  %v8487_v9 = vrot.slane %v8486_v61, 4  ;;  %v16997_v30 = vld [vmem:[#allocation163_spill] sm:$0xff]  ;;  %v16998_v3 = vld [vmem:[#allocation164_spill] sm:$0xff]  ;;  %v11476_v38 = vld [vmem:[#allocation2 + $0x90] sm:$0xff]  }
 0x47e   : > { %11124 = vmatprep.subr.bf16.mxu1 %v16990_v60  ;;  %v10511_v28 = vcombine.low %v8420_v4, %v8430_v26  ;;  %v8463_v35 = vrot.slane %v8462_v37, 4  ;;  %v8510_v15 = vor.u32 %v8509_v50, %v8506_v25  ;;  %v8520_v12 = vor.u32 %v8519_v45, %v8515_v49  ;;  %v11477_v37 = vld [vmem:[#allocation2 + $0x9c] sm:$0xff]   ;;  %v17000_v61 = vld [vmem:[#allocation137_spill] sm:$0xff] }
 0x47f   : > { %v8523_v33 = vshll.u32 %v15785_v63, 16  ;;  %v8497_v7 = vrot.slane %v8496_v23, 4  ;;  %v8501_v5 = vrot.slane %v8499_v34, 5  ;;  %v8478_v21 = vsel %vm12338_vm4, %v8473_v31, %v8477_v17  ;;  %v17003_v50 = vld [vmem:[#allocation56_spill] sm:$0xff]  ;;  %v17007_v23 = vld [vmem:[#allocation134_spill] sm:$0xff] }
 0x480   : > { %v8492_v14 = vsel %vm12338_vm4, %v8487_v9, %v8491_v42  ;;  %v8468_v1 = vsel %vm12338_vm4, %v8463_v35, %v8467_v54  ;;  %v8511_v29 = vrot.slane %v8510_v15, 4  ;;  %v8521_v52 = vrot.slane %v8520_v12, 4  ;;  %v11475_v42 = vld [vmem:[#allocation2 + $0x84] sm:$0xff]   ;;  %v17010_v31 = vld [vmem:[#allocation94_spill] sm:$0xff]  ;;  %v17012_v35 = vld [vmem:[#allocation103_spill] sm:$0xff] }
 0x481   : > { %v8525_v20 = vrot.slane %v8523_v33, 5  ;;  %v10513_v22 = vcombine.low %v8468_v1, %v8478_v21  ;;  %v8502_v63 = vsel %vm12338_vm4, %v8497_v7, %v8501_v5  ;;  %v16993_v62 = vcombine.low %v16991_v43, %v16992_v0  ;;  %v17006_v47 = vld [vmem:[#allocation60_spill] sm:$0xff]  ;;  %v17013_v15 = vld [vmem:[#allocation13_spill] sm:$0xff]  ;;  %v17017_v5 = vld [vmem:[#allocation14_spill] sm:$0xff] }
 0x482   : > { %v10514_v46 = vcombine.low %v8492_v14, %v8502_v63  ;;  %v8516_v54 = vsel %vm12338_vm4, %v8511_v29, %v8515_v49  ;;  %v16996_v26 = vcombine.low %v16994_v13, %v16995_v32  ;;  %v16999_v4 = vcombine.low %v16997_v30, %v16998_v3  ;;  %v17004_v49 = vld [vmem:[#allocation36_spill] sm:$0xff]  ;;  %v17016_v7 = vld [vmem:[#allocation41_spill] sm:$0xff]  ;;  %v17020_v29 = vld [vmem:[#allocation35_spill] sm:$0xff] }
 0x483   : > { %10908 = vmatmul.mubr.msk.bf16.gmra.mrb[4].mxu1 %vm5199_vm5, %v11468_v36  ;;  %11060 = vmatmul.mubr.msk.bf16.gmra.mrb[20].mxu0 %vm5199_vm5, %v10511_v28  ;;  %v8526_v6 = vsel %vm12338_vm4, %v8521_v52, %v8525_v20  ;;  %v17001_v36 = vld [vmem:[#allocation9_spill] sm:$0xff]  ;;  %v17005_v45 = vcombine.low %v17003_v50, %v17004_v49  ;;  %v11479_v28 = vld [vmem:[#allocation2 + $0xb4] sm:$0xff]   ;;  %v17008_v34 = vcombine.low %v17006_v47, %v17007_v23  ;;  %v11480_v9 = vld [vmem:[#allocation2 + $0xc0] sm:$0xff]   ;;  %v8968_v14 = vrot.slane %v15887_v40, 5 }
 0x484   : > { %10911 = vmatprep.mubr.msk.bf16.mxu1 %vm5199_vm5, %v11469_v55  ;;  %11063 = vmatprep.mubr.msk.bf16.mxu0 %vm5199_vm5, %v10512_v16  ;;  %v10515_v39 = vcombine.low %v8516_v54, %v8526_v6  ;;  %v17002_v25 = vcombine.low %v17000_v61, %v17001_v36  ;;  %v11478_v55 = vld [vmem:[#allocation2 + $0xa8] sm:$0xff]   ;;  %v17009_v16 = vld [vmem:[#allocation130_spill] sm:$0xff]  ;;  %v17018_v21 = vcombine.low %v17016_v7, %v17017_v5  ;;  %v8971_v1 = vrot.slane %v15925_v53, 5  ;;  %v17022_v20 = vld [vmem:[#allocation143_spill] sm:$0xff] }
 0x485   : > { %v17011_v17 = vcombine.low %v17009_v16, %v17010_v31  ;;  %v17014_v12 = vld [vmem:[#allocation40_spill] sm:$0xff]  ;;  %v17021_v52 = vld [vmem:[#allocation102_spill] sm:$0xff]  ;;  %v17024_v63 = vld [vmem:[#allocation147_spill] sm:$0xff]  ;;  %v8970_v40 = vrot.slane %v8968_v14, 4  ;;  %vm9747_vm4 = vcmask 73728  }
 0x486   : > { %v17015_v33 = vcombine.low %v17013_v15, %v17014_v12  ;;  %v9670_v0 = vld [vmem:[%s16270_s5 + $0x28] sm:$0xff]  ;;  %v16105_v16 = vld [vmem:[%s16269_s4] ss:$0 sm:$0xff] }
 0x48b   : > { %10912 = vmatmul.mubr.msk.bf16.gmra.mrb[8].mxu1 %vm5199_vm5, %v11470_v58  ;;  %11064 = vmatmul.mubr.msk.bf16.gmra.mrb[24].mxu0 %vm5199_vm5, %v10513_v22  ;;  %v17019_v58 = vld [vmem:[#allocation144_spill] sm:$0xff]  ;;  %v8836_v22 = vld [vmem:[#allocation2 + $0x9c] sm:$0xe] }
 0x48c   : > { %10915 = vmatprep.mubr.msk.bf16.mxu1 %vm5199_vm5, %v11471_v27  ;;  %11067 = vmatprep.mubr.msk.bf16.mxu0 %vm5199_vm5, %v10514_v46  ;;  %v17023_v27 = vcombine.low %v17021_v52, %v17022_v20  ;;  %v17025_v46 = vld [vmem:[#allocation146_spill] sm:$0xff]  ;;  %v10544_v6 = vrot.slane %v8836_v22, 9 }
 0x48d   : > { %v17026_v54 = vcombine.low %v17024_v63, %v17025_v46 }
 0x48e   : > { %v8969_v53 = vsel %vm12881_vm10, %v10544_v6, %v8968_v14 }
 0x493   : > { %10916 = vmatmul.mubr.msk.bf16.gmra.mrb[12].mxu1 %vm5199_vm5, %v11472_v24  ;;  %11068 = vmatmul.mubr.msk.bf16.gmra.mrb[28].mxu0 %vm5199_vm5, %v10515_v39  ;;  %v8972_v39 = vsel %vm12881_vm10, %v8970_v40, %v8971_v1 }
 0x494   : > { %10919 = vmatprep.mubr.msk.bf16.mxu1 %vm5199_vm5, %v11473_v48  ;;  %11073 = vmatprep.mubr.msk.bf16.mxu0 %vm5199_vm5, %v16993_v62  ;;  %v10562_v24 = vcombine.low %v8969_v53, %v8972_v39  ;;  %v17027_v48 = vcombine.low %v15633_v59, %v15637_v51  ;;  %v9665_v59 = vld [vmem:[%s16270_s5] sm:$0xff]  ;;  %v9666_v51 = vld [vmem:[%s16270_s5 + $0x8] sm:$0xff] }
 0x495   : > { %v11125_v11 = vpack.c.bf16 %v9666_v51, %v9665_v59 }
 0x49b   : > { %10920 = vmatmul.mubr.msk.bf16.gmra.mrb[16].mxu1 %vm5199_vm5, %v11474_v19  ;;  %11074 = vmatmul.mubr.msk.bf16.vlgmr.msra.gmra.mrb[0].mxu0 %vm5199_vm5, %v16996_v26  ;;  %v9671_v19 = vld [vmem:[%s16270_s5 + $0x30] sm:$0xff] }
 0x49c   : > { %10923 = vmatprep.mubr.msk.bf16.mxu1 %vm5199_vm5, %v11475_v42  ;;  %11077 = vmatprep.mubr.msk.bf16.mxu0 %vm5199_vm5, %v16999_v4  ;;  %v9672_v42 = vld [vmem:[%s16270_s5 + $0x38] sm:$0xff] }
 0x49d   : > { %v11134_v13 = vpack.c.bf16 %v9672_v42, %v9671_v19 }
 0x4a3   : > { %10924 = vmatmul.mubr.msk.bf16.gmra.mrb[20].mxu1 %vm5199_vm5, %v11476_v38  ;;  %11078 = vmatmul.mubr.msk.bf16.gmra.mrb[4].mxu0 %vm5199_vm5, %v17002_v25 }
 0x4a4   : > { %10927 = vmatprep.mubr.msk.bf16.mxu1 %vm5199_vm5, %v11477_v37  ;;  %11081 = vmatprep.mubr.msk.bf16.mxu0 %vm5199_vm5, %v17005_v45 }
 0x4ab   : > { %10928 = vmatmul.mubr.msk.bf16.gmra.mrb[24].mxu1 %vm5199_vm5, %v11478_v55  ;;  %11082 = vmatmul.mubr.msk.bf16.gmra.mrb[8].mxu0 %vm5199_vm5, %v17008_v34 }
 0x4ac   : > { %10931 = vmatprep.mubr.msk.bf16.mxu1 %vm5199_vm5, %v11479_v28  ;;  %11085 = vmatprep.mubr.msk.bf16.mxu0 %vm5199_vm5, %v17011_v17 }
 0x4b3   : > { %10932 = vmatmul.mubr.msk.bf16.gmra.mrb[28].mxu1 %vm5199_vm5, %v11480_v9  ;;  %11086 = vmatmul.mubr.msk.bf16.gmra.mrb[12].mxu0 %vm5199_vm5, %v17015_v33 }
 0x4b4   : > { %10957 = vmatprep.mubr.msk.bf16.mxu1 %vm5199_vm5, %v17012_v35  ;;  %11089 = vmatprep.mubr.msk.bf16.mxu0 %vm5199_vm5, %v17018_v21 }
 0x4bb   : > { %10958 = vmatmul.mubr.msk.bf16.vlgmr.msra.gmra.mrb[20].mxu1 %vm5199_vm5, %v17019_v58  ;;  %11090 = vmatmul.mubr.msk.bf16.gmra.mrb[16].mxu0 %vm5199_vm5, %v17023_v27 }
 0x4bc   : > { %10961 = vmatprep.mubr.msk.bf16.mxu1 %vm5199_vm5, %v17020_v29  ;;  %11093 = vmatprep.mubr.msk.bf16.mxu0 %vm5199_vm5, %v17026_v54 }
 0x4bd   : > { %11126 = vmatpush3.bf16.msra.mxu1 %v11125_v11 }
 0x4be   : > { %11127 = vmatprep.subr.bf16.mxu1 %v16990_v60 }
 0x4c3   : > { %10962 = vmatmul.mubr.msk.bf16.gmra.mrb[24].mxu1 %vm5199_vm5, %v15592_v10  ;;  %11094 = vmatmul.mubr.msk.bf16.gmra.mrb[20].mxu0 %vm5199_vm5, %v10562_v24  ;;  %v17029_v10 = vcombine.low %v15682_v18, %v15696_v41  ;;  %v9668_v18 = vld [vmem:[%s16270_s5 + $0x18] sm:$0xff] }
 0x4c4   : > { %10965 = vmatprep.mubr.msk.bf16.mxu1 %vm5199_vm5, %v15620_v57  ;;  %11097 = vmatprep.mubr.msk.bf16.mxu0 %vm5199_vm5, %v17027_v48  ;;  %v17030_v57 = vld [vmem:[#allocation52_spill] sm:$0xff]  ;;  %v11128_v41 = vpack.c.bf16 %v9668_v18, %v9667_v56 }
 0x4c5   : > { %v17031_v43 = vcombine.low %v15796_v8, %v17030_v57  ;;  %v9669_v8 = vld [vmem:[%s16270_s5 + $0x20] sm:$0xff] }
 0x4c6   : > { %11129 = vmatpush3.bf16.msra.mxu1 %v11128_v41  ;;  %v11131_v62 = vpack.c.bf16 %v9670_v0, %v9669_v8 }
 0x4c7   : > { %11130 = vmatprep.subr.bf16.mxu1 %v16990_v60 }
 0x4ca   : > { %11132 = vmatpush3.bf16.msra.mxu1 %v11131_v62 }
 0x4cb   : > { %10966 = vmatmul.mubr.msk.bf16.gmra.mrb[28].mxu1 %vm5199_vm5, %v15692_v44  ;;  %11098 = vmatmul.mubr.msk.bf16.gmra.mrb[24].mxu0 %vm5199_vm5, %v17028_v2  ;;  %v11615_v44 = vmov 0.0  }
 0x4cc   : > { %11101 = vmatprep.mubr.msk.bf16.mxu0 %vm5199_vm5, %v17029_v10  ;;  %11121 = vmatprep.mubr.msk.f32.mxu1 %vm11614_vm11, %v11615_v44 }
 0x4cd   : > { %11133 = vmatprep.subr.bf16.mxu1 %v16990_v60 }
 0x4ce   : > { %11135 = vmatpush3.bf16.msra.mxu1 %v11134_v13 }
 0x4d3   : > { %11102 = vmatmul.mubr.msk.bf16.gmra.mrb[28].mxu0 %vm5199_vm5, %v17031_v43 }
 0x54e   : > { %v10905_v32 = vpop.f32.mrb[0].mxu1 }
 0x54f   : > { %v6369_v26 = vpop.f32.mrb[1].mxu1 }
 0x550   : > { %v10906_v30 = vpop.f32.mrb[2].mxu1 }
 0x551   : > { %v6372_v3 = vpop.f32.mrb[3].mxu1 }
 0x556   : > { %v10909_v4 = vpop.f32.mrb[4].mxu1 }
 0x557   : > { %v6385_v38 = vpop.f32.mrb[5].mxu1 }
 0x558   : > { %v10910_v37 = vpop.f32.mrb[6].mxu1 }
 0x559   : > { %v6388_v61 = vpop.f32.mrb[7].mxu1 }
 0x55e   : > { %v10913_v36 = vpop.f32.mrb[8].mxu1 }
 0x55f   : > { %v6401_v25 = vpop.f32.mrb[9].mxu1 }
 0x560   : > { %v10914_v50 = vpop.f32.mrb[10].mxu1 }
 0x561   : > { %v6404_v49 = vpop.f32.mrb[11].mxu1 }
 0x566   : > { %v10917_v45 = vpop.f32.mrb[12].mxu1 }
 0x567   : > { %v6417_v55 = vpop.f32.mrb[13].mxu1 }
 0x568   : > { %v10918_v28 = vpop.f32.mrb[14].mxu1 }
 0x569   : > { %v16096_v47 = vpop.f32.mrb[15].mxu1 }
 0x56e   : > { %v16098_v23 = vpop.f32.mrb[16].mxu1  ;;  %v11075_v34 = vpop.f32.mrb[0].mxu0 }
 0x56f   : > { %v16100_v60 = vpop.f32.mrb[17].mxu1  ;;  %v11138_v31 = vadd.f32 %v11075_v34, %v10905_v32  ;;  %v9140_v9 = vpop.f32.mrb[1].mxu0 }
 0x570   : > { %v16107_v17 = vpop.f32.mrb[18].mxu1  ;;  %v11139_v35 = vadd.f32 %v9140_v9, %v6369_v26  ;;  %v11076_v12 = vpop.f32.mrb[2].mxu0 }
 0x571   : > { %v16109_v15 = vpop.f32.mrb[19].mxu1  ;;  %v9308_v33 = vadd.f32 %v11138_v31, %v16105_v16  ;;  %v11140_v7 = vadd.f32 %v11076_v12, %v10906_v30  ;;  %v9143_v5 = vpop.f32.mrb[3].mxu0 }
 0x572   : > { %v9306_v21 = vadd.f32 %v11139_v35, %v16105_v16  ;;  %v11141_v14 = vadd.f32 %v9143_v5, %v6372_v3 }
 0x573   : > { %v9309_v58 = vadd.f32 %v11140_v7, %v16105_v16 }
 0x574   : > { %v9338_v1 = vmax.f32 %v9306_v21, %v9308_v33  ;;  %v9307_v29 = vadd.f32 %v11141_v14, %v16105_v16 }
 0x576   : > { %9355 = vst.msk [vmem:[#allocation3] sm:$0xff] %vm9354_vm12, %v9338_v1  ;;  %v9339_v52 = vmax.f32 %v9307_v29, %v9309_v58  ;;  %v11079_v20 = vpop.f32.mrb[4].mxu0 }
 0x577   : > { %v11142_v27 = vadd.f32 %v11079_v20, %v10909_v4  ;;  %v9156_v22 = vpop.f32.mrb[5].mxu0 }
 0x578   : > { %9356 = vst.msk [vmem:[#allocation3 + $0x8] sm:$0xff] %vm9354_vm12, %v9339_v52  ;;  %v11143_v63 = vadd.f32 %v9156_v22, %v6385_v38  ;;  %v11080_v46 = vpop.f32.mrb[6].mxu0 }
 0x579   : > { %v9312_v54 = vadd.f32 %v11142_v27, %v16105_v16  ;;  %v11144_v40 = vadd.f32 %v11080_v46, %v10910_v37  ;;  %v9159_v6 = vpop.f32.mrb[7].mxu0 }
 0x57a   : > { %v9310_v39 = vadd.f32 %v11143_v63, %v16105_v16  ;;  %v11145_v53 = vadd.f32 %v9159_v6, %v6388_v61 }
 0x57b   : > { %v9313_v24 = vadd.f32 %v11144_v40, %v16105_v16 }
 0x57c   : > { %v9340_v48 = vmax.f32 %v9310_v39, %v9312_v54  ;;  %v9311_v2 = vadd.f32 %v11145_v53, %v16105_v16 }
 0x57d   : > { %v9371_v5 = vld [vmem:[#allocation3] sm:$0x1]  ;;  %v9379_v21 = vld [vmem:[#allocation3 + $0x1] sm:$0x1]  ;;  %v9403_v1 = vld [vmem:[#allocation3 + $0x2] sm:$0x1] }
 0x57e   : > { %9357 = vst.msk [vmem:[#allocation3 + $0x10] sm:$0xff] %vm9354_vm12, %v9340_v48  ;;  %v9341_v10 = vmax.f32 %v9311_v2, %v9313_v24  ;;  %v11083_v57 = vpop.f32.mrb[8].mxu0  ;;  %v9411_v29 = vld [vmem:[#allocation3 + $0x3] sm:$0x1]  ;;  %v9387_v6 = vmax.f32 %v9371_v5, %v9379_v21 }
 0x57f   : > { %v11146_v43 = vadd.f32 %v11083_v57, %v10913_v36  ;;  %v9172_v59 = vpop.f32.mrb[9].mxu0  ;;  %v9419_v39 = vmax.f32 %v9403_v1, %v9411_v29 }
 0x580   : > { %9358 = vst.msk [vmem:[#allocation3 + $0x18] sm:$0xff] %vm9354_vm12, %v9341_v10  ;;  %v11147_v51 = vadd.f32 %v9172_v59, %v6401_v25  ;;  %v11084_v56 = vpop.f32.mrb[10].mxu0  ;;  %v9435_v59 = vld [vmem:[#allocation3 + $0x4] sm:$0x1] }
 0x581   : > { %v9316_v11 = vadd.f32 %v11146_v43, %v16105_v16  ;;  %v11148_v18 = vadd.f32 %v11084_v56, %v10914_v50  ;;  %v9175_v8 = vpop.f32.mrb[11].mxu0  ;;  %v9427_v56 = vadd.f32 %v9419_v39, %v9387_v6 }
 0x582   : > { %v9314_v44 = vadd.f32 %v11147_v51, %v16105_v16  ;;  %v11149_v62 = vadd.f32 %v9175_v8, %v6404_v49  ;;  %v9443_v51 = vld [vmem:[#allocation3 + $0x5] sm:$0x1]  ;;  %v9467_v8 = vld [vmem:[#allocation3 + $0x6] sm:$0x1] }
 0x583   : > { %v9317_v0 = vadd.f32 %v11148_v18, %v16105_v16 }
 0x584   : > { %v9342_v41 = vmax.f32 %v9314_v44, %v9316_v11  ;;  %v9315_v32 = vadd.f32 %v11149_v62, %v16105_v16 }
 0x585   : > { %v9372_v53 = vld [vmem:[#allocation3 + $0x10] sm:$0x1]  ;;  %v9380_v24 = vld [vmem:[#allocation3 + $0x11] sm:$0x1]  ;;  %v9404_v48 = vld [vmem:[#allocation3 + $0x12] sm:$0x1] }
 0x586   : > { %9359 = vst.msk [vmem:[#allocation3 + $0x20] sm:$0xff] %vm9354_vm12, %v9342_v41  ;;  %v11087_v19 = vpop.f32.mrb[12].mxu0  ;;  %v9343_v36 = vmax.f32 %v9315_v32, %v9317_v0  ;;  %v9412_v2 = vld [vmem:[#allocation3 + $0x13] sm:$0x1]  ;;  %v9388_v11 = vmax.f32 %v9372_v53, %v9380_v24  ;;  %v9451_v41 = vmax.f32 %v9435_v59, %v9443_v51  ;;  %v9475_v0 = vld [vmem:[#allocation3 + $0x7] sm:$0x1] }
 0x587   : > { %v11150_v42 = vadd.f32 %v11087_v19, %v10917_v45  ;;  %v9188_v13 = vpop.f32.mrb[13].mxu0  ;;  %v9420_v18 = vmax.f32 %v9404_v48, %v9412_v2  ;;  %v9436_v62 = vld [vmem:[#allocation3 + $0x14] sm:$0x1]  ;;  %v9444_v19 = vld [vmem:[#allocation3 + $0x15] sm:$0x1] }
 0x588   : > { %v11151_v26 = vadd.f32 %v9188_v13, %v6417_v55  ;;  %v11088_v30 = vpop.f32.mrb[14].mxu0  ;;  %9360 = vst.msk [vmem:[#allocation3 + $0x28] sm:$0xff] %vm9354_vm12, %v9343_v36  ;;  %v9499_v32 = vld [vmem:[#allocation3 + $0x8] sm:$0x1] }
 0x589   : > { %v9320_v4 = vadd.f32 %v11150_v42, %v16105_v16  ;;  %v11152_v38 = vadd.f32 %v11088_v30, %v10918_v28  ;;  %v9191_v37 = vpop.f32.mrb[15].mxu0  ;;  %v9459_v42 = vadd.f32 %v9451_v41, %v9427_v56  ;;  %v9428_v13 = vadd.f32 %v9420_v18, %v9388_v11  ;;  %v9468_v30 = vld [vmem:[#allocation3 + $0x16] sm:$0x1] }
 0x58a   : > { %v9318_v25 = vadd.f32 %v11151_v26, %v16105_v16  ;;  %v11153_v50 = vadd.f32 %v9191_v37, %v16096_v47  ;;  %v9507_v26 = vld [vmem:[#allocation3 + $0x9] sm:$0x1]  ;;  %v9483_v37 = vmax.f32 %v9467_v8, %v9475_v0 }
 0x58b   : > { %v9321_v45 = vadd.f32 %v11152_v38, %v16105_v16  ;;  %v9515_v21 = vmax.f32 %v9499_v32, %v9507_v26 }
 0x58c   : > { %v9344_v28 = vmax.f32 %v9318_v25, %v9320_v4  ;;  %v9319_v35 = vadd.f32 %v11153_v50, %v16105_v16 }
 0x58d   : > { %v9373_v4 = vld [vmem:[#allocation3 + $0x20] sm:$0x1]  ;;  %v9381_v38 = vld [vmem:[#allocation3 + $0x21] sm:$0x1]  ;;  %v9405_v36 = vld [vmem:[#allocation3 + $0x22] sm:$0x1] }
 0x58e   : > { %v10959_v3 = vpop.f32.mrb[20].mxu1  ;;  %v11091_v34 = vpop.f32.mrb[16].mxu0  ;;  %9361 = vst.msk [vmem:[#allocation3 + $0x30] sm:$0xff] %vm9354_vm12, %v9344_v28  ;;  %v9345_v47 = vmax.f32 %v9319_v35, %v9321_v45  ;;  %v9413_v25 = vld [vmem:[#allocation3 + $0x23] sm:$0x1] }
 0x58f   : > { %v7179_v61 = vpop.f32.mrb[21].mxu1  ;;  %v11154_v31 = vadd.f32 %v11091_v34, %v16098_v23  ;;  %v9204_v55 = vpop.f32.mrb[17].mxu0  ;;  %v9500_v35 = vld [vmem:[#allocation3 + $0x18] sm:$0x1]  ;;  %v9445_v5 = vld [vmem:[#allocation3 + $0x25] sm:$0x1] }
 0x590   : > { %v16131_v49 = vpop.f32.mrb[22].mxu1  ;;  %v11155_v12 = vadd.f32 %v9204_v55, %v16100_v60  ;;  %v11092_v7 = vpop.f32.mrb[18].mxu0  ;;  %9362 = vst.msk [vmem:[#allocation3 + $0x38] sm:$0xff] %vm9354_vm12, %v9345_v47  ;;  %v9491_v55 = vadd.f32 %v9483_v37, %v9459_v42  ;;  %v9421_v47 = vmax.f32 %v9405_v36, %v9413_v25  ;;  %v16161_v2 = vld [vmem:[#allocation3 + $0x26] sm:$0x1] }
 0x591   : > { %v16135_v9 = vpop.f32.mrb[23].mxu1  ;;  %v9324_v33 = vadd.f32 %v11154_v31, %v16105_v16  ;;  %v11156_v14 = vadd.f32 %v11092_v7, %v16107_v17  ;;  %v9207_v58 = vpop.f32.mrb[19].mxu0  ;;  %v9437_v7 = vld [vmem:[#allocation3 + $0x24] sm:$0x1] }
 0x592   : > { %v9322_v23 = vadd.f32 %v11155_v12, %v16105_v16  ;;  %v11157_v52 = vadd.f32 %v9207_v58, %v16109_v15  ;;  %v9508_v12 = vld [vmem:[#allocation3 + $0x19] sm:$0x1]  ;;  %v9453_v48 = vmax.f32 %v9437_v7, %v9445_v5 }
 0x593   : > { %v9325_v27 = vadd.f32 %v11156_v14, %v16105_v16 }
 0x594   : > { %v9346_v20 = vmax.f32 %v9322_v23, %v9324_v33  ;;  %v9323_v46 = vadd.f32 %v11157_v52, %v16105_v16  ;;  %v9389_v33 = vmax.f32 %v9373_v4, %v9381_v38 }
 0x595   : > { %v9374_v50 = vld [vmem:[#allocation3 + $0x30] sm:$0x1]  ;;  %v9382_v34 = vld [vmem:[#allocation3 + $0x31] sm:$0x1]  ;;  %v9406_v45 = vld [vmem:[#allocation3 + $0x32] sm:$0x1] }
 0x596   : > { %v16146_v60 = vpop.f32.mrb[24].mxu1  ;;  %v11095_v63 = vpop.f32.mrb[20].mxu0  ;;  %9363 = vst.msk [vmem:[#allocation3 + $0x40] sm:$0xff] %vm9354_vm12, %v9346_v20  ;;  %v9347_v10 = vmax.f32 %v9323_v46, %v9325_v27  ;;  %v9414_v31 = vld [vmem:[#allocation3 + $0x33] sm:$0x1]  ;;  %v9390_v14 = vmax.f32 %v9374_v50, %v9382_v34  ;;  %v16159_v46 = vadd.f32 %v9515_v21, %v9491_v55  ;;  %v9429_v24 = vadd.f32 %v9421_v47, %v9389_v33 }
 0x597   : > { %v16149_v22 = vpop.f32.mrb[25].mxu1  ;;  %v11158_v54 = vadd.f32 %v11095_v63, %v10959_v3  ;;  %v9220_v17 = vpop.f32.mrb[21].mxu0  ;;  %v9476_v3 = vld [vmem:[#allocation3 + $0x17] sm:$0x1]  ;;  %v9422_v58 = vmax.f32 %v9406_v45, %v9414_v31  ;;  %v9438_v56 = vld [vmem:[#allocation3 + $0x34] sm:$0x1] }
 0x598   : > { %v16152_v40 = vpop.f32.mrb[26].mxu1  ;;  %v11159_v15 = vadd.f32 %v9220_v17, %v7179_v61  ;;  %9364 = vst.msk [vmem:[#allocation3 + $0x48] sm:$0xff] %vm9354_vm12, %v9347_v10  ;;  %v9452_v61 = vmax.f32 %v9436_v62, %v9444_v19  ;;  %v9484_v23 = vmax.f32 %v9468_v30, %v9476_v3  ;;  %v11096_v53 = vpop.f32.mrb[22].mxu0  ;;  %v16163_v10 = vld [vmem:[#allocation3 + $0x27] sm:$0x1]  ;;  %v9461_v36 = vadd.f32 %v9453_v48, %v9429_v24 }
 0x599   : > { %v9328_v57 = vadd.f32 %v11158_v54, %v16105_v16  ;;  %v7198_v39 = vpop.f32.mrb[27].mxu1  ;;  %v9430_v51 = vadd.f32 %v9422_v58, %v9390_v14  ;;  %v9446_v11 = vld [vmem:[#allocation3 + $0x35] sm:$0x1]  ;;  %v9485_v30 = vmax.f32 %v16161_v2, %v16163_v10  ;;  %v9470_v3 = vld [vmem:[#allocation3 + $0x36] sm:$0x1] }
 0x59a   : > { %v9326_v43 = vadd.f32 %v11159_v15, %v16105_v16  ;;  %v9460_v28 = vadd.f32 %v9452_v61, %v9428_v13  ;;  %v9516_v15 = vmax.f32 %v9500_v35, %v9508_v12  ;;  %v9478_v4 = vld [vmem:[#allocation3 + $0x37] sm:$0x1]  ;;  %v9454_v25 = vmax.f32 %v9438_v56, %v9446_v11  ;;  %v16179_v58 = vld [vmem:[#allocation3 + $0xa] sm:$0x1]  ;;  %v9501_v2 = vld [vmem:[#allocation3 + $0x28] sm:$0x1] }
 0x59c   : > { %v9348_v44 = vmax.f32 %v9326_v43, %v9328_v57  ;;  %v9492_v54 = vadd.f32 %v9484_v23, %v9460_v28  ;;  %v11160_v57 = vadd.f32 %v11096_v53, %v16131_v49  ;;  %v9223_v43 = vpop.f32.mrb[23].mxu0 }
 0x59d   : > { %v9375_v1 = vld [vmem:[#allocation3 + $0x40] sm:$0x1]  ;;  %v9383_v29 = vld [vmem:[#allocation3 + $0x41] sm:$0x1]  ;;  %v9407_v52 = vld [vmem:[#allocation3 + $0x42] sm:$0x1]  ;;  %v11161_v41 = vadd.f32 %v9223_v43, %v16135_v9 }
 0x59e   : > { %9365 = vst.msk [vmem:[#allocation3 + $0x50] sm:$0xff] %vm9354_vm12, %v9348_v44  ;;  %v9415_v20 = vld [vmem:[#allocation3 + $0x43] sm:$0x1]  ;;  %v10967_v59 = vpop.f32.mrb[28].mxu1  ;;  %v9391_v18 = vmax.f32 %v9375_v1, %v9383_v29  ;;  %v11099_v0 = vpop.f32.mrb[24].mxu0  ;;  %v9329_v42 = vadd.f32 %v11160_v57, %v16105_v16  ;;  %v16169_v49 = vadd.f32 %v9516_v15, %v9492_v54 }
 0x59f   : > { %v9423_v44 = vmax.f32 %v9407_v52, %v9415_v20  ;;  %v7211_v8 = vpop.f32.mrb[29].mxu1  ;;  %v11162_v13 = vadd.f32 %v11099_v0, %v16146_v60  ;;  %v9236_v26 = vpop.f32.mrb[25].mxu0  ;;  %v9327_v38 = vadd.f32 %v11161_v41, %v16105_v16  ;;  %v9439_v50 = vld [vmem:[#allocation3 + $0x44] sm:$0x1]  ;;  %v9447_v34 = vld [vmem:[#allocation3 + $0x45] sm:$0x1] }
 0x5a0   : > { %v10968_v32 = vpop.f32.mrb[30].mxu1  ;;  %v11163_v9 = vadd.f32 %v9236_v26, %v16149_v22  ;;  %v11100_v61 = vpop.f32.mrb[26].mxu0  ;;  %v9462_v22 = vadd.f32 %v9454_v25, %v9430_v51  ;;  %v9539_v1 = vld [vmem:[#allocation3 + $0xb] sm:$0x1]  ;;  %v9532_v29 = vld [vmem:[#allocation3 + $0x1a] sm:$0x1]  ;;  %v9455_v52 = vmax.f32 %v9439_v50, %v9447_v34 }
 0x5a1   : > { %v7214_v37 = vpop.f32.mrb[31].mxu1  ;;  %v9332_v60 = vadd.f32 %v11162_v13, %v16105_v16  ;;  %v11164_v45 = vadd.f32 %v11100_v61, %v16152_v40  ;;  %v9239_v31 = vpop.f32.mrb[27].mxu0  ;;  %v9431_v55 = vadd.f32 %v9423_v44, %v9391_v18  ;;  %v9349_v12 = vmax.f32 %v9327_v38, %v9329_v42  ;;  %v9540_v40 = vld [vmem:[#allocation3 + $0x1b] sm:$0x1]  ;;  %v9509_v44 = vld [vmem:[#allocation3 + $0x29] sm:$0x1] }
 0x5a2   : > { %v9330_v33 = vadd.f32 %v11163_v9, %v16105_v16  ;;  %v11165_v47 = vadd.f32 %v9239_v31, %v7198_v39  ;;  %v9479_v39 = vld [vmem:[#allocation3 + $0x47] sm:$0x1]  ;;  %v9548_v11 = vmax.f32 %v9532_v29, %v9540_v40  ;;  %v9493_v18 = vadd.f32 %v9485_v30, %v9461_v36  ;;  %v9502_v41 = vld [vmem:[#allocation3 + $0x38] sm:$0x1]  ;;  %v16189_v42 = vld [vmem:[#allocation3 + $0xd] sm:$0x1] }
 0x5a3   : > { %v9333_v21 = vadd.f32 %v11164_v45, %v16105_v16  ;;  %9366 = vst.msk [vmem:[#allocation3 + $0x58] sm:$0xff] %vm9354_vm12, %v9349_v12  ;;  %v9463_v10 = vadd.f32 %v9455_v52, %v9431_v55  ;;  %v9564_v13 = vld [vmem:[#allocation3 + $0x1c] sm:$0x1]  ;;  %v9547_v30 = vmax.f32 %v16179_v58, %v9539_v1  ;;  %v9503_v61 = vld [vmem:[#allocation3 + $0x48] sm:$0x1] }
 0x5a4   : > { %v9350_v20 = vmax.f32 %v9330_v33, %v9332_v60  ;;  %v9556_v9 = vadd.f32 %v9548_v11, %v16169_v49  ;;  %v9511_v36 = vld [vmem:[#allocation3 + $0x49] sm:$0x1]  ;;  %v9596_v50 = vld [vmem:[#allocation3 + $0x1e] sm:$0x1]  ;;  %v9604_v34 = vld [vmem:[#allocation3 + $0x1f] sm:$0x1]  ;;  %v9517_v60 = vmax.f32 %v9501_v2, %v9509_v44 }
 0x5a5   : > { %v9376_v27 = vld [vmem:[#allocation3 + $0x50] sm:$0x1]  ;;  %v9384_v63 = vld [vmem:[#allocation3 + $0x51] sm:$0x1]  ;;  %v9408_v17 = vld [vmem:[#allocation3 + $0x52] sm:$0x1] }
 0x5a6   : > { %v9416_v6 = vld [vmem:[#allocation3 + $0x53] sm:$0x1]  ;;  %v9392_v62 = vmax.f32 %v9376_v27, %v9384_v63  ;;  %v9440_v28 = vld [vmem:[#allocation3 + $0x54] sm:$0x1]  ;;  %v9448_v35 = vld [vmem:[#allocation3 + $0x55] sm:$0x1]  ;;  %v9331_v27 = vadd.f32 %v11165_v47, %v16105_v16 }
 0x5a7   : > { %v9424_v19 = vmax.f32 %v9408_v17, %v9416_v6  ;;  %v11103_v7 = vpop.f32.mrb[28].mxu0  ;;  %v9486_v17 = vmax.f32 %v9470_v3, %v9478_v4  ;;  %v9471_v6 = vld [vmem:[#allocation3 + $0x46] sm:$0x1]  ;;  %v9456_v53 = vmax.f32 %v9440_v28, %v9448_v35  ;;  %v9472_v57 = vld [vmem:[#allocation3 + $0x56] sm:$0x1]  ;;  %9367 = vst.msk [vmem:[#allocation3 + $0x60] sm:$0xff] %vm9354_vm12, %v9350_v20 }
 0x5a8   : > { %v11166_v23 = vadd.f32 %v11103_v7, %v10967_v59  ;;  %v9252_v14 = vpop.f32.mrb[29].mxu0  ;;  %v9480_v43 = vld [vmem:[#allocation3 + $0x57] sm:$0x1]  ;;  %v9351_v59 = vmax.f32 %v9331_v27, %v9333_v21  ;;  %v9487_v3 = vmax.f32 %v9471_v6, %v9479_v39  ;;  %v9541_v45 = vld [vmem:[#allocation3 + $0x2b] sm:$0x1] }
 0x5a9   : > { %v9432_v5 = vadd.f32 %v9424_v19, %v9392_v62  ;;  %v11167_v63 = vadd.f32 %v9252_v14, %v7211_v8  ;;  %v11104_v54 = vpop.f32.mrb[30].mxu0  ;;  %v9510_v8 = vld [vmem:[#allocation3 + $0x39] sm:$0x1]  ;;  %v16187_v19 = vld [vmem:[#allocation3 + $0xc] sm:$0x1]  ;;  %v9494_v26 = vadd.f32 %v9486_v17, %v9462_v22  ;;  %v9488_v25 = vmax.f32 %v9472_v57, %v9480_v43 }
 0x5aa   : > { %v9336_v15 = vadd.f32 %v11166_v23, %v16105_v16  ;;  %v11168_v24 = vadd.f32 %v11104_v54, %v10968_v32  ;;  %v9255_v48 = vpop.f32.mrb[31].mxu0  ;;  %v9572_v32 = vld [vmem:[#allocation3 + $0x1d] sm:$0x1]  ;;  %9368 = vst.msk [vmem:[#allocation3 + $0x68] sm:$0xff] %vm9354_vm12, %v9351_v59  ;;  %v9518_v31 = vmax.f32 %v9502_v41, %v9510_v8  ;;  %v9534_v55 = vld [vmem:[#allocation3 + $0x3a] sm:$0x1]  ;;  %v9495_v35 = vadd.f32 %v9487_v3, %v9463_v10 }
 0x5ab   : > { %v9334_v51 = vadd.f32 %v11167_v63, %v16105_v16  ;;  %v11169_v56 = vadd.f32 %v9255_v48, %v7214_v37  ;;  %v9464_v0 = vadd.f32 %v9456_v53, %v9432_v5  ;;  %v9533_v37 = vld [vmem:[#allocation3 + $0x2a] sm:$0x1]  ;;  %v9542_v28 = vld [vmem:[#allocation3 + $0x3b] sm:$0x1]  ;;  %v9504_v47 = vld [vmem:[#allocation3 + $0x58] sm:$0x1]  ;;  %v9555_v22 = vadd.f32 %v9547_v30, %v16159_v46 }
 0x5ac   : > { %v9337_v62 = vadd.f32 %v11168_v24, %v16105_v16  ;;  %v9535_v33 = vld [vmem:[#allocation3 + $0x4a] sm:$0x1]  ;;  %v9512_v7 = vld [vmem:[#allocation3 + $0x59] sm:$0x1]  ;;  %v9525_v5 = vadd.f32 %v9517_v60, %v9493_v18  ;;  %v9526_v21 = vadd.f32 %v9518_v31, %v9494_v26  ;;  %v9519_v23 = vmax.f32 %v9503_v61, %v9511_v36  ;;  %v9543_v14 = vld [vmem:[#allocation3 + $0x4b] sm:$0x1] }
 0x5ad   : > { %v9352_v4 = vmax.f32 %v9334_v51, %v9336_v15  ;;  %v9335_v38 = vadd.f32 %v11169_v56, %v16105_v16  ;;  %v9580_v16 = vmax.f32 %v9564_v13, %v9572_v32  ;;  %v9496_v49 = vadd.f32 %v9488_v25, %v9464_v0  ;;  %v9536_v58 = vld [vmem:[#allocation3 + $0x5a] sm:$0x1]  ;;  %v9544_v1 = vld [vmem:[#allocation3 + $0x5b] sm:$0x1]  ;;  %v9565_v52 = vld [vmem:[#allocation3 + $0x2c] sm:$0x1] }
 0x5ae   : > { %v9579_v29 = vmax.f32 %v16187_v19, %v16189_v42  ;;  %v9573_v20 = vld [vmem:[#allocation3 + $0x2d] sm:$0x1]  ;;  %v9566_v27 = vld [vmem:[#allocation3 + $0x3c] sm:$0x1]  ;;  %v9574_v63 = vld [vmem:[#allocation3 + $0x3d] sm:$0x1]  ;;  %v9520_v54 = vmax.f32 %v9504_v47, %v9512_v7  ;;  %v9549_v39 = vmax.f32 %v9533_v37, %v9541_v45  ;;  %v9550_v53 = vmax.f32 %v9534_v55, %v9542_v28 }
 0x5af   : > { %9369 = vst.msk [vmem:[#allocation3 + $0x70] sm:$0xff] %vm9354_vm12, %v9352_v4  ;;  %v9353_v12 = vmax.f32 %v9335_v38, %v9337_v62  ;;  %v9588_v40 = vadd.f32 %v9580_v16, %v9556_v9  ;;  %v9377_v17 = vld [vmem:[#allocation3 + $0x60] sm:$0x1]  ;;  %v9385_v6 = vld [vmem:[#allocation3 + $0x61] sm:$0x1]  ;;  %v9527_v15 = vadd.f32 %v9519_v23, %v9495_v35  ;;  %v9612_v57 = vmax.f32 %v9596_v50, %v9604_v34 }
 0x5b0   : > { %v9409_v46 = vld [vmem:[#allocation3 + $0x62] sm:$0x1]  ;;  %v9393_v24 = vmax.f32 %v9377_v17, %v9385_v6  ;;  %v9417_v48 = vld [vmem:[#allocation3 + $0x63] sm:$0x1]  ;;  %v9441_v2 = vld [vmem:[#allocation3 + $0x64] sm:$0x1]  ;;  %v9528_v11 = vadd.f32 %v9520_v54, %v9496_v49  ;;  %v16202_v41 = vadd.f32 %v9579_v29, %v9555_v22  ;;  %v9557_v8 = vadd.f32 %v9549_v39, %v9525_v5 }
 0x5b1   : > { %9370 = vst.msk [vmem:[#allocation3 + $0x78] sm:$0xff] %vm9354_vm12, %v9353_v12  ;;  %v9449_v10 = vld [vmem:[#allocation3 + $0x65] sm:$0x1]  ;;  %v9567_v43 = vld [vmem:[#allocation3 + $0x4c] sm:$0x1]  ;;  %v9425_v51 = vmax.f32 %v9409_v46, %v9417_v48  ;;  %v9558_v0 = vadd.f32 %v9550_v53, %v9526_v21  ;;  %v9551_v62 = vmax.f32 %v9535_v33, %v9543_v14  ;;  %v16204_v32 = vadd.f32 %v9612_v57, %v9588_v40 }
 0x5b2   : > { %v9575_v59 = vld [vmem:[#allocation3 + $0x4d] sm:$0x1]  ;;  %v9473_v56 = vld [vmem:[#allocation3 + $0x66] sm:$0x1]  ;;  %v16200_v18 = vld [vmem:[#allocation3 + $0x5c] sm:$0x1]  ;;  %v9457_v30 = vmax.f32 %v9441_v2, %v9449_v10  ;;  %v9552_v36 = vmax.f32 %v9536_v58, %v9544_v1  ;;  %v9581_v25 = vmax.f32 %v9565_v52, %v9573_v20  ;;  %v9582_v50 = vmax.f32 %v9566_v27, %v9574_v63 }
 0x5b3   : > { %v9576_v44 = vld [vmem:[#allocation3 + $0x5d] sm:$0x1]  ;;  %v9481_v19 = vld [vmem:[#allocation3 + $0x67] sm:$0x1]  ;;  %v9505_v42 = vld [vmem:[#allocation3 + $0x68] sm:$0x1]  ;;  %v9433_v38 = vadd.f32 %v9425_v51, %v9393_v24  ;;  %v9559_v55 = vadd.f32 %v9551_v62, %v9527_v15  ;;  %v9583_v22 = vmax.f32 %v9567_v43, %v9575_v59 }
 0x5b4   : > { %v9513_v13 = vld [vmem:[#allocation3 + $0x69] sm:$0x1]  ;;  %v9597_v26 = vld [vmem:[#allocation3 + $0x2e] sm:$0x1]  ;;  %v9605_v3 = vld [vmem:[#allocation3 + $0x2f] sm:$0x1]  ;;  %v9489_v35 = vmax.f32 %v9473_v56, %v9481_v19  ;;  %v9560_v7 = vadd.f32 %v9552_v36, %v9528_v11  ;;  %v9589_v49 = vadd.f32 %v9581_v25, %v9557_v8  ;;  %v9584_v14 = vmax.f32 %v16200_v18, %v9576_v44 }
 0x5b5   : > { %v9598_v4 = vld [vmem:[#allocation3 + $0x3e] sm:$0x1]  ;;  %v9606_v28 = vld [vmem:[#allocation3 + $0x3f] sm:$0x1]  ;;  %v9465_v16 = vadd.f32 %v9457_v30, %v9433_v38  ;;  %v9537_v33 = vld [vmem:[#allocation3 + $0x6a] sm:$0x1]  ;;  %v9590_v58 = vadd.f32 %v9582_v50, %v9558_v0  ;;  %v9521_v17 = vmax.f32 %v9505_v42, %v9513_v13  ;;  %v9613_v6 = vmax.f32 %v9597_v26, %v9605_v3 }
 0x5b6   : > { %v9378_v9 = vld [vmem:[#allocation3 + $0x70] sm:$0x1]  ;;  %v9386_v37 = vld [vmem:[#allocation3 + $0x71] sm:$0x1]  ;;  %v9410_v61 = vld [vmem:[#allocation3 + $0x72] sm:$0x1]  ;;  %v9614_v46 = vmax.f32 %v9598_v4, %v9606_v28  ;;  %v9591_v24 = vadd.f32 %v9583_v22, %v9559_v55  ;;  %v9592_v51 = vadd.f32 %v9584_v14, %v9560_v7 }
 0x5b7   : > { %v9394_v34 = vmax.f32 %v9378_v9, %v9386_v37  ;;  %v9418_v60 = vld [vmem:[#allocation3 + $0x73] sm:$0x1]  ;;  %v9442_v45 = vld [vmem:[#allocation3 + $0x74] sm:$0x1]  ;;  %v9450_v31 = vld [vmem:[#allocation3 + $0x75] sm:$0x1]  ;;  %v9497_v27 = vadd.f32 %v9489_v35, %v9465_v16  ;;  %v9621_v0 = vadd.f32 %v9613_v6, %v9589_v49 }
 0x5b8   : > { %v9426_v12 = vmax.f32 %v9410_v61, %v9418_v60  ;;  %v9545_v47 = vld [vmem:[#allocation3 + $0x6b] sm:$0x1]  ;;  %v9599_v5 = vld [vmem:[#allocation3 + $0x4e] sm:$0x1]  ;;  %v9474_v21 = vld [vmem:[#allocation3 + $0x76] sm:$0x1]  ;;  %v9458_v52 = vmax.f32 %v9442_v45, %v9450_v31  ;;  %v9622_v62 = vadd.f32 %v9614_v46, %v9590_v58 }
 0x5b9   : > { %v9482_v23 = vld [vmem:[#allocation3 + $0x77] sm:$0x1]  ;;  %v9595_v1 = vld [vmem:[#allocation3 + $0xe] sm:$0x1]  ;;  %v9603_v29 = vld [vmem:[#allocation3 + $0xf] sm:$0x1]  ;;  %v9553_v39 = vmax.f32 %v9537_v33, %v9545_v47  ;;  %v9529_v57 = vadd.f32 %v9521_v17, %v9497_v27 }
 0x5ba   : > { %v9607_v40 = vld [vmem:[#allocation3 + $0x4f] sm:$0x1]  ;;  %v9434_v20 = vadd.f32 %v9426_v12, %v9394_v34  ;;  %v9506_v63 = vld [vmem:[#allocation3 + $0x78] sm:$0x1]  ;;  %v9514_v54 = vld [vmem:[#allocation3 + $0x79] sm:$0x1]  ;;  %v9490_v10 = vmax.f32 %v9474_v21, %v9482_v23  ;;  %v9611_v3 = vmax.f32 %v9595_v1, %v9603_v29 }
 0x5bb   : > { %v9569_v53 = vld [vmem:[#allocation3 + $0x6c] sm:$0x1]  ;;  %v9577_v15 = vld [vmem:[#allocation3 + $0x6d] sm:$0x1]  ;;  %v9600_v48 = vld [vmem:[#allocation3 + $0x5e] sm:$0x1]  ;;  %v9522_v11 = vmax.f32 %v9506_v63, %v9514_v54  ;;  %v9615_v8 = vmax.f32 %v9599_v5, %v9607_v40  ;;  %v9561_v42 = vadd.f32 %v9553_v39, %v9529_v57 }
 0x5bc   : > { %v9466_v2 = vadd.f32 %v9458_v52, %v9434_v20  ;;  %v9538_v43 = vld [vmem:[#allocation3 + $0x7a] sm:$0x1]  ;;  %v9546_v59 = vld [vmem:[#allocation3 + $0x7b] sm:$0x1]  ;;  %v9608_v56 = vld [vmem:[#allocation3 + $0x5f] sm:$0x1]  ;;  %v9585_v13 = vmax.f32 %v9569_v53, %v9577_v15  ;;  %v9619_v34 = vadd.f32 %v9611_v3, %v16202_v41 }
 0x5bd   : > { %v9601_v18 = vld [vmem:[#allocation3 + $0x6e] sm:$0x1]  ;;  %v9609_v44 = vld [vmem:[#allocation3 + $0x6f] sm:$0x1]  ;;  %v9616_v26 = vmax.f32 %v9600_v48, %v9608_v56  ;;  %v9554_v4 = vmax.f32 %v9538_v43, %v9546_v59  ;;  %v9570_v38 = vld [vmem:[#allocation3 + $0x7c] sm:$0x1]  ;;  %v9623_v9 = vadd.f32 %v9615_v8, %v9591_v24 }
 0x5be   : > { %v9498_v19 = vadd.f32 %v9490_v10, %v9466_v2  ;;  %v9578_v30 = vld [vmem:[#allocation3 + $0x7d] sm:$0x1]  ;;  %v9635_v37 = vrot.slane %v16204_v32, 7  ;;  %v9593_v36 = vadd.f32 %v9585_v13, %v9561_v42  ;;  %v9617_v25 = vmax.f32 %v9601_v18, %v9609_v44  ;;  %v9602_v60 = vld [vmem:[#allocation3 + $0x7e] sm:$0x1] }
 0x5bf   : > { %v9624_v50 = vadd.f32 %v9616_v26, %v9592_v51  ;;  %v9610_v45 = vld [vmem:[#allocation3 + $0x7f] sm:$0x1]  ;;  %v9638_v31 = vrot.slane %v9621_v0, 6  ;;  %v9586_v28 = vmax.f32 %v9570_v38, %v9578_v30  ;;  %v9641_v12 = vrot.slane %v9622_v62, 5  ;;  %v9673_v6 = vld [vmem:[%s16271_s6] sm:$0x1] }
 0x5c0   : > { %v9530_v61 = vadd.f32 %v9522_v11, %v9498_v19  ;;  %v9625_v35 = vadd.f32 %v9617_v25, %v9593_v36  ;;  %v9644_v16 = vrot.slane %v9623_v9, 4  ;;  %v9618_v47 = vmax.f32 %v9602_v60, %v9610_v45 }
 0x5c1   : > { %v9637_v32 = vsel %vm9636_vm13, %v9635_v37, %v9619_v34  ;;  %v9647_v7 = vrot.slane %v9624_v50, 3 }
 0x5c2   : > { %v9562_v55 = vadd.f32 %v9554_v4, %v9530_v61  ;;  %v9640_v49 = vsel %vm9639_vm14, %v9638_v31, %v9637_v32  ;;  %v9650_v22 = vrot.slane %v9625_v35, 2 }
 0x5c3   : > { %v9643_v5 = vsel %vm9642_vm15, %v9641_v12, %v9640_v49 }
 0x5c4   : > { %v9594_v33 = vadd.f32 %v9586_v28, %v9562_v55  ;;  %v9646_v21 = vsel %vm9645_vm0, %v9644_v16, %v9643_v5 }
 0x5c5   : > { %v9649_v23 = vsel %vm9648_vm1, %v9647_v7, %v9646_v21 }
 0x5c6   : > { %v9626_v41 = vadd.f32 %v9618_v47, %v9594_v33  ;;  %v9652_v58 = vsel %vm9651_vm2, %v9650_v22, %v9649_v23 }
 0x5c8   : > { %v9653_v14 = vrot.slane %v9626_v41, 1 }
 0x5ca   : > { %v9655_v1 = vsel %vm9654_vm3, %v9653_v14, %v9652_v58 }
 0x5cb   : > { %v9657_v29 = vsel %vm9354_vm12, %v9655_v1, 0.0 }
 0x5cc   : > { %v9658_v40 = vrot.slane %v9657_v29, 4 }
 0x5ce   : > { %v9659_v52 = vadd.f32 %v9658_v40, %v9657_v29 }
 0x5d0   : > { %v9660_v20 = vrot.slane %v9659_v52, 2 }
 0x5d2   : > { %v9661_v27 = vadd.f32 %v9660_v20, %v9659_v52 }
 0x5d4   : > { %v9662_v63 = vrot.slane %v9661_v27, 1 }
 0x5d6   : > { %v9663_v54 = vadd.f32 %v9662_v63, %v9661_v27 }
 0x5d8   : > { %v9664_v17 = vmul.f32 0.015625, %v9663_v54 }
 0x5da   : > { %11122 = vmatmul.mubr.msk.f32.vlgmr.msra.gmra.mrb[32].mxu1 %vm9354_vm12, %v9664_v17 }
 0x6ad   : > { %v9743_v46 = vpop.f32.mrb[32].mxu1 }
 0x6ae   : > { %v9744_v39 = vadd.f32 %v9743_v46, %v9673_v6  ;;  %v11123_v53 = vpop.f32.mrb[33].mxu1 }
 0x6b0   : > { %v9748_v15 = vsel %vm9747_vm4, %v9744_v39, -inf }
 0x6b1   : > { %9749 = vmax.xlane.f32.xlu0 %v9748_v15 }
 0x73e   : > { %v9750_v24 = vpop.xlane.xlu0 %9749 }
 0x73f   : > { %v9751_v48 = vsub.f32 %v9744_v39, %v9750_v24 }
 0x741   : > { %v9752_v2 = vmul.f32 1.442695, %v9751_v48 }
 0x743   : > { %11481 = vpow2.f32 %v9752_v2 }
 0x74d   : > { %v11482_v10 = vpop.eup %11481 }
 0x74e   : > { %v9754_v57 = vsel %vm9747_vm4, %v11482_v10, 0.0 }
 0x74f   : > { %9755 = vadd.xlane.f32.xlu1 %v9754_v57 }
 0x7dc   : > { %v9756_v43 = vpop.xlane.xlu1 %9755 }
 0x7dd   : > { %11483 = vlog2.f32 %v9756_v43 }
 0x7e7   : > { %v11484_v59 = vpop.eup %11483 }
 0x7e8   : > { %v9758_v51 = vmul.f32 0.6931472, %v11484_v59 }
 0x7ea   : > { %v9759_v56 = vadd.f32 %v9758_v51, %v9750_v24 }
 0x7ec   : > { %v9760_v11 = vsub.f32 %v9744_v39, %v9759_v56 }
 0x7ee   : > { %9761 = vst.msk [vmem:[%s270_s20] sm:$0x1] %vm9747_vm4, %v9760_v11 }
 0x7ef   : > { %11561 = shalt.err (!%p11558_p3)
}
 0x7f0   : > { %s11562_s14 = scalar_lea.hbm %s16222_s17, 16  ;;  %s11566_s18 = scalar_lea.hbm %s16272_s7, 32 }
 0x7f1   : > { %p11563_p4 = scmp.ne.s32.totalorder %s16222_s17, %s11562_s14  ;;  %p11567_p9 = scmp.lt.u32.totalorder %s16222_s17, %s16272_s7 }
 0x7f2   : > { %p11568_p10 = scmp.lt.u32.totalorder %s11566_s18, %s11562_s14  ;;  %p11570_p12 = scmp.lt.u32.totalorder %s11562_s14, %s16222_s17 }
 0x7f3   : > { %p11564_p7 = pnand %p11563_p4, %p11695_p5 }
 0x7f4   : > { %p11569_p11 = por %p11568_p10, %p11567_p9 }
 0x7f5   : > { %p11565_p8 = pneg %p11564_p7 }
 0x7f6   : > { %p11571_p13 = por %p11570_p12, %p11569_p11 }
 0x7f8   : > { %p11572_p0 = pnand %p11571_p13, %p11565_p8 }
 0x7fa   : > { %11575 = shalt.err (!%p11572_p0)
}
 0x7fb   : > { %11395 = dma.vmem_to_hbm [thread:$0]  (%p11695_p5), %s16224_s21, 16, %s16222_s17, %s9763_s29  }
 0x7fc PF: > { %p11401_p1 = scmp.ge.s32.totalorder %s11610_s27, 2  ;;  %s9787_s22 = sand.u32 1, %s11598_s24  }
 0x7fd   : > { %s9788_s23 = scalar_lea.sflag [#allocation5], %s9787_s22 }
 0x7fe   : > { %p11398_p2 = pnand %p11401_p1, %p11699_p6 }
 0x800   : > { %11593 = dma.done.wait (!%p11398_p2), %s9788_s23, 16  }
 0x801   : > { %11595 = vsyncadd (!%p11398_p2), %s9788_s23, 4294967280  ;;  %p17_p3 = scmp.ge.s32.totalorder %s11682_s30, 4   ;;  %s17032_s24 = smov %s11602_s25 }
 0x802   : > { %s17033_s25 = smov %s11606_s26  ;;  %s17034_s26 = smov %s11693_s10 }
 0x803   : > { %s17035_s27 = smov %s11682_s30  ;;  %19 = sbr.rel (!%p17_p3) target bundleno = 3 (0x3), region = 95 }
 0x80a   :  { %9792 = vsyncpa [#allocation5], 1 }
 0x80b   :  { %9794 = vsyncpa [#allocation5 + $0x1], 1 }

</bundles_post_ra>
